<compile_context>
chip_gen: v7x
topology: tpu7x:2x2x1
jax: 0.10.0
libtpu: 0.0.40
codegen_flags: <defaults>
</compile_context>

<pallas_src>
import jax
import jax.numpy as jnp
import numpy as np
from jax import lax
from jax.experimental import pallas as pl
from jax.experimental.pallas import tpu as pltpu

NUM_GROUPS = 4
CONV_CHANNELS = [48, 48, 48]
FC_CHANNELS = [288, 144, 2]
CH = 48          # every conv layer outputs 48 channels
EPS = 0.0        # the module uses GroupNorm(eps=0)


def _round_up(v, m):
    return (v + m - 1) // m * m


def _rows_per_chunk(h, s, target=96):
    """Largest divisor of h such that (divisor * s) <= target rows per conv chunk."""
    best = 1
    for d in range(1, h + 1):
        if h % d == 0 and d * s <= target:
            best = d
    return best


def feature_discriminator_forward(x_nchw, params):
    """x_nchw: (N, Cin, H, H) float32. Returns (N, num_classes) float32."""
    n, cin, h0, w0 = x_nchw.shape
    assert h0 == w0 and h0 % 8 == 0 and cin <= CH
    num_classes = FC_CHANNELS[-1]

    hs = [h0, h0 // 2, h0 // 4]          # spatial size per conv layer
    ss = [h + 2 for h in hs]             # zero-padded row stride per layer (even)
    feat_hw = h0 // 8                    # spatial size after the 3 pools
    feat_rows = feat_hw * feat_hw

    ipc = [_rows_per_chunk(hs[l], ss[l]) for l in range(3)]    # image rows per chunk
    chunk_rows = [ipc[l] * ss[l] for l in range(3)]
    mask_w = max(chunk_rows)

    # scratch-buffer geometry: 3 padded activation regions + zero margins/gaps
    base0 = _round_up(1 + ss[0], 8) - ss[0]          # >=1; makes the x copy row-aligned
    base1 = base0 + (hs[0] + 2) * ss[0] + 2
    base2 = base1 + (hs[1] + 2) * ss[1] + 2
    buf_rows = _round_up(base2 + (hs[2] + 2) * ss[2] + 2, 8)
    bases = [base0, base1, base2]

    # ---- wrapper-side layout plumbing (no compute) ----
    # NCHW -> lane-dense (N, H*S0, 48): channels zero-padded to 48, each image row
    # padded to the S0=w+2 stride so conv taps read zero padding for free.
    x = jnp.transpose(x_nchw, (0, 2, 3, 1)).astype(jnp.float32)
    x = jnp.pad(x, ((0, 0), (0, 0), (0, 0), (0, CH - cin)))
    x = jnp.pad(x, ((0, 0), (0, 0), (0, ss[0] - w0), (0, 0)))
    x = x.reshape(n, h0 * ss[0], CH)
    x_rows = h0 * ss[0]

    # Conv weights stacked as (27, 48, 48): index = layer*9 + ky*3 + kx.
    cw = jnp.stack([
        jnp.pad(w, ((0, 0), (0, 0), (0, CH - w.shape[2]), (0, 0)))
        for (w, _) in params["conv"]]).reshape(27, CH, CH).astype(jnp.float32)
    cb = jnp.concatenate([b for (_, b) in params["conv"]], axis=0).astype(jnp.float32)

    (w1, b1), (w2, b2), (w3, b3) = params["fc"]
    # Fold PyTorch's channel-major flatten into fc1: row (c, i, j) -> (i*W+j, c).
    w1k = (w1.reshape(CH, feat_rows, FC_CHANNELS[0])
           .transpose(1, 0, 2).astype(jnp.bfloat16))
    w2b = w2.astype(jnp.bfloat16)
    w3b = w3.astype(jnp.bfloat16)

    # Valid-row masks (1 at real pixels, 0 at pad columns), one pattern per layer.
    vmask_np = np.zeros((3, mask_w), np.float32)
    for l in range(3):
        pat = np.concatenate([np.ones(hs[l], np.float32),
                              np.zeros(ss[l] - hs[l], np.float32)])
        vmask_np[l, :chunk_rows[l]] = np.tile(pat, ipc[l])
    vmask_arr = jnp.asarray(vmask_np)

    # 0/1 group-indicator matrices (C,4) and their transposes (4,C) for GroupNorm.
    def gmats(c):
        gsz = c // NUM_GROUPS
        g = (np.arange(c)[:, None] // gsz == np.arange(NUM_GROUPS)[None, :])
        g = g.astype(np.float32)
        return jnp.asarray(g), jnp.asarray(g.T)

    g48, gt48 = gmats(CH)
    gA, gtA = gmats(FC_CHANNELS[0])
    gB, gtB = gmats(FC_CHANNELS[1])

    def kernel(x_ref, cw_ref, cb_ref, vm_ref, g48_ref, gt48_ref,
               w1_ref, b1_ref, ga_ref, gta_ref, w2_ref, b2_ref,
               gb_ref, gtb_ref, w3_ref, b3_ref, o_ref, buf, yref, aref):
        # Zero all pad rows / margins once per sample, then drop the input into
        # its padded region (valid rows only; pads stay zero).
        buf[...] = jnp.zeros_like(buf)
        buf[pl.ds(bases[0] + ss[0], x_rows), :] = x_ref[0]

        def gn_params(s_c, q_c, g_ref, gt_ref, cnt):
            # Group combine + broadcast-back as tiny MXU matmuls; eps = 0,
            # variance clamped at 0 so rsqrt never sees a negative.
            inv_cnt = 1.0 / float(cnt)
            gs = jnp.dot(s_c, g_ref[...], preferred_element_type=jnp.float32) * inv_cnt
            gq = jnp.dot(q_c, g_ref[...], preferred_element_type=jnp.float32) * inv_cnt
            ginv = lax.rsqrt(jnp.maximum(gq - gs * gs, 0.0) + EPS)
            mean_c = jnp.dot(gs, gt_ref[...], preferred_element_type=jnp.float32)
            inv_c = jnp.dot(ginv, gt_ref[...], preferred_element_type=jnp.float32)
            return mean_c, inv_c

        feat_blocks = []
        for layer in range(3):
            h = w = hs[layer]
            S = ss[layer]
            base = bases[layer]
            rows = chunk_rows[layer]
            vmask = vm_ref[pl.ds(layer, 1), pl.ds(0, rows)]      # (1, rows) 0/1 mask

            # ---- 3x3 conv: 9 UNMASKED shifted whole-chunk matmuls.  The padded
            # layout provides the zeros; row chunks keep acc register-resident. ----
            s_tot = jnp.zeros((1, CH), jnp.float32)
            q_tot = jnp.zeros((1, CH), jnp.float32)
            for i0 in range(0, h, ipc[layer]):
                c0 = i0 * S
                acc = None
                for ky in range(3):
                    for kx in range(3):
                        t = buf[pl.ds(base + c0 + ky * S + kx - 1, rows), :]
                        d = jnp.dot(t, cw_ref[layer * 9 + ky * 3 + kx],
                                    preferred_element_type=jnp.float32)
                        acc = d if acc is None else acc + d
                y = acc + cb_ref[pl.ds(layer, 1), :]             # bias add, once
                yref[pl.ds(c0, rows), :] = y
                # Per-channel sum / sumsq over VALID pixels via a row-mask matmul
                # (stats run on the otherwise idle MXU; junk pad columns excluded).
                s_tot = s_tot + jnp.dot(vmask, y, preferred_element_type=jnp.float32)
                q_tot = q_tot + jnp.dot(vmask, y * y, preferred_element_type=jnp.float32)

            mean_c, inv_c = gn_params(s_tot, q_tot, g48_ref, gt48_ref,
                                      h * w * (CH // NUM_GROUPS))

            # ---- 2x2 max-pool first, GroupNorm+ReLU on the 4x smaller pooled
            # data (monotone per-channel affine + ReLU commute with max). ----
            half = (h * S) // 2
            a = jnp.maximum(yref[pl.ds(0, half, 2), :], yref[pl.ds(1, half, 2), :])
            aref[pl.ds(0, half), :] = a
            wo = w // 2
            for io in range(h // 2):
                blk = jnp.maximum(aref[pl.ds(io * S, wo), :],
                                  aref[pl.ds(io * S + S // 2, wo), :])
                blk = jnp.maximum((blk - mean_c) * inv_c, 0.0)
                if layer < 2:
                    buf[pl.ds(bases[layer + 1] + (io + 1) * ss[layer + 1], wo), :] = blk
                else:
                    feat_blocks.append(blk)

        # ---- FC head: bf16 MXU matmuls, f32 accumulation / GroupNorm ----
        h1 = b1_ref[...]
        p = 0
        for blk in feat_blocks:
            for r in range(blk.shape[0]):
                h1 = h1 + jnp.dot(blk[r:r + 1, :].astype(jnp.bfloat16), w1_ref[p],
                                  preferred_element_type=jnp.float32)
                p += 1
        mean_c, inv_c = gn_params(h1, h1 * h1, ga_ref, gta_ref,
                                  FC_CHANNELS[0] // NUM_GROUPS)
        h1 = jnp.maximum((h1 - mean_c) * inv_c, 0.0)

        h2 = jnp.dot(h1.astype(jnp.bfloat16), w2_ref[...],
                     preferred_element_type=jnp.float32) + b2_ref[...]
        mean_c, inv_c = gn_params(h2, h2 * h2, gb_ref, gtb_ref,
                                  FC_CHANNELS[1] // NUM_GROUPS)
        h2 = jnp.maximum((h2 - mean_c) * inv_c, 0.0)

        o_ref[0] = (jnp.dot(h2.astype(jnp.bfloat16), w3_ref[...],
                            preferred_element_type=jnp.float32) + b3_ref[...])

    out = pl.pallas_call(
        kernel,
        out_shape=jax.ShapeDtypeStruct((n, 1, num_classes), jnp.float32),
        grid_spec=pltpu.PrefetchScalarGridSpec(
            num_scalar_prefetch=0,
            grid=(n,),
            in_specs=[
                pl.BlockSpec((1, x_rows, CH), lambda b: (b, 0, 0)),
                pl.BlockSpec((27, CH, CH), lambda b: (0, 0, 0)),
                pl.BlockSpec((3, CH), lambda b: (0, 0)),
                pl.BlockSpec((3, mask_w), lambda b: (0, 0)),
                pl.BlockSpec((CH, NUM_GROUPS), lambda b: (0, 0)),
                pl.BlockSpec((NUM_GROUPS, CH), lambda b: (0, 0)),
                pl.BlockSpec((feat_rows, CH, FC_CHANNELS[0]), lambda b: (0, 0, 0)),
                pl.BlockSpec((1, FC_CHANNELS[0]), lambda b: (0, 0)),
                pl.BlockSpec((FC_CHANNELS[0], NUM_GROUPS), lambda b: (0, 0)),
                pl.BlockSpec((NUM_GROUPS, FC_CHANNELS[0]), lambda b: (0, 0)),
                pl.BlockSpec((FC_CHANNELS[0], FC_CHANNELS[1]), lambda b: (0, 0)),
                pl.BlockSpec((1, FC_CHANNELS[1]), lambda b: (0, 0)),
                pl.BlockSpec((FC_CHANNELS[1], NUM_GROUPS), lambda b: (0, 0)),
                pl.BlockSpec((NUM_GROUPS, FC_CHANNELS[1]), lambda b: (0, 0)),
                pl.BlockSpec((FC_CHANNELS[1], FC_CHANNELS[2]), lambda b: (0, 0)),
                pl.BlockSpec((1, FC_CHANNELS[2]), lambda b: (0, 0)),
            ],
            out_specs=pl.BlockSpec((1, 1, num_classes), lambda b: (b, 0, 0)),
            scratch_shapes=[
                pltpu.VMEM((buf_rows, CH), jnp.float32),              # padded act regions
                pltpu.VMEM((hs[0] * ss[0], CH), jnp.float32),         # conv output slab
                pltpu.VMEM((hs[0] * ss[0] // 2, CH), jnp.float32),    # j-pooled temp
            ],
        ),
        compiler_params=pltpu.CompilerParams(dimension_semantics=("parallel",)),
    )(x, cw, cb, vmask_arr, g48, gt48, w1k, b1, gA, gtA, w2b, b2, gB, gtB, w3b, b3)
    return out.reshape(n, num_classes)


# --------------------------------------------------------------------------
# Pure-JAX reference (verification only)
# --------------------------------------------------------------------------
def reference_forward(x_nchw, params):
    hp = lax.Precision.HIGHEST
    x = jnp.transpose(x_nchw, (0, 2, 3, 1))
    for (w, b) in params["conv"]:
        y = lax.conv_general_dilated(
            x, w, window_strides=(1, 1), padding=((1, 1), (1, 1)),
            dimension_numbers=("NHWC", "HWIO", "NHWC"), precision=hp)
        y = y + b.reshape(1, 1, 1, -1)
        N, H, W, C = y.shape
        g = C // NUM_GROUPS
        yg = y.reshape(N, H, W, NUM_GROUPS, g)
        m = yg.mean(axis=(1, 2, 4), keepdims=True)
        v = (yg * yg).mean(axis=(1, 2, 4), keepdims=True) - m * m
        y = ((yg - m) / jnp.sqrt(v)).reshape(N, H, W, C)
        y = jnp.maximum(y, 0.0)
        x = y.reshape(N, H // 2, 2, W // 2, 2, C).max(axis=(2, 4))
    N = x.shape[0]
    h = jnp.transpose(x, (0, 3, 1, 2)).reshape(N, -1)     # PyTorch C-major flatten
    for i, (w, b) in enumerate(params["fc"]):
        h = jnp.dot(h, w, precision=hp) + b
        if i < len(params["fc"]) - 1:
            C = h.shape[1]
            g = C // NUM_GROUPS
            hg = h.reshape(N, NUM_GROUPS, g)
            m = hg.mean(axis=2, keepdims=True)
            v = (hg * hg).mean(axis=2, keepdims=True) - m * m
            h = ((hg - m) / jnp.sqrt(v)).reshape(N, C)
            h = jnp.maximum(h, 0.0)
    return h


# --------------------------------------------------------------------------
# Deterministic synthetic parameters (shapes from featureDiscriminator.__init__)
# --------------------------------------------------------------------------
def init_params(key, input_channels, input_size):
    params = {"conv": [], "fc": []}
    keys = iter(jax.random.split(key, 2 * (len(CONV_CHANNELS) + len(FC_CHANNELS))))
    cin = input_channels
    ds = input_size
    for cout in CONV_CHANNELS:
        w = jax.random.normal(next(keys), (3, 3, cin, cout), jnp.float32)
        w = w / jnp.sqrt(9.0 * cin)
        b = 0.1 * jax.random.normal(next(keys), (1, cout), jnp.float32)
        params["conv"].append((w, b))
        cin = cout
        ds //= 2
    fin = CONV_CHANNELS[-1] * ds * ds
    for cout in FC_CHANNELS:
        w = jax.random.normal(next(keys), (fin, cout), jnp.float32) / jnp.sqrt(float(fin))
        b = 0.1 * jax.random.normal(next(keys), (1, cout), jnp.float32)
        params["fc"].append((w, b))
        fin = cout
    return params


if __name__ == "__main__":
    key = jax.random.PRNGKey(0)
    kx, kp = jax.random.split(key)
    # PyTorch-style NCHW input: batch=2, input_channels=4, input_size=16
    x = jax.random.normal(kx, (2, 4, 16, 16), jnp.float32)
    params = init_params(kp, input_channels=4, input_size=16)

    fwd = jax.jit(feature_discriminator_forward)
    out = jax.block_until_ready(fwd(x, params))
    ref = jax.block_until_ready(reference_forward(x, params))

    assert out.shape == (2, 2), out.shape
    np.testing.assert_allclose(np.asarray(out), np.asarray(ref), rtol=0.1, atol=0.1)
    print("KERNEL_OK")
</pallas_src>

<mosaic_0001>
module attributes {stable_mosaic.version = 11 : i64} {
  func.func @kernel(%arg0: i32, %arg1: memref<1x288x48xf32, #tpu.memory_space<vmem>>, %arg2: memref<27x48x48xf32, #tpu.memory_space<vmem>>, %arg3: memref<3x48xf32, #tpu.memory_space<vmem>>, %arg4: memref<3x80xf32, #tpu.memory_space<vmem>>, %arg5: memref<48x4xf32, #tpu.memory_space<vmem>>, %arg6: memref<4x48xf32, #tpu.memory_space<vmem>>, %arg7: memref<4x48x288xbf16, #tpu.memory_space<vmem>>, %arg8: memref<1x288xf32, #tpu.memory_space<vmem>>, %arg9: memref<288x4xf32, #tpu.memory_space<vmem>>, %arg10: memref<4x288xf32, #tpu.memory_space<vmem>>, %arg11: memref<288x144xbf16, #tpu.memory_space<vmem>>, %arg12: memref<1x144xf32, #tpu.memory_space<vmem>>, %arg13: memref<144x4xf32, #tpu.memory_space<vmem>>, %arg14: memref<4x144xf32, #tpu.memory_space<vmem>>, %arg15: memref<144x2xbf16, #tpu.memory_space<vmem>>, %arg16: memref<1x2xf32, #tpu.memory_space<vmem>>, %arg17: memref<1x1x2xf32, #tpu.memory_space<vmem>>, %arg18: memref<472x48xf32, #tpu.memory_space<vmem>>, %arg19: memref<288x48xf32, #tpu.memory_space<vmem>>, %arg20: memref<144x48xf32, #tpu.memory_space<vmem>>) attributes {dimension_semantics = [#tpu.dimension_semantics<parallel>], iteration_bounds = array<i64: 2>, scalar_prefetch = 0 : i64, scratch_operands = 3 : i64, tpu.core_type = #tpu.core_type<tc>, window_params = [{transform_indices = @transform_0, window_bounds = array<i64: 1, 288, 48>}, {pipeline_mode = #tpu.pipeline_mode<synchronous>, transform_indices = @transform_1, window_bounds = array<i64: 27, 48, 48>}, {pipeline_mode = #tpu.pipeline_mode<synchronous>, transform_indices = @transform_2, window_bounds = array<i64: 3, 48>}, {pipeline_mode = #tpu.pipeline_mode<synchronous>, transform_indices = @transform_3, window_bounds = array<i64: 3, 80>}, {pipeline_mode = #tpu.pipeline_mode<synchronous>, transform_indices = @transform_4, window_bounds = array<i64: 48, 4>}, {pipeline_mode = #tpu.pipeline_mode<synchronous>, transform_indices = @transform_5, window_bounds = array<i64: 4, 48>}, {pipeline_mode = #tpu.pipeline_mode<synchronous>, transform_indices = @transform_6, window_bounds = array<i64: 4, 48, 288>}, {pipeline_mode = #tpu.pipeline_mode<synchronous>, transform_indices = @transform_7, window_bounds = array<i64: 1, 288>}, {pipeline_mode = #tpu.pipeline_mode<synchronous>, transform_indices = @transform_8, window_bounds = array<i64: 288, 4>}, {pipeline_mode = #tpu.pipeline_mode<synchronous>, transform_indices = @transform_9, window_bounds = array<i64: 4, 288>}, {pipeline_mode = #tpu.pipeline_mode<synchronous>, transform_indices = @transform_10, window_bounds = array<i64: 288, 144>}, {pipeline_mode = #tpu.pipeline_mode<synchronous>, transform_indices = @transform_11, window_bounds = array<i64: 1, 144>}, {pipeline_mode = #tpu.pipeline_mode<synchronous>, transform_indices = @transform_12, window_bounds = array<i64: 144, 4>}, {pipeline_mode = #tpu.pipeline_mode<synchronous>, transform_indices = @transform_13, window_bounds = array<i64: 4, 144>}, {pipeline_mode = #tpu.pipeline_mode<synchronous>, transform_indices = @transform_14, window_bounds = array<i64: 144, 2>}, {pipeline_mode = #tpu.pipeline_mode<synchronous>, transform_indices = @transform_15, window_bounds = array<i64: 1, 2>}, {transform_indices = @transform_16, window_bounds = array<i64: 1, 1, 2>}]} {
    %cst = arith.constant 0.000000e+00 : f32
    %0 = vector.broadcast %cst : f32 to vector<472x48xf32>
    %c0 = arith.constant 0 : index
    %c0_0 = arith.constant 0 : index
    %1 = vector.load %arg18[%c0, %c0_0] : memref<472x48xf32, #tpu.memory_space<vmem>>, vector<472x48xf32>
    tpu.vector_store %arg18[%c0, %c0_0], %0 {strides = array<i32>} : memref<472x48xf32, #tpu.memory_space<vmem>>, vector<472x48xf32>,
    %c0_1 = arith.constant 0 : index
    %c0_2 = arith.constant 0 : index
    %c0_3 = arith.constant 0 : index
    %2 = vector.load %arg1[%c0_1, %c0_2, %c0_3] : memref<1x288x48xf32, #tpu.memory_space<vmem>>, vector<1x288x48xf32>
    %3 = vector.shape_cast %2 : vector<1x288x48xf32> to vector<288x48xf32>
    %c24 = arith.constant 24 : index
    %c0_4 = arith.constant 0 : index
    %4 = vector.load %arg18[%c24, %c0_4] : memref<472x48xf32, #tpu.memory_space<vmem>>, vector<288x48xf32>
    tpu.vector_store %arg18[%c24, %c0_4], %3 {strides = array<i32>} : memref<472x48xf32, #tpu.memory_space<vmem>>, vector<288x48xf32>,
    %c0_5 = arith.constant 0 : index
    %c0_6 = arith.constant 0 : index
    %5 = vector.load %arg4[%c0_5, %c0_6] : memref<3x80xf32, #tpu.memory_space<vmem>>, vector<1x72xf32>
    %cst_7 = arith.constant 0.000000e+00 : f32
    %6 = vector.broadcast %cst_7 : f32 to vector<1x48xf32>
    %cst_8 = arith.constant 0.000000e+00 : f32
    %7 = vector.broadcast %cst_8 : f32 to vector<1x48xf32>
    %c5 = arith.constant 5 : index
    %c0_9 = arith.constant 0 : index
    %8 = vector.load %arg18[%c5, %c0_9] : memref<472x48xf32, #tpu.memory_space<vmem>>, vector<72x48xf32>
    %c0_10 = arith.constant 0 : index
    %c0_11 = arith.constant 0 : index
    %c0_12 = arith.constant 0 : index
    %9 = vector.load %arg2[%c0_10, %c0_11, %c0_12] : memref<27x48x48xf32, #tpu.memory_space<vmem>>, vector<1x48x48xf32>
    %10 = vector.shape_cast %9 : vector<1x48x48xf32> to vector<48x48xf32>
    %cst_13 = arith.constant dense<0.000000e+00> : vector<72x48xf32>
    %11 = tpu.matmul %8, %10, %cst_13 {dimension_numbers = #tpu.dot_dimension_numbers<[1], [0], [0], [1], [0, 0, 1, 1], [], []>} : vector<72x48xf32>, vector<48x48xf32>, vector<72x48xf32> -> vector<72x48xf32>
    %c6 = arith.constant 6 : index
    %c0_14 = arith.constant 0 : index
    %12 = vector.load %arg18[%c6, %c0_14] : memref<472x48xf32, #tpu.memory_space<vmem>>, vector<72x48xf32>
    %c1 = arith.constant 1 : index
    %c0_15 = arith.constant 0 : index
    %c0_16 = arith.constant 0 : index
    %13 = vector.load %arg2[%c1, %c0_15, %c0_16] : memref<27x48x48xf32, #tpu.memory_space<vmem>>, vector<1x48x48xf32>
    %14 = vector.shape_cast %13 : vector<1x48x48xf32> to vector<48x48xf32>
    %cst_17 = arith.constant dense<0.000000e+00> : vector<72x48xf32>
    %15 = tpu.matmul %12, %14, %cst_17 {dimension_numbers = #tpu.dot_dimension_numbers<[1], [0], [0], [1], [0, 0, 1, 1], [], []>} : vector<72x48xf32>, vector<48x48xf32>, vector<72x48xf32> -> vector<72x48xf32>
    %16 = arith.addf %11, %15 : vector<72x48xf32>
    %c7 = arith.constant 7 : index
    %c0_18 = arith.constant 0 : index
    %17 = vector.load %arg18[%c7, %c0_18] : memref<472x48xf32, #tpu.memory_space<vmem>>, vector<72x48xf32>
    %c2 = arith.constant 2 : index
    %c0_19 = arith.constant 0 : index
    %c0_20 = arith.constant 0 : index
    %18 = vector.load %arg2[%c2, %c0_19, %c0_20] : memref<27x48x48xf32, #tpu.memory_space<vmem>>, vector<1x48x48xf32>
    %19 = vector.shape_cast %18 : vector<1x48x48xf32> to vector<48x48xf32>
    %cst_21 = arith.constant dense<0.000000e+00> : vector<72x48xf32>
    %20 = tpu.matmul %17, %19, %cst_21 {dimension_numbers = #tpu.dot_dimension_numbers<[1], [0], [0], [1], [0, 0, 1, 1], [], []>} : vector<72x48xf32>, vector<48x48xf32>, vector<72x48xf32> -> vector<72x48xf32>
    %21 = arith.addf %16, %20 : vector<72x48xf32>
    %c23 = arith.constant 23 : index
    %c0_22 = arith.constant 0 : index
    %22 = vector.load %arg18[%c23, %c0_22] : memref<472x48xf32, #tpu.memory_space<vmem>>, vector<72x48xf32>
    %c3 = arith.constant 3 : index
    %c0_23 = arith.constant 0 : index
    %c0_24 = arith.constant 0 : index
    %23 = vector.load %arg2[%c3, %c0_23, %c0_24] : memref<27x48x48xf32, #tpu.memory_space<vmem>>, vector<1x48x48xf32>
    %24 = vector.shape_cast %23 : vector<1x48x48xf32> to vector<48x48xf32>
    %cst_25 = arith.constant dense<0.000000e+00> : vector<72x48xf32>
    %25 = tpu.matmul %22, %24, %cst_25 {dimension_numbers = #tpu.dot_dimension_numbers<[1], [0], [0], [1], [0, 0, 1, 1], [], []>} : vector<72x48xf32>, vector<48x48xf32>, vector<72x48xf32> -> vector<72x48xf32>
    %26 = arith.addf %21, %25 : vector<72x48xf32>
    %c24_26 = arith.constant 24 : index
    %c0_27 = arith.constant 0 : index
    %27 = vector.load %arg18[%c24_26, %c0_27] : memref<472x48xf32, #tpu.memory_space<vmem>>, vector<72x48xf32>
    %c4 = arith.constant 4 : index
    %c0_28 = arith.constant 0 : index
    %c0_29 = arith.constant 0 : index
    %28 = vector.load %arg2[%c4, %c0_28, %c0_29] : memref<27x48x48xf32, #tpu.memory_space<vmem>>, vector<1x48x48xf32>
    %29 = vector.shape_cast %28 : vector<1x48x48xf32> to vector<48x48xf32>
    %cst_30 = arith.constant dense<0.000000e+00> : vector<72x48xf32>
    %30 = tpu.matmul %27, %29, %cst_30 {dimension_numbers = #tpu.dot_dimension_numbers<[1], [0], [0], [1], [0, 0, 1, 1], [], []>} : vector<72x48xf32>, vector<48x48xf32>, vector<72x48xf32> -> vector<72x48xf32>
    %31 = arith.addf %26, %30 : vector<72x48xf32>
    %c25 = arith.constant 25 : index
    %c0_31 = arith.constant 0 : index
    %32 = vector.load %arg18[%c25, %c0_31] : memref<472x48xf32, #tpu.memory_space<vmem>>, vector<72x48xf32>
    %c5_32 = arith.constant 5 : index
    %c0_33 = arith.constant 0 : index
    %c0_34 = arith.constant 0 : index
    %33 = vector.load %arg2[%c5_32, %c0_33, %c0_34] : memref<27x48x48xf32, #tpu.memory_space<vmem>>, vector<1x48x48xf32>
    %34 = vector.shape_cast %33 : vector<1x48x48xf32> to vector<48x48xf32>
    %cst_35 = arith.constant dense<0.000000e+00> : vector<72x48xf32>
    %35 = tpu.matmul %32, %34, %cst_35 {dimension_numbers = #tpu.dot_dimension_numbers<[1], [0], [0], [1], [0, 0, 1, 1], [], []>} : vector<72x48xf32>, vector<48x48xf32>, vector<72x48xf32> -> vector<72x48xf32>
    %36 = arith.addf %31, %35 : vector<72x48xf32>
    %c41 = arith.constant 41 : index
    %c0_36 = arith.constant 0 : index
    %37 = vector.load %arg18[%c41, %c0_36] : memref<472x48xf32, #tpu.memory_space<vmem>>, vector<72x48xf32>
    %c6_37 = arith.constant 6 : index
    %c0_38 = arith.constant 0 : index
    %c0_39 = arith.constant 0 : index
    %38 = vector.load %arg2[%c6_37, %c0_38, %c0_39] : memref<27x48x48xf32, #tpu.memory_space<vmem>>, vector<1x48x48xf32>
    %39 = vector.shape_cast %38 : vector<1x48x48xf32> to vector<48x48xf32>
    %cst_40 = arith.constant dense<0.000000e+00> : vector<72x48xf32>
    %40 = tpu.matmul %37, %39, %cst_40 {dimension_numbers = #tpu.dot_dimension_numbers<[1], [0], [0], [1], [0, 0, 1, 1], [], []>} : vector<72x48xf32>, vector<48x48xf32>, vector<72x48xf32> -> vector<72x48xf32>
    %41 = arith.addf %36, %40 : vector<72x48xf32>
    %c42 = arith.constant 42 : index
    %c0_41 = arith.constant 0 : index
    %42 = vector.load %arg18[%c42, %c0_41] : memref<472x48xf32, #tpu.memory_space<vmem>>, vector<72x48xf32>
    %c7_42 = arith.constant 7 : index
    %c0_43 = arith.constant 0 : index
    %c0_44 = arith.constant 0 : index
    %43 = vector.load %arg2[%c7_42, %c0_43, %c0_44] : memref<27x48x48xf32, #tpu.memory_space<vmem>>, vector<1x48x48xf32>
    %44 = vector.shape_cast %43 : vector<1x48x48xf32> to vector<48x48xf32>
    %cst_45 = arith.constant dense<0.000000e+00> : vector<72x48xf32>
    %45 = tpu.matmul %42, %44, %cst_45 {dimension_numbers = #tpu.dot_dimension_numbers<[1], [0], [0], [1], [0, 0, 1, 1], [], []>} : vector<72x48xf32>, vector<48x48xf32>, vector<72x48xf32> -> vector<72x48xf32>
    %46 = arith.addf %41, %45 : vector<72x48xf32>
    %c43 = arith.constant 43 : index
    %c0_46 = arith.constant 0 : index
    %47 = vector.load %arg18[%c43, %c0_46] : memref<472x48xf32, #tpu.memory_space<vmem>>, vector<72x48xf32>
    %c8 = arith.constant 8 : index
    %c0_47 = arith.constant 0 : index
    %c0_48 = arith.constant 0 : index
    %48 = vector.load %arg2[%c8, %c0_47, %c0_48] : memref<27x48x48xf32, #tpu.memory_space<vmem>>, vector<1x48x48xf32>
    %49 = vector.shape_cast %48 : vector<1x48x48xf32> to vector<48x48xf32>
    %cst_49 = arith.constant dense<0.000000e+00> : vector<72x48xf32>
    %50 = tpu.matmul %47, %49, %cst_49 {dimension_numbers = #tpu.dot_dimension_numbers<[1], [0], [0], [1], [0, 0, 1, 1], [], []>} : vector<72x48xf32>, vector<48x48xf32>, vector<72x48xf32> -> vector<72x48xf32>
    %51 = arith.addf %46, %50 : vector<72x48xf32>
    %c0_50 = arith.constant 0 : index
    %c0_51 = arith.constant 0 : index
    %52 = vector.load %arg3[%c0_50, %c0_51] : memref<3x48xf32, #tpu.memory_space<vmem>>, vector<1x48xf32>
    %53 = vector.broadcast %52 : vector<1x48xf32> to vector<72x48xf32>
    %54 = arith.addf %51, %53 : vector<72x48xf32>
    %c0_52 = arith.constant 0 : index
    %c0_53 = arith.constant 0 : index
    %55 = vector.load %arg19[%c0_52, %c0_53] : memref<288x48xf32, #tpu.memory_space<vmem>>, vector<72x48xf32>
    tpu.vector_store %arg19[%c0_52, %c0_53], %54 {strides = array<i32>} : memref<288x48xf32, #tpu.memory_space<vmem>>, vector<72x48xf32>,
    %cst_54 = arith.constant dense<0.000000e+00> : vector<1x48xf32>
    %56 = tpu.matmul %5, %54, %cst_54 {dimension_numbers = #tpu.dot_dimension_numbers<[1], [0], [0], [1], [0, 0, 1, 1], [], []>} : vector<1x72xf32>, vector<72x48xf32>, vector<1x48xf32> -> vector<1x48xf32>
    %57 = arith.addf %6, %56 : vector<1x48xf32>
    %58 = arith.mulf %54, %54 : vector<72x48xf32>
    %cst_55 = arith.constant dense<0.000000e+00> : vector<1x48xf32>
    %59 = tpu.matmul %5, %58, %cst_55 {dimension_numbers = #tpu.dot_dimension_numbers<[1], [0], [0], [1], [0, 0, 1, 1], [], []>} : vector<1x72xf32>, vector<72x48xf32>, vector<1x48xf32> -> vector<1x48xf32>
    %60 = arith.addf %7, %59 : vector<1x48xf32>
    %c77 = arith.constant 77 : index
    %c0_56 = arith.constant 0 : index
    %61 = vector.load %arg18[%c77, %c0_56] : memref<472x48xf32, #tpu.memory_space<vmem>>, vector<72x48xf32>
    %c0_57 = arith.constant 0 : index
    %c0_58 = arith.constant 0 : index
    %c0_59 = arith.constant 0 : index
    %62 = vector.load %arg2[%c0_57, %c0_58, %c0_59] : memref<27x48x48xf32, #tpu.memory_space<vmem>>, vector<1x48x48xf32>
    %63 = vector.shape_cast %62 : vector<1x48x48xf32> to vector<48x48xf32>
    %cst_60 = arith.constant dense<0.000000e+00> : vector<72x48xf32>
    %64 = tpu.matmul %61, %63, %cst_60 {dimension_numbers = #tpu.dot_dimension_numbers<[1], [0], [0], [1], [0, 0, 1, 1], [], []>} : vector<72x48xf32>, vector<48x48xf32>, vector<72x48xf32> -> vector<72x48xf32>
    %c78 = arith.constant 78 : index
    %c0_61 = arith.constant 0 : index
    %65 = vector.load %arg18[%c78, %c0_61] : memref<472x48xf32, #tpu.memory_space<vmem>>, vector<72x48xf32>
    %c1_62 = arith.constant 1 : index
    %c0_63 = arith.constant 0 : index
    %c0_64 = arith.constant 0 : index
    %66 = vector.load %arg2[%c1_62, %c0_63, %c0_64] : memref<27x48x48xf32, #tpu.memory_space<vmem>>, vector<1x48x48xf32>
    %67 = vector.shape_cast %66 : vector<1x48x48xf32> to vector<48x48xf32>
    %cst_65 = arith.constant dense<0.000000e+00> : vector<72x48xf32>
    %68 = tpu.matmul %65, %67, %cst_65 {dimension_numbers = #tpu.dot_dimension_numbers<[1], [0], [0], [1], [0, 0, 1, 1], [], []>} : vector<72x48xf32>, vector<48x48xf32>, vector<72x48xf32> -> vector<72x48xf32>
    %69 = arith.addf %64, %68 : vector<72x48xf32>
    %c79 = arith.constant 79 : index
    %c0_66 = arith.constant 0 : index
    %70 = vector.load %arg18[%c79, %c0_66] : memref<472x48xf32, #tpu.memory_space<vmem>>, vector<72x48xf32>
    %c2_67 = arith.constant 2 : index
    %c0_68 = arith.constant 0 : index
    %c0_69 = arith.constant 0 : index
    %71 = vector.load %arg2[%c2_67, %c0_68, %c0_69] : memref<27x48x48xf32, #tpu.memory_space<vmem>>, vector<1x48x48xf32>
    %72 = vector.shape_cast %71 : vector<1x48x48xf32> to vector<48x48xf32>
    %cst_70 = arith.constant dense<0.000000e+00> : vector<72x48xf32>
    %73 = tpu.matmul %70, %72, %cst_70 {dimension_numbers = #tpu.dot_dimension_numbers<[1], [0], [0], [1], [0, 0, 1, 1], [], []>} : vector<72x48xf32>, vector<48x48xf32>, vector<72x48xf32> -> vector<72x48xf32>
    %74 = arith.addf %69, %73 : vector<72x48xf32>
    %c95 = arith.constant 95 : index
    %c0_71 = arith.constant 0 : index
    %75 = vector.load %arg18[%c95, %c0_71] : memref<472x48xf32, #tpu.memory_space<vmem>>, vector<72x48xf32>
    %c3_72 = arith.constant 3 : index
    %c0_73 = arith.constant 0 : index
    %c0_74 = arith.constant 0 : index
    %76 = vector.load %arg2[%c3_72, %c0_73, %c0_74] : memref<27x48x48xf32, #tpu.memory_space<vmem>>, vector<1x48x48xf32>
    %77 = vector.shape_cast %76 : vector<1x48x48xf32> to vector<48x48xf32>
    %cst_75 = arith.constant dense<0.000000e+00> : vector<72x48xf32>
    %78 = tpu.matmul %75, %77, %cst_75 {dimension_numbers = #tpu.dot_dimension_numbers<[1], [0], [0], [1], [0, 0, 1, 1], [], []>} : vector<72x48xf32>, vector<48x48xf32>, vector<72x48xf32> -> vector<72x48xf32>
    %79 = arith.addf %74, %78 : vector<72x48xf32>
    %c96 = arith.constant 96 : index
    %c0_76 = arith.constant 0 : index
    %80 = vector.load %arg18[%c96, %c0_76] : memref<472x48xf32, #tpu.memory_space<vmem>>, vector<72x48xf32>
    %c4_77 = arith.constant 4 : index
    %c0_78 = arith.constant 0 : index
    %c0_79 = arith.constant 0 : index
    %81 = vector.load %arg2[%c4_77, %c0_78, %c0_79] : memref<27x48x48xf32, #tpu.memory_space<vmem>>, vector<1x48x48xf32>
    %82 = vector.shape_cast %81 : vector<1x48x48xf32> to vector<48x48xf32>
    %cst_80 = arith.constant dense<0.000000e+00> : vector<72x48xf32>
    %83 = tpu.matmul %80, %82, %cst_80 {dimension_numbers = #tpu.dot_dimension_numbers<[1], [0], [0], [1], [0, 0, 1, 1], [], []>} : vector<72x48xf32>, vector<48x48xf32>, vector<72x48xf32> -> vector<72x48xf32>
    %84 = arith.addf %79, %83 : vector<72x48xf32>
    %c97 = arith.constant 97 : index
    %c0_81 = arith.constant 0 : index
    %85 = vector.load %arg18[%c97, %c0_81] : memref<472x48xf32, #tpu.memory_space<vmem>>, vector<72x48xf32>
    %c5_82 = arith.constant 5 : index
    %c0_83 = arith.constant 0 : index
    %c0_84 = arith.constant 0 : index
    %86 = vector.load %arg2[%c5_82, %c0_83, %c0_84] : memref<27x48x48xf32, #tpu.memory_space<vmem>>, vector<1x48x48xf32>
    %87 = vector.shape_cast %86 : vector<1x48x48xf32> to vector<48x48xf32>
    %cst_85 = arith.constant dense<0.000000e+00> : vector<72x48xf32>
    %88 = tpu.matmul %85, %87, %cst_85 {dimension_numbers = #tpu.dot_dimension_numbers<[1], [0], [0], [1], [0, 0, 1, 1], [], []>} : vector<72x48xf32>, vector<48x48xf32>, vector<72x48xf32> -> vector<72x48xf32>
    %89 = arith.addf %84, %88 : vector<72x48xf32>
    %c113 = arith.constant 113 : index
    %c0_86 = arith.constant 0 : index
    %90 = vector.load %arg18[%c113, %c0_86] : memref<472x48xf32, #tpu.memory_space<vmem>>, vector<72x48xf32>
    %c6_87 = arith.constant 6 : index
    %c0_88 = arith.constant 0 : index
    %c0_89 = arith.constant 0 : index
    %91 = vector.load %arg2[%c6_87, %c0_88, %c0_89] : memref<27x48x48xf32, #tpu.memory_space<vmem>>, vector<1x48x48xf32>
    %92 = vector.shape_cast %91 : vector<1x48x48xf32> to vector<48x48xf32>
    %cst_90 = arith.constant dense<0.000000e+00> : vector<72x48xf32>
    %93 = tpu.matmul %90, %92, %cst_90 {dimension_numbers = #tpu.dot_dimension_numbers<[1], [0], [0], [1], [0, 0, 1, 1], [], []>} : vector<72x48xf32>, vector<48x48xf32>, vector<72x48xf32> -> vector<72x48xf32>
    %94 = arith.addf %89, %93 : vector<72x48xf32>
    %c114 = arith.constant 114 : index
    %c0_91 = arith.constant 0 : index
    %95 = vector.load %arg18[%c114, %c0_91] : memref<472x48xf32, #tpu.memory_space<vmem>>, vector<72x48xf32>
    %c7_92 = arith.constant 7 : index
    %c0_93 = arith.constant 0 : index
    %c0_94 = arith.constant 0 : index
    %96 = vector.load %arg2[%c7_92, %c0_93, %c0_94] : memref<27x48x48xf32, #tpu.memory_space<vmem>>, vector<1x48x48xf32>
    %97 = vector.shape_cast %96 : vector<1x48x48xf32> to vector<48x48xf32>
    %cst_95 = arith.constant dense<0.000000e+00> : vector<72x48xf32>
    %98 = tpu.matmul %95, %97, %cst_95 {dimension_numbers = #tpu.dot_dimension_numbers<[1], [0], [0], [1], [0, 0, 1, 1], [], []>} : vector<72x48xf32>, vector<48x48xf32>, vector<72x48xf32> -> vector<72x48xf32>
    %99 = arith.addf %94, %98 : vector<72x48xf32>
    %c115 = arith.constant 115 : index
    %c0_96 = arith.constant 0 : index
    %100 = vector.load %arg18[%c115, %c0_96] : memref<472x48xf32, #tpu.memory_space<vmem>>, vector<72x48xf32>
    %c8_97 = arith.constant 8 : index
    %c0_98 = arith.constant 0 : index
    %c0_99 = arith.constant 0 : index
    %101 = vector.load %arg2[%c8_97, %c0_98, %c0_99] : memref<27x48x48xf32, #tpu.memory_space<vmem>>, vector<1x48x48xf32>
    %102 = vector.shape_cast %101 : vector<1x48x48xf32> to vector<48x48xf32>
    %cst_100 = arith.constant dense<0.000000e+00> : vector<72x48xf32>
    %103 = tpu.matmul %100, %102, %cst_100 {dimension_numbers = #tpu.dot_dimension_numbers<[1], [0], [0], [1], [0, 0, 1, 1], [], []>} : vector<72x48xf32>, vector<48x48xf32>, vector<72x48xf32> -> vector<72x48xf32>
    %104 = arith.addf %99, %103 : vector<72x48xf32>
    %c0_101 = arith.constant 0 : index
    %c0_102 = arith.constant 0 : index
    %105 = vector.load %arg3[%c0_101, %c0_102] : memref<3x48xf32, #tpu.memory_space<vmem>>, vector<1x48xf32>
    %106 = vector.broadcast %105 : vector<1x48xf32> to vector<72x48xf32>
    %107 = arith.addf %104, %106 : vector<72x48xf32>
    %c72 = arith.constant 72 : index
    %c0_103 = arith.constant 0 : index
    %108 = vector.load %arg19[%c72, %c0_103] : memref<288x48xf32, #tpu.memory_space<vmem>>, vector<72x48xf32>
    tpu.vector_store %arg19[%c72, %c0_103], %107 {strides = array<i32>} : memref<288x48xf32, #tpu.memory_space<vmem>>, vector<72x48xf32>,
    %cst_104 = arith.constant dense<0.000000e+00> : vector<1x48xf32>
    %109 = tpu.matmul %5, %107, %cst_104 {dimension_numbers = #tpu.dot_dimension_numbers<[1], [0], [0], [1], [0, 0, 1, 1], [], []>} : vector<1x72xf32>, vector<72x48xf32>, vector<1x48xf32> -> vector<1x48xf32>
    %110 = arith.addf %57, %109 : vector<1x48xf32>
    %111 = arith.mulf %107, %107 : vector<72x48xf32>
    %cst_105 = arith.constant dense<0.000000e+00> : vector<1x48xf32>
    %112 = tpu.matmul %5, %111, %cst_105 {dimension_numbers = #tpu.dot_dimension_numbers<[1], [0], [0], [1], [0, 0, 1, 1], [], []>} : vector<1x72xf32>, vector<72x48xf32>, vector<1x48xf32> -> vector<1x48xf32>
    %113 = arith.addf %60, %112 : vector<1x48xf32>
    %c149 = arith.constant 149 : index
    %c0_106 = arith.constant 0 : index
    %114 = vector.load %arg18[%c149, %c0_106] : memref<472x48xf32, #tpu.memory_space<vmem>>, vector<72x48xf32>
    %c0_107 = arith.constant 0 : index
    %c0_108 = arith.constant 0 : index
    %c0_109 = arith.constant 0 : index
    %115 = vector.load %arg2[%c0_107, %c0_108, %c0_109] : memref<27x48x48xf32, #tpu.memory_space<vmem>>, vector<1x48x48xf32>
    %116 = vector.shape_cast %115 : vector<1x48x48xf32> to vector<48x48xf32>
    %cst_110 = arith.constant dense<0.000000e+00> : vector<72x48xf32>
    %117 = tpu.matmul %114, %116, %cst_110 {dimension_numbers = #tpu.dot_dimension_numbers<[1], [0], [0], [1], [0, 0, 1, 1], [], []>} : vector<72x48xf32>, vector<48x48xf32>, vector<72x48xf32> -> vector<72x48xf32>
    %c150 = arith.constant 150 : index
    %c0_111 = arith.constant 0 : index
    %118 = vector.load %arg18[%c150, %c0_111] : memref<472x48xf32, #tpu.memory_space<vmem>>, vector<72x48xf32>
    %c1_112 = arith.constant 1 : index
    %c0_113 = arith.constant 0 : index
    %c0_114 = arith.constant 0 : index
    %119 = vector.load %arg2[%c1_112, %c0_113, %c0_114] : memref<27x48x48xf32, #tpu.memory_space<vmem>>, vector<1x48x48xf32>
    %120 = vector.shape_cast %119 : vector<1x48x48xf32> to vector<48x48xf32>
    %cst_115 = arith.constant dense<0.000000e+00> : vector<72x48xf32>
    %121 = tpu.matmul %118, %120, %cst_115 {dimension_numbers = #tpu.dot_dimension_numbers<[1], [0], [0], [1], [0, 0, 1, 1], [], []>} : vector<72x48xf32>, vector<48x48xf32>, vector<72x48xf32> -> vector<72x48xf32>
    %122 = arith.addf %117, %121 : vector<72x48xf32>
    %c151 = arith.constant 151 : index
    %c0_116 = arith.constant 0 : index
    %123 = vector.load %arg18[%c151, %c0_116] : memref<472x48xf32, #tpu.memory_space<vmem>>, vector<72x48xf32>
    %c2_117 = arith.constant 2 : index
    %c0_118 = arith.constant 0 : index
    %c0_119 = arith.constant 0 : index
    %124 = vector.load %arg2[%c2_117, %c0_118, %c0_119] : memref<27x48x48xf32, #tpu.memory_space<vmem>>, vector<1x48x48xf32>
    %125 = vector.shape_cast %124 : vector<1x48x48xf32> to vector<48x48xf32>
    %cst_120 = arith.constant dense<0.000000e+00> : vector<72x48xf32>
    %126 = tpu.matmul %123, %125, %cst_120 {dimension_numbers = #tpu.dot_dimension_numbers<[1], [0], [0], [1], [0, 0, 1, 1], [], []>} : vector<72x48xf32>, vector<48x48xf32>, vector<72x48xf32> -> vector<72x48xf32>
    %127 = arith.addf %122, %126 : vector<72x48xf32>
    %c167 = arith.constant 167 : index
    %c0_121 = arith.constant 0 : index
    %128 = vector.load %arg18[%c167, %c0_121] : memref<472x48xf32, #tpu.memory_space<vmem>>, vector<72x48xf32>
    %c3_122 = arith.constant 3 : index
    %c0_123 = arith.constant 0 : index
    %c0_124 = arith.constant 0 : index
    %129 = vector.load %arg2[%c3_122, %c0_123, %c0_124] : memref<27x48x48xf32, #tpu.memory_space<vmem>>, vector<1x48x48xf32>
    %130 = vector.shape_cast %129 : vector<1x48x48xf32> to vector<48x48xf32>
    %cst_125 = arith.constant dense<0.000000e+00> : vector<72x48xf32>
    %131 = tpu.matmul %128, %130, %cst_125 {dimension_numbers = #tpu.dot_dimension_numbers<[1], [0], [0], [1], [0, 0, 1, 1], [], []>} : vector<72x48xf32>, vector<48x48xf32>, vector<72x48xf32> -> vector<72x48xf32>
    %132 = arith.addf %127, %131 : vector<72x48xf32>
    %c168 = arith.constant 168 : index
    %c0_126 = arith.constant 0 : index
    %133 = vector.load %arg18[%c168, %c0_126] : memref<472x48xf32, #tpu.memory_space<vmem>>, vector<72x48xf32>
    %c4_127 = arith.constant 4 : index
    %c0_128 = arith.constant 0 : index
    %c0_129 = arith.constant 0 : index
    %134 = vector.load %arg2[%c4_127, %c0_128, %c0_129] : memref<27x48x48xf32, #tpu.memory_space<vmem>>, vector<1x48x48xf32>
    %135 = vector.shape_cast %134 : vector<1x48x48xf32> to vector<48x48xf32>
    %cst_130 = arith.constant dense<0.000000e+00> : vector<72x48xf32>
    %136 = tpu.matmul %133, %135, %cst_130 {dimension_numbers = #tpu.dot_dimension_numbers<[1], [0], [0], [1], [0, 0, 1, 1], [], []>} : vector<72x48xf32>, vector<48x48xf32>, vector<72x48xf32> -> vector<72x48xf32>
    %137 = arith.addf %132, %136 : vector<72x48xf32>
    %c169 = arith.constant 169 : index
    %c0_131 = arith.constant 0 : index
    %138 = vector.load %arg18[%c169, %c0_131] : memref<472x48xf32, #tpu.memory_space<vmem>>, vector<72x48xf32>
    %c5_132 = arith.constant 5 : index
    %c0_133 = arith.constant 0 : index
    %c0_134 = arith.constant 0 : index
    %139 = vector.load %arg2[%c5_132, %c0_133, %c0_134] : memref<27x48x48xf32, #tpu.memory_space<vmem>>, vector<1x48x48xf32>
    %140 = vector.shape_cast %139 : vector<1x48x48xf32> to vector<48x48xf32>
    %cst_135 = arith.constant dense<0.000000e+00> : vector<72x48xf32>
    %141 = tpu.matmul %138, %140, %cst_135 {dimension_numbers = #tpu.dot_dimension_numbers<[1], [0], [0], [1], [0, 0, 1, 1], [], []>} : vector<72x48xf32>, vector<48x48xf32>, vector<72x48xf32> -> vector<72x48xf32>
    %142 = arith.addf %137, %141 : vector<72x48xf32>
    %c185 = arith.constant 185 : index
    %c0_136 = arith.constant 0 : index
    %143 = vector.load %arg18[%c185, %c0_136] : memref<472x48xf32, #tpu.memory_space<vmem>>, vector<72x48xf32>
    %c6_137 = arith.constant 6 : index
    %c0_138 = arith.constant 0 : index
    %c0_139 = arith.constant 0 : index
    %144 = vector.load %arg2[%c6_137, %c0_138, %c0_139] : memref<27x48x48xf32, #tpu.memory_space<vmem>>, vector<1x48x48xf32>
    %145 = vector.shape_cast %144 : vector<1x48x48xf32> to vector<48x48xf32>
    %cst_140 = arith.constant dense<0.000000e+00> : vector<72x48xf32>
    %146 = tpu.matmul %143, %145, %cst_140 {dimension_numbers = #tpu.dot_dimension_numbers<[1], [0], [0], [1], [0, 0, 1, 1], [], []>} : vector<72x48xf32>, vector<48x48xf32>, vector<72x48xf32> -> vector<72x48xf32>
    %147 = arith.addf %142, %146 : vector<72x48xf32>
    %c186 = arith.constant 186 : index
    %c0_141 = arith.constant 0 : index
    %148 = vector.load %arg18[%c186, %c0_141] : memref<472x48xf32, #tpu.memory_space<vmem>>, vector<72x48xf32>
    %c7_142 = arith.constant 7 : index
    %c0_143 = arith.constant 0 : index
    %c0_144 = arith.constant 0 : index
    %149 = vector.load %arg2[%c7_142, %c0_143, %c0_144] : memref<27x48x48xf32, #tpu.memory_space<vmem>>, vector<1x48x48xf32>
    %150 = vector.shape_cast %149 : vector<1x48x48xf32> to vector<48x48xf32>
    %cst_145 = arith.constant dense<0.000000e+00> : vector<72x48xf32>
    %151 = tpu.matmul %148, %150, %cst_145 {dimension_numbers = #tpu.dot_dimension_numbers<[1], [0], [0], [1], [0, 0, 1, 1], [], []>} : vector<72x48xf32>, vector<48x48xf32>, vector<72x48xf32> -> vector<72x48xf32>
    %152 = arith.addf %147, %151 : vector<72x48xf32>
    %c187 = arith.constant 187 : index
    %c0_146 = arith.constant 0 : index
    %153 = vector.load %arg18[%c187, %c0_146] : memref<472x48xf32, #tpu.memory_space<vmem>>, vector<72x48xf32>
    %c8_147 = arith.constant 8 : index
    %c0_148 = arith.constant 0 : index
    %c0_149 = arith.constant 0 : index
    %154 = vector.load %arg2[%c8_147, %c0_148, %c0_149] : memref<27x48x48xf32, #tpu.memory_space<vmem>>, vector<1x48x48xf32>
    %155 = vector.shape_cast %154 : vector<1x48x48xf32> to vector<48x48xf32>
    %cst_150 = arith.constant dense<0.000000e+00> : vector<72x48xf32>
    %156 = tpu.matmul %153, %155, %cst_150 {dimension_numbers = #tpu.dot_dimension_numbers<[1], [0], [0], [1], [0, 0, 1, 1], [], []>} : vector<72x48xf32>, vector<48x48xf32>, vector<72x48xf32> -> vector<72x48xf32>
    %157 = arith.addf %152, %156 : vector<72x48xf32>
    %c0_151 = arith.constant 0 : index
    %c0_152 = arith.constant 0 : index
    %158 = vector.load %arg3[%c0_151, %c0_152] : memref<3x48xf32, #tpu.memory_space<vmem>>, vector<1x48xf32>
    %159 = vector.broadcast %158 : vector<1x48xf32> to vector<72x48xf32>
    %160 = arith.addf %157, %159 : vector<72x48xf32>
    %c144 = arith.constant 144 : index
    %c0_153 = arith.constant 0 : index
    %161 = vector.load %arg19[%c144, %c0_153] : memref<288x48xf32, #tpu.memory_space<vmem>>, vector<72x48xf32>
    tpu.vector_store %arg19[%c144, %c0_153], %160 {strides = array<i32>} : memref<288x48xf32, #tpu.memory_space<vmem>>, vector<72x48xf32>,
    %cst_154 = arith.constant dense<0.000000e+00> : vector<1x48xf32>
    %162 = tpu.matmul %5, %160, %cst_154 {dimension_numbers = #tpu.dot_dimension_numbers<[1], [0], [0], [1], [0, 0, 1, 1], [], []>} : vector<1x72xf32>, vector<72x48xf32>, vector<1x48xf32> -> vector<1x48xf32>
    %163 = arith.addf %110, %162 : vector<1x48xf32>
    %164 = arith.mulf %160, %160 : vector<72x48xf32>
    %cst_155 = arith.constant dense<0.000000e+00> : vector<1x48xf32>
    %165 = tpu.matmul %5, %164, %cst_155 {dimension_numbers = #tpu.dot_dimension_numbers<[1], [0], [0], [1], [0, 0, 1, 1], [], []>} : vector<1x72xf32>, vector<72x48xf32>, vector<1x48xf32> -> vector<1x48xf32>
    %166 = arith.addf %113, %165 : vector<1x48xf32>
    %c221 = arith.constant 221 : index
    %c0_156 = arith.constant 0 : index
    %167 = vector.load %arg18[%c221, %c0_156] : memref<472x48xf32, #tpu.memory_space<vmem>>, vector<72x48xf32>
    %c0_157 = arith.constant 0 : index
    %c0_158 = arith.constant 0 : index
    %c0_159 = arith.constant 0 : index
    %168 = vector.load %arg2[%c0_157, %c0_158, %c0_159] : memref<27x48x48xf32, #tpu.memory_space<vmem>>, vector<1x48x48xf32>
    %169 = vector.shape_cast %168 : vector<1x48x48xf32> to vector<48x48xf32>
    %cst_160 = arith.constant dense<0.000000e+00> : vector<72x48xf32>
    %170 = tpu.matmul %167, %169, %cst_160 {dimension_numbers = #tpu.dot_dimension_numbers<[1], [0], [0], [1], [0, 0, 1, 1], [], []>} : vector<72x48xf32>, vector<48x48xf32>, vector<72x48xf32> -> vector<72x48xf32>
    %c222 = arith.constant 222 : index
    %c0_161 = arith.constant 0 : index
    %171 = vector.load %arg18[%c222, %c0_161] : memref<472x48xf32, #tpu.memory_space<vmem>>, vector<72x48xf32>
    %c1_162 = arith.constant 1 : index
    %c0_163 = arith.constant 0 : index
    %c0_164 = arith.constant 0 : index
    %172 = vector.load %arg2[%c1_162, %c0_163, %c0_164] : memref<27x48x48xf32, #tpu.memory_space<vmem>>, vector<1x48x48xf32>
    %173 = vector.shape_cast %172 : vector<1x48x48xf32> to vector<48x48xf32>
    %cst_165 = arith.constant dense<0.000000e+00> : vector<72x48xf32>
    %174 = tpu.matmul %171, %173, %cst_165 {dimension_numbers = #tpu.dot_dimension_numbers<[1], [0], [0], [1], [0, 0, 1, 1], [], []>} : vector<72x48xf32>, vector<48x48xf32>, vector<72x48xf32> -> vector<72x48xf32>
    %175 = arith.addf %170, %174 : vector<72x48xf32>
    %c223 = arith.constant 223 : index
    %c0_166 = arith.constant 0 : index
    %176 = vector.load %arg18[%c223, %c0_166] : memref<472x48xf32, #tpu.memory_space<vmem>>, vector<72x48xf32>
    %c2_167 = arith.constant 2 : index
    %c0_168 = arith.constant 0 : index
    %c0_169 = arith.constant 0 : index
    %177 = vector.load %arg2[%c2_167, %c0_168, %c0_169] : memref<27x48x48xf32, #tpu.memory_space<vmem>>, vector<1x48x48xf32>
    %178 = vector.shape_cast %177 : vector<1x48x48xf32> to vector<48x48xf32>
    %cst_170 = arith.constant dense<0.000000e+00> : vector<72x48xf32>
    %179 = tpu.matmul %176, %178, %cst_170 {dimension_numbers = #tpu.dot_dimension_numbers<[1], [0], [0], [1], [0, 0, 1, 1], [], []>} : vector<72x48xf32>, vector<48x48xf32>, vector<72x48xf32> -> vector<72x48xf32>
    %180 = arith.addf %175, %179 : vector<72x48xf32>
    %c239 = arith.constant 239 : index
    %c0_171 = arith.constant 0 : index
    %181 = vector.load %arg18[%c239, %c0_171] : memref<472x48xf32, #tpu.memory_space<vmem>>, vector<72x48xf32>
    %c3_172 = arith.constant 3 : index
    %c0_173 = arith.constant 0 : index
    %c0_174 = arith.constant 0 : index
    %182 = vector.load %arg2[%c3_172, %c0_173, %c0_174] : memref<27x48x48xf32, #tpu.memory_space<vmem>>, vector<1x48x48xf32>
    %183 = vector.shape_cast %182 : vector<1x48x48xf32> to vector<48x48xf32>
    %cst_175 = arith.constant dense<0.000000e+00> : vector<72x48xf32>
    %184 = tpu.matmul %181, %183, %cst_175 {dimension_numbers = #tpu.dot_dimension_numbers<[1], [0], [0], [1], [0, 0, 1, 1], [], []>} : vector<72x48xf32>, vector<48x48xf32>, vector<72x48xf32> -> vector<72x48xf32>
    %185 = arith.addf %180, %184 : vector<72x48xf32>
    %c240 = arith.constant 240 : index
    %c0_176 = arith.constant 0 : index
    %186 = vector.load %arg18[%c240, %c0_176] : memref<472x48xf32, #tpu.memory_space<vmem>>, vector<72x48xf32>
    %c4_177 = arith.constant 4 : index
    %c0_178 = arith.constant 0 : index
    %c0_179 = arith.constant 0 : index
    %187 = vector.load %arg2[%c4_177, %c0_178, %c0_179] : memref<27x48x48xf32, #tpu.memory_space<vmem>>, vector<1x48x48xf32>
    %188 = vector.shape_cast %187 : vector<1x48x48xf32> to vector<48x48xf32>
    %cst_180 = arith.constant dense<0.000000e+00> : vector<72x48xf32>
    %189 = tpu.matmul %186, %188, %cst_180 {dimension_numbers = #tpu.dot_dimension_numbers<[1], [0], [0], [1], [0, 0, 1, 1], [], []>} : vector<72x48xf32>, vector<48x48xf32>, vector<72x48xf32> -> vector<72x48xf32>
    %190 = arith.addf %185, %189 : vector<72x48xf32>
    %c241 = arith.constant 241 : index
    %c0_181 = arith.constant 0 : index
    %191 = vector.load %arg18[%c241, %c0_181] : memref<472x48xf32, #tpu.memory_space<vmem>>, vector<72x48xf32>
    %c5_182 = arith.constant 5 : index
    %c0_183 = arith.constant 0 : index
    %c0_184 = arith.constant 0 : index
    %192 = vector.load %arg2[%c5_182, %c0_183, %c0_184] : memref<27x48x48xf32, #tpu.memory_space<vmem>>, vector<1x48x48xf32>
    %193 = vector.shape_cast %192 : vector<1x48x48xf32> to vector<48x48xf32>
    %cst_185 = arith.constant dense<0.000000e+00> : vector<72x48xf32>
    %194 = tpu.matmul %191, %193, %cst_185 {dimension_numbers = #tpu.dot_dimension_numbers<[1], [0], [0], [1], [0, 0, 1, 1], [], []>} : vector<72x48xf32>, vector<48x48xf32>, vector<72x48xf32> -> vector<72x48xf32>
    %195 = arith.addf %190, %194 : vector<72x48xf32>
    %c257 = arith.constant 257 : index
    %c0_186 = arith.constant 0 : index
    %196 = vector.load %arg18[%c257, %c0_186] : memref<472x48xf32, #tpu.memory_space<vmem>>, vector<72x48xf32>
    %c6_187 = arith.constant 6 : index
    %c0_188 = arith.constant 0 : index
    %c0_189 = arith.constant 0 : index
    %197 = vector.load %arg2[%c6_187, %c0_188, %c0_189] : memref<27x48x48xf32, #tpu.memory_space<vmem>>, vector<1x48x48xf32>
    %198 = vector.shape_cast %197 : vector<1x48x48xf32> to vector<48x48xf32>
    %cst_190 = arith.constant dense<0.000000e+00> : vector<72x48xf32>
    %199 = tpu.matmul %196, %198, %cst_190 {dimension_numbers = #tpu.dot_dimension_numbers<[1], [0], [0], [1], [0, 0, 1, 1], [], []>} : vector<72x48xf32>, vector<48x48xf32>, vector<72x48xf32> -> vector<72x48xf32>
    %200 = arith.addf %195, %199 : vector<72x48xf32>
    %c258 = arith.constant 258 : index
    %c0_191 = arith.constant 0 : index
    %201 = vector.load %arg18[%c258, %c0_191] : memref<472x48xf32, #tpu.memory_space<vmem>>, vector<72x48xf32>
    %c7_192 = arith.constant 7 : index
    %c0_193 = arith.constant 0 : index
    %c0_194 = arith.constant 0 : index
    %202 = vector.load %arg2[%c7_192, %c0_193, %c0_194] : memref<27x48x48xf32, #tpu.memory_space<vmem>>, vector<1x48x48xf32>
    %203 = vector.shape_cast %202 : vector<1x48x48xf32> to vector<48x48xf32>
    %cst_195 = arith.constant dense<0.000000e+00> : vector<72x48xf32>
    %204 = tpu.matmul %201, %203, %cst_195 {dimension_numbers = #tpu.dot_dimension_numbers<[1], [0], [0], [1], [0, 0, 1, 1], [], []>} : vector<72x48xf32>, vector<48x48xf32>, vector<72x48xf32> -> vector<72x48xf32>
    %205 = arith.addf %200, %204 : vector<72x48xf32>
    %c259 = arith.constant 259 : index
    %c0_196 = arith.constant 0 : index
    %206 = vector.load %arg18[%c259, %c0_196] : memref<472x48xf32, #tpu.memory_space<vmem>>, vector<72x48xf32>
    %c8_197 = arith.constant 8 : index
    %c0_198 = arith.constant 0 : index
    %c0_199 = arith.constant 0 : index
    %207 = vector.load %arg2[%c8_197, %c0_198, %c0_199] : memref<27x48x48xf32, #tpu.memory_space<vmem>>, vector<1x48x48xf32>
    %208 = vector.shape_cast %207 : vector<1x48x48xf32> to vector<48x48xf32>
    %cst_200 = arith.constant dense<0.000000e+00> : vector<72x48xf32>
    %209 = tpu.matmul %206, %208, %cst_200 {dimension_numbers = #tpu.dot_dimension_numbers<[1], [0], [0], [1], [0, 0, 1, 1], [], []>} : vector<72x48xf32>, vector<48x48xf32>, vector<72x48xf32> -> vector<72x48xf32>
    %210 = arith.addf %205, %209 : vector<72x48xf32>
    %c0_201 = arith.constant 0 : index
    %c0_202 = arith.constant 0 : index
    %211 = vector.load %arg3[%c0_201, %c0_202] : memref<3x48xf32, #tpu.memory_space<vmem>>, vector<1x48xf32>
    %212 = vector.broadcast %211 : vector<1x48xf32> to vector<72x48xf32>
    %213 = arith.addf %210, %212 : vector<72x48xf32>
    %c216 = arith.constant 216 : index
    %c0_203 = arith.constant 0 : index
    %214 = vector.load %arg19[%c216, %c0_203] : memref<288x48xf32, #tpu.memory_space<vmem>>, vector<72x48xf32>
    tpu.vector_store %arg19[%c216, %c0_203], %213 {strides = array<i32>} : memref<288x48xf32, #tpu.memory_space<vmem>>, vector<72x48xf32>,
    %cst_204 = arith.constant dense<0.000000e+00> : vector<1x48xf32>
    %215 = tpu.matmul %5, %213, %cst_204 {dimension_numbers = #tpu.dot_dimension_numbers<[1], [0], [0], [1], [0, 0, 1, 1], [], []>} : vector<1x72xf32>, vector<72x48xf32>, vector<1x48xf32> -> vector<1x48xf32>
    %216 = arith.addf %163, %215 : vector<1x48xf32>
    %217 = arith.mulf %213, %213 : vector<72x48xf32>
    %cst_205 = arith.constant dense<0.000000e+00> : vector<1x48xf32>
    %218 = tpu.matmul %5, %217, %cst_205 {dimension_numbers = #tpu.dot_dimension_numbers<[1], [0], [0], [1], [0, 0, 1, 1], [], []>} : vector<1x72xf32>, vector<72x48xf32>, vector<1x48xf32> -> vector<1x48xf32>
    %219 = arith.addf %166, %218 : vector<1x48xf32>
    %c0_206 = arith.constant 0 : index
    %c0_207 = arith.constant 0 : index
    %220 = vector.load %arg5[%c0_206, %c0_207] : memref<48x4xf32, #tpu.memory_space<vmem>>, vector<48x4xf32>
    %cst_208 = arith.constant dense<0.000000e+00> : vector<1x4xf32>
    %221 = tpu.matmul %216, %220, %cst_208 {dimension_numbers = #tpu.dot_dimension_numbers<[1], [0], [0], [1], [0, 0, 1, 1], [], []>} : vector<1x48xf32>, vector<48x4xf32>, vector<1x4xf32> -> vector<1x4xf32>
    %cst_209 = arith.constant 3.25520843E-4 : f32
    %222 = vector.broadcast %cst_209 : f32 to vector<1x4xf32>
    %223 = arith.mulf %221, %222 : vector<1x4xf32>
    %c0_210 = arith.constant 0 : index
    %c0_211 = arith.constant 0 : index
    %224 = vector.load %arg5[%c0_210, %c0_211] : memref<48x4xf32, #tpu.memory_space<vmem>>, vector<48x4xf32>
    %cst_212 = arith.constant dense<0.000000e+00> : vector<1x4xf32>
    %225 = tpu.matmul %219, %224, %cst_212 {dimension_numbers = #tpu.dot_dimension_numbers<[1], [0], [0], [1], [0, 0, 1, 1], [], []>} : vector<1x48xf32>, vector<48x4xf32>, vector<1x4xf32> -> vector<1x4xf32>
    %cst_213 = arith.constant 3.25520843E-4 : f32
    %226 = vector.broadcast %cst_213 : f32 to vector<1x4xf32>
    %227 = arith.mulf %225, %226 : vector<1x4xf32>
    %228 = arith.mulf %223, %223 : vector<1x4xf32>
    %229 = arith.subf %227, %228 : vector<1x4xf32>
    %cst_214 = arith.constant 0.000000e+00 : f32
    %230 = vector.broadcast %cst_214 : f32 to vector<1x4xf32>
    %231 = arith.maximumf %229, %230 : vector<1x4xf32>
    %cst_215 = arith.constant 0.000000e+00 : f32
    %232 = vector.broadcast %cst_215 : f32 to vector<1x4xf32>
    %233 = arith.addf %231, %232 : vector<1x4xf32>
    %234 = math.rsqrt %233 : vector<1x4xf32>
    %c0_216 = arith.constant 0 : index
    %c0_217 = arith.constant 0 : index
    %235 = vector.load %arg6[%c0_216, %c0_217] : memref<4x48xf32, #tpu.memory_space<vmem>>, vector<4x48xf32>
    %cst_218 = arith.constant dense<0.000000e+00> : vector<1x48xf32>
    %236 = tpu.matmul %223, %235, %cst_218 {dimension_numbers = #tpu.dot_dimension_numbers<[1], [0], [0], [1], [0, 0, 1, 1], [], []>} : vector<1x4xf32>, vector<4x48xf32>, vector<1x48xf32> -> vector<1x48xf32>
    %c0_219 = arith.constant 0 : index
    %c0_220 = arith.constant 0 : index
    %237 = vector.load %arg6[%c0_219, %c0_220] : memref<4x48xf32, #tpu.memory_space<vmem>>, vector<4x48xf32>
    %cst_221 = arith.constant dense<0.000000e+00> : vector<1x48xf32>
    %238 = tpu.matmul %234, %237, %cst_221 {dimension_numbers = #tpu.dot_dimension_numbers<[1], [0], [0], [1], [0, 0, 1, 1], [], []>} : vector<1x4xf32>, vector<4x48xf32>, vector<1x48xf32> -> vector<1x48xf32>
    %c0_222 = arith.constant 0 : index
    %c0_223 = arith.constant 0 : index
    %239 = tpu.strided_load %arg19[%c0_222, %c0_223] {strides = array<i32: 2, 1>} : memref<288x48xf32, #tpu.memory_space<vmem>>, vector<144x48xf32>
    %c1_224 = arith.constant 1 : index
    %c0_225 = arith.constant 0 : index
    %240 = tpu.strided_load %arg19[%c1_224, %c0_225] {strides = array<i32: 2, 1>} : memref<288x48xf32, #tpu.memory_space<vmem>>, vector<144x48xf32>
    %241 = arith.maximumf %239, %240 : vector<144x48xf32>
    %c0_226 = arith.constant 0 : index
    %c0_227 = arith.constant 0 : index
    %242 = vector.load %arg20[%c0_226, %c0_227] : memref<144x48xf32, #tpu.memory_space<vmem>>, vector<144x48xf32>
    tpu.vector_store %arg20[%c0_226, %c0_227], %241 {strides = array<i32>} : memref<144x48xf32, #tpu.memory_space<vmem>>, vector<144x48xf32>,
    %c0_228 = arith.constant 0 : index
    %c0_229 = arith.constant 0 : index
    %243 = vector.load %arg20[%c0_228, %c0_229] : memref<144x48xf32, #tpu.memory_space<vmem>>, vector<8x48xf32>
    %c9 = arith.constant 9 : index
    %c0_230 = arith.constant 0 : index
    %244 = vector.load %arg20[%c9, %c0_230] : memref<144x48xf32, #tpu.memory_space<vmem>>, vector<8x48xf32>
    %245 = arith.maximumf %243, %244 : vector<8x48xf32>
    %246 = vector.broadcast %236 : vector<1x48xf32> to vector<8x48xf32>
    %247 = arith.subf %245, %246 : vector<8x48xf32>
    %248 = vector.broadcast %238 : vector<1x48xf32> to vector<8x48xf32>
    %249 = arith.mulf %247, %248 : vector<8x48xf32>
    %cst_231 = arith.constant 0.000000e+00 : f32
    %250 = vector.broadcast %cst_231 : f32 to vector<8x48xf32>
    %251 = arith.maximumf %249, %250 : vector<8x48xf32>
    %c342 = arith.constant 342 : index
    %c0_232 = arith.constant 0 : index
    %252 = vector.load %arg18[%c342, %c0_232] : memref<472x48xf32, #tpu.memory_space<vmem>>, vector<8x48xf32>
    tpu.vector_store %arg18[%c342, %c0_232], %251 {strides = array<i32>} : memref<472x48xf32, #tpu.memory_space<vmem>>, vector<8x48xf32>,
    %c18 = arith.constant 18 : index
    %c0_233 = arith.constant 0 : index
    %253 = vector.load %arg20[%c18, %c0_233] : memref<144x48xf32, #tpu.memory_space<vmem>>, vector<8x48xf32>
    %c27 = arith.constant 27 : index
    %c0_234 = arith.constant 0 : index
    %254 = vector.load %arg20[%c27, %c0_234] : memref<144x48xf32, #tpu.memory_space<vmem>>, vector<8x48xf32>
    %255 = arith.maximumf %253, %254 : vector<8x48xf32>
    %256 = vector.broadcast %236 : vector<1x48xf32> to vector<8x48xf32>
    %257 = arith.subf %255, %256 : vector<8x48xf32>
    %258 = vector.broadcast %238 : vector<1x48xf32> to vector<8x48xf32>
    %259 = arith.mulf %257, %258 : vector<8x48xf32>
    %cst_235 = arith.constant 0.000000e+00 : f32
    %260 = vector.broadcast %cst_235 : f32 to vector<8x48xf32>
    %261 = arith.maximumf %259, %260 : vector<8x48xf32>
    %c352 = arith.constant 352 : index
    %c0_236 = arith.constant 0 : index
    %262 = vector.load %arg18[%c352, %c0_236] : memref<472x48xf32, #tpu.memory_space<vmem>>, vector<8x48xf32>
    tpu.vector_store %arg18[%c352, %c0_236], %261 {strides = array<i32>} : memref<472x48xf32, #tpu.memory_space<vmem>>, vector<8x48xf32>,
    %c36 = arith.constant 36 : index
    %c0_237 = arith.constant 0 : index
    %263 = vector.load %arg20[%c36, %c0_237] : memref<144x48xf32, #tpu.memory_space<vmem>>, vector<8x48xf32>
    %c45 = arith.constant 45 : index
    %c0_238 = arith.constant 0 : index
    %264 = vector.load %arg20[%c45, %c0_238] : memref<144x48xf32, #tpu.memory_space<vmem>>, vector<8x48xf32>
    %265 = arith.maximumf %263, %264 : vector<8x48xf32>
    %266 = vector.broadcast %236 : vector<1x48xf32> to vector<8x48xf32>
    %267 = arith.subf %265, %266 : vector<8x48xf32>
    %268 = vector.broadcast %238 : vector<1x48xf32> to vector<8x48xf32>
    %269 = arith.mulf %267, %268 : vector<8x48xf32>
    %cst_239 = arith.constant 0.000000e+00 : f32
    %270 = vector.broadcast %cst_239 : f32 to vector<8x48xf32>
    %271 = arith.maximumf %269, %270 : vector<8x48xf32>
    %c362 = arith.constant 362 : index
    %c0_240 = arith.constant 0 : index
    %272 = vector.load %arg18[%c362, %c0_240] : memref<472x48xf32, #tpu.memory_space<vmem>>, vector<8x48xf32>
    tpu.vector_store %arg18[%c362, %c0_240], %271 {strides = array<i32>} : memref<472x48xf32, #tpu.memory_space<vmem>>, vector<8x48xf32>,
    %c54 = arith.constant 54 : index
    %c0_241 = arith.constant 0 : index
    %273 = vector.load %arg20[%c54, %c0_241] : memref<144x48xf32, #tpu.memory_space<vmem>>, vector<8x48xf32>
    %c63 = arith.constant 63 : index
    %c0_242 = arith.constant 0 : index
    %274 = vector.load %arg20[%c63, %c0_242] : memref<144x48xf32, #tpu.memory_space<vmem>>, vector<8x48xf32>
    %275 = arith.maximumf %273, %274 : vector<8x48xf32>
    %276 = vector.broadcast %236 : vector<1x48xf32> to vector<8x48xf32>
    %277 = arith.subf %275, %276 : vector<8x48xf32>
    %278 = vector.broadcast %238 : vector<1x48xf32> to vector<8x48xf32>
    %279 = arith.mulf %277, %278 : vector<8x48xf32>
    %cst_243 = arith.constant 0.000000e+00 : f32
    %280 = vector.broadcast %cst_243 : f32 to vector<8x48xf32>
    %281 = arith.maximumf %279, %280 : vector<8x48xf32>
    %c372 = arith.constant 372 : index
    %c0_244 = arith.constant 0 : index
    %282 = vector.load %arg18[%c372, %c0_244] : memref<472x48xf32, #tpu.memory_space<vmem>>, vector<8x48xf32>
    tpu.vector_store %arg18[%c372, %c0_244], %281 {strides = array<i32>} : memref<472x48xf32, #tpu.memory_space<vmem>>, vector<8x48xf32>,
    %c72_245 = arith.constant 72 : index
    %c0_246 = arith.constant 0 : index
    %283 = vector.load %arg20[%c72_245, %c0_246] : memref<144x48xf32, #tpu.memory_space<vmem>>, vector<8x48xf32>
    %c81 = arith.constant 81 : index
    %c0_247 = arith.constant 0 : index
    %284 = vector.load %arg20[%c81, %c0_247] : memref<144x48xf32, #tpu.memory_space<vmem>>, vector<8x48xf32>
    %285 = arith.maximumf %283, %284 : vector<8x48xf32>
    %286 = vector.broadcast %236 : vector<1x48xf32> to vector<8x48xf32>
    %287 = arith.subf %285, %286 : vector<8x48xf32>
    %288 = vector.broadcast %238 : vector<1x48xf32> to vector<8x48xf32>
    %289 = arith.mulf %287, %288 : vector<8x48xf32>
    %cst_248 = arith.constant 0.000000e+00 : f32
    %290 = vector.broadcast %cst_248 : f32 to vector<8x48xf32>
    %291 = arith.maximumf %289, %290 : vector<8x48xf32>
    %c382 = arith.constant 382 : index
    %c0_249 = arith.constant 0 : index
    %292 = vector.load %arg18[%c382, %c0_249] : memref<472x48xf32, #tpu.memory_space<vmem>>, vector<8x48xf32>
    tpu.vector_store %arg18[%c382, %c0_249], %291 {strides = array<i32>} : memref<472x48xf32, #tpu.memory_space<vmem>>, vector<8x48xf32>,
    %c90 = arith.constant 90 : index
    %c0_250 = arith.constant 0 : index
    %293 = vector.load %arg20[%c90, %c0_250] : memref<144x48xf32, #tpu.memory_space<vmem>>, vector<8x48xf32>
    %c99 = arith.constant 99 : index
    %c0_251 = arith.constant 0 : index
    %294 = vector.load %arg20[%c99, %c0_251] : memref<144x48xf32, #tpu.memory_space<vmem>>, vector<8x48xf32>
    %295 = arith.maximumf %293, %294 : vector<8x48xf32>
    %296 = vector.broadcast %236 : vector<1x48xf32> to vector<8x48xf32>
    %297 = arith.subf %295, %296 : vector<8x48xf32>
    %298 = vector.broadcast %238 : vector<1x48xf32> to vector<8x48xf32>
    %299 = arith.mulf %297, %298 : vector<8x48xf32>
    %cst_252 = arith.constant 0.000000e+00 : f32
    %300 = vector.broadcast %cst_252 : f32 to vector<8x48xf32>
    %301 = arith.maximumf %299, %300 : vector<8x48xf32>
    %c392 = arith.constant 392 : index
    %c0_253 = arith.constant 0 : index
    %302 = vector.load %arg18[%c392, %c0_253] : memref<472x48xf32, #tpu.memory_space<vmem>>, vector<8x48xf32>
    tpu.vector_store %arg18[%c392, %c0_253], %301 {strides = array<i32>} : memref<472x48xf32, #tpu.memory_space<vmem>>, vector<8x48xf32>,
    %c108 = arith.constant 108 : index
    %c0_254 = arith.constant 0 : index
    %303 = vector.load %arg20[%c108, %c0_254] : memref<144x48xf32, #tpu.memory_space<vmem>>, vector<8x48xf32>
    %c117 = arith.constant 117 : index
    %c0_255 = arith.constant 0 : index
    %304 = vector.load %arg20[%c117, %c0_255] : memref<144x48xf32, #tpu.memory_space<vmem>>, vector<8x48xf32>
    %305 = arith.maximumf %303, %304 : vector<8x48xf32>
    %306 = vector.broadcast %236 : vector<1x48xf32> to vector<8x48xf32>
    %307 = arith.subf %305, %306 : vector<8x48xf32>
    %308 = vector.broadcast %238 : vector<1x48xf32> to vector<8x48xf32>
    %309 = arith.mulf %307, %308 : vector<8x48xf32>
    %cst_256 = arith.constant 0.000000e+00 : f32
    %310 = vector.broadcast %cst_256 : f32 to vector<8x48xf32>
    %311 = arith.maximumf %309, %310 : vector<8x48xf32>
    %c402 = arith.constant 402 : index
    %c0_257 = arith.constant 0 : index
    %312 = vector.load %arg18[%c402, %c0_257] : memref<472x48xf32, #tpu.memory_space<vmem>>, vector<8x48xf32>
    tpu.vector_store %arg18[%c402, %c0_257], %311 {strides = array<i32>} : memref<472x48xf32, #tpu.memory_space<vmem>>, vector<8x48xf32>,
    %c126 = arith.constant 126 : index
    %c0_258 = arith.constant 0 : index
    %313 = vector.load %arg20[%c126, %c0_258] : memref<144x48xf32, #tpu.memory_space<vmem>>, vector<8x48xf32>
    %c135 = arith.constant 135 : index
    %c0_259 = arith.constant 0 : index
    %314 = vector.load %arg20[%c135, %c0_259] : memref<144x48xf32, #tpu.memory_space<vmem>>, vector<8x48xf32>
    %315 = arith.maximumf %313, %314 : vector<8x48xf32>
    %316 = vector.broadcast %236 : vector<1x48xf32> to vector<8x48xf32>
    %317 = arith.subf %315, %316 : vector<8x48xf32>
    %318 = vector.broadcast %238 : vector<1x48xf32> to vector<8x48xf32>
    %319 = arith.mulf %317, %318 : vector<8x48xf32>
    %cst_260 = arith.constant 0.000000e+00 : f32
    %320 = vector.broadcast %cst_260 : f32 to vector<8x48xf32>
    %321 = arith.maximumf %319, %320 : vector<8x48xf32>
    %c412 = arith.constant 412 : index
    %c0_261 = arith.constant 0 : index
    %322 = vector.load %arg18[%c412, %c0_261] : memref<472x48xf32, #tpu.memory_space<vmem>>, vector<8x48xf32>
    tpu.vector_store %arg18[%c412, %c0_261], %321 {strides = array<i32>} : memref<472x48xf32, #tpu.memory_space<vmem>>, vector<8x48xf32>,
    %c1_262 = arith.constant 1 : index
    %c0_263 = arith.constant 0 : index
    %323 = vector.load %arg4[%c1_262, %c0_263] : memref<3x80xf32, #tpu.memory_space<vmem>>, vector<1x80xf32>
    %cst_264 = arith.constant 0.000000e+00 : f32
    %324 = vector.broadcast %cst_264 : f32 to vector<1x48xf32>
    %cst_265 = arith.constant 0.000000e+00 : f32
    %325 = vector.broadcast %cst_265 : f32 to vector<1x48xf32>
    %c331 = arith.constant 331 : index
    %c0_266 = arith.constant 0 : index
    %326 = vector.load %arg18[%c331, %c0_266] : memref<472x48xf32, #tpu.memory_space<vmem>>, vector<80x48xf32>
    %c9_267 = arith.constant 9 : index
    %c0_268 = arith.constant 0 : index
    %c0_269 = arith.constant 0 : index
    %327 = vector.load %arg2[%c9_267, %c0_268, %c0_269] : memref<27x48x48xf32, #tpu.memory_space<vmem>>, vector<1x48x48xf32>
    %328 = vector.shape_cast %327 : vector<1x48x48xf32> to vector<48x48xf32>
    %cst_270 = arith.constant dense<0.000000e+00> : vector<80x48xf32>
    %329 = tpu.matmul %326, %328, %cst_270 {dimension_numbers = #tpu.dot_dimension_numbers<[1], [0], [0], [1], [0, 0, 1, 1], [], []>} : vector<80x48xf32>, vector<48x48xf32>, vector<80x48xf32> -> vector<80x48xf32>
    %c332 = arith.constant 332 : index
    %c0_271 = arith.constant 0 : index
    %330 = vector.load %arg18[%c332, %c0_271] : memref<472x48xf32, #tpu.memory_space<vmem>>, vector<80x48xf32>
    %c10 = arith.constant 10 : index
    %c0_272 = arith.constant 0 : index
    %c0_273 = arith.constant 0 : index
    %331 = vector.load %arg2[%c10, %c0_272, %c0_273] : memref<27x48x48xf32, #tpu.memory_space<vmem>>, vector<1x48x48xf32>
    %332 = vector.shape_cast %331 : vector<1x48x48xf32> to vector<48x48xf32>
    %cst_274 = arith.constant dense<0.000000e+00> : vector<80x48xf32>
    %333 = tpu.matmul %330, %332, %cst_274 {dimension_numbers = #tpu.dot_dimension_numbers<[1], [0], [0], [1], [0, 0, 1, 1], [], []>} : vector<80x48xf32>, vector<48x48xf32>, vector<80x48xf32> -> vector<80x48xf32>
    %334 = arith.addf %329, %333 : vector<80x48xf32>
    %c333 = arith.constant 333 : index
    %c0_275 = arith.constant 0 : index
    %335 = vector.load %arg18[%c333, %c0_275] : memref<472x48xf32, #tpu.memory_space<vmem>>, vector<80x48xf32>
    %c11 = arith.constant 11 : index
    %c0_276 = arith.constant 0 : index
    %c0_277 = arith.constant 0 : index
    %336 = vector.load %arg2[%c11, %c0_276, %c0_277] : memref<27x48x48xf32, #tpu.memory_space<vmem>>, vector<1x48x48xf32>
    %337 = vector.shape_cast %336 : vector<1x48x48xf32> to vector<48x48xf32>
    %cst_278 = arith.constant dense<0.000000e+00> : vector<80x48xf32>
    %338 = tpu.matmul %335, %337, %cst_278 {dimension_numbers = #tpu.dot_dimension_numbers<[1], [0], [0], [1], [0, 0, 1, 1], [], []>} : vector<80x48xf32>, vector<48x48xf32>, vector<80x48xf32> -> vector<80x48xf32>
    %339 = arith.addf %334, %338 : vector<80x48xf32>
    %c341 = arith.constant 341 : index
    %c0_279 = arith.constant 0 : index
    %340 = vector.load %arg18[%c341, %c0_279] : memref<472x48xf32, #tpu.memory_space<vmem>>, vector<80x48xf32>
    %c12 = arith.constant 12 : index
    %c0_280 = arith.constant 0 : index
    %c0_281 = arith.constant 0 : index
    %341 = vector.load %arg2[%c12, %c0_280, %c0_281] : memref<27x48x48xf32, #tpu.memory_space<vmem>>, vector<1x48x48xf32>
    %342 = vector.shape_cast %341 : vector<1x48x48xf32> to vector<48x48xf32>
    %cst_282 = arith.constant dense<0.000000e+00> : vector<80x48xf32>
    %343 = tpu.matmul %340, %342, %cst_282 {dimension_numbers = #tpu.dot_dimension_numbers<[1], [0], [0], [1], [0, 0, 1, 1], [], []>} : vector<80x48xf32>, vector<48x48xf32>, vector<80x48xf32> -> vector<80x48xf32>
    %344 = arith.addf %339, %343 : vector<80x48xf32>
    %c342_283 = arith.constant 342 : index
    %c0_284 = arith.constant 0 : index
    %345 = vector.load %arg18[%c342_283, %c0_284] : memref<472x48xf32, #tpu.memory_space<vmem>>, vector<80x48xf32>
    %c13 = arith.constant 13 : index
    %c0_285 = arith.constant 0 : index
    %c0_286 = arith.constant 0 : index
    %346 = vector.load %arg2[%c13, %c0_285, %c0_286] : memref<27x48x48xf32, #tpu.memory_space<vmem>>, vector<1x48x48xf32>
    %347 = vector.shape_cast %346 : vector<1x48x48xf32> to vector<48x48xf32>
    %cst_287 = arith.constant dense<0.000000e+00> : vector<80x48xf32>
    %348 = tpu.matmul %345, %347, %cst_287 {dimension_numbers = #tpu.dot_dimension_numbers<[1], [0], [0], [1], [0, 0, 1, 1], [], []>} : vector<80x48xf32>, vector<48x48xf32>, vector<80x48xf32> -> vector<80x48xf32>
    %349 = arith.addf %344, %348 : vector<80x48xf32>
    %c343 = arith.constant 343 : index
    %c0_288 = arith.constant 0 : index
    %350 = vector.load %arg18[%c343, %c0_288] : memref<472x48xf32, #tpu.memory_space<vmem>>, vector<80x48xf32>
    %c14 = arith.constant 14 : index
    %c0_289 = arith.constant 0 : index
    %c0_290 = arith.constant 0 : index
    %351 = vector.load %arg2[%c14, %c0_289, %c0_290] : memref<27x48x48xf32, #tpu.memory_space<vmem>>, vector<1x48x48xf32>
    %352 = vector.shape_cast %351 : vector<1x48x48xf32> to vector<48x48xf32>
    %cst_291 = arith.constant dense<0.000000e+00> : vector<80x48xf32>
    %353 = tpu.matmul %350, %352, %cst_291 {dimension_numbers = #tpu.dot_dimension_numbers<[1], [0], [0], [1], [0, 0, 1, 1], [], []>} : vector<80x48xf32>, vector<48x48xf32>, vector<80x48xf32> -> vector<80x48xf32>
    %354 = arith.addf %349, %353 : vector<80x48xf32>
    %c351 = arith.constant 351 : index
    %c0_292 = arith.constant 0 : index
    %355 = vector.load %arg18[%c351, %c0_292] : memref<472x48xf32, #tpu.memory_space<vmem>>, vector<80x48xf32>
    %c15 = arith.constant 15 : index
    %c0_293 = arith.constant 0 : index
    %c0_294 = arith.constant 0 : index
    %356 = vector.load %arg2[%c15, %c0_293, %c0_294] : memref<27x48x48xf32, #tpu.memory_space<vmem>>, vector<1x48x48xf32>
    %357 = vector.shape_cast %356 : vector<1x48x48xf32> to vector<48x48xf32>
    %cst_295 = arith.constant dense<0.000000e+00> : vector<80x48xf32>
    %358 = tpu.matmul %355, %357, %cst_295 {dimension_numbers = #tpu.dot_dimension_numbers<[1], [0], [0], [1], [0, 0, 1, 1], [], []>} : vector<80x48xf32>, vector<48x48xf32>, vector<80x48xf32> -> vector<80x48xf32>
    %359 = arith.addf %354, %358 : vector<80x48xf32>
    %c352_296 = arith.constant 352 : index
    %c0_297 = arith.constant 0 : index
    %360 = vector.load %arg18[%c352_296, %c0_297] : memref<472x48xf32, #tpu.memory_space<vmem>>, vector<80x48xf32>
    %c16 = arith.constant 16 : index
    %c0_298 = arith.constant 0 : index
    %c0_299 = arith.constant 0 : index
    %361 = vector.load %arg2[%c16, %c0_298, %c0_299] : memref<27x48x48xf32, #tpu.memory_space<vmem>>, vector<1x48x48xf32>
    %362 = vector.shape_cast %361 : vector<1x48x48xf32> to vector<48x48xf32>
    %cst_300 = arith.constant dense<0.000000e+00> : vector<80x48xf32>
    %363 = tpu.matmul %360, %362, %cst_300 {dimension_numbers = #tpu.dot_dimension_numbers<[1], [0], [0], [1], [0, 0, 1, 1], [], []>} : vector<80x48xf32>, vector<48x48xf32>, vector<80x48xf32> -> vector<80x48xf32>
    %364 = arith.addf %359, %363 : vector<80x48xf32>
    %c353 = arith.constant 353 : index
    %c0_301 = arith.constant 0 : index
    %365 = vector.load %arg18[%c353, %c0_301] : memref<472x48xf32, #tpu.memory_space<vmem>>, vector<80x48xf32>
    %c17 = arith.constant 17 : index
    %c0_302 = arith.constant 0 : index
    %c0_303 = arith.constant 0 : index
    %366 = vector.load %arg2[%c17, %c0_302, %c0_303] : memref<27x48x48xf32, #tpu.memory_space<vmem>>, vector<1x48x48xf32>
    %367 = vector.shape_cast %366 : vector<1x48x48xf32> to vector<48x48xf32>
    %cst_304 = arith.constant dense<0.000000e+00> : vector<80x48xf32>
    %368 = tpu.matmul %365, %367, %cst_304 {dimension_numbers = #tpu.dot_dimension_numbers<[1], [0], [0], [1], [0, 0, 1, 1], [], []>} : vector<80x48xf32>, vector<48x48xf32>, vector<80x48xf32> -> vector<80x48xf32>
    %369 = arith.addf %364, %368 : vector<80x48xf32>
    %c1_305 = arith.constant 1 : index
    %c0_306 = arith.constant 0 : index
    %370 = vector.load %arg3[%c1_305, %c0_306] : memref<3x48xf32, #tpu.memory_space<vmem>>, vector<1x48xf32>
    %371 = vector.broadcast %370 : vector<1x48xf32> to vector<80x48xf32>
    %372 = arith.addf %369, %371 : vector<80x48xf32>
    %c0_307 = arith.constant 0 : index
    %c0_308 = arith.constant 0 : index
    %373 = vector.load %arg19[%c0_307, %c0_308] : memref<288x48xf32, #tpu.memory_space<vmem>>, vector<80x48xf32>
    tpu.vector_store %arg19[%c0_307, %c0_308], %372 {strides = array<i32>} : memref<288x48xf32, #tpu.memory_space<vmem>>, vector<80x48xf32>,
    %cst_309 = arith.constant dense<0.000000e+00> : vector<1x48xf32>
    %374 = tpu.matmul %323, %372, %cst_309 {dimension_numbers = #tpu.dot_dimension_numbers<[1], [0], [0], [1], [0, 0, 1, 1], [], []>} : vector<1x80xf32>, vector<80x48xf32>, vector<1x48xf32> -> vector<1x48xf32>
    %375 = arith.addf %324, %374 : vector<1x48xf32>
    %376 = arith.mulf %372, %372 : vector<80x48xf32>
    %cst_310 = arith.constant dense<0.000000e+00> : vector<1x48xf32>
    %377 = tpu.matmul %323, %376, %cst_310 {dimension_numbers = #tpu.dot_dimension_numbers<[1], [0], [0], [1], [0, 0, 1, 1], [], []>} : vector<1x80xf32>, vector<80x48xf32>, vector<1x48xf32> -> vector<1x48xf32>
    %378 = arith.addf %325, %377 : vector<1x48xf32>
    %c0_311 = arith.constant 0 : index
    %c0_312 = arith.constant 0 : index
    %379 = vector.load %arg5[%c0_311, %c0_312] : memref<48x4xf32, #tpu.memory_space<vmem>>, vector<48x4xf32>
    %cst_313 = arith.constant dense<0.000000e+00> : vector<1x4xf32>
    %380 = tpu.matmul %375, %379, %cst_313 {dimension_numbers = #tpu.dot_dimension_numbers<[1], [0], [0], [1], [0, 0, 1, 1], [], []>} : vector<1x48xf32>, vector<48x4xf32>, vector<1x4xf32> -> vector<1x4xf32>
    %cst_314 = arith.constant 0.00130208337 : f32
    %381 = vector.broadcast %cst_314 : f32 to vector<1x4xf32>
    %382 = arith.mulf %380, %381 : vector<1x4xf32>
    %c0_315 = arith.constant 0 : index
    %c0_316 = arith.constant 0 : index
    %383 = vector.load %arg5[%c0_315, %c0_316] : memref<48x4xf32, #tpu.memory_space<vmem>>, vector<48x4xf32>
    %cst_317 = arith.constant dense<0.000000e+00> : vector<1x4xf32>
    %384 = tpu.matmul %378, %383, %cst_317 {dimension_numbers = #tpu.dot_dimension_numbers<[1], [0], [0], [1], [0, 0, 1, 1], [], []>} : vector<1x48xf32>, vector<48x4xf32>, vector<1x4xf32> -> vector<1x4xf32>
    %cst_318 = arith.constant 0.00130208337 : f32
    %385 = vector.broadcast %cst_318 : f32 to vector<1x4xf32>
    %386 = arith.mulf %384, %385 : vector<1x4xf32>
    %387 = arith.mulf %382, %382 : vector<1x4xf32>
    %388 = arith.subf %386, %387 : vector<1x4xf32>
    %cst_319 = arith.constant 0.000000e+00 : f32
    %389 = vector.broadcast %cst_319 : f32 to vector<1x4xf32>
    %390 = arith.maximumf %388, %389 : vector<1x4xf32>
    %cst_320 = arith.constant 0.000000e+00 : f32
    %391 = vector.broadcast %cst_320 : f32 to vector<1x4xf32>
    %392 = arith.addf %390, %391 : vector<1x4xf32>
    %393 = math.rsqrt %392 : vector<1x4xf32>
    %c0_321 = arith.constant 0 : index
    %c0_322 = arith.constant 0 : index
    %394 = vector.load %arg6[%c0_321, %c0_322] : memref<4x48xf32, #tpu.memory_space<vmem>>, vector<4x48xf32>
    %cst_323 = arith.constant dense<0.000000e+00> : vector<1x48xf32>
    %395 = tpu.matmul %382, %394, %cst_323 {dimension_numbers = #tpu.dot_dimension_numbers<[1], [0], [0], [1], [0, 0, 1, 1], [], []>} : vector<1x4xf32>, vector<4x48xf32>, vector<1x48xf32> -> vector<1x48xf32>
    %c0_324 = arith.constant 0 : index
    %c0_325 = arith.constant 0 : index
    %396 = vector.load %arg6[%c0_324, %c0_325] : memref<4x48xf32, #tpu.memory_space<vmem>>, vector<4x48xf32>
    %cst_326 = arith.constant dense<0.000000e+00> : vector<1x48xf32>
    %397 = tpu.matmul %393, %396, %cst_326 {dimension_numbers = #tpu.dot_dimension_numbers<[1], [0], [0], [1], [0, 0, 1, 1], [], []>} : vector<1x4xf32>, vector<4x48xf32>, vector<1x48xf32> -> vector<1x48xf32>
    %c0_327 = arith.constant 0 : index
    %c0_328 = arith.constant 0 : index
    %398 = tpu.strided_load %arg19[%c0_327, %c0_328] {strides = array<i32: 2, 1>} : memref<288x48xf32, #tpu.memory_space<vmem>>, vector<40x48xf32>
    %c1_329 = arith.constant 1 : index
    %c0_330 = arith.constant 0 : index
    %399 = tpu.strided_load %arg19[%c1_329, %c0_330] {strides = array<i32: 2, 1>} : memref<288x48xf32, #tpu.memory_space<vmem>>, vector<40x48xf32>
    %400 = arith.maximumf %398, %399 : vector<40x48xf32>
    %c0_331 = arith.constant 0 : index
    %c0_332 = arith.constant 0 : index
    %401 = vector.load %arg20[%c0_331, %c0_332] : memref<144x48xf32, #tpu.memory_space<vmem>>, vector<40x48xf32>
    tpu.vector_store %arg20[%c0_331, %c0_332], %400 {strides = array<i32>} : memref<144x48xf32, #tpu.memory_space<vmem>>, vector<40x48xf32>,
    %c0_333 = arith.constant 0 : index
    %c0_334 = arith.constant 0 : index
    %402 = vector.load %arg20[%c0_333, %c0_334] : memref<144x48xf32, #tpu.memory_space<vmem>>, vector<4x48xf32>
    %c5_335 = arith.constant 5 : index
    %c0_336 = arith.constant 0 : index
    %403 = vector.load %arg20[%c5_335, %c0_336] : memref<144x48xf32, #tpu.memory_space<vmem>>, vector<4x48xf32>
    %404 = arith.maximumf %402, %403 : vector<4x48xf32>
    %405 = vector.broadcast %395 : vector<1x48xf32> to vector<4x48xf32>
    %406 = arith.subf %404, %405 : vector<4x48xf32>
    %407 = vector.broadcast %397 : vector<1x48xf32> to vector<4x48xf32>
    %408 = arith.mulf %406, %407 : vector<4x48xf32>
    %cst_337 = arith.constant 0.000000e+00 : f32
    %409 = vector.broadcast %cst_337 : f32 to vector<4x48xf32>
    %410 = arith.maximumf %408, %409 : vector<4x48xf32>
    %c440 = arith.constant 440 : index
    %c0_338 = arith.constant 0 : index
    %411 = vector.load %arg18[%c440, %c0_338] : memref<472x48xf32, #tpu.memory_space<vmem>>, vector<4x48xf32>
    tpu.vector_store %arg18[%c440, %c0_338], %410 {strides = array<i32>} : memref<472x48xf32, #tpu.memory_space<vmem>>, vector<4x48xf32>,
    %c10_339 = arith.constant 10 : index
    %c0_340 = arith.constant 0 : index
    %412 = vector.load %arg20[%c10_339, %c0_340] : memref<144x48xf32, #tpu.memory_space<vmem>>, vector<4x48xf32>
    %c15_341 = arith.constant 15 : index
    %c0_342 = arith.constant 0 : index
    %413 = vector.load %arg20[%c15_341, %c0_342] : memref<144x48xf32, #tpu.memory_space<vmem>>, vector<4x48xf32>
    %414 = arith.maximumf %412, %413 : vector<4x48xf32>
    %415 = vector.broadcast %395 : vector<1x48xf32> to vector<4x48xf32>
    %416 = arith.subf %414, %415 : vector<4x48xf32>
    %417 = vector.broadcast %397 : vector<1x48xf32> to vector<4x48xf32>
    %418 = arith.mulf %416, %417 : vector<4x48xf32>
    %cst_343 = arith.constant 0.000000e+00 : f32
    %419 = vector.broadcast %cst_343 : f32 to vector<4x48xf32>
    %420 = arith.maximumf %418, %419 : vector<4x48xf32>
    %c446 = arith.constant 446 : index
    %c0_344 = arith.constant 0 : index
    %421 = vector.load %arg18[%c446, %c0_344] : memref<472x48xf32, #tpu.memory_space<vmem>>, vector<4x48xf32>
    tpu.vector_store %arg18[%c446, %c0_344], %420 {strides = array<i32>} : memref<472x48xf32, #tpu.memory_space<vmem>>, vector<4x48xf32>,
    %c20 = arith.constant 20 : index
    %c0_345 = arith.constant 0 : index
    %422 = vector.load %arg20[%c20, %c0_345] : memref<144x48xf32, #tpu.memory_space<vmem>>, vector<4x48xf32>
    %c25_346 = arith.constant 25 : index
    %c0_347 = arith.constant 0 : index
    %423 = vector.load %arg20[%c25_346, %c0_347] : memref<144x48xf32, #tpu.memory_space<vmem>>, vector<4x48xf32>
    %424 = arith.maximumf %422, %423 : vector<4x48xf32>
    %425 = vector.broadcast %395 : vector<1x48xf32> to vector<4x48xf32>
    %426 = arith.subf %424, %425 : vector<4x48xf32>
    %427 = vector.broadcast %397 : vector<1x48xf32> to vector<4x48xf32>
    %428 = arith.mulf %426, %427 : vector<4x48xf32>
    %cst_348 = arith.constant 0.000000e+00 : f32
    %429 = vector.broadcast %cst_348 : f32 to vector<4x48xf32>
    %430 = arith.maximumf %428, %429 : vector<4x48xf32>
    %c452 = arith.constant 452 : index
    %c0_349 = arith.constant 0 : index
    %431 = vector.load %arg18[%c452, %c0_349] : memref<472x48xf32, #tpu.memory_space<vmem>>, vector<4x48xf32>
    tpu.vector_store %arg18[%c452, %c0_349], %430 {strides = array<i32>} : memref<472x48xf32, #tpu.memory_space<vmem>>, vector<4x48xf32>,
    %c30 = arith.constant 30 : index
    %c0_350 = arith.constant 0 : index
    %432 = vector.load %arg20[%c30, %c0_350] : memref<144x48xf32, #tpu.memory_space<vmem>>, vector<4x48xf32>
    %c35 = arith.constant 35 : index
    %c0_351 = arith.constant 0 : index
    %433 = vector.load %arg20[%c35, %c0_351] : memref<144x48xf32, #tpu.memory_space<vmem>>, vector<4x48xf32>
    %434 = arith.maximumf %432, %433 : vector<4x48xf32>
    %435 = vector.broadcast %395 : vector<1x48xf32> to vector<4x48xf32>
    %436 = arith.subf %434, %435 : vector<4x48xf32>
    %437 = vector.broadcast %397 : vector<1x48xf32> to vector<4x48xf32>
    %438 = arith.mulf %436, %437 : vector<4x48xf32>
    %cst_352 = arith.constant 0.000000e+00 : f32
    %439 = vector.broadcast %cst_352 : f32 to vector<4x48xf32>
    %440 = arith.maximumf %438, %439 : vector<4x48xf32>
    %c458 = arith.constant 458 : index
    %c0_353 = arith.constant 0 : index
    %441 = vector.load %arg18[%c458, %c0_353] : memref<472x48xf32, #tpu.memory_space<vmem>>, vector<4x48xf32>
    tpu.vector_store %arg18[%c458, %c0_353], %440 {strides = array<i32>} : memref<472x48xf32, #tpu.memory_space<vmem>>, vector<4x48xf32>,
    %c2_354 = arith.constant 2 : index
    %c0_355 = arith.constant 0 : index
    %442 = vector.load %arg4[%c2_354, %c0_355] : memref<3x80xf32, #tpu.memory_space<vmem>>, vector<1x24xf32>
    %cst_356 = arith.constant 0.000000e+00 : f32
    %443 = vector.broadcast %cst_356 : f32 to vector<1x48xf32>
    %cst_357 = arith.constant 0.000000e+00 : f32
    %444 = vector.broadcast %cst_357 : f32 to vector<1x48xf32>
    %c433 = arith.constant 433 : index
    %c0_358 = arith.constant 0 : index
    %445 = vector.load %arg18[%c433, %c0_358] : memref<472x48xf32, #tpu.memory_space<vmem>>, vector<24x48xf32>
    %c18_359 = arith.constant 18 : index
    %c0_360 = arith.constant 0 : index
    %c0_361 = arith.constant 0 : index
    %446 = vector.load %arg2[%c18_359, %c0_360, %c0_361] : memref<27x48x48xf32, #tpu.memory_space<vmem>>, vector<1x48x48xf32>
    %447 = vector.shape_cast %446 : vector<1x48x48xf32> to vector<48x48xf32>
    %cst_362 = arith.constant dense<0.000000e+00> : vector<24x48xf32>
    %448 = tpu.matmul %445, %447, %cst_362 {dimension_numbers = #tpu.dot_dimension_numbers<[1], [0], [0], [1], [0, 0, 1, 1], [], []>} : vector<24x48xf32>, vector<48x48xf32>, vector<24x48xf32> -> vector<24x48xf32>
    %c434 = arith.constant 434 : index
    %c0_363 = arith.constant 0 : index
    %449 = vector.load %arg18[%c434, %c0_363] : memref<472x48xf32, #tpu.memory_space<vmem>>, vector<24x48xf32>
    %c19 = arith.constant 19 : index
    %c0_364 = arith.constant 0 : index
    %c0_365 = arith.constant 0 : index
    %450 = vector.load %arg2[%c19, %c0_364, %c0_365] : memref<27x48x48xf32, #tpu.memory_space<vmem>>, vector<1x48x48xf32>
    %451 = vector.shape_cast %450 : vector<1x48x48xf32> to vector<48x48xf32>
    %cst_366 = arith.constant dense<0.000000e+00> : vector<24x48xf32>
    %452 = tpu.matmul %449, %451, %cst_366 {dimension_numbers = #tpu.dot_dimension_numbers<[1], [0], [0], [1], [0, 0, 1, 1], [], []>} : vector<24x48xf32>, vector<48x48xf32>, vector<24x48xf32> -> vector<24x48xf32>
    %453 = arith.addf %448, %452 : vector<24x48xf32>
    %c435 = arith.constant 435 : index
    %c0_367 = arith.constant 0 : index
    %454 = vector.load %arg18[%c435, %c0_367] : memref<472x48xf32, #tpu.memory_space<vmem>>, vector<24x48xf32>
    %c20_368 = arith.constant 20 : index
    %c0_369 = arith.constant 0 : index
    %c0_370 = arith.constant 0 : index
    %455 = vector.load %arg2[%c20_368, %c0_369, %c0_370] : memref<27x48x48xf32, #tpu.memory_space<vmem>>, vector<1x48x48xf32>
    %456 = vector.shape_cast %455 : vector<1x48x48xf32> to vector<48x48xf32>
    %cst_371 = arith.constant dense<0.000000e+00> : vector<24x48xf32>
    %457 = tpu.matmul %454, %456, %cst_371 {dimension_numbers = #tpu.dot_dimension_numbers<[1], [0], [0], [1], [0, 0, 1, 1], [], []>} : vector<24x48xf32>, vector<48x48xf32>, vector<24x48xf32> -> vector<24x48xf32>
    %458 = arith.addf %453, %457 : vector<24x48xf32>
    %c439 = arith.constant 439 : index
    %c0_372 = arith.constant 0 : index
    %459 = vector.load %arg18[%c439, %c0_372] : memref<472x48xf32, #tpu.memory_space<vmem>>, vector<24x48xf32>
    %c21 = arith.constant 21 : index
    %c0_373 = arith.constant 0 : index
    %c0_374 = arith.constant 0 : index
    %460 = vector.load %arg2[%c21, %c0_373, %c0_374] : memref<27x48x48xf32, #tpu.memory_space<vmem>>, vector<1x48x48xf32>
    %461 = vector.shape_cast %460 : vector<1x48x48xf32> to vector<48x48xf32>
    %cst_375 = arith.constant dense<0.000000e+00> : vector<24x48xf32>
    %462 = tpu.matmul %459, %461, %cst_375 {dimension_numbers = #tpu.dot_dimension_numbers<[1], [0], [0], [1], [0, 0, 1, 1], [], []>} : vector<24x48xf32>, vector<48x48xf32>, vector<24x48xf32> -> vector<24x48xf32>
    %463 = arith.addf %458, %462 : vector<24x48xf32>
    %c440_376 = arith.constant 440 : index
    %c0_377 = arith.constant 0 : index
    %464 = vector.load %arg18[%c440_376, %c0_377] : memref<472x48xf32, #tpu.memory_space<vmem>>, vector<24x48xf32>
    %c22 = arith.constant 22 : index
    %c0_378 = arith.constant 0 : index
    %c0_379 = arith.constant 0 : index
    %465 = vector.load %arg2[%c22, %c0_378, %c0_379] : memref<27x48x48xf32, #tpu.memory_space<vmem>>, vector<1x48x48xf32>
    %466 = vector.shape_cast %465 : vector<1x48x48xf32> to vector<48x48xf32>
    %cst_380 = arith.constant dense<0.000000e+00> : vector<24x48xf32>
    %467 = tpu.matmul %464, %466, %cst_380 {dimension_numbers = #tpu.dot_dimension_numbers<[1], [0], [0], [1], [0, 0, 1, 1], [], []>} : vector<24x48xf32>, vector<48x48xf32>, vector<24x48xf32> -> vector<24x48xf32>
    %468 = arith.addf %463, %467 : vector<24x48xf32>
    %c441 = arith.constant 441 : index
    %c0_381 = arith.constant 0 : index
    %469 = vector.load %arg18[%c441, %c0_381] : memref<472x48xf32, #tpu.memory_space<vmem>>, vector<24x48xf32>
    %c23_382 = arith.constant 23 : index
    %c0_383 = arith.constant 0 : index
    %c0_384 = arith.constant 0 : index
    %470 = vector.load %arg2[%c23_382, %c0_383, %c0_384] : memref<27x48x48xf32, #tpu.memory_space<vmem>>, vector<1x48x48xf32>
    %471 = vector.shape_cast %470 : vector<1x48x48xf32> to vector<48x48xf32>
    %cst_385 = arith.constant dense<0.000000e+00> : vector<24x48xf32>
    %472 = tpu.matmul %469, %471, %cst_385 {dimension_numbers = #tpu.dot_dimension_numbers<[1], [0], [0], [1], [0, 0, 1, 1], [], []>} : vector<24x48xf32>, vector<48x48xf32>, vector<24x48xf32> -> vector<24x48xf32>
    %473 = arith.addf %468, %472 : vector<24x48xf32>
    %c445 = arith.constant 445 : index
    %c0_386 = arith.constant 0 : index
    %474 = vector.load %arg18[%c445, %c0_386] : memref<472x48xf32, #tpu.memory_space<vmem>>, vector<24x48xf32>
    %c24_387 = arith.constant 24 : index
    %c0_388 = arith.constant 0 : index
    %c0_389 = arith.constant 0 : index
    %475 = vector.load %arg2[%c24_387, %c0_388, %c0_389] : memref<27x48x48xf32, #tpu.memory_space<vmem>>, vector<1x48x48xf32>
    %476 = vector.shape_cast %475 : vector<1x48x48xf32> to vector<48x48xf32>
    %cst_390 = arith.constant dense<0.000000e+00> : vector<24x48xf32>
    %477 = tpu.matmul %474, %476, %cst_390 {dimension_numbers = #tpu.dot_dimension_numbers<[1], [0], [0], [1], [0, 0, 1, 1], [], []>} : vector<24x48xf32>, vector<48x48xf32>, vector<24x48xf32> -> vector<24x48xf32>
    %478 = arith.addf %473, %477 : vector<24x48xf32>
    %c446_391 = arith.constant 446 : index
    %c0_392 = arith.constant 0 : index
    %479 = vector.load %arg18[%c446_391, %c0_392] : memref<472x48xf32, #tpu.memory_space<vmem>>, vector<24x48xf32>
    %c25_393 = arith.constant 25 : index
    %c0_394 = arith.constant 0 : index
    %c0_395 = arith.constant 0 : index
    %480 = vector.load %arg2[%c25_393, %c0_394, %c0_395] : memref<27x48x48xf32, #tpu.memory_space<vmem>>, vector<1x48x48xf32>
    %481 = vector.shape_cast %480 : vector<1x48x48xf32> to vector<48x48xf32>
    %cst_396 = arith.constant dense<0.000000e+00> : vector<24x48xf32>
    %482 = tpu.matmul %479, %481, %cst_396 {dimension_numbers = #tpu.dot_dimension_numbers<[1], [0], [0], [1], [0, 0, 1, 1], [], []>} : vector<24x48xf32>, vector<48x48xf32>, vector<24x48xf32> -> vector<24x48xf32>
    %483 = arith.addf %478, %482 : vector<24x48xf32>
    %c447 = arith.constant 447 : index
    %c0_397 = arith.constant 0 : index
    %484 = vector.load %arg18[%c447, %c0_397] : memref<472x48xf32, #tpu.memory_space<vmem>>, vector<24x48xf32>
    %c26 = arith.constant 26 : index
    %c0_398 = arith.constant 0 : index
    %c0_399 = arith.constant 0 : index
    %485 = vector.load %arg2[%c26, %c0_398, %c0_399] : memref<27x48x48xf32, #tpu.memory_space<vmem>>, vector<1x48x48xf32>
    %486 = vector.shape_cast %485 : vector<1x48x48xf32> to vector<48x48xf32>
    %cst_400 = arith.constant dense<0.000000e+00> : vector<24x48xf32>
    %487 = tpu.matmul %484, %486, %cst_400 {dimension_numbers = #tpu.dot_dimension_numbers<[1], [0], [0], [1], [0, 0, 1, 1], [], []>} : vector<24x48xf32>, vector<48x48xf32>, vector<24x48xf32> -> vector<24x48xf32>
    %488 = arith.addf %483, %487 : vector<24x48xf32>
    %c2_401 = arith.constant 2 : index
    %c0_402 = arith.constant 0 : index
    %489 = vector.load %arg3[%c2_401, %c0_402] : memref<3x48xf32, #tpu.memory_space<vmem>>, vector<1x48xf32>
    %490 = vector.broadcast %489 : vector<1x48xf32> to vector<24x48xf32>
    %491 = arith.addf %488, %490 : vector<24x48xf32>
    %c0_403 = arith.constant 0 : index
    %c0_404 = arith.constant 0 : index
    %492 = vector.load %arg19[%c0_403, %c0_404] : memref<288x48xf32, #tpu.memory_space<vmem>>, vector<24x48xf32>
    tpu.vector_store %arg19[%c0_403, %c0_404], %491 {strides = array<i32>} : memref<288x48xf32, #tpu.memory_space<vmem>>, vector<24x48xf32>,
    %cst_405 = arith.constant dense<0.000000e+00> : vector<1x48xf32>
    %493 = tpu.matmul %442, %491, %cst_405 {dimension_numbers = #tpu.dot_dimension_numbers<[1], [0], [0], [1], [0, 0, 1, 1], [], []>} : vector<1x24xf32>, vector<24x48xf32>, vector<1x48xf32> -> vector<1x48xf32>
    %494 = arith.addf %443, %493 : vector<1x48xf32>
    %495 = arith.mulf %491, %491 : vector<24x48xf32>
    %cst_406 = arith.constant dense<0.000000e+00> : vector<1x48xf32>
    %496 = tpu.matmul %442, %495, %cst_406 {dimension_numbers = #tpu.dot_dimension_numbers<[1], [0], [0], [1], [0, 0, 1, 1], [], []>} : vector<1x24xf32>, vector<24x48xf32>, vector<1x48xf32> -> vector<1x48xf32>
    %497 = arith.addf %444, %496 : vector<1x48xf32>
    %c0_407 = arith.constant 0 : index
    %c0_408 = arith.constant 0 : index
    %498 = vector.load %arg5[%c0_407, %c0_408] : memref<48x4xf32, #tpu.memory_space<vmem>>, vector<48x4xf32>
    %cst_409 = arith.constant dense<0.000000e+00> : vector<1x4xf32>
    %499 = tpu.matmul %494, %498, %cst_409 {dimension_numbers = #tpu.dot_dimension_numbers<[1], [0], [0], [1], [0, 0, 1, 1], [], []>} : vector<1x48xf32>, vector<48x4xf32>, vector<1x4xf32> -> vector<1x4xf32>
    %cst_410 = arith.constant 0.00520833349 : f32
    %500 = vector.broadcast %cst_410 : f32 to vector<1x4xf32>
    %501 = arith.mulf %499, %500 : vector<1x4xf32>
    %c0_411 = arith.constant 0 : index
    %c0_412 = arith.constant 0 : index
    %502 = vector.load %arg5[%c0_411, %c0_412] : memref<48x4xf32, #tpu.memory_space<vmem>>, vector<48x4xf32>
    %cst_413 = arith.constant dense<0.000000e+00> : vector<1x4xf32>
    %503 = tpu.matmul %497, %502, %cst_413 {dimension_numbers = #tpu.dot_dimension_numbers<[1], [0], [0], [1], [0, 0, 1, 1], [], []>} : vector<1x48xf32>, vector<48x4xf32>, vector<1x4xf32> -> vector<1x4xf32>
    %cst_414 = arith.constant 0.00520833349 : f32
    %504 = vector.broadcast %cst_414 : f32 to vector<1x4xf32>
    %505 = arith.mulf %503, %504 : vector<1x4xf32>
    %506 = arith.mulf %501, %501 : vector<1x4xf32>
    %507 = arith.subf %505, %506 : vector<1x4xf32>
    %cst_415 = arith.constant 0.000000e+00 : f32
    %508 = vector.broadcast %cst_415 : f32 to vector<1x4xf32>
    %509 = arith.maximumf %507, %508 : vector<1x4xf32>
    %cst_416 = arith.constant 0.000000e+00 : f32
    %510 = vector.broadcast %cst_416 : f32 to vector<1x4xf32>
    %511 = arith.addf %509, %510 : vector<1x4xf32>
    %512 = math.rsqrt %511 : vector<1x4xf32>
    %c0_417 = arith.constant 0 : index
    %c0_418 = arith.constant 0 : index
    %513 = vector.load %arg6[%c0_417, %c0_418] : memref<4x48xf32, #tpu.memory_space<vmem>>, vector<4x48xf32>
    %cst_419 = arith.constant dense<0.000000e+00> : vector<1x48xf32>
    %514 = tpu.matmul %501, %513, %cst_419 {dimension_numbers = #tpu.dot_dimension_numbers<[1], [0], [0], [1], [0, 0, 1, 1], [], []>} : vector<1x4xf32>, vector<4x48xf32>, vector<1x48xf32> -> vector<1x48xf32>
    %c0_420 = arith.constant 0 : index
    %c0_421 = arith.constant 0 : index
    %515 = vector.load %arg6[%c0_420, %c0_421] : memref<4x48xf32, #tpu.memory_space<vmem>>, vector<4x48xf32>
    %cst_422 = arith.constant dense<0.000000e+00> : vector<1x48xf32>
    %516 = tpu.matmul %512, %515, %cst_422 {dimension_numbers = #tpu.dot_dimension_numbers<[1], [0], [0], [1], [0, 0, 1, 1], [], []>} : vector<1x4xf32>, vector<4x48xf32>, vector<1x48xf32> -> vector<1x48xf32>
    %c0_423 = arith.constant 0 : index
    %c0_424 = arith.constant 0 : index
    %517 = tpu.strided_load %arg19[%c0_423, %c0_424] {strides = array<i32: 2, 1>} : memref<288x48xf32, #tpu.memory_space<vmem>>, vector<12x48xf32>
    %c1_425 = arith.constant 1 : index
    %c0_426 = arith.constant 0 : index
    %518 = tpu.strided_load %arg19[%c1_425, %c0_426] {strides = array<i32: 2, 1>} : memref<288x48xf32, #tpu.memory_space<vmem>>, vector<12x48xf32>
    %519 = arith.maximumf %517, %518 : vector<12x48xf32>
    %c0_427 = arith.constant 0 : index
    %c0_428 = arith.constant 0 : index
    %520 = vector.load %arg20[%c0_427, %c0_428] : memref<144x48xf32, #tpu.memory_space<vmem>>, vector<12x48xf32>
    tpu.vector_store %arg20[%c0_427, %c0_428], %519 {strides = array<i32>} : memref<144x48xf32, #tpu.memory_space<vmem>>, vector<12x48xf32>,
    %c0_429 = arith.constant 0 : index
    %c0_430 = arith.constant 0 : index
    %521 = vector.load %arg20[%c0_429, %c0_430] : memref<144x48xf32, #tpu.memory_space<vmem>>, vector<2x48xf32>
    %c3_431 = arith.constant 3 : index
    %c0_432 = arith.constant 0 : index
    %522 = vector.load %arg20[%c3_431, %c0_432] : memref<144x48xf32, #tpu.memory_space<vmem>>, vector<2x48xf32>
    %523 = arith.maximumf %521, %522 : vector<2x48xf32>
    %524 = vector.broadcast %514 : vector<1x48xf32> to vector<2x48xf32>
    %525 = arith.subf %523, %524 : vector<2x48xf32>
    %526 = vector.broadcast %516 : vector<1x48xf32> to vector<2x48xf32>
    %527 = arith.mulf %525, %526 : vector<2x48xf32>
    %cst_433 = arith.constant 0.000000e+00 : f32
    %528 = vector.broadcast %cst_433 : f32 to vector<2x48xf32>
    %529 = arith.maximumf %527, %528 : vector<2x48xf32>
    %c6_434 = arith.constant 6 : index
    %c0_435 = arith.constant 0 : index
    %530 = vector.load %arg20[%c6_434, %c0_435] : memref<144x48xf32, #tpu.memory_space<vmem>>, vector<2x48xf32>
    %c9_436 = arith.constant 9 : index
    %c0_437 = arith.constant 0 : index
    %531 = vector.load %arg20[%c9_436, %c0_437] : memref<144x48xf32, #tpu.memory_space<vmem>>, vector<2x48xf32>
    %532 = arith.maximumf %530, %531 : vector<2x48xf32>
    %533 = vector.broadcast %514 : vector<1x48xf32> to vector<2x48xf32>
    %534 = arith.subf %532, %533 : vector<2x48xf32>
    %535 = vector.broadcast %516 : vector<1x48xf32> to vector<2x48xf32>
    %536 = arith.mulf %534, %535 : vector<2x48xf32>
    %cst_438 = arith.constant 0.000000e+00 : f32
    %537 = vector.broadcast %cst_438 : f32 to vector<2x48xf32>
    %538 = arith.maximumf %536, %537 : vector<2x48xf32>
    %c0_439 = arith.constant 0 : index
    %c0_440 = arith.constant 0 : index
    %539 = vector.load %arg8[%c0_439, %c0_440] : memref<1x288xf32, #tpu.memory_space<vmem>>, vector<1x288xf32>
    %540 = vector.extract_strided_slice %529 {offsets = [0, 0], sizes = [1, 48], strides = [1, 1]} : vector<2x48xf32> to vector<1x48xf32>
    %541 = arith.truncf %540 : vector<1x48xf32> to vector<1x48xbf16>
    %c0_441 = arith.constant 0 : index
    %c0_442 = arith.constant 0 : index
    %c0_443 = arith.constant 0 : index
    %542 = vector.load %arg7[%c0_441, %c0_442, %c0_443] : memref<4x48x288xbf16, #tpu.memory_space<vmem>>, vector<1x48x288xbf16>
    %543 = vector.shape_cast %542 : vector<1x48x288xbf16> to vector<48x288xbf16>
    %cst_444 = arith.constant dense<0.000000e+00> : vector<1x288xf32>
    %544 = tpu.matmul %541, %543, %cst_444 {dimension_numbers = #tpu.dot_dimension_numbers<[1], [0], [0], [1], [0, 0, 1, 1], [], []>} : vector<1x48xbf16>, vector<48x288xbf16>, vector<1x288xf32> -> vector<1x288xf32>
    %545 = arith.addf %539, %544 : vector<1x288xf32>
    %546 = vector.extract_strided_slice %529 {offsets = [1, 0], sizes = [1, 48], strides = [1, 1]} : vector<2x48xf32> to vector<1x48xf32>
    %547 = arith.truncf %546 : vector<1x48xf32> to vector<1x48xbf16>
    %c1_445 = arith.constant 1 : index
    %c0_446 = arith.constant 0 : index
    %c0_447 = arith.constant 0 : index
    %548 = vector.load %arg7[%c1_445, %c0_446, %c0_447] : memref<4x48x288xbf16, #tpu.memory_space<vmem>>, vector<1x48x288xbf16>
    %549 = vector.shape_cast %548 : vector<1x48x288xbf16> to vector<48x288xbf16>
    %cst_448 = arith.constant dense<0.000000e+00> : vector<1x288xf32>
    %550 = tpu.matmul %547, %549, %cst_448 {dimension_numbers = #tpu.dot_dimension_numbers<[1], [0], [0], [1], [0, 0, 1, 1], [], []>} : vector<1x48xbf16>, vector<48x288xbf16>, vector<1x288xf32> -> vector<1x288xf32>
    %551 = arith.addf %545, %550 : vector<1x288xf32>
    %552 = vector.extract_strided_slice %538 {offsets = [0, 0], sizes = [1, 48], strides = [1, 1]} : vector<2x48xf32> to vector<1x48xf32>
    %553 = arith.truncf %552 : vector<1x48xf32> to vector<1x48xbf16>
    %c2_449 = arith.constant 2 : index
    %c0_450 = arith.constant 0 : index
    %c0_451 = arith.constant 0 : index
    %554 = vector.load %arg7[%c2_449, %c0_450, %c0_451] : memref<4x48x288xbf16, #tpu.memory_space<vmem>>, vector<1x48x288xbf16>
    %555 = vector.shape_cast %554 : vector<1x48x288xbf16> to vector<48x288xbf16>
    %cst_452 = arith.constant dense<0.000000e+00> : vector<1x288xf32>
    %556 = tpu.matmul %553, %555, %cst_452 {dimension_numbers = #tpu.dot_dimension_numbers<[1], [0], [0], [1], [0, 0, 1, 1], [], []>} : vector<1x48xbf16>, vector<48x288xbf16>, vector<1x288xf32> -> vector<1x288xf32>
    %557 = arith.addf %551, %556 : vector<1x288xf32>
    %558 = vector.extract_strided_slice %538 {offsets = [1, 0], sizes = [1, 48], strides = [1, 1]} : vector<2x48xf32> to vector<1x48xf32>
    %559 = arith.truncf %558 : vector<1x48xf32> to vector<1x48xbf16>
    %c3_453 = arith.constant 3 : index
    %c0_454 = arith.constant 0 : index
    %c0_455 = arith.constant 0 : index
    %560 = vector.load %arg7[%c3_453, %c0_454, %c0_455] : memref<4x48x288xbf16, #tpu.memory_space<vmem>>, vector<1x48x288xbf16>
    %561 = vector.shape_cast %560 : vector<1x48x288xbf16> to vector<48x288xbf16>
    %cst_456 = arith.constant dense<0.000000e+00> : vector<1x288xf32>
    %562 = tpu.matmul %559, %561, %cst_456 {dimension_numbers = #tpu.dot_dimension_numbers<[1], [0], [0], [1], [0, 0, 1, 1], [], []>} : vector<1x48xbf16>, vector<48x288xbf16>, vector<1x288xf32> -> vector<1x288xf32>
    %563 = arith.addf %557, %562 : vector<1x288xf32>
    %564 = arith.mulf %563, %563 : vector<1x288xf32>
    %c0_457 = arith.constant 0 : index
    %c0_458 = arith.constant 0 : index
    %565 = vector.load %arg9[%c0_457, %c0_458] : memref<288x4xf32, #tpu.memory_space<vmem>>, vector<288x4xf32>
    %cst_459 = arith.constant dense<0.000000e+00> : vector<1x4xf32>
    %566 = tpu.matmul %563, %565, %cst_459 {dimension_numbers = #tpu.dot_dimension_numbers<[1], [0], [0], [1], [0, 0, 1, 1], [], []>} : vector<1x288xf32>, vector<288x4xf32>, vector<1x4xf32> -> vector<1x4xf32>
    %cst_460 = arith.constant 0.013888889 : f32
    %567 = vector.broadcast %cst_460 : f32 to vector<1x4xf32>
    %568 = arith.mulf %566, %567 : vector<1x4xf32>
    %c0_461 = arith.constant 0 : index
    %c0_462 = arith.constant 0 : index
    %569 = vector.load %arg9[%c0_461, %c0_462] : memref<288x4xf32, #tpu.memory_space<vmem>>, vector<288x4xf32>
    %cst_463 = arith.constant dense<0.000000e+00> : vector<1x4xf32>
    %570 = tpu.matmul %564, %569, %cst_463 {dimension_numbers = #tpu.dot_dimension_numbers<[1], [0], [0], [1], [0, 0, 1, 1], [], []>} : vector<1x288xf32>, vector<288x4xf32>, vector<1x4xf32> -> vector<1x4xf32>
    %cst_464 = arith.constant 0.013888889 : f32
    %571 = vector.broadcast %cst_464 : f32 to vector<1x4xf32>
    %572 = arith.mulf %570, %571 : vector<1x4xf32>
    %573 = arith.mulf %568, %568 : vector<1x4xf32>
    %574 = arith.subf %572, %573 : vector<1x4xf32>
    %cst_465 = arith.constant 0.000000e+00 : f32
    %575 = vector.broadcast %cst_465 : f32 to vector<1x4xf32>
    %576 = arith.maximumf %574, %575 : vector<1x4xf32>
    %cst_466 = arith.constant 0.000000e+00 : f32
    %577 = vector.broadcast %cst_466 : f32 to vector<1x4xf32>
    %578 = arith.addf %576, %577 : vector<1x4xf32>
    %579 = math.rsqrt %578 : vector<1x4xf32>
    %c0_467 = arith.constant 0 : index
    %c0_468 = arith.constant 0 : index
    %580 = vector.load %arg10[%c0_467, %c0_468] : memref<4x288xf32, #tpu.memory_space<vmem>>, vector<4x288xf32>
    %cst_469 = arith.constant dense<0.000000e+00> : vector<1x288xf32>
    %581 = tpu.matmul %568, %580, %cst_469 {dimension_numbers = #tpu.dot_dimension_numbers<[1], [0], [0], [1], [0, 0, 1, 1], [], []>} : vector<1x4xf32>, vector<4x288xf32>, vector<1x288xf32> -> vector<1x288xf32>
    %c0_470 = arith.constant 0 : index
    %c0_471 = arith.constant 0 : index
    %582 = vector.load %arg10[%c0_470, %c0_471] : memref<4x288xf32, #tpu.memory_space<vmem>>, vector<4x288xf32>
    %cst_472 = arith.constant dense<0.000000e+00> : vector<1x288xf32>
    %583 = tpu.matmul %579, %582, %cst_472 {dimension_numbers = #tpu.dot_dimension_numbers<[1], [0], [0], [1], [0, 0, 1, 1], [], []>} : vector<1x4xf32>, vector<4x288xf32>, vector<1x288xf32> -> vector<1x288xf32>
    %584 = arith.subf %563, %581 : vector<1x288xf32>
    %585 = arith.mulf %584, %583 : vector<1x288xf32>
    %cst_473 = arith.constant 0.000000e+00 : f32
    %586 = vector.broadcast %cst_473 : f32 to vector<1x288xf32>
    %587 = arith.maximumf %585, %586 : vector<1x288xf32>
    %588 = arith.truncf %587 : vector<1x288xf32> to vector<1x288xbf16>
    %c0_474 = arith.constant 0 : index
    %c0_475 = arith.constant 0 : index
    %589 = vector.load %arg11[%c0_474, %c0_475] : memref<288x144xbf16, #tpu.memory_space<vmem>>, vector<288x144xbf16>
    %cst_476 = arith.constant dense<0.000000e+00> : vector<1x144xf32>
    %590 = tpu.matmul %588, %589, %cst_476 {dimension_numbers = #tpu.dot_dimension_numbers<[1], [0], [0], [1], [0, 0, 1, 1], [], []>} : vector<1x288xbf16>, vector<288x144xbf16>, vector<1x144xf32> -> vector<1x144xf32>
    %c0_477 = arith.constant 0 : index
    %c0_478 = arith.constant 0 : index
    %591 = vector.load %arg12[%c0_477, %c0_478] : memref<1x144xf32, #tpu.memory_space<vmem>>, vector<1x144xf32>
    %592 = arith.addf %590, %591 : vector<1x144xf32>
    %593 = arith.mulf %592, %592 : vector<1x144xf32>
    %c0_479 = arith.constant 0 : index
    %c0_480 = arith.constant 0 : index
    %594 = vector.load %arg13[%c0_479, %c0_480] : memref<144x4xf32, #tpu.memory_space<vmem>>, vector<144x4xf32>
    %cst_481 = arith.constant dense<0.000000e+00> : vector<1x4xf32>
    %595 = tpu.matmul %592, %594, %cst_481 {dimension_numbers = #tpu.dot_dimension_numbers<[1], [0], [0], [1], [0, 0, 1, 1], [], []>} : vector<1x144xf32>, vector<144x4xf32>, vector<1x4xf32> -> vector<1x4xf32>
    %cst_482 = arith.constant 0.027777778 : f32
    %596 = vector.broadcast %cst_482 : f32 to vector<1x4xf32>
    %597 = arith.mulf %595, %596 : vector<1x4xf32>
    %c0_483 = arith.constant 0 : index
    %c0_484 = arith.constant 0 : index
    %598 = vector.load %arg13[%c0_483, %c0_484] : memref<144x4xf32, #tpu.memory_space<vmem>>, vector<144x4xf32>
    %cst_485 = arith.constant dense<0.000000e+00> : vector<1x4xf32>
    %599 = tpu.matmul %593, %598, %cst_485 {dimension_numbers = #tpu.dot_dimension_numbers<[1], [0], [0], [1], [0, 0, 1, 1], [], []>} : vector<1x144xf32>, vector<144x4xf32>, vector<1x4xf32> -> vector<1x4xf32>
    %cst_486 = arith.constant 0.027777778 : f32
    %600 = vector.broadcast %cst_486 : f32 to vector<1x4xf32>
    %601 = arith.mulf %599, %600 : vector<1x4xf32>
    %602 = arith.mulf %597, %597 : vector<1x4xf32>
    %603 = arith.subf %601, %602 : vector<1x4xf32>
    %cst_487 = arith.constant 0.000000e+00 : f32
    %604 = vector.broadcast %cst_487 : f32 to vector<1x4xf32>
    %605 = arith.maximumf %603, %604 : vector<1x4xf32>
    %cst_488 = arith.constant 0.000000e+00 : f32
    %606 = vector.broadcast %cst_488 : f32 to vector<1x4xf32>
    %607 = arith.addf %605, %606 : vector<1x4xf32>
    %608 = math.rsqrt %607 : vector<1x4xf32>
    %c0_489 = arith.constant 0 : index
    %c0_490 = arith.constant 0 : index
    %609 = vector.load %arg14[%c0_489, %c0_490] : memref<4x144xf32, #tpu.memory_space<vmem>>, vector<4x144xf32>
    %cst_491 = arith.constant dense<0.000000e+00> : vector<1x144xf32>
    %610 = tpu.matmul %597, %609, %cst_491 {dimension_numbers = #tpu.dot_dimension_numbers<[1], [0], [0], [1], [0, 0, 1, 1], [], []>} : vector<1x4xf32>, vector<4x144xf32>, vector<1x144xf32> -> vector<1x144xf32>
    %c0_492 = arith.constant 0 : index
    %c0_493 = arith.constant 0 : index
    %611 = vector.load %arg14[%c0_492, %c0_493] : memref<4x144xf32, #tpu.memory_space<vmem>>, vector<4x144xf32>
    %cst_494 = arith.constant dense<0.000000e+00> : vector<1x144xf32>
    %612 = tpu.matmul %608, %611, %cst_494 {dimension_numbers = #tpu.dot_dimension_numbers<[1], [0], [0], [1], [0, 0, 1, 1], [], []>} : vector<1x4xf32>, vector<4x144xf32>, vector<1x144xf32> -> vector<1x144xf32>
    %613 = arith.subf %592, %610 : vector<1x144xf32>
    %614 = arith.mulf %613, %612 : vector<1x144xf32>
    %cst_495 = arith.constant 0.000000e+00 : f32
    %615 = vector.broadcast %cst_495 : f32 to vector<1x144xf32>
    %616 = arith.maximumf %614, %615 : vector<1x144xf32>
    %617 = arith.truncf %616 : vector<1x144xf32> to vector<1x144xbf16>
    %c0_496 = arith.constant 0 : index
    %c0_497 = arith.constant 0 : index
    %618 = vector.load %arg15[%c0_496, %c0_497] : memref<144x2xbf16, #tpu.memory_space<vmem>>, vector<144x2xbf16>
    %cst_498 = arith.constant dense<0.000000e+00> : vector<1x2xf32>
    %619 = tpu.matmul %617, %618, %cst_498 {dimension_numbers = #tpu.dot_dimension_numbers<[1], [0], [0], [1], [0, 0, 1, 1], [], []>} : vector<1x144xbf16>, vector<144x2xbf16>, vector<1x2xf32> -> vector<1x2xf32>
    %c0_499 = arith.constant 0 : index
    %c0_500 = arith.constant 0 : index
    %620 = vector.load %arg16[%c0_499, %c0_500] : memref<1x2xf32, #tpu.memory_space<vmem>>, vector<1x2xf32>
    %621 = arith.addf %619, %620 : vector<1x2xf32>
    %c0_501 = arith.constant 0 : index
    %c0_502 = arith.constant 0 : index
    %c0_503 = arith.constant 0 : index
    %622 = vector.load %arg17[%c0_501, %c0_502, %c0_503] : memref<1x1x2xf32, #tpu.memory_space<vmem>>, vector<1x1x2xf32>
    %623 = vector.shape_cast %622 : vector<1x1x2xf32> to vector<1x2xf32>
    %624 = vector.shape_cast %621 : vector<1x2xf32> to vector<1x1x2xf32>
    tpu.vector_store %arg17[%c0_501, %c0_502, %c0_503], %624 {strides = array<i32>} : memref<1x1x2xf32, #tpu.memory_space<vmem>>, vector<1x1x2xf32>,
    return
  }
  func.func @transform_0(%arg0: i32) -> (i32, i32, i32) {
    %c0_i32 = arith.constant 0 : i32
    %c0_i32_0 = arith.constant 0 : i32
    %c0_i32_1 = arith.constant 0 : i32
    return %arg0, %c0_i32, %c0_i32_0 : i32, i32, i32
  }
  func.func @transform_1(%arg0: i32) -> (i32, i32, i32) {
    %c0_i32 = arith.constant 0 : i32
    %c0_i32_0 = arith.constant 0 : i32
    %c0_i32_1 = arith.constant 0 : i32
    %c0_i32_2 = arith.constant 0 : i32
    return %c0_i32, %c0_i32_0, %c0_i32_1 : i32, i32, i32
  }
  func.func @transform_2(%arg0: i32) -> (i32, i32) {
    %c0_i32 = arith.constant 0 : i32
    %c0_i32_0 = arith.constant 0 : i32
    %c0_i32_1 = arith.constant 0 : i32
    return %c0_i32, %c0_i32_0 : i32, i32
  }
  func.func @transform_3(%arg0: i32) -> (i32, i32) {
    %c0_i32 = arith.constant 0 : i32
    %c0_i32_0 = arith.constant 0 : i32
    %c0_i32_1 = arith.constant 0 : i32
    return %c0_i32, %c0_i32_0 : i32, i32
  }
  func.func @transform_4(%arg0: i32) -> (i32, i32) {
    %c0_i32 = arith.constant 0 : i32
    %c0_i32_0 = arith.constant 0 : i32
    %c0_i32_1 = arith.constant 0 : i32
    return %c0_i32, %c0_i32_0 : i32, i32
  }
  func.func @transform_5(%arg0: i32) -> (i32, i32) {
    %c0_i32 = arith.constant 0 : i32
    %c0_i32_0 = arith.constant 0 : i32
    %c0_i32_1 = arith.constant 0 : i32
    return %c0_i32, %c0_i32_0 : i32, i32
  }
  func.func @transform_6(%arg0: i32) -> (i32, i32, i32) {
    %c0_i32 = arith.constant 0 : i32
    %c0_i32_0 = arith.constant 0 : i32
    %c0_i32_1 = arith.constant 0 : i32
    %c0_i32_2 = arith.constant 0 : i32
    return %c0_i32, %c0_i32_0, %c0_i32_1 : i32, i32, i32
  }
  func.func @transform_7(%arg0: i32) -> (i32, i32) {
    %c0_i32 = arith.constant 0 : i32
    %c0_i32_0 = arith.constant 0 : i32
    %c0_i32_1 = arith.constant 0 : i32
    return %c0_i32, %c0_i32_0 : i32, i32
  }
  func.func @transform_8(%arg0: i32) -> (i32, i32) {
    %c0_i32 = arith.constant 0 : i32
    %c0_i32_0 = arith.constant 0 : i32
    %c0_i32_1 = arith.constant 0 : i32
    return %c0_i32, %c0_i32_0 : i32, i32
  }
  func.func @transform_9(%arg0: i32) -> (i32, i32) {
    %c0_i32 = arith.constant 0 : i32
    %c0_i32_0 = arith.constant 0 : i32
    %c0_i32_1 = arith.constant 0 : i32
    return %c0_i32, %c0_i32_0 : i32, i32
  }
  func.func @transform_10(%arg0: i32) -> (i32, i32) {
    %c0_i32 = arith.constant 0 : i32
    %c0_i32_0 = arith.constant 0 : i32
    %c0_i32_1 = arith.constant 0 : i32
    return %c0_i32, %c0_i32_0 : i32, i32
  }
  func.func @transform_11(%arg0: i32) -> (i32, i32) {
    %c0_i32 = arith.constant 0 : i32
    %c0_i32_0 = arith.constant 0 : i32
    %c0_i32_1 = arith.constant 0 : i32
    return %c0_i32, %c0_i32_0 : i32, i32
  }
  func.func @transform_12(%arg0: i32) -> (i32, i32) {
    %c0_i32 = arith.constant 0 : i32
    %c0_i32_0 = arith.constant 0 : i32
    %c0_i32_1 = arith.constant 0 : i32
    return %c0_i32, %c0_i32_0 : i32, i32
  }
  func.func @transform_13(%arg0: i32) -> (i32, i32) {
    %c0_i32 = arith.constant 0 : i32
    %c0_i32_0 = arith.constant 0 : i32
    %c0_i32_1 = arith.constant 0 : i32
    return %c0_i32, %c0_i32_0 : i32, i32
  }
  func.func @transform_14(%arg0: i32) -> (i32, i32) {
    %c0_i32 = arith.constant 0 : i32
    %c0_i32_0 = arith.constant 0 : i32
    %c0_i32_1 = arith.constant 0 : i32
    return %c0_i32, %c0_i32_0 : i32, i32
  }
  func.func @transform_15(%arg0: i32) -> (i32, i32) {
    %c0_i32 = arith.constant 0 : i32
    %c0_i32_0 = arith.constant 0 : i32
    %c0_i32_1 = arith.constant 0 : i32
    return %c0_i32, %c0_i32_0 : i32, i32
  }
  func.func @transform_16(%arg0: i32) -> (i32, i32, i32) {
    %c0_i32 = arith.constant 0 : i32
    %c0_i32_0 = arith.constant 0 : i32
    %c0_i32_1 = arith.constant 0 : i32
    return %arg0, %c0_i32, %c0_i32_0 : i32, i32, i32
  }
}

</mosaic_0001>

<bundles_post_ra>
// kernel: feature_discriminator_forward.1
= control target key start
LH: loop header
LB: loop body
LE: loop exit
PB: predicated region body
PF: predicated region fallthrough
CT: control target
= control target key end

     0   :  { %s22701_s0 = inlined_call_operand.vmem [shape: f32[2,288,48], index: 0, kind: input, shape index: {}]   ;;  %s22702_s1 = inlined_call_operand.vmem [shape: f32[27,48,48], index: 1, kind: input, shape index: {}]   ;;  %s22703_s2 = inlined_call_operand.vmem [shape: f32[3,48], index: 2, kind: input, shape index: {}]   ;;  %s22704_s3 = inlined_call_operand.vmem [shape: f32[3,80], index: 3, kind: input, shape index: {}]   ;;  %s22705_s4 = inlined_call_operand.vmem [shape: f32[48,4], index: 4, kind: input, shape index: {}]   ;;  %s22706_s5 = inlined_call_operand.vmem [shape: f32[4,48], index: 5, kind: input, shape index: {}]   ;;  %s22707_s6 = inlined_call_operand.vmem [shape: bf16[4,48,288], index: 6, kind: input, shape index: {}]   ;;  %s22708_s7 = inlined_call_operand.vmem [shape: f32[1,288], index: 7, kind: input, shape index: {}]   ;;  %s22709_s8 = inlined_call_operand.vmem [shape: f32[288,4], index: 8, kind: input, shape index: {}]   ;;  %s22710_s9 = inlined_call_operand.vmem [shape: f32[4,288], index: 9, kind: input, shape index: {}]   ;;  %s22711_s10 = inlined_call_operand.vmem [shape: bf16[288,144], index: 10, kind: input, shape index: {}]   ;;  %s22712_s11 = inlined_call_operand.vmem [shape: f32[1,144], index: 11, kind: input, shape index: {}]   ;;  %s22713_s12 = inlined_call_operand.vmem [shape: f32[144,4], index: 12, kind: input, shape index: {}]   ;;  %s22714_s13 = inlined_call_operand.vmem [shape: f32[4,144], index: 13, kind: input, shape index: {}]   ;;  %s22715_s14 = inlined_call_operand.vmem [shape: bf16[144,2], index: 14, kind: input, shape index: {}]   ;;  %s22716_s15 = inlined_call_operand.vmem [shape: f32[1,2], index: 15, kind: input, shape index: {}]   ;;  %s22717_s16 = inlined_call_operand.hbm [shape: f32[2,1,2], index: 16, kind: output, shape index: {}]  }
   0x1   :  { %22723 = sst [smem:[#allocation13_spill]] %s22701_s0 }
   0x2   :  { %21 = vsyncpa [#allocation6], 0 }
   0x3   :  { %23 = vsyncpa [#allocation6 + $0x1], 0  ;;  %s18786_s21 = smov 0   ;;  %s18788_s22 = smov 0  }
   0x4   :  { %s18790_s23 = smov 0   ;;  %s18792_s24 = smov 0  }
   0x5 LB: > { %22724 = sst [smem:[#allocation8_spill]] %s18681_s21  ;;  %s18807_s25 = sadd.s32 4294967295, %s18693_s24   ;;  %s18693_s24 = sphi %s18792_s24, %s22734_s24   ;;  %s18689_s23 = sphi %s18790_s23, %s22736_s23   ;;  %s18685_s22 = sphi %s18788_s22, %s22738_s22   ;;  %s18681_s21 = sphi %s18786_s21, %s22737_s21  }
   0x6   : > { %22725 = sst [smem:[#allocation9_spill]] %s18689_s23  ;;  %s13313_s26 = sadd.s32 4294967294, %s18693_s24  }
   0x7   : > { %s18811_s27 = sadd.s32 1, %s18693_s24   ;;  %s377_s28 = sadd.s32 1, %s18689_s23 }
   0x8   : > { %22726 = sst [smem:[#allocation10_spill]] %s18811_s27  ;;  %s374_s29 = ssub.s32 %s18693_s24, %s18811_s27 }
   0x9   : > { %p387_p0 = scmp.ne.s32.totalorder %s18689_s23, %s18685_s22  ;;  %p375_p1 = scmp.eq.s32.totalorder %s374_s29, 0 }
   0xa   : > { %p388_p2 = scmp.eq.s32.totalorder %s18807_s25, 1  ;;  %p393_p3 = scmp.ne.s32.totalorder %s18685_s22, %s18681_s21 }
   0xb   : > { %p394_p4 = scmp.eq.s32.totalorder %s13313_s26, 1  ;;  %p13316_p7 = scmp.ge.s32.totalorder %s18693_s24, 1 }
   0xc   : > { %s18822_s30 = scalar_select %p375_p1, %s18689_s23, %s377_s28  }
   0xd   : > { %p18824_p5 = por %p388_p2, %p387_p0  ;;  %p18828_p6 = por %p394_p4, %p393_p3 }
   0xe   : > { %22727 = sst [smem:[#allocation11_spill]] %s18822_s30  ;;  %p465_p8 = scmp.lt.s32.totalorder %s18693_s24, 3 }
   0xf   : > { %s22729_s17 = scalar_select %p18828_p6, 1, 0 }
  0x10   : > { %p466_p9 = pnand %p13316_p7, %p465_p8 }
  0x11   : > { %22730 = sst [smem:[#allocation12_spill]] %s22729_s17  ;;  %v13318_v0 = vld [vmem:[%s22702_s1 + $0x30] sm:$0xff] (!%p466_p9)  ;;  %v13319_v1 = vld [vmem:[%s22702_s1 + $0x38] sm:$0xff] (!%p466_p9)  ;;  %v662_v2 = vld [vmem:[%s22702_s1] sm:$0xff] (!%p466_p9)  ;;  %v18695_v3 = vmov (!%p466_p9), 0.0|0.0   ;;  %vm520_vm0 = vcmask (!%p466_p9), 392192  }
  0x12   : > { %469 = sbr.rel (%p466_p9) target bundleno = 5852 (0x16dc), region = 84  ;;  %17534 = vmatprep.subr.bf16.mxu0 (!%p466_p9), %v18695_v3  ;;  %17543 = vmatprep.subr.bf16.mxu1 (!%p466_p9), %v18695_v3  ;;  %v18845_v4 = vpack.c.bf16 (!%p466_p9), %v13319_v1, %v13318_v0  ;;  %v663_v5 = vld [vmem:[%s22702_s1 + $0x8] sm:$0xff] (!%p466_p9)  ;;  %v18853_v6 = vld [vmem:[%s22702_s1 + $0x40] sm:$0xff] (!%p466_p9)  ;;  %p514_p10 = scmp.lt.s32.totalorder (!%p466_p9), %s18807_s25, 1  ;;  %v18866_v9 = vld [vmem:[%s22702_s1 + $0x10] sm:$0xff] (!%p466_p9)  ;;  %vm18696_vm1 = vmmov (!%p466_p9), 0  }
  0x13   : > { %v18858_v7 = vld [vmem:[%s22702_s1 + $0x48] sm:$0xff] (!%p466_p9)  ;;  %v18861_v8 = vpack.c.bf16 (!%p466_p9), %v663_v5, %v662_v2  ;;  %v18871_v10 = vld [vmem:[%s22702_s1 + $0x18] sm:$0xff] (!%p466_p9)  ;;  %v18697_v11 = vmov (!%p466_p9), 0.0   ;;  %v13322_v14 = vld [vmem:[%s22702_s1 + $0x50] sm:$0xff] (!%p466_p9)  ;;  %s22731_s21 = sld [smem:[#allocation13_spill]] (!%p466_p9)  ;;  %vm3578_vm2 = vcmask (!%p466_p9), 588800  }
  0x14   : > { %15286 = vmatprep.mubr.msk.f32.mxu0 (!%p466_p9), %vm18696_vm1, %v18697_v11  ;;  %15325 = vmatprep.mubr.msk.f32.mxu1 (!%p466_p9), %vm18696_vm1, %v18697_v11  ;;  %521 = vst.msk [vmem:[#allocation2] sm:$0xff] (!%p466_p9), %vm520_vm0, %v18697_v11  ;;  %522 = vst.msk [vmem:[#allocation2 + $0x8] sm:$0xff] (!%p466_p9), %vm520_vm0, %v18697_v11  ;;  %v18998_v12 = vpack.c.bf16 (!%p466_p9), %v18858_v7, %v18853_v6  ;;  %v19007_v13 = vpack.c.bf16 (!%p466_p9), %v18871_v10, %v18866_v9  ;;  %v13323_v15 = vld [vmem:[%s22702_s1 + $0x58] sm:$0xff] (!%p466_p9)  ;;  %v666_v16 = vld [vmem:[%s22702_s1 + $0x20] sm:$0xff] (!%p466_p9)  ;;  %vm7245_vm3 = vcmask (!%p466_p9), 1043456   ;;  %vm7241_vm4 = vcmask (!%p466_p9), 31744  }
  0x15   : > { %523 = vst.msk [vmem:[#allocation2 + $0x10] sm:$0xff] (!%p466_p9), %vm520_vm0, %v18697_v11  ;;  %524 = vst.msk [vmem:[#allocation2 + $0x18] sm:$0xff] (!%p466_p9), %vm520_vm0, %v18697_v11  ;;  %17536 = vmatpush3.bf16.msra.mxu0 (!%p466_p9), %v18845_v4  ;;  %17545 = vmatpush3.bf16.msra.mxu1 (!%p466_p9), %v18861_v8  ;;  %v667_v17 = vld [vmem:[%s22702_s1 + $0x28] sm:$0xff] (!%p466_p9)  ;;  %v19023_v18 = vpack.c.bf16 (!%p466_p9), %v13323_v15, %v13322_v14  ;;  %v13342_v23 = vld [vmem:[%s22702_s1 + $0x60] sm:$0xff] (!%p466_p9)  ;;  %vm9117_vm5 = vcmask (!%p466_p9), 654336   ;;  %vm9614_vm6 = vcmask (!%p466_p9), 388096  }
  0x16   : > { %525 = vst.msk [vmem:[#allocation2 + $0x20] sm:$0xff] (!%p466_p9), %vm520_vm0, %v18697_v11  ;;  %526 = vst.msk [vmem:[#allocation2 + $0x28] sm:$0xff] (!%p466_p9), %vm520_vm0, %v18697_v11  ;;  %17537 = vmatprep.subr.bf16.mxu0 (!%p466_p9), %v18695_v3  ;;  %17546 = vmatprep.subr.bf16.mxu1 (!%p466_p9), %v18695_v3  ;;  %v17550_v19 = vpack.c.bf16 (!%p466_p9), %v667_v17, %v666_v16  ;;  %v13343_v24 = vld [vmem:[%s22702_s1 + $0x68] sm:$0xff] (!%p466_p9)  ;;  %v13357_v25 = vld [vmem:[%s22702_s1 + $0x90] sm:$0xff] (!%p466_p9)  ;;  %vm10561_vm7 = vcmask (!%p466_p9), 195584   ;;  %vm11795_vm8 = vcmask (!%p466_p9), 261120  }
  0x17   : > { %527 = vst.msk [vmem:[#allocation2 + $0x30] sm:$0xff] (!%p466_p9), %vm520_vm0, %v18697_v11  ;;  %528 = vst.msk [vmem:[#allocation2 + $0x38] sm:$0xff] (!%p466_p9), %vm520_vm0, %v18697_v11  ;;  %v13358_v26 = vld [vmem:[%s22702_s1 + $0x98] sm:$0xff] (!%p466_p9)  ;;  %v19059_v33 = vpack.c.bf16 (!%p466_p9), %v13343_v24, %v13342_v23  ;;  %v13344_v35 = vld [vmem:[%s22702_s1 + $0x70] sm:$0xff] (!%p466_p9)  ;;  %vm12810_vm9 = vcmask (!%p466_p9), 130048   ;;  %s512_s19 = sand.u32 (!%p466_p9), 1, %s18685_s22  }
  0x18   : > { %529 = vst.msk [vmem:[#allocation2 + $0x40] sm:$0xff] (!%p466_p9), %vm520_vm0, %v18697_v11  ;;  %530 = vst.msk [vmem:[#allocation2 + $0x48] sm:$0xff] (!%p466_p9), %vm520_vm0, %v18697_v11  ;;  %v19064_v34 = vpack.c.bf16 (!%p466_p9), %v13358_v26, %v13357_v25  ;;  %v13345_v36 = vld [vmem:[%s22702_s1 + $0x78] sm:$0xff] (!%p466_p9)  ;;  %v13359_v37 = vld [vmem:[%s22702_s1 + $0xa0] sm:$0xff] (!%p466_p9)  ;;  %s14242_s27 = sshll.u32 (!%p466_p9), %s18807_s25, 4  ;;  %vm13243_vm10 = vcmask (!%p466_p9), 8192  }
  0x19   : > { %531 = vst.msk [vmem:[#allocation2 + $0x50] sm:$0xff] %vm520_vm0, %v18697_v11  ;;  %532 = vst.msk [vmem:[#allocation2 + $0x58] sm:$0xff] %vm520_vm0, %v18697_v11  ;;  %s515_s18 = scalar_select %p514_p10, %s18807_s25, 1  ;;  %17539 = vmatpush3.bf16.msra.mxu0 %v18998_v12  ;;  %17548 = vmatpush3.bf16.msra.mxu1 %v19007_v13  ;;  %v13360_v38 = vld [vmem:[%s22702_s1 + $0xa8] sm:$0xff]  ;;  %v19087_v43 = vpack.c.bf16 %v13345_v36, %v13344_v35  ;;  %v13346_v45 = vld [vmem:[%s22702_s1 + $0x80] sm:$0xff] }
  0x1a   : > { %533 = vst.msk [vmem:[#allocation2 + $0x60] sm:$0xff] %vm520_vm0, %v18697_v11  ;;  %534 = vst.msk [vmem:[#allocation2 + $0x68] sm:$0xff] %vm520_vm0, %v18697_v11  ;;  %17540 = vmatprep.subr.bf16.mxu0 %v18695_v3  ;;  %17549 = vmatprep.subr.bf16.mxu1 %v18695_v3  ;;  %v19093_v44 = vpack.c.bf16 %v13360_v38, %v13359_v37  ;;  %v13347_v46 = vld [vmem:[%s22702_s1 + $0x88] sm:$0xff]  ;;  %v13361_v47 = vld [vmem:[%s22702_s1 + $0xb0] sm:$0xff]  ;;  %s22659_s23 = scalar_lea.hbm %s22717_s16, %s14242_s27  ;;  %s13246_s25 = scalar_lea.sflag [#allocation6], %s512_s19 }
  0x1b   : > { %535 = vst.msk [vmem:[#allocation2 + $0x70] sm:$0xff] %vm520_vm0, %v18697_v11  ;;  %536 = vst.msk [vmem:[#allocation2 + $0x78] sm:$0xff] %vm520_vm0, %v18697_v11  ;;  %s18461_s17 = smul.u32 288, %s515_s18  ;;  %v668_v29 = vld [vmem:[#allocation2 + $0x6] sm:$0xff]  ;;  %v13362_v48 = vld [vmem:[%s22702_s1 + $0xb8] sm:$0xff]  ;;  %v19115_v51 = vpack.c.bf16 %v13347_v46, %v13346_v45 }
  0x1c   : > { %537 = vst.msk [vmem:[#allocation2 + $0x80] sm:$0xff] %vm520_vm0, %v18697_v11  ;;  %538 = vst.msk [vmem:[#allocation2 + $0x88] sm:$0xff] %vm520_vm0, %v18697_v11  ;;  %v653_v32 = vld [vmem:[#allocation2 + $0x5] sm:$0xff]  ;;  %v669_v39 = vld [vmem:[#allocation2 + $0xe] sm:$0xff]  ;;  %v19119_v52 = vpack.c.bf16 %v13362_v48, %v13361_v47 }
  0x1d   : > { %539 = vst.msk [vmem:[#allocation2 + $0x90] sm:$0xff] %vm520_vm0, %v18697_v11  ;;  %540 = vst.msk [vmem:[#allocation2 + $0x98] sm:$0xff] %vm520_vm0, %v18697_v11  ;;  %s19028_s26 = scalar_lea.vmem %s22731_s21, %s18461_s17  ;;  %17542 = vmatpush3.bf16.msra.mxu0 %v19023_v18  ;;  %17551 = vmatpush3.bf16.msra.mxu1 %v17550_v19  ;;  %v654_v42 = vld [vmem:[#allocation2 + $0xd] sm:$0xff]  ;;  %v13372_v6 = vld [vmem:[%s22702_s1 + $0xc0] sm:$0xff]  ;;  %s513_s17 = scalar_lea.vmem [#allocation5], %s512_s19 }
  0x1e   : > { %541 = vst.msk [vmem:[#allocation2 + $0xa0] sm:$0xff] %vm520_vm0, %v18697_v11  ;;  %542 = vst.msk [vmem:[#allocation2 + $0xa8] sm:$0xff] %vm520_vm0, %v18697_v11  ;;  %v580_v20 = vld [vmem:[%s19028_s26] sm:$0xff]  ;;  %v581_v21 = vld [vmem:[%s19028_s26 + $0x8] sm:$0xff]  ;;  %17552 = vmatprep.subr.bf16.mxu0 %v18695_v3  ;;  %17561 = vmatprep.subr.bf16.mxu1 %v18695_v3  ;;  %s13258_s18 = sshll.u32 %s513_s17, 4  ;;  %s22661_s18 = int_to_ptr.vmem [resolvable:$true] %s13258_s18 }
  0x1f   : > { %543 = vst.msk [vmem:[#allocation2 + $0xb0] sm:$0xff] %vm520_vm0, %v18697_v11  ;;  %544 = vst.msk [vmem:[#allocation2 + $0xb8] sm:$0xff] %vm520_vm0, %v18697_v11  ;;  %v582_v22 = vld [vmem:[%s19028_s26 + $0x10] sm:$0xff]  ;;  %v583_v27 = vld [vmem:[%s19028_s26 + $0x18] sm:$0xff]  ;;  %s18631_s30 = scalar_lea.vmem %s22661_s18, 16 }
  0x20   : > { %545 = vst.msk [vmem:[#allocation2 + $0xc0] sm:$0xff] %vm520_vm0, %v18697_v11  ;;  %546 = vst.msk [vmem:[#allocation2 + $0xc8] sm:$0xff] %vm520_vm0, %v18697_v11  ;;  %v584_v28 = vld [vmem:[%s19028_s26 + $0x20] sm:$0xff]  ;;  %v585_v30 = vld [vmem:[%s19028_s26 + $0x28] sm:$0xff]  ;;  %15287 = vmatmul.mubr.msk.f32.vlgmr.msra.gmra.mrb[0].mxu0 %vm520_vm0, %v668_v29  ;;  %15326 = vmatmul.mubr.msk.f32.vlgmr.msra.gmra.mrb[0].mxu1 %vm520_vm0, %v653_v32  ;;  %p18632_p11 = scmp.ne.s32.totalorder %s22661_s18, %s18631_s30 }
  0x21   : > { %547 = vst.msk [vmem:[#allocation2 + $0xd0] sm:$0xff] %vm520_vm0, %v18697_v11  ;;  %548 = vst.msk [vmem:[#allocation2 + $0xd8] sm:$0xff] %vm520_vm0, %v18697_v11  ;;  %v586_v31 = vld [vmem:[%s19028_s26 + $0x30] sm:$0xff]  ;;  %15289 = vmatprep.mubr.msk.f32.mxu0 %vm18696_vm1, %v18697_v11  ;;  %v587_v40 = vld [vmem:[%s19028_s26 + $0x38] sm:$0xff]  ;;  %15328 = vmatprep.mubr.msk.f32.mxu1 %vm18696_vm1, %v18697_v11 }
  0x22   : > { %549 = vst.msk [vmem:[#allocation2 + $0xe0] sm:$0xff] %vm520_vm0, %v18697_v11  ;;  %550 = vst.msk [vmem:[#allocation2 + $0xe8] sm:$0xff] %vm520_vm0, %v18697_v11  ;;  %v588_v41 = vld [vmem:[%s19028_s26 + $0x40] sm:$0xff]  ;;  %17554 = vmatpush3.bf16.msra.mxu0 %v19059_v33  ;;  %17563 = vmatpush3.bf16.msra.mxu1 %v19064_v34  ;;  %v589_v59 = vld [vmem:[%s19028_s26 + $0x48] sm:$0xff]  ;;  %p18633_p12 = pnand %p18632_p11, %p18824_p5 }
  0x23   : > { %551 = vst.msk [vmem:[#allocation2 + $0xf0] sm:$0xff] %vm520_vm0, %v18697_v11  ;;  %552 = vst.msk [vmem:[#allocation2 + $0xf8] sm:$0xff] %vm520_vm0, %v18697_v11  ;;  %17555 = vmatprep.subr.bf16.mxu0 %v18695_v3  ;;  %17564 = vmatprep.subr.bf16.mxu1 %v18695_v3  ;;  %v590_v62 = vld [vmem:[%s19028_s26 + $0x50] sm:$0xff]  ;;  %v591_v63 = vld [vmem:[%s19028_s26 + $0x58] sm:$0xff] }
  0x24   : > { %553 = vst.msk [vmem:[#allocation2 + $0x100] sm:$0xff] %vm520_vm0, %v18697_v11  ;;  %554 = vst.msk [vmem:[#allocation2 + $0x108] sm:$0xff] %vm520_vm0, %v18697_v11  ;;  %15290 = vmatmul.mubr.msk.f32.gmra.mrb[2].mxu0 %vm520_vm0, %v669_v39  ;;  %15329 = vmatmul.mubr.msk.f32.gmra.mrb[2].mxu1 %vm520_vm0, %v654_v42  ;;  %v13373_v7 = vld [vmem:[%s22702_s1 + $0xc8] sm:$0xff]  ;;  %v592_v9 = vld [vmem:[%s19028_s26 + $0x60] sm:$0xff]  ;;  %p18634_p13 = pneg %p18633_p12 }
  0x25   : > { %555 = vst.msk [vmem:[#allocation2 + $0x110] sm:$0xff] %vm520_vm0, %v18697_v11  ;;  %556 = vst.msk [vmem:[#allocation2 + $0x118] sm:$0xff] %vm520_vm0, %v18697_v11  ;;  %15292 = vmatprep.mubr.msk.f32.mxu0 %vm18696_vm1, %v18697_v11  ;;  %15331 = vmatprep.mubr.msk.f32.mxu1 %vm18696_vm1, %v18697_v11  ;;  %v13387_v10 = vld [vmem:[%s22702_s1 + $0xf0] sm:$0xff]  ;;  %v13388_v14 = vld [vmem:[%s22702_s1 + $0xf8] sm:$0xff] }
  0x26   : > { %557 = vst.msk [vmem:[#allocation2 + $0x120] sm:$0xff] %vm520_vm0, %v18697_v11  ;;  %558 = vst.msk [vmem:[#allocation2 + $0x128] sm:$0xff] %vm520_vm0, %v18697_v11  ;;  %17557 = vmatpush3.bf16.msra.mxu0 %v19087_v43  ;;  %17566 = vmatpush3.bf16.msra.mxu1 %v19093_v44  ;;  %v958_v15 = vld [vmem:[#allocation2 + $0x7] sm:$0xff]  ;;  %v13374_v16 = vld [vmem:[%s22702_s1 + $0xd0] sm:$0xff]  ;;  %v19203_v25 = vpack.c.bf16 %v13388_v14, %v13387_v10 }
  0x27   : > { %559 = vst.msk [vmem:[#allocation2 + $0x130] sm:$0xff] %vm520_vm0, %v18697_v11  ;;  %560 = vst.msk [vmem:[#allocation2 + $0x138] sm:$0xff] %vm520_vm0, %v18697_v11  ;;  %17558 = vmatprep.subr.bf16.mxu0 %v18695_v3  ;;  %17567 = vmatprep.subr.bf16.mxu1 %v18695_v3  ;;  %v13375_v17 = vld [vmem:[%s22702_s1 + $0xd8] sm:$0xff]  ;;  %v593_v23 = vld [vmem:[%s19028_s26 + $0x68] sm:$0xff] }
  0x28   : > { %561 = vst.msk [vmem:[#allocation2 + $0x140] sm:$0xff] %vm520_vm0, %v18697_v11  ;;  %562 = vst.msk [vmem:[#allocation2 + $0x148] sm:$0xff] %vm520_vm0, %v18697_v11  ;;  %v959_v24 = vld [vmem:[#allocation2 + $0xf] sm:$0xff]  ;;  %v13392_v32 = vld [vmem:[%s22702_s1 + $0x118] sm:$0xff] }
  0x29   : > { %563 = vst.msk [vmem:[#allocation2 + $0x150] sm:$0xff] %vm520_vm0, %v18697_v11  ;;  %564 = vst.msk [vmem:[#allocation2 + $0x158] sm:$0xff] %vm520_vm0, %v18697_v11  ;;  %v594_v29 = vld [vmem:[%s19028_s26 + $0x70] sm:$0xff]  ;;  %v595_v36 = vld [vmem:[%s19028_s26 + $0x78] sm:$0xff] }
  0x2a   : > { %565 = vst.msk [vmem:[#allocation2 + $0x160] sm:$0xff] %vm520_vm0, %v18697_v11  ;;  %566 = vst.msk [vmem:[#allocation2 + $0x168] sm:$0xff] %vm520_vm0, %v18697_v11  ;;  %17560 = vmatpush3.bf16.msra.mxu0 %v19115_v51  ;;  %17569 = vmatpush3.bf16.msra.mxu1 %v19119_v52  ;;  %v13402_v48 = vld [vmem:[%s22702_s1 + $0x120] sm:$0xff] }
  0x2b   : > { %567 = vst.msk [vmem:[#allocation2 + $0x170] sm:$0xff] %vm520_vm0, %v18697_v11  ;;  %568 = vst.msk [vmem:[#allocation2 + $0x178] sm:$0xff] %vm520_vm0, %v18697_v11  ;;  %17570 = vmatprep.subr.bf16.mxu0 %v18695_v3  ;;  %17579 = vmatprep.subr.bf16.mxu1 %v18695_v3 }
  0x2c   : > { %569 = vst.msk [vmem:[#allocation2 + $0x180] sm:$0xff] %vm520_vm0, %v18697_v11  ;;  %570 = vst.msk [vmem:[#allocation2 + $0x188] sm:$0xff] %vm520_vm0, %v18697_v11 }
  0x2d   : > { %571 = vst.msk [vmem:[#allocation2 + $0x190] sm:$0xff] %vm520_vm0, %v18697_v11  ;;  %572 = vst.msk [vmem:[#allocation2 + $0x198] sm:$0xff] %vm520_vm0, %v18697_v11 }
  0x2e   : > { %573 = vst.msk [vmem:[#allocation2 + $0x1a0] sm:$0xff] %vm520_vm0, %v18697_v11  ;;  %574 = vst.msk [vmem:[#allocation2 + $0x1a8] sm:$0xff] %vm520_vm0, %v18697_v11 }
  0x2f   : > { %575 = vst.msk [vmem:[#allocation2 + $0x1b0] sm:$0xff] %vm520_vm0, %v18697_v11  ;;  %576 = vst.msk [vmem:[#allocation2 + $0x1b8] sm:$0xff] %vm520_vm0, %v18697_v11 }
  0x30   : > { %577 = vst.msk [vmem:[#allocation2 + $0x1c0] sm:$0xff] %vm520_vm0, %v18697_v11  ;;  %578 = vst.msk [vmem:[#allocation2 + $0x1c8] sm:$0xff] %vm520_vm0, %v18697_v11 }
  0x31   : > { %579 = vst.msk [vmem:[#allocation2 + $0x1d0] sm:$0xff] %vm520_vm0, %v18697_v11  ;;  %616 = vst.msk [vmem:[#allocation2 + $0x18] sm:$0xff] %vm520_vm0, %v580_v20  ;;  %v19194_v20 = vpack.c.bf16 %v13373_v7, %v13372_v6  ;;  %v13421_v6 = vld [vmem:[%s22702_s1 + $0x170] sm:$0xff]  ;;  %v13422_v7 = vld [vmem:[%s22702_s1 + $0x178] sm:$0xff] }
  0x32   : > { %617 = vst.msk [vmem:[#allocation2 + $0x20] sm:$0xff] %vm520_vm0, %v581_v21  ;;  %618 = vst.msk [vmem:[#allocation2 + $0x28] sm:$0xff] %vm520_vm0, %v582_v22  ;;  %v13389_v21 = vld [vmem:[%s22702_s1 + $0x100] sm:$0xff]  ;;  %v13390_v22 = vld [vmem:[%s22702_s1 + $0x108] sm:$0xff] }
  0x33   : > { %619 = vst.msk [vmem:[#allocation2 + $0x30] sm:$0xff] %vm520_vm0, %v583_v27  ;;  %620 = vst.msk [vmem:[#allocation2 + $0x38] sm:$0xff] %vm520_vm0, %v584_v28  ;;  %v13376_v27 = vld [vmem:[%s22702_s1 + $0xe0] sm:$0xff]  ;;  %v13377_v28 = vld [vmem:[%s22702_s1 + $0xe8] sm:$0xff]  ;;  %v19231_v35 = vpack.c.bf16 %v13390_v22, %v13389_v21 }
  0x34   : > { %621 = vst.msk [vmem:[#allocation2 + $0x40] sm:$0xff] %vm520_vm0, %v585_v30  ;;  %622 = vst.msk [vmem:[#allocation2 + $0x48] sm:$0xff] %vm520_vm0, %v586_v31  ;;  %v19220_v30 = vpack.c.bf16 %v13375_v17, %v13374_v16  ;;  %v13391_v31 = vld [vmem:[%s22702_s1 + $0x110] sm:$0xff]  ;;  %v19242_v38 = vpack.c.bf16 %v13377_v28, %v13376_v27 }
  0x35   : > { %623 = vst.msk [vmem:[#allocation2 + $0x50] sm:$0xff] %vm520_vm0, %v587_v40  ;;  %624 = vst.msk [vmem:[#allocation2 + $0x58] sm:$0xff] %vm520_vm0, %v588_v41  ;;  %v19247_v39 = vpack.c.bf16 %v13392_v32, %v13391_v31  ;;  %v13432_v32 = vld [vmem:[%s22702_s1 + $0x180] sm:$0xff] }
  0x36   : > { %625 = vst.msk [vmem:[#allocation2 + $0x60] sm:$0xff] %vm520_vm0, %v589_v59  ;;  %626 = vst.msk [vmem:[#allocation2 + $0x68] sm:$0xff] %vm520_vm0, %v590_v62 }
  0x37   : > { %627 = vst.msk [vmem:[#allocation2 + $0x70] sm:$0xff] %vm520_vm0, %v591_v63  ;;  %628 = vst.msk [vmem:[#allocation2 + $0x78] sm:$0xff] %vm520_vm0, %v592_v9 }
  0x38   : > { %v670_v49 = vld [vmem:[#allocation2 + $0x16] sm:$0xff]  ;;  %629 = vst.msk [vmem:[#allocation2 + $0x80] sm:$0xff] %vm520_vm0, %v593_v23  ;;  %630 = vst.msk [vmem:[#allocation2 + $0x88] sm:$0xff] %vm520_vm0, %v594_v29 }
  0x39   : > { %v655_v50 = vld [vmem:[#allocation2 + $0x15] sm:$0xff]  ;;  %15293 = vmatmul.mubr.msk.f32.gmra.mrb[4].mxu0 %vm520_vm0, %v670_v49  ;;  %v671_v53 = vld [vmem:[#allocation2 + $0x1e] sm:$0xff]  ;;  %v672_v55 = vld [vmem:[#allocation2 + $0x26] sm:$0xff]  ;;  %631 = vst.msk [vmem:[#allocation2 + $0x90] sm:$0xff] %vm520_vm0, %v595_v36 }
  0x3a   : > { %15332 = vmatmul.mubr.msk.f32.gmra.mrb[4].mxu1 %vm520_vm0, %v655_v50  ;;  %15295 = vmatprep.mubr.msk.f32.mxu0 %vm18696_vm1, %v18697_v11  ;;  %v656_v54 = vld [vmem:[#allocation2 + $0x1d] sm:$0xff]  ;;  %v657_v56 = vld [vmem:[#allocation2 + $0x25] sm:$0xff]  ;;  %v673_v57 = vld [vmem:[#allocation2 + $0x2e] sm:$0xff] }
  0x3b   : > { %15334 = vmatprep.mubr.msk.f32.mxu1 %vm18696_vm1, %v18697_v11  ;;  %v658_v58 = vld [vmem:[#allocation2 + $0x2d] sm:$0xff]  ;;  %v674_v60 = vld [vmem:[#allocation2 + $0x36] sm:$0xff]  ;;  %v675_v0 = vld [vmem:[#allocation2 + $0x3e] sm:$0xff] }
  0x3c   : > { %v659_v61 = vld [vmem:[#allocation2 + $0x35] sm:$0xff]  ;;  %v660_v1 = vld [vmem:[#allocation2 + $0x3d] sm:$0xff]  ;;  %v676_v2 = vld [vmem:[#allocation2 + $0x46] sm:$0xff] }
  0x3d   : > { %15296 = vmatmul.mubr.msk.f32.gmra.mrb[6].mxu0 %vm520_vm0, %v671_v53  ;;  %v661_v5 = vld [vmem:[#allocation2 + $0x45] sm:$0xff]  ;;  %v1120_v19 = vld [vmem:[#allocation2 + $0x17] sm:$0xff]  ;;  %v1123_v40 = vld [vmem:[#allocation2 + $0x2f] sm:$0xff] }
  0x3e   : > { %15335 = vmatmul.mubr.msk.f32.gmra.mrb[6].mxu1 %vm520_vm0, %v656_v54  ;;  %15298 = vmatprep.mubr.msk.f32.mxu0 %vm18696_vm1, %v18697_v11  ;;  %v1121_v26 = vld [vmem:[#allocation2 + $0x1f] sm:$0xff]  ;;  %v1122_v37 = vld [vmem:[#allocation2 + $0x27] sm:$0xff]  ;;  %v1124_v41 = vld [vmem:[#allocation2 + $0x37] sm:$0xff] }
  0x3f   : > { %15337 = vmatprep.mubr.msk.f32.mxu1 %vm18696_vm1, %v18697_v11  ;;  %v1125_v42 = vld [vmem:[#allocation2 + $0x3f] sm:$0xff]  ;;  %v1126_v45 = vld [vmem:[#allocation2 + $0x47] sm:$0xff]  ;;  %v19282_v46 = vld [vmem:[#allocation2 + $0x4f] sm:$0xff] }
  0x40   : > { %v19287_v47 = vld [vmem:[#allocation2 + $0x57] sm:$0xff]  ;;  %v13403_v49 = vld [vmem:[%s22702_s1 + $0x128] sm:$0xff]  ;;  %v1283_v62 = vld [vmem:[#allocation2 + $0x20] sm:$0xff] }
  0x41   : > { %15299 = vmatmul.mubr.msk.f32.gmra.mrb[8].mxu0 %vm520_vm0, %v672_v55  ;;  %v13417_v50 = vld [vmem:[%s22702_s1 + $0x150] sm:$0xff]  ;;  %v1282_v53 = vld [vmem:[#allocation2 + $0x18] sm:$0xff]  ;;  %v1445_v63 = vld [vmem:[#allocation2 + $0x21] sm:$0xff] }
  0x42   : > { %15338 = vmatmul.mubr.msk.f32.gmra.mrb[8].mxu1 %vm520_vm0, %v657_v56  ;;  %15301 = vmatprep.mubr.msk.f32.mxu0 %vm18696_vm1, %v18697_v11  ;;  %v1444_v54 = vld [vmem:[#allocation2 + $0x19] sm:$0xff]  ;;  %v13404_v56 = vld [vmem:[%s22702_s1 + $0x130] sm:$0xff]  ;;  %v1284_v9 = vld [vmem:[#allocation2 + $0x28] sm:$0xff] }
  0x43   : > { %15340 = vmatprep.mubr.msk.f32.mxu1 %vm18696_vm1, %v18697_v11  ;;  %v13418_v55 = vld [vmem:[%s22702_s1 + $0x158] sm:$0xff]  ;;  %v1446_v10 = vld [vmem:[#allocation2 + $0x29] sm:$0xff]  ;;  %v1287_v22 = vld [vmem:[#allocation2 + $0x40] sm:$0xff] }
  0x44   : > { %v19322_v59 = vpack.c.bf16 %v13418_v55, %v13417_v50  ;;  %v1285_v16 = vld [vmem:[#allocation2 + $0x30] sm:$0xff]  ;;  %v1448_v21 = vld [vmem:[#allocation2 + $0x39] sm:$0xff]  ;;  %v19386_v23 = vld [vmem:[#allocation2 + $0x41] sm:$0xff] }
  0x45   : > { %15302 = vmatmul.mubr.msk.f32.gmra.mrb[10].mxu0 %vm520_vm0, %v673_v57  ;;  %v13405_v57 = vld [vmem:[%s22702_s1 + $0x138] sm:$0xff]  ;;  %v1289_v27 = vld [vmem:[#allocation2 + $0x50] sm:$0xff]  ;;  %v13433_v36 = vld [vmem:[%s22702_s1 + $0x188] sm:$0xff] }
  0x46   : > { %15341 = vmatmul.mubr.msk.f32.gmra.mrb[10].mxu1 %vm520_vm0, %v658_v58  ;;  %15304 = vmatprep.mubr.msk.f32.mxu0 %vm18696_vm1, %v18697_v11  ;;  %v19320_v58 = vpack.c.bf16 %v13403_v49, %v13402_v48  ;;  %v1447_v17 = vld [vmem:[#allocation2 + $0x31] sm:$0xff]  ;;  %v1452_v31 = vld [vmem:[#allocation2 + $0x59] sm:$0xff] }
  0x47   : > { %15343 = vmatprep.mubr.msk.f32.mxu1 %vm18696_vm1, %v18697_v11  ;;  %v1451_v28 = vld [vmem:[#allocation2 + $0x51] sm:$0xff]  ;;  %v13436_v50 = vld [vmem:[%s22702_s1 + $0x1a0] sm:$0xff] }
  0x48   : > { %v1290_v29 = vld [vmem:[#allocation2 + $0x58] sm:$0xff] }
  0x49   : > { %15305 = vmatmul.mubr.msk.f32.gmra.mrb[12].mxu0 %vm520_vm0, %v674_v60  ;;  %v13419_v60 = vld [vmem:[%s22702_s1 + $0x160] sm:$0xff]  ;;  %v1769_v48 = vld [vmem:[#allocation2 + $0x32] sm:$0xff] }
  0x4a   : > { %15344 = vmatmul.mubr.msk.f32.gmra.mrb[12].mxu1 %vm520_vm0, %v659_v61  ;;  %15307 = vmatprep.mubr.msk.f32.mxu0 %vm18696_vm1, %v18697_v11  ;;  %v13420_v61 = vld [vmem:[%s22702_s1 + $0x168] sm:$0xff] }
  0x4b   : > { %15346 = vmatprep.mubr.msk.f32.mxu1 %vm18696_vm1, %v18697_v11 }
  0x4d   : > { %15308 = vmatmul.mubr.msk.f32.gmra.mrb[14].mxu0 %vm520_vm0, %v675_v0  ;;  %v19337_v0 = vpack.c.bf16 %v13405_v57, %v13404_v56  ;;  %v1771_v56 = vld [vmem:[#allocation2 + $0x42] sm:$0xff]  ;;  %v1774_v57 = vld [vmem:[#allocation2 + $0x5a] sm:$0xff] }
  0x4e   : > { %15347 = vmatmul.mubr.msk.f32.gmra.mrb[14].mxu1 %vm520_vm0, %v660_v1  ;;  %15310 = vmatprep.mubr.msk.f32.mxu0 %vm18696_vm1, %v18697_v11  ;;  %v17601_v1 = vpack.c.bf16 %v13420_v61, %v13419_v60  ;;  %v19498_v60 = vld [vmem:[#allocation2 + $0x61] sm:$0xff] }
  0x4f   : > { %15349 = vmatprep.mubr.msk.f32.mxu1 %vm18696_vm1, %v18697_v11  ;;  %v1775_v61 = vld [vmem:[#allocation2 + $0x62] sm:$0xff] }
  0x51   : > { %15311 = vmatmul.mubr.msk.f32.gmra.mrb[16].mxu0 %vm520_vm0, %v676_v2  ;;  %v13406_v2 = vld [vmem:[%s22702_s1 + $0x140] sm:$0xff] }
  0x52   : > { %15350 = vmatmul.mubr.msk.f32.gmra.mrb[16].mxu1 %vm520_vm0, %v661_v5  ;;  %15364 = vmatprep.mubr.msk.f32.mxu0 %vm18696_vm1, %v18697_v11  ;;  %v13407_v5 = vld [vmem:[%s22702_s1 + $0x148] sm:$0xff] }
  0x53   : > { %15403 = vmatprep.mubr.msk.f32.mxu1 %vm18696_vm1, %v18697_v11  ;;  %v19361_v14 = vpack.c.bf16 %v13407_v5, %v13406_v2  ;;  %v598_v2 = vld [vmem:[%s19028_s26 + $0x90] sm:$0xff] }
  0x54   : > { %v2139_v5 = vld [vmem:[#allocation2 + $0x4e] sm:$0xff]  ;;  %634 = vst.msk [vmem:[#allocation2 + $0xa8] sm:$0xff] %vm520_vm0, %v598_v2 }
  0x55   : > { %15365 = vmatmul.mubr.msk.f32.vlgmr.msra.gmra.mrb[18].mxu0 %vm520_vm0, %v958_v15  ;;  %v17604_v15 = vpack.c.bf16 %v13422_v7, %v13421_v6  ;;  %v1931_v6 = vld [vmem:[#allocation2 + $0x33] sm:$0xff]  ;;  %v2751_v2 = vld [vmem:[#allocation2 + $0x68] sm:$0xff] }
  0x56   : > { %15404 = vmatmul.mubr.msk.f32.vlgmr.msra.gmra.mrb[18].mxu1 %vm520_vm0, %v1120_v19  ;;  %15367 = vmatprep.mubr.msk.f32.mxu0 %vm18696_vm1, %v18697_v11  ;;  %v599_v7 = vld [vmem:[%s19028_s26 + $0x98] sm:$0xff] }
  0x57   : > { %15406 = vmatprep.mubr.msk.f32.mxu1 %vm18696_vm1, %v18697_v11  ;;  %17572 = vmatpush3.bf16.msra.mxu0 %v19194_v20  ;;  %635 = vst.msk [vmem:[#allocation2 + $0xb0] sm:$0xff] %vm520_vm0, %v599_v7 }
  0x58   : > { %17581 = vmatpush3.bf16.msra.mxu1 %v19203_v25  ;;  %17573 = vmatprep.subr.bf16.mxu0 %v18695_v3 }
  0x59   : > { %15368 = vmatmul.mubr.msk.f32.gmra.mrb[20].mxu0 %vm520_vm0, %v959_v24  ;;  %17582 = vmatprep.subr.bf16.mxu1 %v18695_v3  ;;  %v1288_v24 = vld [vmem:[#allocation2 + $0x48] sm:$0xff] }
  0x5a   : > { %15407 = vmatmul.mubr.msk.f32.gmra.mrb[20].mxu1 %vm520_vm0, %v1121_v26  ;;  %15370 = vmatprep.mubr.msk.f32.mxu0 %vm18696_vm1, %v18697_v11 }
  0x5b   : > { %15409 = vmatprep.mubr.msk.f32.mxu1 %vm18696_vm1, %v18697_v11  ;;  %17575 = vmatpush3.bf16.msra.mxu0 %v19220_v30 }
  0x5c   : > { %17584 = vmatpush3.bf16.msra.mxu1 %v19231_v35  ;;  %17576 = vmatprep.subr.bf16.mxu0 %v18695_v3 }
  0x5d   : > { %15371 = vmatmul.mubr.msk.f32.gmra.mrb[22].mxu0 %vm520_vm0, %v1120_v19  ;;  %17585 = vmatprep.subr.bf16.mxu1 %v18695_v3  ;;  %v1286_v19 = vld [vmem:[#allocation2 + $0x38] sm:$0xff] }
  0x5e   : > { %15410 = vmatmul.mubr.msk.f32.gmra.mrb[22].mxu1 %vm520_vm0, %v1122_v37  ;;  %15373 = vmatprep.mubr.msk.f32.mxu0 %vm18696_vm1, %v18697_v11 }
  0x5f   : > { %15412 = vmatprep.mubr.msk.f32.mxu1 %vm18696_vm1, %v18697_v11  ;;  %17578 = vmatpush3.bf16.msra.mxu0 %v19242_v38 }
  0x60   : > { %17587 = vmatpush3.bf16.msra.mxu1 %v19247_v39  ;;  %17588 = vmatprep.subr.bf16.mxu0 %v18695_v3 }
  0x61   : > { %15374 = vmatmul.mubr.msk.f32.gmra.mrb[24].mxu0 %vm520_vm0, %v1121_v26  ;;  %17597 = vmatprep.subr.bf16.mxu1 %v18695_v3  ;;  %v19395_v26 = vld [vmem:[#allocation2 + $0x49] sm:$0xff] }
  0x62   : > { %15413 = vmatmul.mubr.msk.f32.gmra.mrb[24].mxu1 %vm520_vm0, %v1123_v40  ;;  %15376 = vmatprep.mubr.msk.f32.mxu0 %vm18696_vm1, %v18697_v11 }
  0x63   : > { %15415 = vmatprep.mubr.msk.f32.mxu1 %vm18696_vm1, %v18697_v11 }
  0x65   : > { %15377 = vmatmul.mubr.msk.f32.gmra.mrb[26].mxu0 %vm520_vm0, %v1122_v37  ;;  %v1768_v37 = vld [vmem:[#allocation2 + $0x2a] sm:$0xff] }
  0x66   : > { %15416 = vmatmul.mubr.msk.f32.gmra.mrb[26].mxu1 %vm520_vm0, %v1124_v41  ;;  %15379 = vmatprep.mubr.msk.f32.mxu0 %vm18696_vm1, %v18697_v11 }
  0x67   : > { %15418 = vmatprep.mubr.msk.f32.mxu1 %vm18696_vm1, %v18697_v11 }
  0x69   : > { %15380 = vmatmul.mubr.msk.f32.gmra.mrb[28].mxu0 %vm520_vm0, %v1123_v40  ;;  %v19422_v40 = vpack.c.bf16 %v13433_v36, %v13432_v32  ;;  %v2125_v32 = vld [vmem:[#allocation2 + $0x55] sm:$0xff]  ;;  %v2430_v36 = vld [vmem:[#allocation2 + $0x5f] sm:$0xff] }
  0x6a   : > { %15419 = vmatmul.mubr.msk.f32.gmra.mrb[28].mxu1 %vm520_vm0, %v1125_v42  ;;  %15382 = vmatprep.mubr.msk.f32.mxu0 %vm18696_vm1, %v18697_v11 }
  0x6b   : > { %15421 = vmatprep.mubr.msk.f32.mxu1 %vm18696_vm1, %v18697_v11 }
  0x6d   : > { %15383 = vmatmul.mubr.msk.f32.gmra.mrb[30].mxu0 %vm520_vm0, %v1124_v41  ;;  %v13434_v41 = vld [vmem:[%s22702_s1 + $0x190] sm:$0xff] }
  0x6e   : > { %15422 = vmatmul.mubr.msk.f32.gmra.mrb[30].mxu1 %vm520_vm0, %v1126_v45  ;;  %15385 = vmatprep.mubr.msk.f32.mxu0 %vm18696_vm1, %v18697_v11 }
  0x6f   : > { %15424 = vmatprep.mubr.msk.f32.mxu1 %vm18696_vm1, %v18697_v11 }
  0x71   : > { %15386 = vmatmul.mubr.msk.f32.gmra.mrb[32].mxu0 %vm520_vm0, %v1125_v42  ;;  %v13435_v42 = vld [vmem:[%s22702_s1 + $0x198] sm:$0xff] }
  0x72   : > { %15425 = vmatmul.mubr.msk.f32.gmra.mrb[32].mxu1 %vm520_vm0, %v19282_v46  ;;  %15388 = vmatprep.mubr.msk.f32.mxu0 %vm18696_vm1, %v18697_v11  ;;  %v19439_v49 = vpack.c.bf16 %v13435_v42, %v13434_v41  ;;  %v2131_v41 = vld [vmem:[#allocation2 + $0x85] sm:$0xff] }
  0x73   : > { %15427 = vmatprep.mubr.msk.f32.mxu1 %vm18696_vm1, %v18697_v11  ;;  %v19660_v42 = vld [vmem:[#allocation2 + $0x87] sm:$0xff] }
  0x75   : > { %15389 = vmatmul.mubr.msk.f32.gmra.mrb[34].mxu0 %vm520_vm0, %v1126_v45  ;;  %v596_v45 = vld [vmem:[%s19028_s26 + $0x80] sm:$0xff] }
  0x76   : > { %15428 = vmatmul.mubr.msk.f32.gmra.mrb[34].mxu1 %vm520_vm0, %v19287_v47  ;;  %15442 = vmatprep.mubr.msk.f32.mxu0 %vm18696_vm1, %v18697_v11  ;;  %632 = vst.msk [vmem:[#allocation2 + $0x98] sm:$0xff] %vm520_vm0, %v596_v45  ;;  %v2132_v45 = vld [vmem:[#allocation2 + $0x8d] sm:$0xff] }
  0x77   : > { %15481 = vmatprep.mubr.msk.f32.mxu1 %vm18696_vm1, %v18697_v11 }
  0x79   : > { %15443 = vmatmul.mubr.msk.f32.vlgmr.msra.gmra.mrb[36].mxu0 %vm520_vm0, %v1282_v53  ;;  %v13437_v53 = vld [vmem:[%s22702_s1 + $0x1a8] sm:$0xff] }
  0x7a   : > { %15482 = vmatmul.mubr.msk.f32.vlgmr.msra.gmra.mrb[36].mxu1 %vm520_vm0, %v1444_v54  ;;  %15445 = vmatprep.mubr.msk.f32.mxu0 %vm18696_vm1, %v18697_v11  ;;  %v597_v54 = vld [vmem:[%s19028_s26 + $0x88] sm:$0xff]  ;;  %v19459_v55 = vpack.c.bf16 %v13437_v53, %v13436_v50 }
  0x7b   : > { %15484 = vmatprep.mubr.msk.f32.mxu1 %vm18696_vm1, %v18697_v11  ;;  %17590 = vmatpush3.bf16.msra.mxu0 %v19320_v58  ;;  %633 = vst.msk [vmem:[#allocation2 + $0xa0] sm:$0xff] %vm520_vm0, %v597_v54 }
  0x7c   : > { %17599 = vmatpush3.bf16.msra.mxu1 %v19322_v59  ;;  %17591 = vmatprep.subr.bf16.mxu0 %v18695_v3 }
  0x7d   : > { %15446 = vmatmul.mubr.msk.f32.gmra.mrb[38].mxu0 %vm520_vm0, %v1283_v62  ;;  %17600 = vmatprep.subr.bf16.mxu1 %v18695_v3  ;;  %v19507_v62 = vld [vmem:[#allocation2 + $0x69] sm:$0xff] }
  0x7e   : > { %15485 = vmatmul.mubr.msk.f32.gmra.mrb[38].mxu1 %vm520_vm0, %v1445_v63  ;;  %15448 = vmatprep.mubr.msk.f32.mxu0 %vm18696_vm1, %v18697_v11  ;;  %v1776_v63 = vld [vmem:[#allocation2 + $0x6a] sm:$0xff] }
  0x7f   : > { %15487 = vmatprep.mubr.msk.f32.mxu1 %vm18696_vm1, %v18697_v11  ;;  %17593 = vmatpush3.bf16.msra.mxu0 %v19337_v0 }
  0x80   : > { %17602 = vmatpush3.bf16.msra.mxu1 %v17601_v1  ;;  %17594 = vmatprep.subr.bf16.mxu0 %v18695_v3  ;;  %v1930_v1 = vld [vmem:[#allocation2 + $0x2b] sm:$0xff] }
  0x81   : > { %15449 = vmatmul.mubr.msk.f32.gmra.mrb[40].mxu0 %vm520_vm0, %v1284_v9  ;;  %17603 = vmatprep.subr.bf16.mxu1 %v18695_v3  ;;  %v2140_v9 = vld [vmem:[#allocation2 + $0x56] sm:$0xff] }
  0x82   : > { %15488 = vmatmul.mubr.msk.f32.gmra.mrb[40].mxu1 %vm520_vm0, %v1446_v10  ;;  %15451 = vmatprep.mubr.msk.f32.mxu0 %vm18696_vm1, %v18697_v11 }
  0x83   : > { %15490 = vmatprep.mubr.msk.f32.mxu1 %vm18696_vm1, %v18697_v11  ;;  %17596 = vmatpush3.bf16.msra.mxu0 %v19361_v14 }
  0x84   : > { %17605 = vmatpush3.bf16.msra.mxu1 %v17604_v15  ;;  %17606 = vmatprep.subr.bf16.mxu0 %v18695_v3  ;;  %v2138_v15 = vld [vmem:[%s22702_s1 + $0x28] sm:$0xff] }
  0x85   : > { %15452 = vmatmul.mubr.msk.f32.gmra.mrb[42].mxu0 %vm520_vm0, %v1285_v16  ;;  %17615 = vmatprep.subr.bf16.mxu1 %v18695_v3  ;;  %v2141_v16 = vld [vmem:[#allocation2 + $0x5e] sm:$0xff] }
  0x86   : > { %15491 = vmatmul.mubr.msk.f32.gmra.mrb[42].mxu1 %vm520_vm0, %v1447_v17  ;;  %15454 = vmatprep.mubr.msk.f32.mxu0 %vm18696_vm1, %v18697_v11 }
  0x87   : > { %15493 = vmatprep.mubr.msk.f32.mxu1 %vm18696_vm1, %v18697_v11 }
  0x89   : > { %15455 = vmatmul.mubr.msk.f32.gmra.mrb[44].mxu0 %vm520_vm0, %v1286_v19  ;;  %v1933_v19 = vld [vmem:[#allocation2 + $0x43] sm:$0xff] }
  0x8a   : > { %15494 = vmatmul.mubr.msk.f32.gmra.mrb[44].mxu1 %vm520_vm0, %v1448_v21  ;;  %15457 = vmatprep.mubr.msk.f32.mxu0 %vm18696_vm1, %v18697_v11 }
  0x8b   : > { %15496 = vmatprep.mubr.msk.f32.mxu1 %vm18696_vm1, %v18697_v11 }
  0x8d   : > { %15458 = vmatmul.mubr.msk.f32.gmra.mrb[46].mxu0 %vm520_vm0, %v1287_v22  ;;  %v2144_v22 = vld [vmem:[#allocation2 + $0x76] sm:$0xff] }
  0x8e   : > { %15497 = vmatmul.mubr.msk.f32.gmra.mrb[46].mxu1 %vm520_vm0, %v19386_v23  ;;  %15460 = vmatprep.mubr.msk.f32.mxu0 %vm18696_vm1, %v18697_v11 }
  0x8f   : > { %15499 = vmatprep.mubr.msk.f32.mxu1 %vm18696_vm1, %v18697_v11 }
  0x91   : > { %15461 = vmatmul.mubr.msk.f32.gmra.mrb[48].mxu0 %vm520_vm0, %v1288_v24  ;;  %v2145_v24 = vld [vmem:[#allocation2 + $0x7e] sm:$0xff] }
  0x92   : > { %15500 = vmatmul.mubr.msk.f32.gmra.mrb[48].mxu1 %vm520_vm0, %v19395_v26  ;;  %15463 = vmatprep.mubr.msk.f32.mxu0 %vm18696_vm1, %v18697_v11 }
  0x93   : > { %15502 = vmatprep.mubr.msk.f32.mxu1 %vm18696_vm1, %v18697_v11 }
  0x95   : > { %15464 = vmatmul.mubr.msk.f32.gmra.mrb[50].mxu0 %vm520_vm0, %v1289_v27  ;;  %v2146_v27 = vld [vmem:[#allocation2 + $0x86] sm:$0xff] }
  0x96   : > { %15503 = vmatmul.mubr.msk.f32.gmra.mrb[50].mxu1 %vm520_vm0, %v1451_v28  ;;  %15466 = vmatprep.mubr.msk.f32.mxu0 %vm18696_vm1, %v18697_v11 }
  0x97   : > { %15505 = vmatprep.mubr.msk.f32.mxu1 %vm18696_vm1, %v18697_v11 }
  0x99   : > { %15467 = vmatmul.mubr.msk.f32.gmra.mrb[52].mxu0 %vm520_vm0, %v1290_v29  ;;  %v2147_v29 = vld [vmem:[#allocation2 + $0x8e] sm:$0xff] }
  0x9a   : > { %15506 = vmatmul.mubr.msk.f32.gmra.mrb[52].mxu1 %vm520_vm0, %v1452_v31  ;;  %15520 = vmatprep.mubr.msk.f32.mxu0 %vm18696_vm1, %v18697_v11 }
  0x9b   : > { %15559 = vmatprep.mubr.msk.f32.mxu1 %vm18696_vm1, %v18697_v11 }
  0x9d   : > { %15521 = vmatmul.mubr.msk.f32.vlgmr.msra.gmra.mrb[54].mxu0 %vm520_vm0, %v1446_v10  ;;  %v2137_v10 = vld [vmem:[%s22702_s1 + $0x20] sm:$0xff] }
  0x9e   : > { %15560 = vmatmul.mubr.msk.f32.vlgmr.msra.gmra.mrb[54].mxu1 %vm520_vm0, %v1768_v37  ;;  %15523 = vmatprep.mubr.msk.f32.mxu0 %vm18696_vm1, %v18697_v11  ;;  %v19651_v37 = vld [vmem:[#allocation2 + $0x7f] sm:$0xff] }
  0x9f   : > { %15562 = vmatprep.mubr.msk.f32.mxu1 %vm18696_vm1, %v18697_v11  ;;  %17608 = vmatpush3.bf16.msra.mxu0 %v19422_v40 }
  0xa0   : > { %17617 = vmatpush3.bf16.msra.mxu1 %v18845_v4  ;;  %17609 = vmatprep.subr.bf16.mxu0 %v18695_v3  ;;  %v1770_v4 = vld [vmem:[#allocation2 + $0x3a] sm:$0xff] }
  0xa1   : > { %15524 = vmatmul.mubr.msk.f32.gmra.mrb[56].mxu0 %vm520_vm0, %v1447_v17  ;;  %17618 = vmatprep.subr.bf16.mxu1 %v18695_v3  ;;  %v17631_v17 = vpack.c.bf16 %v2138_v15, %v2137_v10 }
  0xa2   : > { %15563 = vmatmul.mubr.msk.f32.gmra.mrb[56].mxu1 %vm520_vm0, %v1769_v48  ;;  %15526 = vmatprep.mubr.msk.f32.mxu0 %vm18696_vm1, %v18697_v11  ;;  %v19669_v48 = vld [vmem:[#allocation2 + $0x8f] sm:$0xff] }
  0xa3   : > { %15565 = vmatprep.mubr.msk.f32.mxu1 %vm18696_vm1, %v18697_v11  ;;  %17611 = vmatpush3.bf16.msra.mxu0 %v19439_v49 }
  0xa4   : > { %17620 = vmatpush3.bf16.msra.mxu1 %v18998_v12  ;;  %17612 = vmatprep.subr.bf16.mxu0 %v18695_v3  ;;  %v1772_v12 = vld [vmem:[#allocation2 + $0x4a] sm:$0xff] }
  0xa5   : > { %15527 = vmatmul.mubr.msk.f32.gmra.mrb[58].mxu0 %vm520_vm0, %v1448_v21  ;;  %17621 = vmatprep.subr.bf16.mxu1 %v18695_v3  ;;  %v2143_v21 = vld [vmem:[#allocation2 + $0x6e] sm:$0xff] }
  0xa6   : > { %15566 = vmatmul.mubr.msk.f32.gmra.mrb[58].mxu1 %vm520_vm0, %v1770_v4  ;;  %15529 = vmatprep.mubr.msk.f32.mxu0 %vm18696_vm1, %v18697_v11 }
  0xa7   : > { %15568 = vmatprep.mubr.msk.f32.mxu1 %vm18696_vm1, %v18697_v11  ;;  %17614 = vmatpush3.bf16.msra.mxu0 %v19459_v55 }
  0xa8   : > { %17623 = vmatpush3.bf16.msra.mxu1 %v19023_v18  ;;  %17624 = vmatprep.subr.bf16.mxu0 %v18695_v3  ;;  %v1773_v18 = vld [vmem:[#allocation2 + $0x52] sm:$0xff] }
  0xa9   : > { %15530 = vmatmul.mubr.msk.f32.gmra.mrb[60].mxu0 %vm520_vm0, %v19386_v23  ;;  %17633 = vmatprep.subr.bf16.mxu1 %v18695_v3  ;;  %v1936_v23 = vld [vmem:[#allocation2 + $0x5b] sm:$0xff] }
  0xaa   : > { %15569 = vmatmul.mubr.msk.f32.gmra.mrb[60].mxu1 %vm520_vm0, %v1771_v56  ;;  %15532 = vmatprep.mubr.msk.f32.mxu0 %vm18696_vm1, %v18697_v11 }
  0xab   : > { %15571 = vmatprep.mubr.msk.f32.mxu1 %vm18696_vm1, %v18697_v11 }
  0xad   : > { %15533 = vmatmul.mubr.msk.f32.gmra.mrb[62].mxu0 %vm520_vm0, %v19395_v26  ;;  %v1937_v26 = vld [vmem:[#allocation2 + $0x63] sm:$0xff] }
  0xae   : > { %15572 = vmatmul.mubr.msk.f32.gmra.mrb[62].mxu1 %vm520_vm0, %v1772_v12  ;;  %15535 = vmatprep.mubr.msk.f32.mxu0 %vm18696_vm1, %v18697_v11  ;;  %v2750_v12 = vld [vmem:[#allocation2 + $0x60] sm:$0xff] }
  0xaf   : > { %15574 = vmatprep.mubr.msk.f32.mxu1 %vm18696_vm1, %v18697_v11 }
  0xb1   : > { %15536 = vmatmul.mubr.msk.f32.gmra.mrb[64].mxu0 %vm520_vm0, %v1451_v28  ;;  %v1938_v28 = vld [vmem:[#allocation2 + $0x6b] sm:$0xff] }
  0xb2   : > { %15575 = vmatmul.mubr.msk.f32.gmra.mrb[64].mxu1 %vm520_vm0, %v1773_v18  ;;  %15538 = vmatprep.mubr.msk.f32.mxu0 %vm18696_vm1, %v18697_v11 }
  0xb3   : > { %15577 = vmatprep.mubr.msk.f32.mxu1 %vm18696_vm1, %v18697_v11 }
  0xb5   : > { %15539 = vmatmul.mubr.msk.f32.gmra.mrb[66].mxu0 %vm520_vm0, %v1452_v31  ;;  %v2124_v31 = vld [vmem:[#allocation2 + $0x4d] sm:$0xff] }
  0xb6   : > { %15578 = vmatmul.mubr.msk.f32.gmra.mrb[66].mxu1 %vm520_vm0, %v1774_v57  ;;  %15541 = vmatprep.mubr.msk.f32.mxu0 %vm18696_vm1, %v18697_v11 }
  0xb7   : > { %15580 = vmatprep.mubr.msk.f32.mxu1 %vm18696_vm1, %v18697_v11 }
  0xb9   : > { %15542 = vmatmul.mubr.msk.f32.gmra.mrb[68].mxu0 %vm520_vm0, %v19498_v60 }
  0xba   : > { %15581 = vmatmul.mubr.msk.f32.gmra.mrb[68].mxu1 %vm520_vm0, %v1775_v61  ;;  %15544 = vmatprep.mubr.msk.f32.mxu0 %vm18696_vm1, %v18697_v11 }
  0xbb   : > { %15583 = vmatprep.mubr.msk.f32.mxu1 %vm18696_vm1, %v18697_v11 }
  0xbd   : > { %15545 = vmatmul.mubr.msk.f32.gmra.mrb[70].mxu0 %vm520_vm0, %v19507_v62 }
  0xbe   : > { %15584 = vmatmul.mubr.msk.f32.gmra.mrb[70].mxu1 %vm520_vm0, %v1776_v63  ;;  %15598 = vmatprep.mubr.msk.f32.mxu0 %vm18696_vm1, %v18697_v11 }
  0xbf   : > { %15637 = vmatprep.mubr.msk.f32.mxu1 %vm18696_vm1, %v18697_v11 }
  0xc1   : > { %15599 = vmatmul.mubr.msk.f32.vlgmr.msra.gmra.mrb[72].mxu0 %vm520_vm0, %v1930_v1 }
  0xc2   : > { %15638 = vmatmul.mubr.msk.f32.vlgmr.msra.gmra.mrb[72].mxu1 %vm520_vm0, %v2139_v5  ;;  %15601 = vmatprep.mubr.msk.f32.mxu0 %vm18696_vm1, %v18697_v11 }
  0xc3   : > { %15640 = vmatprep.mubr.msk.f32.mxu1 %vm18696_vm1, %v18697_v11  ;;  %17626 = vmatpush3.bf16.msra.mxu0 %v18861_v8  ;;  %v1932_v8 = vld [vmem:[#allocation2 + $0x3b] sm:$0xff] }
  0xc4   : > { %17635 = vmatpush3.bf16.msra.mxu1 %v19059_v33  ;;  %17627 = vmatprep.subr.bf16.mxu0 %v18695_v3  ;;  %v600_v33 = vld [vmem:[%s19028_s26 + $0xa0] sm:$0xff] }
  0xc5   : > { %15602 = vmatmul.mubr.msk.f32.gmra.mrb[74].mxu0 %vm520_vm0, %v1931_v6  ;;  %17636 = vmatprep.subr.bf16.mxu1 %v18695_v3  ;;  %636 = vst.msk [vmem:[#allocation2 + $0xb8] sm:$0xff] %vm520_vm0, %v600_v33 }
  0xc6   : > { %15641 = vmatmul.mubr.msk.f32.gmra.mrb[74].mxu1 %vm520_vm0, %v2140_v9  ;;  %15604 = vmatprep.mubr.msk.f32.mxu0 %vm18696_vm1, %v18697_v11 }
  0xc7   : > { %15643 = vmatprep.mubr.msk.f32.mxu1 %vm18696_vm1, %v18697_v11  ;;  %17629 = vmatpush3.bf16.msra.mxu0 %v19007_v13  ;;  %v2142_v13 = vld [vmem:[#allocation2 + $0x66] sm:$0xff] }
  0xc8   : > { %17638 = vmatpush3.bf16.msra.mxu1 %v19087_v43  ;;  %17630 = vmatprep.subr.bf16.mxu0 %v18695_v3  ;;  %v1934_v43 = vld [vmem:[#allocation2 + $0x4b] sm:$0xff] }
  0xc9   : > { %15605 = vmatmul.mubr.msk.f32.gmra.mrb[76].mxu0 %vm520_vm0, %v1932_v8  ;;  %17639 = vmatprep.subr.bf16.mxu1 %v18695_v3 }
  0xca   : > { %15644 = vmatmul.mubr.msk.f32.gmra.mrb[76].mxu1 %vm520_vm0, %v2141_v16  ;;  %15607 = vmatprep.mubr.msk.f32.mxu0 %vm18696_vm1, %v18697_v11 }
  0xcb   : > { %15646 = vmatprep.mubr.msk.f32.mxu1 %vm18696_vm1, %v18697_v11  ;;  %17632 = vmatpush3.bf16.msra.mxu0 %v17631_v17 }
  0xcc   : > { %17641 = vmatpush3.bf16.msra.mxu1 %v19115_v51  ;;  %17642 = vmatprep.subr.bf16.mxu0 %v18695_v3  ;;  %v1935_v51 = vld [vmem:[#allocation2 + $0x53] sm:$0xff] }
  0xcd   : > { %15608 = vmatmul.mubr.msk.f32.gmra.mrb[78].mxu0 %vm520_vm0, %v1933_v19  ;;  %17651 = vmatprep.subr.bf16.mxu1 %v18695_v3 }
  0xce   : > { %15647 = vmatmul.mubr.msk.f32.gmra.mrb[78].mxu1 %vm520_vm0, %v2142_v13  ;;  %15610 = vmatprep.mubr.msk.f32.mxu0 %vm18696_vm1, %v18697_v11 }
  0xcf   : > { %15649 = vmatprep.mubr.msk.f32.mxu1 %vm18696_vm1, %v18697_v11 }
  0xd1   : > { %15611 = vmatmul.mubr.msk.f32.gmra.mrb[80].mxu0 %vm520_vm0, %v1934_v43 }
  0xd2   : > { %15650 = vmatmul.mubr.msk.f32.gmra.mrb[80].mxu1 %vm520_vm0, %v2143_v21  ;;  %15613 = vmatprep.mubr.msk.f32.mxu0 %vm18696_vm1, %v18697_v11 }
  0xd3   : > { %15652 = vmatprep.mubr.msk.f32.mxu1 %vm18696_vm1, %v18697_v11 }
  0xd5   : > { %15614 = vmatmul.mubr.msk.f32.gmra.mrb[82].mxu0 %vm520_vm0, %v1935_v51 }
  0xd6   : > { %15653 = vmatmul.mubr.msk.f32.gmra.mrb[82].mxu1 %vm520_vm0, %v2144_v22  ;;  %15616 = vmatprep.mubr.msk.f32.mxu0 %vm18696_vm1, %v18697_v11 }
  0xd7   : > { %15655 = vmatprep.mubr.msk.f32.mxu1 %vm18696_vm1, %v18697_v11 }
  0xd9   : > { %15617 = vmatmul.mubr.msk.f32.gmra.mrb[84].mxu0 %vm520_vm0, %v1936_v23 }
  0xda   : > { %15656 = vmatmul.mubr.msk.f32.gmra.mrb[84].mxu1 %vm520_vm0, %v2145_v24  ;;  %15619 = vmatprep.mubr.msk.f32.mxu0 %vm18696_vm1, %v18697_v11  ;;  %v2755_v24 = vld [vmem:[#allocation2 + $0x88] sm:$0xff] }
  0xdb   : > { %15658 = vmatprep.mubr.msk.f32.mxu1 %vm18696_vm1, %v18697_v11 }
  0xdd   : > { %15620 = vmatmul.mubr.msk.f32.gmra.mrb[86].mxu0 %vm520_vm0, %v1937_v26 }
  0xde   : > { %15659 = vmatmul.mubr.msk.f32.gmra.mrb[86].mxu1 %vm520_vm0, %v2146_v27  ;;  %15622 = vmatprep.mubr.msk.f32.mxu0 %vm18696_vm1, %v18697_v11 }
  0xdf   : > { %15661 = vmatprep.mubr.msk.f32.mxu1 %vm18696_vm1, %v18697_v11 }
  0xe1   : > { %15623 = vmatmul.mubr.msk.f32.gmra.mrb[88].mxu0 %vm520_vm0, %v1938_v28 }
  0xe2   : > { %15662 = vmatmul.mubr.msk.f32.gmra.mrb[88].mxu1 %vm520_vm0, %v2147_v29  ;;  %15676 = vmatprep.mubr.msk.f32.mxu0 %vm18696_vm1, %v18697_v11 }
  0xe3   : > { %15715 = vmatprep.mubr.msk.f32.mxu1 %vm18696_vm1, %v18697_v11 }
  0xe5   : > { %15677 = vmatmul.mubr.msk.f32.vlgmr.msra.gmra.mrb[90].mxu0 %vm520_vm0, %v2124_v31 }
  0xe6   : > { %15716 = vmatmul.mubr.msk.f32.vlgmr.msra.gmra.mrb[90].mxu1 %vm520_vm0, %v19282_v46  ;;  %15679 = vmatprep.mubr.msk.f32.mxu0 %vm18696_vm1, %v18697_v11  ;;  %v2126_v46 = vld [vmem:[#allocation2 + $0x5d] sm:$0xff] }
  0xe7   : > { %15718 = vmatprep.mubr.msk.f32.mxu1 %vm18696_vm1, %v18697_v11  ;;  %17644 = vmatpush3.bf16.msra.mxu0 %v19064_v34  ;;  %v2127_v34 = vld [vmem:[#allocation2 + $0x65] sm:$0xff] }
  0xe8   : > { %17653 = vmatpush3.bf16.msra.mxu1 %v19194_v20  ;;  %17645 = vmatprep.subr.bf16.mxu0 %v18695_v3  ;;  %v2431_v20 = vld [vmem:[#allocation2 + $0x67] sm:$0xff] }
  0xe9   : > { %15680 = vmatmul.mubr.msk.f32.gmra.mrb[92].mxu0 %vm520_vm0, %v2125_v32  ;;  %17654 = vmatprep.subr.bf16.mxu1 %v18695_v3  ;;  %v2756_v32 = vld [vmem:[#allocation2 + $0x90] sm:$0xff] }
  0xea   : > { %15719 = vmatmul.mubr.msk.f32.gmra.mrb[92].mxu1 %vm520_vm0, %v19287_v47  ;;  %15682 = vmatprep.mubr.msk.f32.mxu0 %vm18696_vm1, %v18697_v11  ;;  %v2130_v47 = vld [vmem:[#allocation2 + $0x7d] sm:$0xff] }
  0xeb   : > { %15721 = vmatprep.mubr.msk.f32.mxu1 %vm18696_vm1, %v18697_v11  ;;  %17647 = vmatpush3.bf16.msra.mxu0 %v19093_v44  ;;  %v2128_v44 = vld [vmem:[#allocation2 + $0x6d] sm:$0xff] }
  0xec   : > { %17656 = vmatpush3.bf16.msra.mxu1 %v19220_v30  ;;  %17648 = vmatprep.subr.bf16.mxu0 %v18695_v3  ;;  %v19633_v30 = vld [vmem:[#allocation2 + $0x6f] sm:$0xff] }
  0xed   : > { %15683 = vmatmul.mubr.msk.f32.gmra.mrb[94].mxu0 %vm520_vm0, %v2126_v46  ;;  %17657 = vmatprep.subr.bf16.mxu1 %v18695_v3 }
  0xee   : > { %15722 = vmatmul.mubr.msk.f32.gmra.mrb[94].mxu1 %vm520_vm0, %v2430_v36  ;;  %15685 = vmatprep.mubr.msk.f32.mxu0 %vm18696_vm1, %v18697_v11 }
  0xef   : > { %15724 = vmatprep.mubr.msk.f32.mxu1 %vm18696_vm1, %v18697_v11  ;;  %17650 = vmatpush3.bf16.msra.mxu0 %v19119_v52  ;;  %v2129_v52 = vld [vmem:[#allocation2 + $0x75] sm:$0xff] }
  0xf0   : > { %17659 = vmatpush3.bf16.msra.mxu1 %v19242_v38  ;;  %17660 = vmatprep.subr.bf16.mxu0 %v18695_v3  ;;  %v19642_v38 = vld [vmem:[#allocation2 + $0x77] sm:$0xff] }
  0xf1   : > { %15686 = vmatmul.mubr.msk.f32.gmra.mrb[96].mxu0 %vm520_vm0, %v2127_v34  ;;  %17669 = vmatprep.subr.bf16.mxu1 %v18695_v3 }
  0xf2   : > { %15725 = vmatmul.mubr.msk.f32.gmra.mrb[96].mxu1 %vm520_vm0, %v2431_v20  ;;  %15688 = vmatprep.mubr.msk.f32.mxu0 %vm18696_vm1, %v18697_v11 }
  0xf3   : > { %15727 = vmatprep.mubr.msk.f32.mxu1 %vm18696_vm1, %v18697_v11  ;;  %v777_v50 = vpop.f32.mrb[0].mxu0  ;;  %v914_v53 = vpop.f32.mrb[0].mxu1 }
  0xf4   : > { %v15288_v54 = vpop.f32.mrb[1].mxu0  ;;  %v19672_v4 = vadd.f32 %v914_v53, %v777_v50  ;;  %v15327_v56 = vpop.f32.mrb[1].mxu1 }
  0xf5   : > { %15689 = vmatmul.mubr.msk.f32.gmra.mrb[98].mxu0 %vm520_vm0, %v2128_v44 }
  0xf6   : > { %15728 = vmatmul.mubr.msk.f32.gmra.mrb[98].mxu1 %vm520_vm0, %v19633_v30  ;;  %15691 = vmatprep.mubr.msk.f32.mxu0 %vm18696_vm1, %v18697_v11 }
  0xf7   : > { %15730 = vmatprep.mubr.msk.f32.mxu1 %vm18696_vm1, %v18697_v11  ;;  %v782_v18 = vpop.f32.mrb[2].mxu0  ;;  %v919_v57 = vpop.f32.mrb[2].mxu1 }
  0xf8   : > { %v15291_v61 = vpop.f32.mrb[3].mxu0  ;;  %v19681_v63 = vadd.f32 %v919_v57, %v782_v18  ;;  %v15330_v1 = vpop.f32.mrb[3].mxu1  ;;  %v3072_v57 = vld [vmem:[#allocation2 + $0x71] sm:$0xff] }
  0xf9   : > { %15692 = vmatmul.mubr.msk.f32.gmra.mrb[100].mxu0 %vm520_vm0, %v2129_v52  ;;  %v2757_v52 = vld [vmem:[#allocation2 + $0x98] sm:$0xff]  ;;  %v13550_v1 = vld [vmem:[%s22702_s1 + $0x168] sm:$0xff] }
  0xfa   : > { %15731 = vmatmul.mubr.msk.f32.gmra.mrb[100].mxu1 %vm520_vm0, %v19642_v38  ;;  %15694 = vmatprep.mubr.msk.f32.mxu0 %vm18696_vm1, %v18697_v11 }
  0xfb   : > { %15733 = vmatprep.mubr.msk.f32.mxu1 %vm18696_vm1, %v18697_v11 }
  0xfd   : > { %15695 = vmatmul.mubr.msk.f32.gmra.mrb[102].mxu0 %vm520_vm0, %v2130_v47 }
  0xfe   : > { %15734 = vmatmul.mubr.msk.f32.gmra.mrb[102].mxu1 %vm520_vm0, %v19651_v37  ;;  %15697 = vmatprep.mubr.msk.f32.mxu0 %vm18696_vm1, %v18697_v11 }
  0xff   : > { %15736 = vmatprep.mubr.msk.f32.mxu1 %vm18696_vm1, %v18697_v11 }
 0x101   : > { %15698 = vmatmul.mubr.msk.f32.gmra.mrb[104].mxu0 %vm520_vm0, %v2131_v41 }
 0x102   : > { %15737 = vmatmul.mubr.msk.f32.gmra.mrb[104].mxu1 %vm520_vm0, %v19660_v42  ;;  %15700 = vmatprep.mubr.msk.f32.mxu0 %vm18696_vm1, %v18697_v11 }
 0x103   : > { %15739 = vmatprep.mubr.msk.f32.mxu1 %vm18696_vm1, %v18697_v11 }
 0x105   : > { %15701 = vmatmul.mubr.msk.f32.gmra.mrb[106].mxu0 %vm520_vm0, %v2132_v45  ;;  %v2597_v45 = vld [vmem:[#allocation2 + $0x9f] sm:$0xff] }
 0x106   : > { %15740 = vmatmul.mubr.msk.f32.gmra.mrb[106].mxu1 %vm520_vm0, %v19669_v48  ;;  %15754 = vmatprep.mubr.msk.f32.mxu0 %vm18696_vm1, %v18697_v11 }
 0x107   : > { %15793 = vmatprep.mubr.msk.f32.mxu1 %vm18696_vm1, %v18697_v11 }
 0x109   : > { %15755 = vmatmul.mubr.msk.f32.vlgmr.msra.gmra.mrb[108].mxu0 %vm520_vm0, %v2430_v36 }
 0x10a   : > { %15794 = vmatmul.mubr.msk.f32.vlgmr.msra.gmra.mrb[108].mxu1 %vm520_vm0, %v2750_v12  ;;  %15757 = vmatprep.mubr.msk.f32.mxu0 %vm18696_vm1, %v18697_v11 }
 0x10b   : > { %15796 = vmatprep.mubr.msk.f32.mxu1 %vm18696_vm1, %v18697_v11  ;;  %17662 = vmatpush3.bf16.msra.mxu0 %v19203_v25  ;;  %v2752_v25 = vld [vmem:[#allocation2 + $0x70] sm:$0xff] }
 0x10c   : > { %v787_v5 = vpop.f32.mrb[4].mxu0  ;;  %17671 = vmatpush3.bf16.msra.mxu1 %v19320_v58  ;;  %17663 = vmatprep.subr.bf16.mxu0 %v18695_v3 }
 0x10d   : > { %v924_v6 = vpop.f32.mrb[4].mxu1  ;;  %v15294_v7 = vpop.f32.mrb[5].mxu0  ;;  %15758 = vmatmul.mubr.msk.f32.gmra.mrb[110].mxu0 %vm520_vm0, %v2431_v20  ;;  %17672 = vmatprep.subr.bf16.mxu1 %v18695_v3 }
 0x10e   : > { %v19693_v9 = vadd.f32 %v924_v6, %v787_v5  ;;  %v15333_v10 = vpop.f32.mrb[5].mxu1  ;;  %15797 = vmatmul.mubr.msk.f32.gmra.mrb[110].mxu1 %vm520_vm0, %v2751_v2  ;;  %15760 = vmatprep.mubr.msk.f32.mxu0 %vm18696_vm1, %v18697_v11 }
 0x10f   : > { %15799 = vmatprep.mubr.msk.f32.mxu1 %vm18696_vm1, %v18697_v11  ;;  %17665 = vmatpush3.bf16.msra.mxu0 %v19231_v35  ;;  %v2753_v35 = vld [vmem:[#allocation2 + $0x78] sm:$0xff] }
 0x110   : > { %v792_v58 = vpop.f32.mrb[6].mxu0  ;;  %17674 = vmatpush3.bf16.msra.mxu1 %v19337_v0  ;;  %17666 = vmatprep.subr.bf16.mxu0 %v18695_v3 }
 0x111   : > { %v929_v15 = vpop.f32.mrb[6].mxu1  ;;  %v15297_v8 = vpop.f32.mrb[7].mxu0  ;;  %15761 = vmatmul.mubr.msk.f32.gmra.mrb[112].mxu0 %vm520_vm0, %v19633_v30  ;;  %17675 = vmatprep.subr.bf16.mxu1 %v18695_v3  ;;  %v2596_v30 = vld [vmem:[#allocation2 + $0x97] sm:$0xff] }
 0x112   : > { %v19706_v33 = vadd.f32 %v929_v15, %v792_v58  ;;  %v15336_v16 = vpop.f32.mrb[7].mxu1  ;;  %15800 = vmatmul.mubr.msk.f32.gmra.mrb[112].mxu1 %vm520_vm0, %v2752_v25  ;;  %15763 = vmatprep.mubr.msk.f32.mxu0 %vm18696_vm1, %v18697_v11  ;;  %v3073_v25 = vld [vmem:[#allocation2 + $0x79] sm:$0xff] }
 0x113   : > { %15802 = vmatprep.mubr.msk.f32.mxu1 %vm18696_vm1, %v18697_v11  ;;  %17668 = vmatpush3.bf16.msra.mxu0 %v19247_v39  ;;  %v2754_v39 = vld [vmem:[#allocation2 + $0x80] sm:$0xff]  ;;  %v13552_v15 = vld [vmem:[%s22702_s1 + $0x178] sm:$0xff] }
 0x114   : > { %v797_v0 = vpop.f32.mrb[8].mxu0  ;;  %17677 = vmatpush3.bf16.msra.mxu1 %v19361_v14  ;;  %17678 = vmatprep.subr.bf16.mxu0 %v18695_v3 }
 0x115   : > { %v934_v17 = vpop.f32.mrb[8].mxu1  ;;  %v15300_v19 = vpop.f32.mrb[9].mxu0  ;;  %15764 = vmatmul.mubr.msk.f32.gmra.mrb[114].mxu0 %vm520_vm0, %v19642_v38  ;;  %17687 = vmatprep.subr.bf16.mxu1 %v18695_v3 }
 0x116   : > { %v19719_v13 = vadd.f32 %v934_v17, %v797_v0  ;;  %v15339_v43 = vpop.f32.mrb[9].mxu1  ;;  %15803 = vmatmul.mubr.msk.f32.gmra.mrb[114].mxu1 %vm520_vm0, %v2753_v35  ;;  %15766 = vmatprep.mubr.msk.f32.mxu0 %vm18696_vm1, %v18697_v11  ;;  %v3074_v0 = vld [vmem:[#allocation2 + $0x81] sm:$0xff] }
 0x117   : > { %15805 = vmatprep.mubr.msk.f32.mxu1 %vm18696_vm1, %v18697_v11 }
 0x118   : > { %v802_v14 = vpop.f32.mrb[10].mxu0 }
 0x119   : > { %v939_v21 = vpop.f32.mrb[10].mxu1  ;;  %v15303_v51 = vpop.f32.mrb[11].mxu0  ;;  %15767 = vmatmul.mubr.msk.f32.gmra.mrb[116].mxu0 %vm520_vm0, %v19651_v37 }
 0x11a   : > { %v19728_v22 = vadd.f32 %v939_v21, %v802_v14  ;;  %v15342_v23 = vpop.f32.mrb[11].mxu1  ;;  %15806 = vmatmul.mubr.msk.f32.gmra.mrb[116].mxu1 %vm520_vm0, %v2754_v39  ;;  %15769 = vmatprep.mubr.msk.f32.mxu0 %vm18696_vm1, %v18697_v11 }
 0x11b   : > { %15808 = vmatprep.mubr.msk.f32.mxu1 %vm18696_vm1, %v18697_v11 }
 0x11c   : > { %v807_v26 = vpop.f32.mrb[12].mxu0 }
 0x11d   : > { %v944_v27 = vpop.f32.mrb[12].mxu1  ;;  %v15306_v28 = vpop.f32.mrb[13].mxu0  ;;  %15770 = vmatmul.mubr.msk.f32.gmra.mrb[118].mxu0 %vm520_vm0, %v19660_v42 }
 0x11e   : > { %v19737_v29 = vadd.f32 %v944_v27, %v807_v26  ;;  %v15345_v31 = vpop.f32.mrb[13].mxu1  ;;  %15809 = vmatmul.mubr.msk.f32.gmra.mrb[118].mxu1 %vm520_vm0, %v2755_v24  ;;  %15772 = vmatprep.mubr.msk.f32.mxu0 %vm18696_vm1, %v18697_v11 }
 0x11f   : > { %15811 = vmatprep.mubr.msk.f32.mxu1 %vm18696_vm1, %v18697_v11 }
 0x120   : > { %v812_v46 = vpop.f32.mrb[14].mxu0 }
 0x121   : > { %v949_v36 = vpop.f32.mrb[14].mxu1  ;;  %v15309_v34 = vpop.f32.mrb[15].mxu0  ;;  %15773 = vmatmul.mubr.msk.f32.gmra.mrb[120].mxu0 %vm520_vm0, %v19669_v48  ;;  %v2758_v48 = vld [vmem:[#allocation2 + $0xa0] sm:$0xff] }
 0x122   : > { %v19746_v20 = vadd.f32 %v949_v36, %v812_v46  ;;  %v15348_v44 = vpop.f32.mrb[15].mxu1  ;;  %15812 = vmatmul.mubr.msk.f32.gmra.mrb[120].mxu1 %vm520_vm0, %v2756_v32  ;;  %15775 = vmatprep.mubr.msk.f32.mxu0 %vm18696_vm1, %v18697_v11  ;;  %v3077_v36 = vld [vmem:[#allocation2 + $0x99] sm:$0xff] }
 0x123   : > { %15814 = vmatprep.mubr.msk.f32.mxu1 %vm18696_vm1, %v18697_v11 }
 0x124   : > { %v817_v38 = vpop.f32.mrb[16].mxu0 }
 0x125   : > { %v954_v47 = vpop.f32.mrb[16].mxu1  ;;  %v15312_v37 = vpop.f32.mrb[17].mxu0  ;;  %15776 = vmatmul.mubr.msk.f32.gmra.mrb[122].mxu0 %vm520_vm0, %v2596_v30 }
 0x126   : > { %v19754_v41 = vadd.f32 %v954_v47, %v817_v38  ;;  %v15351_v42 = vpop.f32.mrb[17].mxu1  ;;  %15815 = vmatmul.mubr.msk.f32.gmra.mrb[122].mxu1 %vm520_vm0, %v2757_v52  ;;  %15778 = vmatprep.mubr.msk.f32.mxu0 %vm18696_vm1, %v18697_v11  ;;  %v3078_v47 = vld [vmem:[#allocation2 + $0xa1] sm:$0xff] }
 0x127   : > { %15817 = vmatprep.mubr.msk.f32.mxu1 %vm18696_vm1, %v18697_v11 }
 0x128   : > { %v1067_v50 = vpop.f32.mrb[18].mxu0 }
 0x129   : > { %v1111_v53 = vadd.f32 %v1067_v50, %v19672_v4  ;;  %v15366_v54 = vpop.f32.mrb[19].mxu0  ;;  %v1229_v56 = vpop.f32.mrb[18].mxu1  ;;  %15779 = vmatmul.mubr.msk.f32.gmra.mrb[124].mxu0 %vm520_vm0, %v2597_v45  ;;  %v13549_v4 = vld [vmem:[%s22702_s1 + $0x160] sm:$0xff] }
 0x12a   : > { %v15405_v12 = vpop.f32.mrb[19].mxu1  ;;  %15818 = vmatmul.mubr.msk.f32.gmra.mrb[124].mxu1 %vm520_vm0, %v2758_v48  ;;  %15832 = vmatprep.mubr.msk.f32.mxu0 %vm18696_vm1, %v18697_v11 }
 0x12b   : > { %v19766_v18 = vadd.f32 %v1229_v56, %v1111_v53  ;;  %15871 = vmatprep.mubr.msk.f32.mxu1 %vm18696_vm1, %v18697_v11  ;;  %v3079_v53 = vld [vmem:[#allocation2 + $0xa9] sm:$0xff] }
 0x12c   : > { %v1072_v61 = vpop.f32.mrb[20].mxu0 }
 0x12d   : > { %v1112_v2 = vadd.f32 %v1072_v61, %v19681_v63  ;;  %v15369_v5 = vpop.f32.mrb[21].mxu0  ;;  %v1234_v6 = vpop.f32.mrb[20].mxu1  ;;  %15833 = vmatmul.mubr.msk.f32.vlgmr.msra.gmra.mrb[126].mxu0 %vm520_vm0, %v19498_v60  ;;  %v17682_v63 = vpack.c.bf16 %v13550_v1, %v13549_v4  ;;  %v13551_v60 = vld [vmem:[%s22702_s1 + $0x170] sm:$0xff] }
 0x12e   : > { %v15408_v7 = vpop.f32.mrb[21].mxu1  ;;  %15872 = vmatmul.mubr.msk.f32.vlgmr.msra.gmra.mrb[126].mxu1 %vm520_vm0, %v3072_v57  ;;  %15835 = vmatprep.mubr.msk.f32.mxu0 %vm18696_vm1, %v18697_v11  ;;  %v3080_v4 = vld [vmem:[#allocation2 + $0xb1] sm:$0xff] }
 0x12f   : > { %v19782_v10 = vadd.f32 %v1234_v6, %v1112_v2  ;;  %15874 = vmatprep.mubr.msk.f32.mxu1 %vm18696_vm1, %v18697_v11  ;;  %17680 = vmatpush3.bf16.msra.mxu0 %v19322_v59  ;;  %v3233_v7 = vld [vmem:[#allocation2 + $0x72] sm:$0xff] }
 0x130   : > { %v1077_v58 = vpop.f32.mrb[22].mxu0  ;;  %17689 = vmatpush3.bf16.msra.mxu1 %v19422_v40  ;;  %17681 = vmatprep.subr.bf16.mxu0 %v18695_v3 }
 0x131   : > { %v1113_v8 = vadd.f32 %v1077_v58, %v19693_v9  ;;  %v15372_v16 = vpop.f32.mrb[23].mxu0  ;;  %v1239_v35 = vpop.f32.mrb[22].mxu1  ;;  %15836 = vmatmul.mubr.msk.f32.gmra.mrb[128].mxu0 %vm520_vm0, %v19507_v62  ;;  %17690 = vmatprep.subr.bf16.mxu1 %v18695_v3  ;;  %v17685_v9 = vpack.c.bf16 %v13552_v15, %v13551_v60 }
 0x132   : > { %v15411_v59 = vpop.f32.mrb[23].mxu1  ;;  %15875 = vmatmul.mubr.msk.f32.gmra.mrb[128].mxu1 %vm520_vm0, %v3073_v25  ;;  %15838 = vmatprep.mubr.msk.f32.mxu0 %vm18696_vm1, %v18697_v11  ;;  %v3234_v16 = vld [vmem:[#allocation2 + $0x7a] sm:$0xff] }
 0x133   : > { %v19802_v40 = vadd.f32 %v1239_v35, %v1113_v8  ;;  %15877 = vmatprep.mubr.msk.f32.mxu1 %vm18696_vm1, %v18697_v11  ;;  %17683 = vmatpush3.bf16.msra.mxu0 %v17682_v63  ;;  %v3394_v63 = vld [vmem:[#allocation2 + $0x73] sm:$0xff]  ;;  %v3395_v59 = vld [vmem:[#allocation2 + $0x7b] sm:$0xff] }
 0x134   : > { %v1082_v17 = vpop.f32.mrb[24].mxu0  ;;  %17692 = vmatpush3.bf16.msra.mxu1 %v19439_v49  ;;  %17684 = vmatprep.subr.bf16.mxu0 %v18695_v3  ;;  %v3075_v49 = vld [vmem:[#allocation2 + $0x89] sm:$0xff] }
 0x135   : > { %v1114_v62 = vadd.f32 %v1082_v17, %v19706_v33  ;;  %v15375_v19 = vpop.f32.mrb[25].mxu0  ;;  %v1244_v43 = vpop.f32.mrb[24].mxu1  ;;  %15839 = vmatmul.mubr.msk.f32.gmra.mrb[130].mxu0 %vm520_vm0, %v3072_v57  ;;  %17693 = vmatprep.subr.bf16.mxu1 %v18695_v3 }
 0x136   : > { %v15414_v39 = vpop.f32.mrb[25].mxu1  ;;  %15878 = vmatmul.mubr.msk.f32.gmra.mrb[130].mxu1 %vm520_vm0, %v3074_v0  ;;  %15841 = vmatprep.mubr.msk.f32.mxu0 %vm18696_vm1, %v18697_v11  ;;  %v3235_v19 = vld [vmem:[#allocation2 + $0x82] sm:$0xff] }
 0x137   : > { %v19814_v14 = vadd.f32 %v1244_v43, %v1114_v62  ;;  %15880 = vmatprep.mubr.msk.f32.mxu1 %vm18696_vm1, %v18697_v11  ;;  %17686 = vmatpush3.bf16.msra.mxu0 %v17685_v9  ;;  %v3396_v39 = vld [vmem:[#allocation2 + $0x83] sm:$0xff] }
 0x138   : > { %v1087_v33 = vpop.f32.mrb[26].mxu0  ;;  %17695 = vmatpush3.bf16.msra.mxu1 %v19459_v55  ;;  %17696 = vmatprep.subr.bf16.mxu0 %v18695_v3  ;;  %v3076_v55 = vld [vmem:[#allocation2 + $0x91] sm:$0xff] }
 0x139   : > { %v1115_v21 = vadd.f32 %v1087_v33, %v19719_v13  ;;  %v15378_v51 = vpop.f32.mrb[27].mxu0  ;;  %v1249_v23 = vpop.f32.mrb[26].mxu1  ;;  %15842 = vmatmul.mubr.msk.f32.gmra.mrb[132].mxu0 %vm520_vm0, %v3073_v25  ;;  %17720 = vmatprep.subr.bf16.mxu1 %v18695_v3 }
 0x13a   : > { %v15417_v24 = vpop.f32.mrb[27].mxu1  ;;  %15881 = vmatmul.mubr.msk.f32.gmra.mrb[132].mxu1 %vm520_vm0, %v3075_v49  ;;  %15844 = vmatprep.mubr.msk.f32.mxu0 %vm18696_vm1, %v18697_v11 }
 0x13b   : > { %v19826_v26 = vadd.f32 %v1249_v23, %v1115_v21  ;;  %15883 = vmatprep.mubr.msk.f32.mxu1 %vm18696_vm1, %v18697_v11  ;;  %v3236_v23 = vld [vmem:[#allocation2 + $0x8a] sm:$0xff] }
 0x13c   : > { %v1092_v27 = vpop.f32.mrb[28].mxu0 }
 0x13d   : > { %v1116_v13 = vadd.f32 %v1092_v27, %v19728_v22  ;;  %v15381_v28 = vpop.f32.mrb[29].mxu0  ;;  %v1254_v31 = vpop.f32.mrb[28].mxu1  ;;  %15845 = vmatmul.mubr.msk.f32.gmra.mrb[134].mxu0 %vm520_vm0, %v3074_v0 }
 0x13e   : > { %v15420_v32 = vpop.f32.mrb[29].mxu1  ;;  %15884 = vmatmul.mubr.msk.f32.gmra.mrb[134].mxu1 %vm520_vm0, %v3076_v55  ;;  %15847 = vmatprep.mubr.msk.f32.mxu0 %vm18696_vm1, %v18697_v11 }
 0x13f   : > { %v19835_v46 = vadd.f32 %v1254_v31, %v1116_v13  ;;  %15886 = vmatprep.mubr.msk.f32.mxu1 %vm18696_vm1, %v18697_v11  ;;  %v3237_v32 = vld [vmem:[#allocation2 + $0x92] sm:$0xff] }
 0x140   : > { %v1097_v34 = vpop.f32.mrb[30].mxu0 }
 0x141   : > { %v1117_v44 = vadd.f32 %v1097_v34, %v19737_v29  ;;  %v15384_v22 = vpop.f32.mrb[31].mxu0  ;;  %v1259_v30 = vpop.f32.mrb[30].mxu1  ;;  %15848 = vmatmul.mubr.msk.f32.gmra.mrb[136].mxu0 %vm520_vm0, %v3075_v49  ;;  %v3398_v34 = vld [vmem:[#allocation2 + $0x93] sm:$0xff] }
 0x142   : > { %v15423_v52 = vpop.f32.mrb[31].mxu1  ;;  %15887 = vmatmul.mubr.msk.f32.gmra.mrb[136].mxu1 %vm520_vm0, %v3077_v36  ;;  %15850 = vmatprep.mubr.msk.f32.mxu0 %vm18696_vm1, %v18697_v11 }
 0x143   : > { %v19844_v38 = vadd.f32 %v1259_v30, %v1117_v44  ;;  %15889 = vmatprep.mubr.msk.f32.mxu1 %vm18696_vm1, %v18697_v11 }
 0x144   : > { %v1102_v37 = vpop.f32.mrb[32].mxu0 }
 0x145   : > { %v1118_v42 = vadd.f32 %v1102_v37, %v19746_v20  ;;  %v15387_v29 = vpop.f32.mrb[33].mxu0  ;;  %v1264_v45 = vpop.f32.mrb[32].mxu1  ;;  %15851 = vmatmul.mubr.msk.f32.gmra.mrb[138].mxu0 %vm520_vm0, %v3076_v55  ;;  %v3397_v55 = vld [vmem:[#allocation2 + $0x8b] sm:$0xff] }
 0x146   : > { %v15426_v48 = vpop.f32.mrb[33].mxu1  ;;  %15890 = vmatmul.mubr.msk.f32.gmra.mrb[138].mxu1 %vm520_vm0, %v3078_v47  ;;  %15853 = vmatprep.mubr.msk.f32.mxu0 %vm18696_vm1, %v18697_v11 }
 0x147   : > { %v19853_v50 = vadd.f32 %v1264_v45, %v1118_v42  ;;  %15892 = vmatprep.mubr.msk.f32.mxu1 %vm18696_vm1, %v18697_v11  ;;  %v3399_v42 = vld [vmem:[#allocation2 + $0x9b] sm:$0xff] }
 0x148   : > { %v1107_v54 = vpop.f32.mrb[34].mxu0 }
 0x149   : > { %v1119_v56 = vadd.f32 %v1107_v54, %v19754_v41  ;;  %v15390_v20 = vpop.f32.mrb[35].mxu0  ;;  %v1269_v12 = vpop.f32.mrb[34].mxu1  ;;  %15854 = vmatmul.mubr.msk.f32.gmra.mrb[140].mxu0 %vm520_vm0, %v3077_v36  ;;  %v3239_v54 = vld [vmem:[#allocation2 + $0xa2] sm:$0xff] }
 0x14a   : > { %v15429_v57 = vpop.f32.mrb[35].mxu1  ;;  %15893 = vmatmul.mubr.msk.f32.gmra.mrb[140].mxu1 %vm520_vm0, %v3079_v53  ;;  %15856 = vmatprep.mubr.msk.f32.mxu0 %vm18696_vm1, %v18697_v11  ;;  %v3400_v20 = vld [vmem:[#allocation2 + $0xa3] sm:$0xff] }
 0x14b   : > { %v19862_v61 = vadd.f32 %v1269_v12, %v1119_v56  ;;  %15895 = vmatprep.mubr.msk.f32.mxu1 %vm18696_vm1, %v18697_v11 }
 0x14c   : > { %v1391_v1 = vpop.f32.mrb[36].mxu0 }
 0x14d   : > { %v1435_v2 = vadd.f32 %v1391_v1, %v19766_v18  ;;  %v15444_v41 = vpop.f32.mrb[37].mxu0  ;;  %v1553_v5 = vpop.f32.mrb[36].mxu1  ;;  %15857 = vmatmul.mubr.msk.f32.gmra.mrb[142].mxu0 %vm520_vm0, %v3078_v47  ;;  %v3238_v47 = vld [vmem:[#allocation2 + $0x9a] sm:$0xff] }
 0x14e   : > { %v15483_v6 = vpop.f32.mrb[37].mxu1  ;;  %15896 = vmatmul.mubr.msk.f32.gmra.mrb[142].mxu1 %vm520_vm0, %v3080_v4  ;;  %15910 = vmatprep.mubr.msk.f32.mxu0 %vm18696_vm1, %v18697_v11 }
 0x14f   : > { %v19871_v25 = vadd.f32 %v1553_v5, %v1435_v2  ;;  %15949 = vmatprep.mubr.msk.f32.mxu1 %vm18696_vm1, %v18697_v11  ;;  %v3240_v2 = vld [vmem:[#allocation2 + $0xaa] sm:$0xff] }
 0x150   : > { %v1396_v58 = vpop.f32.mrb[38].mxu0  ;;  %v3401_v5 = vld [vmem:[#allocation2 + $0xab] sm:$0xff] }
 0x151   : > { %v1436_v18 = vadd.f32 %v1396_v58, %v19782_v10  ;;  %v15447_v60 = vpop.f32.mrb[39].mxu0  ;;  %v1558_v15 = vpop.f32.mrb[38].mxu1  ;;  %15911 = vmatmul.mubr.msk.f32.vlgmr.msra.gmra.mrb[144].mxu0 %vm520_vm0, %v3233_v7 }
 0x152   : > { %v15486_v8 = vpop.f32.mrb[39].mxu1  ;;  %15950 = vmatmul.mubr.msk.f32.vlgmr.msra.gmra.mrb[144].mxu1 %vm520_vm0, %v3394_v63  ;;  %15913 = vmatprep.mubr.msk.f32.mxu0 %vm18696_vm1, %v18697_v11 }
 0x153   : > { %v19880_v35 = vadd.f32 %v1558_v15, %v1436_v18  ;;  %15952 = vmatprep.mubr.msk.f32.mxu1 %vm18696_vm1, %v18697_v11  ;;  %v3241_v18 = vld [vmem:[#allocation2 + $0xb2] sm:$0xff] }
 0x154   : > { %v1401_v0 = vpop.f32.mrb[40].mxu0  ;;  %v3402_v15 = vld [vmem:[#allocation2 + $0xb3] sm:$0xff] }
 0x155   : > { %v1437_v10 = vadd.f32 %v1401_v0, %v19802_v40  ;;  %v15450_v9 = vpop.f32.mrb[41].mxu0  ;;  %v1563_v17 = vpop.f32.mrb[40].mxu1  ;;  %15914 = vmatmul.mubr.msk.f32.gmra.mrb[146].mxu0 %vm520_vm0, %v3234_v16 }
 0x156   : > { %v15489_v62 = vpop.f32.mrb[41].mxu1  ;;  %15953 = vmatmul.mubr.msk.f32.gmra.mrb[146].mxu1 %vm520_vm0, %v3395_v59  ;;  %15916 = vmatprep.mubr.msk.f32.mxu0 %vm18696_vm1, %v18697_v11 }
 0x157   : > { %v19889_v43 = vadd.f32 %v1563_v17, %v1437_v10  ;;  %15955 = vmatprep.mubr.msk.f32.mxu1 %vm18696_vm1, %v18697_v11 }
 0x158   : > { %v1406_v49 = vpop.f32.mrb[42].mxu0 }
 0x159   : > { %v1438_v40 = vadd.f32 %v1406_v49, %v19814_v14  ;;  %v15453_v33 = vpop.f32.mrb[43].mxu0  ;;  %v1568_v21 = vpop.f32.mrb[42].mxu1  ;;  %15917 = vmatmul.mubr.msk.f32.gmra.mrb[148].mxu0 %vm520_vm0, %v3235_v19 }
 0x15a   : > { %v15492_v51 = vpop.f32.mrb[43].mxu1  ;;  %15956 = vmatmul.mubr.msk.f32.gmra.mrb[148].mxu1 %vm520_vm0, %v3396_v39  ;;  %15919 = vmatprep.mubr.msk.f32.mxu0 %vm18696_vm1, %v18697_v11 }
 0x15b   : > { %v19898_v24 = vadd.f32 %v1568_v21, %v1438_v40  ;;  %15958 = vmatprep.mubr.msk.f32.mxu1 %vm18696_vm1, %v18697_v11 }
 0x15c   : > { %v1411_v27 = vpop.f32.mrb[44].mxu0 }
 0x15d   : > { %v1439_v14 = vadd.f32 %v1411_v27, %v19826_v26  ;;  %v15456_v13 = vpop.f32.mrb[45].mxu0  ;;  %v1573_v28 = vpop.f32.mrb[44].mxu1  ;;  %15920 = vmatmul.mubr.msk.f32.gmra.mrb[150].mxu0 %vm520_vm0, %v3236_v23 }
 0x15e   : > { %v15495_v31 = vpop.f32.mrb[45].mxu1  ;;  %15959 = vmatmul.mubr.msk.f32.gmra.mrb[150].mxu1 %vm520_vm0, %v3397_v55  ;;  %15922 = vmatprep.mubr.msk.f32.mxu0 %vm18696_vm1, %v18697_v11 }
 0x15f   : > { %v19907_v36 = vadd.f32 %v1573_v28, %v1439_v14  ;;  %15961 = vmatprep.mubr.msk.f32.mxu1 %vm18696_vm1, %v18697_v11 }
 0x160   : > { %v1416_v44 = vpop.f32.mrb[46].mxu0 }
 0x161   : > { %v1440_v26 = vadd.f32 %v1416_v44, %v19835_v46  ;;  %v15459_v22 = vpop.f32.mrb[47].mxu0  ;;  %v1578_v30 = vpop.f32.mrb[46].mxu1  ;;  %15923 = vmatmul.mubr.msk.f32.gmra.mrb[152].mxu0 %vm520_vm0, %v3237_v32 }
 0x162   : > { %v15498_v52 = vpop.f32.mrb[47].mxu1  ;;  %15962 = vmatmul.mubr.msk.f32.gmra.mrb[152].mxu1 %vm520_vm0, %v3398_v34  ;;  %15925 = vmatprep.mubr.msk.f32.mxu0 %vm18696_vm1, %v18697_v11 }
 0x163   : > { %v19916_v37 = vadd.f32 %v1578_v30, %v1440_v26  ;;  %15964 = vmatprep.mubr.msk.f32.mxu1 %vm18696_vm1, %v18697_v11 }
 0x164   : > { %v1421_v29 = vpop.f32.mrb[48].mxu0 }
 0x165   : > { %v1441_v46 = vadd.f32 %v1421_v29, %v19844_v38  ;;  %v15462_v45 = vpop.f32.mrb[49].mxu0  ;;  %v1583_v48 = vpop.f32.mrb[48].mxu1  ;;  %15926 = vmatmul.mubr.msk.f32.gmra.mrb[154].mxu0 %vm520_vm0, %v3238_v47 }
 0x166   : > { %v15501_v53 = vpop.f32.mrb[49].mxu1  ;;  %15965 = vmatmul.mubr.msk.f32.gmra.mrb[154].mxu1 %vm520_vm0, %v3399_v42  ;;  %15928 = vmatprep.mubr.msk.f32.mxu0 %vm18696_vm1, %v18697_v11 }
 0x167   : > { %v19925_v56 = vadd.f32 %v1583_v48, %v1441_v46  ;;  %15967 = vmatprep.mubr.msk.f32.mxu1 %vm18696_vm1, %v18697_v11 }
 0x168   : > { %v1426_v12 = vpop.f32.mrb[50].mxu0 }
 0x169   : > { %v1442_v38 = vadd.f32 %v1426_v12, %v19853_v50  ;;  %v15465_v57 = vpop.f32.mrb[51].mxu0  ;;  %v1588_v4 = vpop.f32.mrb[50].mxu1  ;;  %15929 = vmatmul.mubr.msk.f32.gmra.mrb[156].mxu0 %vm520_vm0, %v3239_v54 }
 0x16a   : > { %v15504_v1 = vpop.f32.mrb[51].mxu1  ;;  %15968 = vmatmul.mubr.msk.f32.gmra.mrb[156].mxu1 %vm520_vm0, %v3400_v20  ;;  %15931 = vmatprep.mubr.msk.f32.mxu0 %vm18696_vm1, %v18697_v11 }
 0x16b   : > { %v1604_v41 = vadd.f32 %v1588_v4, %v1442_v38  ;;  %15970 = vmatprep.mubr.msk.f32.mxu1 %vm18696_vm1, %v18697_v11 }
 0x16c   : > { %v1431_v6 = vpop.f32.mrb[52].mxu0 }
 0x16d   : > { %v1443_v7 = vadd.f32 %v1431_v6, %v19862_v61  ;;  %v15468_v50 = vpop.f32.mrb[53].mxu0  ;;  %v1593_v63 = vpop.f32.mrb[52].mxu1  ;;  %15932 = vmatmul.mubr.msk.f32.gmra.mrb[158].mxu0 %vm520_vm0, %v3240_v2 }
 0x16e   : > { %v15507_v58 = vpop.f32.mrb[53].mxu1  ;;  %15971 = vmatmul.mubr.msk.f32.gmra.mrb[158].mxu1 %vm520_vm0, %v3401_v5  ;;  %15934 = vmatprep.mubr.msk.f32.mxu0 %vm18696_vm1, %v18697_v11  ;;  %v19969_v50 = vld [vmem:[%s22703_s2] ss:$0 sm:$0xff] }
 0x16f   : > { %v1605_v60 = vadd.f32 %v1593_v63, %v1443_v7  ;;  %15973 = vmatprep.mubr.msk.f32.mxu1 %vm18696_vm1, %v18697_v11 }
 0x170   : > { %v1715_v8 = vpop.f32.mrb[54].mxu0 }
 0x171   : > { %v1759_v16 = vadd.f32 %v1715_v8, %v19871_v25  ;;  %v15522_v61 = vpop.f32.mrb[55].mxu0  ;;  %v1877_v59 = vpop.f32.mrb[54].mxu1  ;;  %15935 = vmatmul.mubr.msk.f32.gmra.mrb[160].mxu0 %vm520_vm0, %v3241_v18 }
 0x172   : > { %v15561_v0 = vpop.f32.mrb[55].mxu1  ;;  %15974 = vmatmul.mubr.msk.f32.gmra.mrb[160].mxu1 %vm520_vm0, %v3402_v15  ;;  %15994 = vmatprep.mubr.msk.f32.mxu0 %vm18696_vm1, %v18697_v11 }
 0x173   : > { %v1921_v10 = vadd.f32 %v1877_v59, %v1759_v16  ;;  %16036 = vmatprep.mubr.msk.f32.mxu1 %vm18696_vm1, %v18697_v11 }
 0x174   : > { %v1720_v9 = vpop.f32.mrb[56].mxu0 }
 0x175   : > { %v1760_v17 = vadd.f32 %v1720_v9, %v19880_v35  ;;  %v15525_v62 = vpop.f32.mrb[57].mxu0  ;;  %v1882_v19 = vpop.f32.mrb[56].mxu1 }
 0x176   : > { %v15564_v25 = vpop.f32.mrb[57].mxu1 }
 0x177   : > { %v1922_v39 = vadd.f32 %v1882_v19, %v1760_v17 }
 0x178   : > { %v1725_v49 = vpop.f32.mrb[58].mxu0 }
 0x179   : > { %v1761_v40 = vadd.f32 %v1725_v49, %v19889_v43  ;;  %v15528_v33 = vpop.f32.mrb[59].mxu0  ;;  %v1887_v21 = vpop.f32.mrb[58].mxu1 }
 0x17a   : > { %v15567_v51 = vpop.f32.mrb[59].mxu1 }
 0x17b   : > { %v1923_v23 = vadd.f32 %v1887_v21, %v1761_v40 }
 0x17c   : > { %v1730_v55 = vpop.f32.mrb[60].mxu0 }
 0x17d   : > { %v1762_v27 = vadd.f32 %v1730_v55, %v19898_v24  ;;  %v15531_v14 = vpop.f32.mrb[61].mxu0  ;;  %v1892_v13 = vpop.f32.mrb[60].mxu1 }
 0x17e   : > { %v15570_v28 = vpop.f32.mrb[61].mxu1 }
 0x17f   : > { %v1924_v31 = vadd.f32 %v1892_v13, %v1762_v27 }
 0x180   : > { %v1735_v32 = vpop.f32.mrb[62].mxu0 }
 0x181   : > { %v1763_v35 = vadd.f32 %v1735_v32, %v19907_v36  ;;  %v15534_v34 = vpop.f32.mrb[63].mxu0  ;;  %v1897_v44 = vpop.f32.mrb[62].mxu1 }
 0x182   : > { %v15573_v26 = vpop.f32.mrb[63].mxu1 }
 0x183   : > { %v19954_v22 = vadd.f32 %v1897_v44, %v1763_v35 }
 0x184   : > { %v1740_v43 = vpop.f32.mrb[64].mxu0 }
 0x185   : > { %v1764_v30 = vadd.f32 %v1740_v43, %v19916_v37  ;;  %v15537_v52 = vpop.f32.mrb[65].mxu0  ;;  %v1902_v47 = vpop.f32.mrb[64].mxu1 }
 0x186   : > { %v15576_v42 = vpop.f32.mrb[65].mxu1 }
 0x187   : > { %v19957_v29 = vadd.f32 %v1902_v47, %v1764_v30 }
 0x188   : > { %v1745_v24 = vpop.f32.mrb[66].mxu0 }
 0x189   : > { %v1765_v46 = vadd.f32 %v1745_v24, %v19925_v56  ;;  %v15540_v45 = vpop.f32.mrb[67].mxu0  ;;  %v1907_v48 = vpop.f32.mrb[66].mxu1 }
 0x18a   : > { %v15579_v53 = vpop.f32.mrb[67].mxu1 }
 0x18b   : > { %v19960_v36 = vadd.f32 %v1907_v48, %v1765_v46 }
 0x18c   : > { %v1750_v54 = vpop.f32.mrb[68].mxu0 }
 0x18d   : > { %v1766_v20 = vadd.f32 %v1750_v54, %v1604_v41  ;;  %v15543_v12 = vpop.f32.mrb[69].mxu0  ;;  %v1912_v38 = vpop.f32.mrb[68].mxu1 }
 0x18e   : > { %v15582_v57 = vpop.f32.mrb[69].mxu1 }
 0x18f   : > { %v19962_v4 = vadd.f32 %v1912_v38, %v1766_v20 }
 0x190   : > { %v1755_v37 = vpop.f32.mrb[70].mxu0 }
 0x191   : > { %v1767_v1 = vadd.f32 %v1755_v37, %v1605_v60  ;;  %v15546_v2 = vpop.f32.mrb[71].mxu0  ;;  %v1917_v5 = vpop.f32.mrb[70].mxu1 }
 0x192   : > { %v15585_v6 = vpop.f32.mrb[71].mxu1 }
 0x193   : > { %v19964_v7 = vadd.f32 %v1917_v5, %v1767_v1 }
 0x194   : > { %v2039_v56 = vpop.f32.mrb[72].mxu0 }
 0x195   : > { %v2083_v63 = vadd.f32 %v2039_v56, %v1921_v10  ;;  %v15600_v41 = vpop.f32.mrb[73].mxu0  ;;  %v19971_v58 = vpop.f32.mrb[72].mxu1 }
 0x196   : > { %v15639_v18 = vpop.f32.mrb[73].mxu1 }
 0x197   : > { %v19974_v15 = vadd.f32 %v19969_v50, %v2083_v63 }
 0x198   : > { %v2044_v60 = vpop.f32.mrb[74].mxu0 }
 0x199   : > { %2106 = vst.msk [vmem:[#allocation3] sm:$0xff] %vm520_vm0, %v19974_v15  ;;  %v2084_v8 = vadd.f32 %v2044_v60, %v1922_v39  ;;  %v15603_v16 = vpop.f32.mrb[75].mxu0  ;;  %v19978_v61 = vpop.f32.mrb[74].mxu1  ;;  %v19991_v19 = vmul.f32 %v19974_v15, %v19974_v15 }
 0x19a   : > { %v15642_v59 = vpop.f32.mrb[75].mxu1 }
 0x19b   : > { %v19981_v0 = vadd.f32 %v19969_v50, %v2084_v8 }
 0x19c   : > { %v2049_v10 = vpop.f32.mrb[76].mxu0 }
 0x19d   : > { %2107 = vst.msk [vmem:[#allocation3 + $0x8] sm:$0xff] %vm520_vm0, %v19981_v0  ;;  %v15606_v9 = vpop.f32.mrb[77].mxu0  ;;  %v19985_v17 = vpop.f32.mrb[76].mxu1  ;;  %v17709_v62 = vpack.c.bf16 %v19981_v0, %v19974_v15  ;;  %v19995_v25 = vmul.f32 %v19981_v0, %v19981_v0  ;;  %v2085_v39 = vadd.f32 %v2049_v10, %v1923_v23  ;;  %v13582_v0 = vld [vmem:[%s22702_s1 + $0x30] sm:$0xff] }
 0x19e   : > { %v15645_v49 = vpop.f32.mrb[77].mxu1 }
 0x19f   : > { %v17733_v40 = vpack.c.bf16 %v19995_v25, %v19991_v19  ;;  %v20000_v33 = vadd.f32 %v19969_v50, %v2085_v39  ;;  %v3880_v19 = vld [vmem:[%s22702_s1] sm:$0xff]  ;;  %v3881_v25 = vld [vmem:[%s22702_s1 + $0x8] sm:$0xff] }
 0x1a0   : > { %v2054_v21 = vpop.f32.mrb[78].mxu0 }
 0x1a1   : > { %v15609_v51 = vpop.f32.mrb[79].mxu0  ;;  %v20002_v55 = vpop.f32.mrb[78].mxu1  ;;  %v2086_v27 = vadd.f32 %v2054_v21, %v1924_v31  ;;  %2108 = vst.msk [vmem:[#allocation3 + $0x10] sm:$0xff] %vm520_vm0, %v20000_v33  ;;  %v20011_v35 = vmul.f32 %v20000_v33, %v20000_v33 }
 0x1a2   : > { %v15648_v14 = vpop.f32.mrb[79].mxu1 }
 0x1a3   : > { %v20007_v13 = vadd.f32 %v19969_v50, %v2086_v27 }
 0x1a4   : > { %v7392_v23 = vld [vmem:[#allocation3] ss:$2 sm:$0xff]  ;;  %v7428_v28 = vld [vmem:[#allocation3 + $0x1] ss:$2 sm:$0xff]  ;;  %v2059_v32 = vpop.f32.mrb[80].mxu0 }
 0x1a5   : > { %v7463_v34 = vmax.f32 %v7392_v23, %v7428_v28  ;;  %v15612_v44 = vpop.f32.mrb[81].mxu0  ;;  %v20013_v26 = vpop.f32.mrb[80].mxu1  ;;  %2109 = vst.msk [vmem:[#allocation3 + $0x18] sm:$0xff] %vm520_vm0, %v20007_v13  ;;  %v17712_v31 = vpack.c.bf16 %v20007_v13, %v20000_v33  ;;  %v20021_v43 = vmul.f32 %v20007_v13, %v20007_v13  ;;  %v2087_v30 = vadd.f32 %v2059_v32, %v19954_v22  ;;  %v13584_v33 = vld [vmem:[%s22702_s1 + $0x40] sm:$0xff]  ;;  %v13585_v13 = vld [vmem:[%s22702_s1 + $0x48] sm:$0xff] }
 0x1a6   : > { %v15651_v52 = vpop.f32.mrb[81].mxu1 }
 0x1a7   : > { %7481 = vst.msk [vmem:[#allocation4] sm:$0xff] %vm520_vm0, %v7463_v34  ;;  %v17736_v47 = vpack.c.bf16 %v20021_v43, %v20011_v35  ;;  %v20028_v42 = vadd.f32 %v19969_v50, %v2087_v30  ;;  %v3882_v43 = vld [vmem:[%s22702_s1 + $0x10] sm:$0xff] }
 0x1a8   : > { %v2064_v24 = vpop.f32.mrb[82].mxu0 }
 0x1a9   : > { %v15615_v46 = vpop.f32.mrb[83].mxu0  ;;  %v20030_v45 = vpop.f32.mrb[82].mxu1  ;;  %v2088_v48 = vadd.f32 %v2064_v24, %v19957_v29  ;;  %2110 = vst.msk [vmem:[#allocation3 + $0x20] sm:$0xff] %vm520_vm0, %v20028_v42  ;;  %v20040_v38 = vmul.f32 %v20028_v42, %v20028_v42 }
 0x1aa   : > { %v15654_v53 = vpop.f32.mrb[83].mxu1 }
 0x1ab   : > { %v20036_v22 = vadd.f32 %v19969_v50, %v2088_v48 }
 0x1ac   : > { %v2069_v54 = vpop.f32.mrb[84].mxu0  ;;  %v7394_v20 = vld [vmem:[#allocation3 + $0x10] ss:$2 sm:$0xff]  ;;  %v7430_v12 = vld [vmem:[#allocation3 + $0x11] ss:$2 sm:$0xff] }
 0x1ad   : > { %v15618_v57 = vpop.f32.mrb[85].mxu0  ;;  %v20042_v37 = vpop.f32.mrb[84].mxu1  ;;  %v7464_v1 = vmax.f32 %v7394_v20, %v7430_v12  ;;  %2111 = vst.msk [vmem:[#allocation3 + $0x28] sm:$0xff] %vm520_vm0, %v20036_v22  ;;  %v17715_v29 = vpack.c.bf16 %v20036_v22, %v20028_v42  ;;  %v20050_v2 = vmul.f32 %v20036_v22, %v20036_v22  ;;  %v2089_v5 = vadd.f32 %v2069_v54, %v19960_v36  ;;  %v13586_v22 = vld [vmem:[%s22702_s1 + $0x50] sm:$0xff] }
 0x1ae   : > { %v15657_v6 = vpop.f32.mrb[85].mxu1  ;;  %v17748_v42 = vpack.c.bf16 %v13585_v13, %v13584_v33  ;;  %v13653_v33 = vld [vmem:[%s22702_s1 + $0x100] sm:$0xff]  ;;  %v13654_v13 = vld [vmem:[%s22702_s1 + $0x108] sm:$0xff] }
 0x1af   : > { %7482 = vst.msk [vmem:[#allocation4 + $0x8] sm:$0xff] %vm520_vm0, %v7464_v1  ;;  %v17739_v56 = vpack.c.bf16 %v20050_v2, %v20040_v38  ;;  %v20057_v63 = vadd.f32 %v19969_v50, %v2089_v5  ;;  %v13587_v38 = vld [vmem:[%s22702_s1 + $0x58] sm:$0xff]  ;;  %v3884_v2 = vld [vmem:[%s22702_s1 + $0x20] sm:$0xff] }
 0x1b0   : > { %v2074_v41 = vpop.f32.mrb[86].mxu0 }
 0x1b1   : > { %v2090_v18 = vadd.f32 %v2074_v41, %v19962_v4  ;;  %v15621_v60 = vpop.f32.mrb[87].mxu0  ;;  %v20060_v8 = vpop.f32.mrb[86].mxu1  ;;  %2112 = vst.msk [vmem:[#allocation3 + $0x30] sm:$0xff] %vm520_vm0, %v20057_v63  ;;  %v20069_v39 = vmul.f32 %v20057_v63, %v20057_v63 }
 0x1b2   : > { %v15660_v16 = vpop.f32.mrb[87].mxu1 }
 0x1b3   : > { %v20065_v36 = vadd.f32 %v19969_v50, %v2090_v18 }
 0x1b4   : > { %v2079_v59 = vpop.f32.mrb[88].mxu0  ;;  %v7396_v10 = vld [vmem:[#allocation3 + $0x20] ss:$2 sm:$0xff]  ;;  %v7432_v9 = vld [vmem:[#allocation3 + $0x21] ss:$2 sm:$0xff] }
 0x1b5   : > { %2113 = vst.msk [vmem:[#allocation3 + $0x38] sm:$0xff] %vm520_vm0, %v20065_v36  ;;  %v2091_v4 = vadd.f32 %v2079_v59, %v19964_v7  ;;  %v15624_v49 = vpop.f32.mrb[89].mxu0  ;;  %v2287_v21 = vpop.f32.mrb[88].mxu1  ;;  %v7465_v51 = vmax.f32 %v7396_v10, %v7432_v9  ;;  %v17718_v27 = vpack.c.bf16 %v20065_v36, %v20057_v63  ;;  %v20078_v14 = vmul.f32 %v20065_v36, %v20065_v36  ;;  %v13606_v36 = vld [vmem:[%s22702_s1 + $0x60] sm:$0xff] }
 0x1b6   : > { %v15663_v23 = vpop.f32.mrb[89].mxu1  ;;  %v17751_v63 = vpack.c.bf16 %v13587_v38, %v13586_v22  ;;  %v17793_v22 = vpack.c.bf16 %v13654_v13, %v13653_v33  ;;  %v13655_v38 = vld [vmem:[%s22702_s1 + $0x110] sm:$0xff]  ;;  %v13700_v33 = vld [vmem:[%s22702_s1 + $0x1a0] sm:$0xff]  ;;  %v13701_v13 = vld [vmem:[%s22702_s1 + $0x1a8] sm:$0xff] }
 0x1b7   : > { %v20081_v28 = vadd.f32 %v19969_v50, %v2091_v4  ;;  %7483 = vst.msk [vmem:[#allocation4 + $0x10] sm:$0xff] %vm520_vm0, %v7465_v51  ;;  %v17742_v32 = vpack.c.bf16 %v20078_v14, %v20069_v39  ;;  %v13607_v39 = vld [vmem:[%s22702_s1 + $0x68] sm:$0xff]  ;;  %v13621_v14 = vld [vmem:[%s22702_s1 + $0x90] sm:$0xff] }
 0x1b8   : > { %v2384_v7 = vpop.f32.mrb[90].mxu0 }
 0x1b9   : > { %2114 = vst.msk [vmem:[#allocation3 + $0x40] sm:$0xff] %vm520_vm0, %v20081_v28  ;;  %v2385_v34 = vadd.f32 %v2384_v7, %v19971_v58  ;;  %v15678_v44 = vpop.f32.mrb[91].mxu0  ;;  %v2536_v30 = vpop.f32.mrb[90].mxu1  ;;  %v2123_v35 = vmul.f32 %v20081_v28, %v20081_v28 }
 0x1ba   : > { %v15717_v52 = vpop.f32.mrb[91].mxu1 }
 0x1bb   : > { %v2580_v24 = vadd.f32 %v2536_v30, %v2385_v34 }
 0x1bc   : > { %v2389_v46 = vpop.f32.mrb[92].mxu0  ;;  %v7398_v48 = vld [vmem:[#allocation3 + $0x30] ss:$2 sm:$0xff]  ;;  %v7434_v53 = vld [vmem:[#allocation3 + $0x31] ss:$2 sm:$0xff] }
 0x1bd   : > { %v2390_v54 = vadd.f32 %v2389_v46, %v19978_v61  ;;  %v15681_v20 = vpop.f32.mrb[93].mxu0  ;;  %v2541_v12 = vpop.f32.mrb[92].mxu1  ;;  %v7466_v57 = vmax.f32 %v7398_v48, %v7434_v53 }
 0x1be   : > { %v15720_v1 = vpop.f32.mrb[93].mxu1 }
 0x1bf   : > { %v2581_v5 = vadd.f32 %v2541_v12, %v2390_v54  ;;  %7484 = vst.msk [vmem:[#allocation4 + $0x18] sm:$0xff] %vm520_vm0, %v7466_v57 }
 0x1c0   : > { %v2394_v6 = vpop.f32.mrb[94].mxu0 }
 0x1c1   : > { %v2395_v41 = vadd.f32 %v2394_v6, %v19985_v17  ;;  %v15684_v58 = vpop.f32.mrb[95].mxu0  ;;  %v2546_v18 = vpop.f32.mrb[94].mxu1 }
 0x1c2   : > { %v15723_v60 = vpop.f32.mrb[95].mxu1 }
 0x1c3   : > { %v2582_v16 = vadd.f32 %v2546_v18, %v2395_v41 }
 0x1c4   : > { %v2399_v59 = vpop.f32.mrb[96].mxu0 }
 0x1c5   : > { %v2400_v10 = vadd.f32 %v2399_v59, %v20002_v55  ;;  %v15687_v9 = vpop.f32.mrb[97].mxu0  ;;  %v2551_v4 = vpop.f32.mrb[96].mxu1 }
 0x1c6   : > { %v15726_v61 = vpop.f32.mrb[97].mxu1 }
 0x1c7   : > { %v2583_v49 = vadd.f32 %v2551_v4, %v2400_v10 }
 0x1c8   : > { %v2404_v51 = vpop.f32.mrb[98].mxu0 }
 0x1c9   : > { %v2405_v23 = vadd.f32 %v2404_v51, %v20013_v26  ;;  %v15690_v7 = vpop.f32.mrb[99].mxu0  ;;  %v2556_v34 = vpop.f32.mrb[98].mxu1 }
 0x1ca   : > { %v15729_v44 = vpop.f32.mrb[99].mxu1 }
 0x1cb   : > { %v2584_v30 = vadd.f32 %v2556_v34, %v2405_v23 }
 0x1cc   : > { %v2409_v52 = vpop.f32.mrb[100].mxu0 }
 0x1cd   : > { %v2410_v17 = vadd.f32 %v2409_v52, %v20030_v45  ;;  %v15693_v46 = vpop.f32.mrb[101].mxu0  ;;  %v2561_v48 = vpop.f32.mrb[100].mxu1 }
 0x1ce   : > { %v15732_v53 = vpop.f32.mrb[101].mxu1 }
 0x1cf   : > { %v2585_v54 = vadd.f32 %v2561_v48, %v2410_v17 }
 0x1d0   : > { %v2414_v20 = vpop.f32.mrb[102].mxu0 }
 0x1d1   : > { %v2415_v55 = vadd.f32 %v2414_v20, %v20042_v37  ;;  %v15696_v12 = vpop.f32.mrb[103].mxu0  ;;  %v2566_v57 = vpop.f32.mrb[102].mxu1 }
 0x1d2   : > { %v15735_v1 = vpop.f32.mrb[103].mxu1 }
 0x1d3   : > { %v2586_v6 = vadd.f32 %v2566_v57, %v2415_v55 }
 0x1d4   : > { %v2419_v41 = vpop.f32.mrb[104].mxu0 }
 0x1d5   : > { %v2420_v26 = vadd.f32 %v2419_v41, %v20060_v8  ;;  %v15699_v58 = vpop.f32.mrb[105].mxu0  ;;  %v2571_v18 = vpop.f32.mrb[104].mxu1 }
 0x1d6   : > { %v15738_v60 = vpop.f32.mrb[105].mxu1 }
 0x1d7   : > { %v2587_v59 = vadd.f32 %v2571_v18, %v2420_v26 }
 0x1d8   : > { %v2424_v10 = vpop.f32.mrb[106].mxu0 }
 0x1d9   : > { %v2425_v45 = vadd.f32 %v2424_v10, %v2287_v21  ;;  %v15702_v9 = vpop.f32.mrb[107].mxu0  ;;  %v2576_v4 = vpop.f32.mrb[106].mxu1 }
 0x1da   : > { %v15741_v61 = vpop.f32.mrb[107].mxu1 }
 0x1db   : > { %v2588_v51 = vadd.f32 %v2576_v4, %v2425_v45 }
 0x1dc   : > { %v2697_v23 = vpop.f32.mrb[108].mxu0 }
 0x1dd   : > { %v2741_v7 = vadd.f32 %v2697_v23, %v2580_v24  ;;  %v15756_v37 = vpop.f32.mrb[109].mxu0  ;;  %v2858_v34 = vpop.f32.mrb[108].mxu1 }
 0x1de   : > { %v15795_v44 = vpop.f32.mrb[109].mxu1 }
 0x1df   : > { %v2902_v52 = vadd.f32 %v2858_v34, %v2741_v7 }
 0x1e0   : > { %v2702_v17 = vpop.f32.mrb[110].mxu0 }
 0x1e1   : > { %v2742_v46 = vadd.f32 %v2702_v17, %v2581_v5  ;;  %v15759_v48 = vpop.f32.mrb[111].mxu0  ;;  %v2863_v8 = vpop.f32.mrb[110].mxu1 }
 0x1e2   : > { %v15798_v53 = vpop.f32.mrb[111].mxu1 }
 0x1e3   : > { %v2903_v20 = vadd.f32 %v2863_v8, %v2742_v46 }
 0x1e4   : > { %v2707_v55 = vpop.f32.mrb[112].mxu0 }
 0x1e5   : > { %v2743_v12 = vadd.f32 %v2707_v55, %v2582_v16  ;;  %v15762_v57 = vpop.f32.mrb[113].mxu0  ;;  %v2868_v21 = vpop.f32.mrb[112].mxu1 }
 0x1e6   : > { %v15801_v1 = vpop.f32.mrb[113].mxu1 }
 0x1e7   : > { %v2904_v41 = vadd.f32 %v2868_v21, %v2743_v12 }
 0x1e8   : > { %v2712_v26 = vpop.f32.mrb[114].mxu0 }
 0x1e9   : > { %v2744_v58 = vadd.f32 %v2712_v26, %v2583_v49  ;;  %v15765_v18 = vpop.f32.mrb[115].mxu0  ;;  %v2873_v24 = vpop.f32.mrb[114].mxu1 }
 0x1ea   : > { %v15804_v60 = vpop.f32.mrb[115].mxu1  ;;  %v602_v18 = vld [vmem:[%s19028_s26 + $0xb0] sm:$0xff] }
 0x1eb   : > { %v2905_v10 = vadd.f32 %v2873_v24, %v2744_v58  ;;  %638 = vst.msk [vmem:[#allocation2 + $0xc8] sm:$0xff] %vm520_vm0, %v602_v18 }
 0x1ec   : > { %v2717_v45 = vpop.f32.mrb[116].mxu0 }
 0x1ed   : > { %v2745_v9 = vadd.f32 %v2717_v45, %v2584_v30  ;;  %v15768_v4 = vpop.f32.mrb[117].mxu0  ;;  %v2878_v5 = vpop.f32.mrb[116].mxu1  ;;  %v601_v30 = vld [vmem:[%s19028_s26 + $0xa8] sm:$0xff] }
 0x1ee   : > { %v15807_v61 = vpop.f32.mrb[117].mxu1  ;;  %637 = vst.msk [vmem:[#allocation2 + $0xc0] sm:$0xff] %vm520_vm0, %v601_v30 }
 0x1ef   : > { %v2906_v23 = vadd.f32 %v2878_v5, %v2745_v9 }
 0x1f0   : > { %v2722_v7 = vpop.f32.mrb[118].mxu0 }
 0x1f1   : > { %v2746_v37 = vadd.f32 %v2722_v7, %v2585_v54  ;;  %v15771_v16 = vpop.f32.mrb[119].mxu0  ;;  %v2883_v34 = vpop.f32.mrb[118].mxu1 }
 0x1f2   : > { %v15810_v44 = vpop.f32.mrb[119].mxu1 }
 0x1f3   : > { %v2907_v17 = vadd.f32 %v2883_v34, %v2746_v37  ;;  %v604_v44 = vld [vmem:[%s19028_s26 + $0xc0] sm:$0xff] }
 0x1f4   : > { %v2727_v46 = vpop.f32.mrb[120].mxu0  ;;  %640 = vst.msk [vmem:[#allocation2 + $0xd8] sm:$0xff] %vm520_vm0, %v604_v44 }
 0x1f5   : > { %v15774_v49 = vpop.f32.mrb[121].mxu0  ;;  %v2888_v48 = vpop.f32.mrb[120].mxu1  ;;  %v2747_v8 = vadd.f32 %v2727_v46, %v2586_v6 }
 0x1f6   : > { %v15813_v53 = vpop.f32.mrb[121].mxu1 }
 0x1f7   : > { %v2908_v55 = vadd.f32 %v2888_v48, %v2747_v8 }
 0x1f8   : > { %v2732_v12 = vpop.f32.mrb[122].mxu0 }
 0x1f9   : > { %v15777_v57 = vpop.f32.mrb[123].mxu0  ;;  %v2893_v21 = vpop.f32.mrb[122].mxu1  ;;  %v2748_v1 = vadd.f32 %v2732_v12, %v2587_v59  ;;  %v603_v59 = vld [vmem:[%s19028_s26 + $0xb8] sm:$0xff] }
 0x1fa   : > { %v15816_v54 = vpop.f32.mrb[123].mxu1  ;;  %639 = vst.msk [vmem:[#allocation2 + $0xd0] sm:$0xff] %vm520_vm0, %v603_v59 }
 0x1fb   : > { %v2909_v26 = vadd.f32 %v2893_v21, %v2748_v1 }
 0x1fc   : > { %v2737_v58 = vpop.f32.mrb[124].mxu0 }
 0x1fd   : > { %v2749_v24 = vadd.f32 %v2737_v58, %v2588_v51  ;;  %v15780_v60 = vpop.f32.mrb[125].mxu0  ;;  %v2898_v45 = vpop.f32.mrb[124].mxu1 }
 0x1fe   : > { %v15819_v6 = vpop.f32.mrb[125].mxu1 }
 0x1ff   : > { %v2910_v9 = vadd.f32 %v2898_v45, %v2749_v24 }
 0x200   : > { %v3019_v4 = vpop.f32.mrb[126].mxu0 }
 0x201   : > { %v3063_v5 = vadd.f32 %v3019_v4, %v2902_v52  ;;  %v15834_v61 = vpop.f32.mrb[127].mxu0  ;;  %v3180_v7 = vpop.f32.mrb[126].mxu1 }
 0x202   : > { %v15873_v37 = vpop.f32.mrb[127].mxu1 }
 0x203   : > { %v3224_v16 = vadd.f32 %v3180_v7, %v3063_v5 }
 0x204   : > { %v3024_v34 = vpop.f32.mrb[128].mxu0 }
 0x205   : > { %v3064_v46 = vadd.f32 %v3024_v34, %v2903_v20  ;;  %v15837_v49 = vpop.f32.mrb[129].mxu0  ;;  %v3185_v51 = vpop.f32.mrb[128].mxu1 }
 0x206   : > { %v15876_v48 = vpop.f32.mrb[129].mxu1 }
 0x207   : > { %v3225_v8 = vadd.f32 %v3185_v51, %v3064_v46 }
 0x208   : > { %v3029_v53 = vpop.f32.mrb[130].mxu0 }
 0x209   : > { %v3065_v12 = vadd.f32 %v3029_v53, %v2904_v41  ;;  %v15840_v30 = vpop.f32.mrb[131].mxu0  ;;  %v3190_v52 = vpop.f32.mrb[130].mxu1 }
 0x20a   : > { %v15879_v57 = vpop.f32.mrb[131].mxu1 }
 0x20b   : > { %v3226_v21 = vadd.f32 %v3190_v52, %v3065_v12 }
 0x20c   : > { %v3034_v1 = vpop.f32.mrb[132].mxu0 }
 0x20d   : > { %v3066_v54 = vadd.f32 %v3034_v1, %v2905_v10  ;;  %v15843_v58 = vpop.f32.mrb[133].mxu0  ;;  %v3195_v18 = vpop.f32.mrb[132].mxu1 }
 0x20e   : > { %v15882_v24 = vpop.f32.mrb[133].mxu1 }
 0x20f   : > { %v3227_v60 = vadd.f32 %v3195_v18, %v3066_v54 }
 0x210   : > { %v3039_v45 = vpop.f32.mrb[134].mxu0 }
 0x211   : > { %v3067_v20 = vadd.f32 %v3039_v45, %v2906_v23  ;;  %v15846_v6 = vpop.f32.mrb[135].mxu0  ;;  %v3200_v4 = vpop.f32.mrb[134].mxu1 }
 0x212   : > { %v15885_v5 = vpop.f32.mrb[135].mxu1 }
 0x213   : > { %v20105_v61 = vadd.f32 %v3200_v4, %v3067_v20 }
 0x214   : > { %v3044_v7 = vpop.f32.mrb[136].mxu0 }
 0x215   : > { %v3068_v59 = vadd.f32 %v3044_v7, %v2907_v17  ;;  %v15849_v41 = vpop.f32.mrb[137].mxu0  ;;  %v3205_v37 = vpop.f32.mrb[136].mxu1 }
 0x216   : > { %v15888_v34 = vpop.f32.mrb[137].mxu1 }
 0x217   : > { %v20107_v44 = vadd.f32 %v3205_v37, %v3068_v59 }
 0x218   : > { %v3049_v46 = vpop.f32.mrb[138].mxu0 }
 0x219   : > { %v3069_v10 = vadd.f32 %v3049_v46, %v2908_v55  ;;  %v15852_v49 = vpop.f32.mrb[139].mxu0  ;;  %v3210_v51 = vpop.f32.mrb[138].mxu1 }
 0x21a   : > { %v15891_v48 = vpop.f32.mrb[139].mxu1 }
 0x21b   : > { %v20109_v53 = vadd.f32 %v3210_v51, %v3069_v10  ;;  %v606_v10 = vld [vmem:[%s19028_s26 + $0xd0] sm:$0xff] }
 0x21c   : > { %v3054_v23 = vpop.f32.mrb[140].mxu0  ;;  %642 = vst.msk [vmem:[#allocation2 + $0xe8] sm:$0xff] %vm520_vm0, %v606_v10 }
 0x21d   : > { %v3070_v12 = vadd.f32 %v3054_v23, %v2909_v26  ;;  %v15855_v30 = vpop.f32.mrb[141].mxu0  ;;  %v3215_v52 = vpop.f32.mrb[140].mxu1  ;;  %v605_v26 = vld [vmem:[%s19028_s26 + $0xc8] sm:$0xff] }
 0x21e   : > { %v15894_v57 = vpop.f32.mrb[141].mxu1  ;;  %641 = vst.msk [vmem:[#allocation2 + $0xe0] sm:$0xff] %vm520_vm0, %v605_v26 }
 0x21f   : > { %v20111_v1 = vadd.f32 %v3215_v52, %v3070_v12 }
 0x220   : > { %v3059_v17 = vpop.f32.mrb[142].mxu0 }
 0x221   : > { %v3071_v54 = vadd.f32 %v3059_v17, %v2910_v9  ;;  %v15858_v58 = vpop.f32.mrb[143].mxu0  ;;  %v3220_v18 = vpop.f32.mrb[142].mxu1 }
 0x222   : > { %v15897_v24 = vpop.f32.mrb[143].mxu1 }
 0x223   : > { %v20113_v55 = vadd.f32 %v3220_v18, %v3071_v54 }
 0x224   : > { %v3341_v45 = vpop.f32.mrb[144].mxu0 }
 0x225   : > { %v3385_v20 = vadd.f32 %v3341_v45, %v3224_v16  ;;  %v15912_v6 = vpop.f32.mrb[145].mxu0  ;;  %v3502_v4 = vpop.f32.mrb[144].mxu1 }
 0x226   : > { %v15951_v5 = vpop.f32.mrb[145].mxu1 }
 0x227   : > { %v3546_v7 = vadd.f32 %v3502_v4, %v3385_v20 }
 0x228   : > { %v3346_v59 = vpop.f32.mrb[146].mxu0 }
 0x229   : > { %v3560_v41 = vadd.f32 %v19969_v50, %v3546_v7  ;;  %v3386_v37 = vadd.f32 %v3346_v59, %v3225_v8  ;;  %v15915_v9 = vpop.f32.mrb[147].mxu0  ;;  %v3507_v34 = vpop.f32.mrb[146].mxu1 }
 0x22a   : > { %v15954_v46 = vpop.f32.mrb[147].mxu1 }
 0x22b   : > { %3569 = vst.msk [vmem:[#allocation3 + $0x48] sm:$0xff] %vm520_vm0, %v3560_v41  ;;  %v3547_v49 = vadd.f32 %v3507_v34, %v3386_v37  ;;  %v3722_v57 = vmul.f32 %v3560_v41, %v3560_v41 }
 0x22c   : > { %v3351_v16 = vpop.f32.mrb[148].mxu0 }
 0x22d   : > { %v3561_v51 = vadd.f32 %v19969_v50, %v3547_v49  ;;  %v3387_v48 = vadd.f32 %v3351_v16, %v3226_v21  ;;  %v15918_v23 = vpop.f32.mrb[149].mxu0  ;;  %v3512_v12 = vpop.f32.mrb[148].mxu1 }
 0x22e   : > { %v15957_v30 = vpop.f32.mrb[149].mxu1 }
 0x22f   : > { %3570 = vst.msk [vmem:[#allocation3 + $0x50] sm:$0xff] %vm520_vm0, %v3561_v51  ;;  %v3548_v52 = vadd.f32 %v3512_v12, %v3387_v48  ;;  %v17697_v8 = vpack.c.bf16 %v3561_v51, %v3560_v41  ;;  %v3723_v17 = vmul.f32 %v3561_v51, %v3561_v51 }
 0x230   : > { %v3356_v54 = vpop.f32.mrb[150].mxu0 }
 0x231   : > { %v3562_v58 = vadd.f32 %v19969_v50, %v3548_v52  ;;  %v3388_v18 = vadd.f32 %v3356_v54, %v3227_v60  ;;  %v15921_v24 = vpop.f32.mrb[151].mxu0  ;;  %v3517_v45 = vpop.f32.mrb[150].mxu1  ;;  %17698 = vmatpush3.bf16.msra.mxu0 %v17697_v8  ;;  %v17721_v20 = vpack.c.bf16 %v3723_v17, %v3722_v57 }
 0x232   : > { %v7400_v6 = vld [vmem:[#allocation3 + $0x40] ss:$2 sm:$0xff]  ;;  %v7436_v4 = vld [vmem:[#allocation3 + $0x41] ss:$2 sm:$0xff]  ;;  %v15960_v21 = vpop.f32.mrb[151].mxu1  ;;  %17699 = vmatprep.subr.bf16.mxu0 %v18695_v3 }
 0x233   : > { %v7467_v5 = vmax.f32 %v7400_v6, %v7436_v4  ;;  %3571 = vst.msk [vmem:[#allocation3 + $0x58] sm:$0xff] %vm520_vm0, %v3562_v58  ;;  %v3549_v26 = vadd.f32 %v3517_v45, %v3388_v18  ;;  %17722 = vmatpush3.bf16.msra.mxu1 %v17721_v20  ;;  %v3724_v10 = vmul.f32 %v3562_v58, %v3562_v58 }
 0x234   : > { %v3361_v7 = vpop.f32.mrb[152].mxu0  ;;  %17723 = vmatprep.subr.bf16.mxu1 %v18695_v3 }
 0x235   : > { %7485 = vst.msk [vmem:[#allocation4 + $0x20] sm:$0xff] %vm520_vm0, %v7467_v5  ;;  %v3563_v60 = vadd.f32 %v19969_v50, %v3549_v26  ;;  %v3389_v59 = vadd.f32 %v3361_v7, %v20105_v61  ;;  %v15924_v41 = vpop.f32.mrb[153].mxu0  ;;  %v3522_v37 = vpop.f32.mrb[152].mxu1 }
 0x236   : > { %v15963_v9 = vpop.f32.mrb[153].mxu1 }
 0x237   : > { %3572 = vst.msk [vmem:[#allocation3 + $0x60] sm:$0xff] %vm520_vm0, %v3563_v60  ;;  %v3550_v34 = vadd.f32 %v3522_v37, %v3389_v59  ;;  %v17700_v46 = vpack.c.bf16 %v3563_v60, %v3562_v58  ;;  %v3725_v49 = vmul.f32 %v3563_v60, %v3563_v60 }
 0x238   : > { %v3366_v16 = vpop.f32.mrb[154].mxu0 }
 0x239   : > { %v3564_v51 = vadd.f32 %v19969_v50, %v3550_v34  ;;  %v3390_v48 = vadd.f32 %v3366_v16, %v20107_v44  ;;  %v15927_v23 = vpop.f32.mrb[155].mxu0  ;;  %v3527_v12 = vpop.f32.mrb[154].mxu1  ;;  %17701 = vmatpush3.bf16.msra.mxu0 %v17700_v46  ;;  %v17724_v30 = vpack.c.bf16 %v3725_v49, %v3724_v10 }
 0x23a   : > { %v7402_v52 = vld [vmem:[#allocation3 + $0x50] ss:$2 sm:$0xff]  ;;  %v7438_v61 = vld [vmem:[#allocation3 + $0x51] ss:$2 sm:$0xff]  ;;  %v15966_v8 = vpop.f32.mrb[155].mxu1  ;;  %17702 = vmatprep.subr.bf16.mxu0 %v18695_v3 }
 0x23b   : > { %v7468_v57 = vmax.f32 %v7402_v52, %v7438_v61  ;;  %3573 = vst.msk [vmem:[#allocation3 + $0x68] sm:$0xff] %vm520_vm0, %v3564_v51  ;;  %v3551_v17 = vadd.f32 %v3527_v12, %v3390_v48  ;;  %17725 = vmatpush3.bf16.msra.mxu1 %v17724_v30  ;;  %v3726_v4 = vmul.f32 %v3564_v51, %v3564_v51 }
 0x23c   : > { %v3371_v54 = vpop.f32.mrb[156].mxu0  ;;  %17726 = vmatprep.subr.bf16.mxu1 %v18695_v3 }
 0x23d   : > { %7486 = vst.msk [vmem:[#allocation4 + $0x28] sm:$0xff] %vm520_vm0, %v7468_v57  ;;  %v3565_v44 = vadd.f32 %v19969_v50, %v3551_v17  ;;  %v3391_v58 = vadd.f32 %v3371_v54, %v20109_v53  ;;  %v15930_v18 = vpop.f32.mrb[157].mxu0  ;;  %v3532_v24 = vpop.f32.mrb[156].mxu1 }
 0x23e   : > { %v15969_v45 = vpop.f32.mrb[157].mxu1 }
 0x23f   : > { %3574 = vst.msk [vmem:[#allocation3 + $0x70] sm:$0xff] %vm520_vm0, %v3565_v44  ;;  %v3552_v20 = vadd.f32 %v3532_v24, %v3391_v58  ;;  %v17703_v6 = vpack.c.bf16 %v3565_v44, %v3564_v51  ;;  %v3727_v21 = vmul.f32 %v3565_v44, %v3565_v44  ;;  %v607_v44 = vld [vmem:[%s19028_s26 + $0xd8] sm:$0xff]  ;;  %v17763_v24 = vpack.c.bf16 %v13607_v39, %v13606_v36  ;;  %v13608_v45 = vld [vmem:[%s22702_s1 + $0x70] sm:$0xff]  ;;  %v4340_v39 = vld [vmem:[#allocation2 + $0xc7] sm:$0xff] }
 0x240   : > { %v3376_v5 = vpop.f32.mrb[158].mxu0  ;;  %643 = vst.msk [vmem:[#allocation2 + $0xf0] sm:$0xff] %vm520_vm0, %v607_v44  ;;  %v3879_v44 = vld [vmem:[#allocation2 + $0xd5] sm:$0xff]  ;;  %v4339_v36 = vld [vmem:[#allocation2 + $0xbf] sm:$0xff] }
 0x241   : > { %v3566_v26 = vadd.f32 %v19969_v50, %v3552_v20  ;;  %v3392_v7 = vadd.f32 %v3376_v5, %v20111_v1  ;;  %v15933_v60 = vpop.f32.mrb[159].mxu0  ;;  %v3537_v59 = vpop.f32.mrb[158].mxu1  ;;  %17704 = vmatpush3.bf16.msra.mxu0 %v17703_v6  ;;  %v17727_v41 = vpack.c.bf16 %v3727_v21, %v3726_v4  ;;  %v13609_v20 = vld [vmem:[%s22702_s1 + $0x78] sm:$0xff]  ;;  %v13623_v21 = vld [vmem:[%s22702_s1 + $0xa0] sm:$0xff]  ;;  %v13624_v5 = vld [vmem:[%s22702_s1 + $0xa8] sm:$0xff] }
 0x242   : > { %v7404_v37 = vld [vmem:[#allocation3 + $0x60] ss:$2 sm:$0xff]  ;;  %v7440_v53 = vld [vmem:[#allocation3 + $0x61] ss:$2 sm:$0xff]  ;;  %v15972_v9 = vpop.f32.mrb[159].mxu1  ;;  %17705 = vmatprep.subr.bf16.mxu0 %v18695_v3 }
 0x243   : > { %v7469_v34 = vmax.f32 %v7404_v37, %v7440_v53  ;;  %3575 = vst.msk [vmem:[#allocation3 + $0x78] sm:$0xff] %vm520_vm0, %v3566_v26  ;;  %v3553_v46 = vadd.f32 %v3537_v59, %v3392_v7  ;;  %17728 = vmatpush3.bf16.msra.mxu1 %v17727_v41  ;;  %v3728_v30 = vmul.f32 %v3566_v26, %v3566_v26  ;;  %v3871_v6 = vld [vmem:[#allocation2 + $0x95] sm:$0xff]  ;;  %v608_v60 = vld [vmem:[%s19028_s26 + $0xe0] sm:$0xff]  ;;  %v13611_v41 = vld [vmem:[%s22702_s1 + $0x88] sm:$0xff] }
 0x244   : > { %v3381_v10 = vpop.f32.mrb[160].mxu0  ;;  %17729 = vmatprep.subr.bf16.mxu1 %v18695_v3  ;;  %v17766_v7 = vpack.c.bf16 %v13609_v20, %v13608_v45  ;;  %v13610_v59 = vld [vmem:[%s22702_s1 + $0x80] sm:$0xff]  ;;  %644 = vst.msk [vmem:[#allocation2 + $0xf8] sm:$0xff] %vm520_vm0, %v608_v60  ;;  %v17775_v53 = vpack.c.bf16 %v13624_v5, %v13623_v21  ;;  %v13625_v9 = vld [vmem:[%s22702_s1 + $0xb0] sm:$0xff] }
 0x245   : > { %7487 = vst.msk [vmem:[#allocation4 + $0x30] sm:$0xff] %vm520_vm0, %v7469_v34  ;;  %v3567_v1 = vadd.f32 %v19969_v50, %v3553_v46  ;;  %v3393_v49 = vadd.f32 %v3381_v10, %v20113_v55  ;;  %v15936_v16 = vpop.f32.mrb[161].mxu0  ;;  %v3542_v51 = vpop.f32.mrb[160].mxu1  ;;  %v652_v55 = vld [vmem:[%s22704_s3] sm:$0x1]  ;;  %v13626_v34 = vld [vmem:[%s22702_s1 + $0xb8] sm:$0xff] }
 0x246   : > { %v15975_v48 = vpop.f32.mrb[161].mxu1  ;;  %v3872_v37 = vld [vmem:[#allocation2 + $0x9d] sm:$0xff]  ;;  %v609_v46 = vld [vmem:[%s19028_s26 + $0xe8] sm:$0xff]  ;;  %v17778_v16 = vpack.c.bf16 %v13626_v34, %v13625_v9  ;;  %v13681_v20 = vld [vmem:[%s22702_s1 + $0x150] sm:$0xff] }
 0x247   : > { %3576 = vst.msk [vmem:[#allocation3 + $0x80] sm:$0xff] %vm520_vm0, %v3567_v1  ;;  %v3554_v23 = vadd.f32 %v3542_v51, %v3393_v49  ;;  %v17706_v12 = vpack.c.bf16 %v3567_v1, %v3566_v26  ;;  %v3729_v52 = vmul.f32 %v3567_v1, %v3567_v1  ;;  %v3887_v26 = vld [vmem:[#allocation2 + $0x9e] sm:$0xff]  ;;  %v3888_v10 = vld [vmem:[#allocation2 + $0xa6] sm:$0xff]  ;;  %v17769_v1 = vpack.c.bf16 %v13611_v41, %v13610_v59  ;;  %v3889_v51 = vld [vmem:[#allocation2 + $0xae] sm:$0xff] }
 0x248   : > { %645 = vst.msk [vmem:[#allocation2 + $0x100] sm:$0xff] %vm520_vm0, %v609_v46  ;;  %v3873_v49 = vld [vmem:[#allocation2 + $0xa5] sm:$0xff]  ;;  %v3874_v48 = vld [vmem:[#allocation2 + $0xad] sm:$0xff] }
 0x249   : > { %v3568_v61 = vadd.f32 %v19969_v50, %v3554_v23  ;;  %17707 = vmatpush3.bf16.msra.mxu0 %v17706_v12  ;;  %v17730_v8 = vpack.c.bf16 %v3729_v52, %v3728_v30  ;;  %v3890_v23 = vld [vmem:[#allocation2 + $0xb6] sm:$0xff]  ;;  %v3891_v30 = vld [vmem:[#allocation2 + $0xbe] sm:$0xff]  ;;  %v4344_v45 = vld [vmem:[#allocation2 + $0xe7] sm:$0xff] }
 0x24a   : > { %v7406_v57 = vld [vmem:[#allocation3 + $0x70] ss:$2 sm:$0xff]  ;;  %v7442_v17 = vld [vmem:[#allocation3 + $0x71] ss:$2 sm:$0xff]  ;;  %15992 = vmatprep.subr.mxu0 %v18697_v11  ;;  %v3876_v52 = vld [vmem:[#allocation2 + $0xbd] sm:$0xff] }
 0x24b   : > { %v7470_v54 = vmax.f32 %v7406_v57, %v7442_v17  ;;  %3577 = vst.msk [vmem:[#allocation3 + $0x88] sm:$0xff] %vm520_vm0, %v3568_v61  ;;  %17731 = vmatpush3.bf16.msra.mxu1 %v17730_v8  ;;  %v3730_v50 = vmul.f32 %v3568_v61, %v3568_v61  ;;  %v3875_v12 = vld [vmem:[#allocation2 + $0xb5] sm:$0xff]  ;;  %v3877_v8 = vld [vmem:[#allocation2 + $0xc5] sm:$0xff]  ;;  %v3878_v17 = vld [vmem:[#allocation2 + $0xcd] sm:$0xff] }
 0x24c   : > { %16034 = vmatprep.subr.mxu1 %v18697_v11  ;;  %v3893_v57 = vld [vmem:[#allocation2 + $0xce] sm:$0xff]  ;;  %v13683_v59 = vld [vmem:[%s22702_s1 + $0x160] sm:$0xff] }
 0x24d   : > { %7488 = vst.msk [vmem:[#allocation4 + $0x38] sm:$0xff] %vm520_vm0, %v7470_v54  ;;  %15993 = vmatpush3.msra.mxu0 %v3568_v61  ;;  %v3892_v61 = vld [vmem:[#allocation2 + $0xc6] sm:$0xff]  ;;  %v3894_v54 = vld [vmem:[#allocation2 + $0xd6] sm:$0xff] }
 0x24e   : > { %17708 = vmatprep.subr.bf16.mxu0 %v18695_v3  ;;  %15995 = vmatmul.mubr.msk.f32.vlgmr.msra.gmra.mrb[162].mxu0 %vm3578_vm2, %v652_v55  ;;  %v13668_v5 = vld [vmem:[%s22702_s1 + $0x130] sm:$0xff]  ;;  %v13684_v41 = vld [vmem:[%s22702_s1 + $0x168] sm:$0xff]  ;;  %v13670_v9 = vld [vmem:[%s22702_s1 + $0x140] sm:$0xff] }
 0x24f   : > { %17710 = vmatpush3.bf16.msra.mxu0 %v17709_v62  ;;  %16035 = vmatpush3.msra.mxu1 %v3730_v50  ;;  %v13583_v62 = vld [vmem:[%s22702_s1 + $0x38] sm:$0xff]  ;;  %v13637_v50 = vld [vmem:[%s22702_s1 + $0xc8] sm:$0xff] }
 0x250   : > { %17732 = vmatprep.subr.bf16.mxu1 %v18695_v3  ;;  %16037 = vmatmul.mubr.msk.f32.vlgmr.msra.gmra.mrb[162].mxu1 %vm3578_vm2, %v652_v55  ;;  %v13671_v34 = vld [vmem:[%s22702_s1 + $0x148] sm:$0xff]  ;;  %v4659_v46 = vld [vmem:[#allocation2 + $0xb1] sm:$0xff] }
 0x251   : > { %17734 = vmatpush3.bf16.msra.mxu1 %v17733_v40  ;;  %17711 = vmatprep.subr.bf16.mxu0 %v18695_v3  ;;  %v17745_v40 = vpack.c.bf16 %v13583_v62, %v13582_v0  ;;  %v13638_v62 = vld [vmem:[%s22702_s1 + $0xd0] sm:$0xff] }
 0x252   : > { %v7408_v58 = vld [vmem:[#allocation3 + $0x80] ss:$2 sm:$0xff]  ;;  %v7444_v18 = vld [vmem:[#allocation3 + $0x81] ss:$2 sm:$0xff]  ;;  %17735 = vmatprep.subr.bf16.mxu1 %v18695_v3  ;;  %16015 = vmatprep.mubr.msk.f32.mxu0 %vm18696_vm1, %v18697_v11 }
 0x253   : > { %v7471_v15 = vmax.f32 %v7408_v58, %v7444_v18  ;;  %17713 = vmatpush3.bf16.msra.mxu0 %v17712_v31  ;;  %16057 = vmatprep.mubr.msk.f32.mxu1 %vm18696_vm1, %v18697_v11  ;;  %v17754_v31 = vpack.c.bf16 %v3881_v25, %v3880_v19  ;;  %v13651_v58 = vld [vmem:[%s22702_s1 + $0xf0] sm:$0xff]  ;;  %v13652_v18 = vld [vmem:[%s22702_s1 + $0xf8] sm:$0xff]  ;;  %v4336_v25 = vld [vmem:[#allocation2 + $0xa7] sm:$0xff] }
 0x254   : > { %17714 = vmatprep.subr.bf16.mxu0 %v18695_v3  ;;  %v13639_v19 = vld [vmem:[%s22702_s1 + $0xd8] sm:$0xff] }
 0x255   : > { %7489 = vst.msk [vmem:[#allocation4 + $0x40] sm:$0xff] %vm520_vm0, %v7471_v15  ;;  %17737 = vmatpush3.bf16.msra.mxu1 %v17736_v47  ;;  %v3883_v47 = vld [vmem:[%s22702_s1 + $0x18] sm:$0xff] }
 0x256   : > { %17738 = vmatprep.subr.bf16.mxu1 %v18695_v3  ;;  %v4175_v15 = vld [vmem:[#allocation2 + $0x97] sm:$0xff] }
 0x257   : > { %17716 = vmatpush3.bf16.msra.mxu0 %v17715_v29  ;;  %v17757_v29 = vpack.c.bf16 %v3883_v47, %v3882_v43  ;;  %v13640_v43 = vld [vmem:[%s22702_s1 + $0xe0] sm:$0xff]  ;;  %v13641_v47 = vld [vmem:[%s22702_s1 + $0xe8] sm:$0xff] }
 0x258   : > { %17717 = vmatprep.subr.bf16.mxu0 %v18695_v3 }
 0x259   : > { %17740 = vmatpush3.bf16.msra.mxu1 %v17739_v56  ;;  %v3885_v56 = vld [vmem:[%s22702_s1 + $0x28] sm:$0xff] }
 0x25a   : > { %17741 = vmatprep.subr.bf16.mxu1 %v18695_v3 }
 0x25b   : > { %17719 = vmatpush3.bf16.msra.mxu0 %v17718_v27  ;;  %v17760_v27 = vpack.c.bf16 %v3885_v56, %v3884_v2  ;;  %v17787_v2 = vpack.c.bf16 %v13641_v47, %v13640_v43  ;;  %v4338_v56 = vld [vmem:[#allocation2 + $0xb7] sm:$0xff]  ;;  %v4982_v43 = vld [vmem:[#allocation2 + $0xca] sm:$0xff] }
 0x25c   : > { %16013 = vmatprep.subr.mxu0 %v18697_v11  ;;  %v4983_v47 = vld [vmem:[#allocation2 + $0xd2] sm:$0xff] }
 0x25d   : > { %17743 = vmatpush3.bf16.msra.mxu1 %v17742_v32  ;;  %v3886_v32 = vld [vmem:[#allocation2 + $0x96] sm:$0xff] }
 0x25e   : > { %16055 = vmatprep.subr.mxu1 %v18697_v11 }
 0x25f   : > { %16014 = vmatpush3.msra.mxu0 %v20081_v28  ;;  %v13622_v28 = vld [vmem:[%s22702_s1 + $0x98] sm:$0xff] }
 0x260   : > { %17744 = vmatprep.subr.bf16.mxu0 %v18695_v3  ;;  %16016 = vmatmul.mubr.msk.f32.vlgmr.msra.gmra.mrb[162].mxu0 %vm3578_vm2, %v652_v55  ;;  %v17772_v4 = vpack.c.bf16 %v13622_v28, %v13621_v14  ;;  %v4342_v14 = vld [vmem:[#allocation2 + $0xd7] sm:$0xff]  ;;  %v4343_v28 = vld [vmem:[#allocation2 + $0xdf] sm:$0xff] }
 0x261   : > { %16056 = vmatpush3.msra.mxu1 %v2123_v35  ;;  %17746 = vmatpush3.bf16.msra.mxu0 %v17745_v40  ;;  %v17790_v40 = vpack.c.bf16 %v13652_v18, %v13651_v58  ;;  %v4176_v35 = vld [vmem:[#allocation2 + $0x9f] sm:$0xff]  ;;  %v13697_v18 = vld [vmem:[%s22702_s1 + $0x188] sm:$0xff] }
 0x262   : > { %17753 = vmatprep.subr.bf16.mxu1 %v18695_v3  ;;  %16058 = vmatmul.mubr.msk.f32.vlgmr.msra.gmra.mrb[162].mxu1 %vm3578_vm2, %v652_v55  ;;  %v13636_v55 = vld [vmem:[%s22702_s1 + $0xc0] sm:$0xff] }
 0x263   : > { %17755 = vmatpush3.bf16.msra.mxu1 %v17754_v31  ;;  %17747 = vmatprep.subr.bf16.mxu0 %v18695_v3  ;;  %v17781_v0 = vpack.c.bf16 %v13637_v50, %v13636_v55  ;;  %v17784_v31 = vpack.c.bf16 %v13639_v19, %v13638_v62  ;;  %v4504_v55 = vld [vmem:[#allocation2 + $0xe0] sm:$0xff]  ;;  %v13698_v62 = vld [vmem:[%s22702_s1 + $0x190] sm:$0xff]  ;;  %v13699_v19 = vld [vmem:[%s22702_s1 + $0x198] sm:$0xff] }
 0x264   : > { %17756 = vmatprep.subr.bf16.mxu1 %v18695_v3  ;;  %16072 = vmatprep.mubr.msk.f32.mxu0 %vm18696_vm1, %v18697_v11  ;;  %v4665_v50 = vld [vmem:[#allocation2 + $0xe1] sm:$0xff] }
 0x265   : > { %17749 = vmatpush3.bf16.msra.mxu0 %v17748_v42  ;;  %16111 = vmatprep.mubr.msk.f32.mxu1 %vm18696_vm1, %v18697_v11  ;;  %v4337_v42 = vld [vmem:[#allocation2 + $0xaf] sm:$0xff]  ;;  %v13696_v58 = vld [vmem:[%s22702_s1 + $0x180] sm:$0xff] }
 0x266   : > { %17750 = vmatprep.subr.bf16.mxu0 %v18695_v3 }
 0x267   : > { %17758 = vmatpush3.bf16.msra.mxu1 %v17757_v29  ;;  %v13656_v29 = vld [vmem:[%s22702_s1 + $0x118] sm:$0xff] }
 0x268   : > { %17759 = vmatprep.subr.bf16.mxu1 %v18695_v3 }
 0x269   : > { %17752 = vmatpush3.bf16.msra.mxu0 %v17751_v63  ;;  %v17796_v63 = vpack.c.bf16 %v13656_v29, %v13655_v38  ;;  %v4986_v38 = vld [vmem:[#allocation2 + $0xea] sm:$0xff] }
 0x26a   : > { %17762 = vmatprep.subr.bf16.mxu0 %v18695_v3  ;;  %v4826_v29 = vld [vmem:[#allocation2 + $0xf1] sm:$0xff] }
 0x26b   : > { %17761 = vmatpush3.bf16.msra.mxu1 %v17760_v27  ;;  %v4341_v27 = vld [vmem:[#allocation2 + $0xcf] sm:$0xff] }
 0x26c   : > { %16073 = vmatmul.mubr.msk.f32.vlgmr.msra.gmra.mrb[164].mxu0 %vm520_vm0, %v3886_v32  ;;  %17771 = vmatprep.subr.bf16.mxu1 %v18695_v3  ;;  %v13666_v32 = vld [vmem:[%s22702_s1 + $0x120] sm:$0xff] }
 0x26d   : > { %16075 = vmatprep.mubr.msk.f32.mxu0 %vm18696_vm1, %v18697_v11  ;;  %17764 = vmatpush3.bf16.msra.mxu0 %v17763_v24  ;;  %v13667_v24 = vld [vmem:[%s22702_s1 + $0x128] sm:$0xff] }
 0x26e   : > { %16112 = vmatmul.mubr.msk.f32.vlgmr.msra.gmra.mrb[164].mxu1 %vm520_vm0, %v3871_v6  ;;  %17765 = vmatprep.subr.bf16.mxu0 %v18695_v3  ;;  %v13682_v6 = vld [vmem:[%s22702_s1 + $0x158] sm:$0xff]  ;;  %v17799_v21 = vpack.c.bf16 %v13667_v24, %v13666_v32  ;;  %v5146_v32 = vld [vmem:[#allocation2 + $0xe3] sm:$0xff]  ;;  %v5147_v24 = vld [vmem:[#allocation2 + $0xeb] sm:$0xff] }
 0x26f   : > { %16114 = vmatprep.mubr.msk.f32.mxu1 %vm18696_vm1, %v18697_v11  ;;  %17773 = vmatpush3.bf16.msra.mxu1 %v17772_v4  ;;  %v4497_v4 = vld [vmem:[#allocation2 + $0xa8] sm:$0xff]  ;;  %v17808_v60 = vpack.c.bf16 %v13682_v6, %v13681_v20  ;;  %v5149_v20 = vld [vmem:[#allocation2 + $0xfb] sm:$0xff] }
 0x270   : > { %16076 = vmatmul.mubr.msk.f32.gmra.mrb[166].mxu0 %vm520_vm0, %v3887_v26  ;;  %17774 = vmatprep.subr.bf16.mxu1 %v18695_v3  ;;  %v13669_v26 = vld [vmem:[%s22702_s1 + $0x138] sm:$0xff] }
 0x271   : > { %16078 = vmatprep.mubr.msk.f32.mxu0 %vm18696_vm1, %v18697_v11  ;;  %17767 = vmatpush3.bf16.msra.mxu0 %v17766_v7  ;;  %v4658_v7 = vld [vmem:[#allocation2 + $0xa9] sm:$0xff] }
 0x272   : > { %16115 = vmatmul.mubr.msk.f32.gmra.mrb[166].mxu1 %vm520_vm0, %v3872_v37  ;;  %17768 = vmatprep.subr.bf16.mxu0 %v18695_v3  ;;  %v4498_v37 = vld [vmem:[#allocation2 + $0xb0] sm:$0xff] }
 0x273   : > { %16117 = vmatprep.mubr.msk.f32.mxu1 %vm18696_vm1, %v18697_v11  ;;  %17776 = vmatpush3.bf16.msra.mxu1 %v17775_v53  ;;  %v17802_v53 = vpack.c.bf16 %v13669_v26, %v13668_v5 }
 0x274   : > { %16079 = vmatmul.mubr.msk.f32.gmra.mrb[168].mxu0 %vm520_vm0, %v3888_v10  ;;  %17777 = vmatprep.subr.bf16.mxu1 %v18695_v3  ;;  %v17811_v10 = vpack.c.bf16 %v13684_v41, %v13683_v59 }
 0x275   : > { %16081 = vmatprep.mubr.msk.f32.mxu0 %vm18696_vm1, %v18697_v11  ;;  %17770 = vmatpush3.bf16.msra.mxu0 %v17769_v1  ;;  %v13685_v1 = vld [vmem:[%s22702_s1 + $0x170] sm:$0xff] }
 0x276   : > { %16118 = vmatmul.mubr.msk.f32.gmra.mrb[168].mxu1 %vm520_vm0, %v3873_v49  ;;  %17780 = vmatprep.subr.bf16.mxu0 %v18695_v3  ;;  %v13686_v49 = vld [vmem:[%s22702_s1 + $0x178] sm:$0xff] }
 0x277   : > { %16120 = vmatprep.mubr.msk.f32.mxu1 %vm18696_vm1, %v18697_v11  ;;  %17779 = vmatpush3.bf16.msra.mxu1 %v17778_v16  ;;  %v4499_v16 = vld [vmem:[#allocation2 + $0xb8] sm:$0xff] }
 0x278   : > { %16082 = vmatmul.mubr.msk.f32.gmra.mrb[170].mxu0 %vm520_vm0, %v3889_v51  ;;  %17789 = vmatprep.subr.bf16.mxu1 %v18695_v3  ;;  %v17805_v51 = vpack.c.bf16 %v13671_v34, %v13670_v9 }
 0x279   : > { %16084 = vmatprep.mubr.msk.f32.mxu0 %vm18696_vm1, %v18697_v11 }
 0x27a   : > { %16121 = vmatmul.mubr.msk.f32.gmra.mrb[170].mxu1 %vm520_vm0, %v3874_v48  ;;  %v4660_v48 = vld [vmem:[#allocation2 + $0xb9] sm:$0xff] }
 0x27b   : > { %16123 = vmatprep.mubr.msk.f32.mxu1 %vm18696_vm1, %v18697_v11 }
 0x27c   : > { %16085 = vmatmul.mubr.msk.f32.gmra.mrb[172].mxu0 %vm520_vm0, %v3890_v23  ;;  %v17814_v23 = vpack.c.bf16 %v13686_v49, %v13685_v1 }
 0x27d   : > { %16087 = vmatprep.mubr.msk.f32.mxu0 %vm18696_vm1, %v18697_v11 }
 0x27e   : > { %16124 = vmatmul.mubr.msk.f32.gmra.mrb[172].mxu1 %vm520_vm0, %v3875_v12  ;;  %v4500_v12 = vld [vmem:[#allocation2 + $0xc0] sm:$0xff] }
 0x27f   : > { %16126 = vmatprep.mubr.msk.f32.mxu1 %vm18696_vm1, %v18697_v11 }
 0x280   : > { %16088 = vmatmul.mubr.msk.f32.gmra.mrb[174].mxu0 %vm520_vm0, %v3891_v30  ;;  %v4661_v30 = vld [vmem:[#allocation2 + $0xc1] sm:$0xff] }
 0x281   : > { %16090 = vmatprep.mubr.msk.f32.mxu0 %vm18696_vm1, %v18697_v11 }
 0x282   : > { %16127 = vmatmul.mubr.msk.f32.gmra.mrb[174].mxu1 %vm520_vm0, %v3876_v52  ;;  %v4501_v52 = vld [vmem:[#allocation2 + $0xc8] sm:$0xff] }
 0x283   : > { %16129 = vmatprep.mubr.msk.f32.mxu1 %vm18696_vm1, %v18697_v11 }
 0x284   : > { %16091 = vmatmul.mubr.msk.f32.gmra.mrb[176].mxu0 %vm520_vm0, %v3892_v61  ;;  %v4662_v61 = vld [vmem:[#allocation2 + $0xc9] sm:$0xff] }
 0x285   : > { %16093 = vmatprep.mubr.msk.f32.mxu0 %vm18696_vm1, %v18697_v11 }
 0x286   : > { %16130 = vmatmul.mubr.msk.f32.gmra.mrb[176].mxu1 %vm520_vm0, %v3877_v8  ;;  %v4502_v8 = vld [vmem:[#allocation2 + $0xd0] sm:$0xff] }
 0x287   : > { %16132 = vmatprep.mubr.msk.f32.mxu1 %vm18696_vm1, %v18697_v11 }
 0x288   : > { %16094 = vmatmul.mubr.msk.f32.gmra.mrb[178].mxu0 %vm520_vm0, %v3893_v57  ;;  %v4663_v57 = vld [vmem:[#allocation2 + $0xd1] sm:$0xff] }
 0x289   : > { %16096 = vmatprep.mubr.msk.f32.mxu0 %vm18696_vm1, %v18697_v11 }
 0x28a   : > { %16133 = vmatmul.mubr.msk.f32.gmra.mrb[178].mxu1 %vm520_vm0, %v3878_v17  ;;  %v4503_v17 = vld [vmem:[#allocation2 + $0xd8] sm:$0xff] }
 0x28b   : > { %16135 = vmatprep.mubr.msk.f32.mxu1 %vm18696_vm1, %v18697_v11 }
 0x28c   : > { %16097 = vmatmul.mubr.msk.f32.gmra.mrb[180].mxu0 %vm520_vm0, %v3894_v54  ;;  %v4664_v54 = vld [vmem:[#allocation2 + $0xd9] sm:$0xff] }
 0x28d   : > { %16150 = vmatprep.mubr.msk.f32.mxu0 %vm18696_vm1, %v18697_v11 }
 0x28e   : > { %16136 = vmatmul.mubr.msk.f32.gmra.mrb[180].mxu1 %vm520_vm0, %v3879_v44  ;;  %v4505_v44 = vld [vmem:[#allocation2 + $0xe8] sm:$0xff] }
 0x28f   : > { %16189 = vmatprep.mubr.msk.f32.mxu1 %vm18696_vm1, %v18697_v11 }
 0x290   : > { %16151 = vmatmul.mubr.msk.f32.vlgmr.msra.gmra.mrb[182].mxu0 %vm520_vm0, %v4175_v15  ;;  %v4666_v15 = vld [vmem:[#allocation2 + $0xe9] sm:$0xff] }
 0x291   : > { %16153 = vmatprep.mubr.msk.f32.mxu0 %vm18696_vm1, %v18697_v11  ;;  %17782 = vmatpush3.bf16.msra.mxu0 %v17781_v0  ;;  %v17817_v0 = vpack.c.bf16 %v13697_v18, %v13696_v58 }
 0x292   : > { %16190 = vmatmul.mubr.msk.f32.vlgmr.msra.gmra.mrb[182].mxu1 %vm520_vm0, %v4336_v25  ;;  %17783 = vmatprep.subr.bf16.mxu0 %v18695_v3 }
 0x293   : > { %16192 = vmatprep.mubr.msk.f32.mxu1 %vm18696_vm1, %v18697_v11  ;;  %17791 = vmatpush3.bf16.msra.mxu1 %v17790_v40  ;;  %v17820_v40 = vpack.c.bf16 %v13699_v19, %v13698_v62 }
 0x294   : > { %16154 = vmatmul.mubr.msk.f32.gmra.mrb[184].mxu0 %vm520_vm0, %v4176_v35  ;;  %17792 = vmatprep.subr.bf16.mxu1 %v18695_v3  ;;  %v4981_v35 = vld [vmem:[#allocation2 + $0xc2] sm:$0xff] }
 0x295   : > { %16156 = vmatprep.mubr.msk.f32.mxu0 %vm18696_vm1, %v18697_v11  ;;  %17785 = vmatpush3.bf16.msra.mxu0 %v17784_v31  ;;  %v17823_v31 = vpack.c.bf16 %v13701_v13, %v13700_v33 }
 0x296   : > { %16193 = vmatmul.mubr.msk.f32.gmra.mrb[184].mxu1 %vm520_vm0, %v4337_v42  ;;  %17786 = vmatprep.subr.bf16.mxu0 %v18695_v3 }
 0x297   : > { %16195 = vmatprep.mubr.msk.f32.mxu1 %vm18696_vm1, %v18697_v11  ;;  %17794 = vmatpush3.bf16.msra.mxu1 %v17793_v22  ;;  %v4985_v22 = vld [vmem:[#allocation2 + $0xe2] sm:$0xff] }
 0x298   : > { %16157 = vmatmul.mubr.msk.f32.gmra.mrb[186].mxu0 %vm520_vm0, %v4336_v25  ;;  %17795 = vmatprep.subr.bf16.mxu1 %v18695_v3  ;;  %v4980_v25 = vld [vmem:[#allocation2 + $0xba] sm:$0xff] }
 0x299   : > { %16159 = vmatprep.mubr.msk.f32.mxu0 %vm18696_vm1, %v18697_v11  ;;  %17788 = vmatpush3.bf16.msra.mxu0 %v17787_v2  ;;  %v4987_v2 = vld [vmem:[#allocation2 + $0xf2] sm:$0xff] }
 0x29a   : > { %16196 = vmatmul.mubr.msk.f32.gmra.mrb[186].mxu1 %vm520_vm0, %v4338_v56  ;;  %17798 = vmatprep.subr.bf16.mxu0 %v18695_v3 }
 0x29b   : > { %16198 = vmatprep.mubr.msk.f32.mxu1 %vm18696_vm1, %v18697_v11  ;;  %17797 = vmatpush3.bf16.msra.mxu1 %v17796_v63  ;;  %v4988_v63 = vld [vmem:[#allocation2 + $0xfa] sm:$0xff] }
 0x29c   : > { %16160 = vmatmul.mubr.msk.f32.gmra.mrb[188].mxu0 %vm520_vm0, %v4337_v42  ;;  %17807 = vmatprep.subr.bf16.mxu1 %v18695_v3  ;;  %v4984_v42 = vld [vmem:[#allocation2 + $0xda] sm:$0xff] }
 0x29d   : > { %16162 = vmatprep.mubr.msk.f32.mxu0 %vm18696_vm1, %v18697_v11 }
 0x29e   : > { %16199 = vmatmul.mubr.msk.f32.gmra.mrb[188].mxu1 %vm520_vm0, %v4339_v36 }
 0x29f   : > { %16201 = vmatprep.mubr.msk.f32.mxu1 %vm18696_vm1, %v18697_v11 }
 0x2a0   : > { %16163 = vmatmul.mubr.msk.f32.gmra.mrb[190].mxu0 %vm520_vm0, %v4338_v56  ;;  %v4827_v56 = vld [vmem:[#allocation2 + $0xf9] sm:$0xff] }
 0x2a1   : > { %16165 = vmatprep.mubr.msk.f32.mxu0 %vm18696_vm1, %v18697_v11 }
 0x2a2   : > { %16202 = vmatmul.mubr.msk.f32.gmra.mrb[190].mxu1 %vm520_vm0, %v4340_v39 }
 0x2a3   : > { %16204 = vmatprep.mubr.msk.f32.mxu1 %vm18696_vm1, %v18697_v11 }
 0x2a4   : > { %16166 = vmatmul.mubr.msk.f32.gmra.mrb[192].mxu0 %vm520_vm0, %v4339_v36  ;;  %v5141_v36 = vld [vmem:[#allocation2 + $0xbb] sm:$0xff] }
 0x2a5   : > { %16168 = vmatprep.mubr.msk.f32.mxu0 %vm18696_vm1, %v18697_v11 }
 0x2a6   : > { %16205 = vmatmul.mubr.msk.f32.gmra.mrb[192].mxu1 %vm520_vm0, %v4341_v27 }
 0x2a7   : > { %16207 = vmatprep.mubr.msk.f32.mxu1 %vm18696_vm1, %v18697_v11 }
 0x2a8   : > { %16169 = vmatmul.mubr.msk.f32.gmra.mrb[194].mxu0 %vm520_vm0, %v4340_v39  ;;  %v5142_v39 = vld [vmem:[#allocation2 + $0xc3] sm:$0xff] }
 0x2a9   : > { %16171 = vmatprep.mubr.msk.f32.mxu0 %vm18696_vm1, %v18697_v11 }
 0x2aa   : > { %16208 = vmatmul.mubr.msk.f32.gmra.mrb[194].mxu1 %vm520_vm0, %v4342_v14 }
 0x2ab   : > { %16210 = vmatprep.mubr.msk.f32.mxu1 %vm18696_vm1, %v18697_v11 }
 0x2ac   : > { %16172 = vmatmul.mubr.msk.f32.gmra.mrb[196].mxu0 %vm520_vm0, %v4341_v27  ;;  %v5143_v27 = vld [vmem:[#allocation2 + $0xcb] sm:$0xff] }
 0x2ad   : > { %16174 = vmatprep.mubr.msk.f32.mxu0 %vm18696_vm1, %v18697_v11 }
 0x2ae   : > { %16211 = vmatmul.mubr.msk.f32.gmra.mrb[196].mxu1 %vm520_vm0, %v4343_v28  ;;  %v5145_v28 = vld [vmem:[#allocation2 + $0xdb] sm:$0xff] }
 0x2af   : > { %16213 = vmatprep.mubr.msk.f32.mxu1 %vm18696_vm1, %v18697_v11 }
 0x2b0   : > { %16175 = vmatmul.mubr.msk.f32.gmra.mrb[198].mxu0 %vm520_vm0, %v4342_v14  ;;  %v5144_v14 = vld [vmem:[#allocation2 + $0xd3] sm:$0xff] }
 0x2b1   : > { %16228 = vmatprep.mubr.msk.f32.mxu0 %vm18696_vm1, %v18697_v11 }
 0x2b2   : > { %16214 = vmatmul.mubr.msk.f32.gmra.mrb[198].mxu1 %vm520_vm0, %v4344_v45  ;;  %v5148_v45 = vld [vmem:[#allocation2 + $0xf3] sm:$0xff] }
 0x2b3   : > { %16267 = vmatprep.mubr.msk.f32.mxu1 %vm18696_vm1, %v18697_v11 }
 0x2b4   : > { %16229 = vmatmul.mubr.msk.f32.vlgmr.msra.gmra.mrb[200].mxu0 %vm520_vm0, %v4497_v4 }
 0x2b5   : > { %16231 = vmatprep.mubr.msk.f32.mxu0 %vm18696_vm1, %v18697_v11  ;;  %17800 = vmatpush3.bf16.msra.mxu0 %v17799_v21 }
 0x2b6   : > { %16268 = vmatmul.mubr.msk.f32.vlgmr.msra.gmra.mrb[200].mxu1 %vm520_vm0, %v4658_v7  ;;  %17801 = vmatprep.subr.bf16.mxu0 %v18695_v3 }
 0x2b7   : > { %16270 = vmatprep.mubr.msk.f32.mxu1 %vm18696_vm1, %v18697_v11  ;;  %17809 = vmatpush3.bf16.msra.mxu1 %v17808_v60 }
 0x2b8   : > { %16232 = vmatmul.mubr.msk.f32.gmra.mrb[202].mxu0 %vm520_vm0, %v4498_v37  ;;  %17810 = vmatprep.subr.bf16.mxu1 %v18695_v3 }
 0x2b9   : > { %16234 = vmatprep.mubr.msk.f32.mxu0 %vm18696_vm1, %v18697_v11  ;;  %17803 = vmatpush3.bf16.msra.mxu0 %v17802_v53 }
 0x2ba   : > { %16271 = vmatmul.mubr.msk.f32.gmra.mrb[202].mxu1 %vm520_vm0, %v4659_v46  ;;  %17804 = vmatprep.subr.bf16.mxu0 %v18695_v3 }
 0x2bb   : > { %16273 = vmatprep.mubr.msk.f32.mxu1 %vm18696_vm1, %v18697_v11  ;;  %17812 = vmatpush3.bf16.msra.mxu1 %v17811_v10 }
 0x2bc   : > { %16235 = vmatmul.mubr.msk.f32.gmra.mrb[204].mxu0 %vm520_vm0, %v4499_v16  ;;  %17813 = vmatprep.subr.bf16.mxu1 %v18695_v3 }
 0x2bd   : > { %16237 = vmatprep.mubr.msk.f32.mxu0 %vm18696_vm1, %v18697_v11  ;;  %17806 = vmatpush3.bf16.msra.mxu0 %v17805_v51 }
 0x2be   : > { %16274 = vmatmul.mubr.msk.f32.gmra.mrb[204].mxu1 %vm520_vm0, %v4660_v48  ;;  %17816 = vmatprep.subr.bf16.mxu0 %v18695_v3 }
 0x2bf   : > { %16276 = vmatprep.mubr.msk.f32.mxu1 %vm18696_vm1, %v18697_v11  ;;  %17815 = vmatpush3.bf16.msra.mxu1 %v17814_v23 }
 0x2c0   : > { %16238 = vmatmul.mubr.msk.f32.gmra.mrb[206].mxu0 %vm520_vm0, %v4500_v12  ;;  %17837 = vmatprep.subr.bf16.mxu1 %v18695_v3 }
 0x2c1   : > { %16240 = vmatprep.mubr.msk.f32.mxu0 %vm18696_vm1, %v18697_v11 }
 0x2c2   : > { %16277 = vmatmul.mubr.msk.f32.gmra.mrb[206].mxu1 %vm520_vm0, %v4661_v30 }
 0x2c3   : > { %16279 = vmatprep.mubr.msk.f32.mxu1 %vm18696_vm1, %v18697_v11 }
 0x2c4   : > { %16241 = vmatmul.mubr.msk.f32.gmra.mrb[208].mxu0 %vm520_vm0, %v4501_v52 }
 0x2c5   : > { %16243 = vmatprep.mubr.msk.f32.mxu0 %vm18696_vm1, %v18697_v11 }
 0x2c6   : > { %16280 = vmatmul.mubr.msk.f32.gmra.mrb[208].mxu1 %vm520_vm0, %v4662_v61 }
 0x2c7   : > { %16282 = vmatprep.mubr.msk.f32.mxu1 %vm18696_vm1, %v18697_v11 }
 0x2c8   : > { %16244 = vmatmul.mubr.msk.f32.gmra.mrb[210].mxu0 %vm520_vm0, %v4502_v8 }
 0x2c9   : > { %16246 = vmatprep.mubr.msk.f32.mxu0 %vm18696_vm1, %v18697_v11 }
 0x2ca   : > { %16283 = vmatmul.mubr.msk.f32.gmra.mrb[210].mxu1 %vm520_vm0, %v4663_v57 }
 0x2cb   : > { %16285 = vmatprep.mubr.msk.f32.mxu1 %vm18696_vm1, %v18697_v11 }
 0x2cc   : > { %16247 = vmatmul.mubr.msk.f32.gmra.mrb[212].mxu0 %vm520_vm0, %v4503_v17 }
 0x2cd   : > { %16249 = vmatprep.mubr.msk.f32.mxu0 %vm18696_vm1, %v18697_v11 }
 0x2ce   : > { %16286 = vmatmul.mubr.msk.f32.gmra.mrb[212].mxu1 %vm520_vm0, %v4664_v54 }
 0x2cf   : > { %16288 = vmatprep.mubr.msk.f32.mxu1 %vm18696_vm1, %v18697_v11 }
 0x2d0   : > { %16250 = vmatmul.mubr.msk.f32.gmra.mrb[214].mxu0 %vm520_vm0, %v4504_v55 }
 0x2d1   : > { %16252 = vmatprep.mubr.msk.f32.mxu0 %vm18696_vm1, %v18697_v11 }
 0x2d2   : > { %16289 = vmatmul.mubr.msk.f32.gmra.mrb[214].mxu1 %vm520_vm0, %v4665_v50 }
 0x2d3   : > { %16291 = vmatprep.mubr.msk.f32.mxu1 %vm18696_vm1, %v18697_v11 }
 0x2d4   : > { %16253 = vmatmul.mubr.msk.f32.gmra.mrb[216].mxu0 %vm520_vm0, %v4505_v44 }
 0x2d5   : > { %16306 = vmatprep.mubr.msk.f32.mxu0 %vm18696_vm1, %v18697_v11 }
 0x2d6   : > { %16292 = vmatmul.mubr.msk.f32.gmra.mrb[216].mxu1 %vm520_vm0, %v4666_v15 }
 0x2d7   : > { %16345 = vmatprep.mubr.msk.f32.mxu1 %vm18696_vm1, %v18697_v11 }
 0x2d8   : > { %16307 = vmatmul.mubr.msk.f32.vlgmr.msra.gmra.mrb[218].mxu0 %vm520_vm0, %v4660_v48 }
 0x2d9   : > { %16309 = vmatprep.mubr.msk.f32.mxu0 %vm18696_vm1, %v18697_v11  ;;  %17818 = vmatpush3.bf16.msra.mxu0 %v17817_v0 }
 0x2da   : > { %16346 = vmatmul.mubr.msk.f32.vlgmr.msra.gmra.mrb[218].mxu1 %vm520_vm0, %v4980_v25  ;;  %17819 = vmatprep.subr.bf16.mxu0 %v18695_v3 }
 0x2db   : > { %16348 = vmatprep.mubr.msk.f32.mxu1 %vm18696_vm1, %v18697_v11 }
 0x2dc   : > { %16310 = vmatmul.mubr.msk.f32.gmra.mrb[220].mxu0 %vm520_vm0, %v4661_v30 }
 0x2dd   : > { %16312 = vmatprep.mubr.msk.f32.mxu0 %vm18696_vm1, %v18697_v11  ;;  %17821 = vmatpush3.bf16.msra.mxu0 %v17820_v40 }
 0x2de   : > { %16349 = vmatmul.mubr.msk.f32.gmra.mrb[220].mxu1 %vm520_vm0, %v4981_v35  ;;  %17822 = vmatprep.subr.bf16.mxu0 %v18695_v3 }
 0x2df   : > { %16351 = vmatprep.mubr.msk.f32.mxu1 %vm18696_vm1, %v18697_v11 }
 0x2e0   : > { %16313 = vmatmul.mubr.msk.f32.gmra.mrb[222].mxu0 %vm520_vm0, %v4662_v61 }
 0x2e1   : > { %16315 = vmatprep.mubr.msk.f32.mxu0 %vm18696_vm1, %v18697_v11  ;;  %17824 = vmatpush3.bf16.msra.mxu0 %v17823_v31 }
 0x2e2   : > { %16352 = vmatmul.mubr.msk.f32.gmra.mrb[222].mxu1 %vm520_vm0, %v4982_v43  ;;  %17825 = vmatprep.subr.bf16.mxu0 %v18695_v3 }
 0x2e3   : > { %16354 = vmatprep.mubr.msk.f32.mxu1 %vm18696_vm1, %v18697_v11 }
 0x2e4   : > { %16316 = vmatmul.mubr.msk.f32.gmra.mrb[224].mxu0 %vm520_vm0, %v4663_v57 }
 0x2e5   : > { %16318 = vmatprep.mubr.msk.f32.mxu0 %vm18696_vm1, %v18697_v11 }
 0x2e6   : > { %16355 = vmatmul.mubr.msk.f32.gmra.mrb[224].mxu1 %vm520_vm0, %v4983_v47 }
 0x2e7   : > { %16357 = vmatprep.mubr.msk.f32.mxu1 %vm18696_vm1, %v18697_v11 }
 0x2e8   : > { %16319 = vmatmul.mubr.msk.f32.gmra.mrb[226].mxu0 %vm520_vm0, %v4664_v54 }
 0x2e9   : > { %16321 = vmatprep.mubr.msk.f32.mxu0 %vm18696_vm1, %v18697_v11 }
 0x2ea   : > { %16358 = vmatmul.mubr.msk.f32.gmra.mrb[226].mxu1 %vm520_vm0, %v4984_v42 }
 0x2eb   : > { %16360 = vmatprep.mubr.msk.f32.mxu1 %vm18696_vm1, %v18697_v11 }
 0x2ec   : > { %16322 = vmatmul.mubr.msk.f32.gmra.mrb[228].mxu0 %vm520_vm0, %v4665_v50 }
 0x2ed   : > { %16324 = vmatprep.mubr.msk.f32.mxu0 %vm18696_vm1, %v18697_v11 }
 0x2ee   : > { %16361 = vmatmul.mubr.msk.f32.gmra.mrb[228].mxu1 %vm520_vm0, %v4985_v22 }
 0x2ef   : > { %16363 = vmatprep.mubr.msk.f32.mxu1 %vm18696_vm1, %v18697_v11 }
 0x2f0   : > { %16325 = vmatmul.mubr.msk.f32.gmra.mrb[230].mxu0 %vm520_vm0, %v4666_v15 }
 0x2f1   : > { %16327 = vmatprep.mubr.msk.f32.mxu0 %vm18696_vm1, %v18697_v11 }
 0x2f2   : > { %16364 = vmatmul.mubr.msk.f32.gmra.mrb[230].mxu1 %vm520_vm0, %v4986_v38 }
 0x2f3   : > { %16366 = vmatprep.mubr.msk.f32.mxu1 %vm18696_vm1, %v18697_v11 }
 0x2f4   : > { %16328 = vmatmul.mubr.msk.f32.gmra.mrb[232].mxu0 %vm520_vm0, %v4826_v29 }
 0x2f5   : > { %16330 = vmatprep.mubr.msk.f32.mxu0 %vm18696_vm1, %v18697_v11 }
 0x2f6   : > { %16367 = vmatmul.mubr.msk.f32.gmra.mrb[232].mxu1 %vm520_vm0, %v4987_v2 }
 0x2f7   : > { %16369 = vmatprep.mubr.msk.f32.mxu1 %vm18696_vm1, %v18697_v11 }
 0x2f8   : > { %16331 = vmatmul.mubr.msk.f32.gmra.mrb[234].mxu0 %vm520_vm0, %v4827_v56 }
 0x2f9   : > { %16384 = vmatprep.mubr.msk.f32.mxu0 %vm18696_vm1, %v18697_v11 }
 0x2fa   : > { %16370 = vmatmul.mubr.msk.f32.gmra.mrb[234].mxu1 %vm520_vm0, %v4988_v63 }
 0x2fb   : > { %16450 = vmatprep.mubr.msk.f32.mxu1 %vm18696_vm1, %v18697_v11 }
 0x2fc   : > { %16385 = vmatmul.mubr.msk.f32.vlgmr.msra.gmra.mrb[236].mxu0 %vm520_vm0, %v5141_v36 }
 0x2fd   : > { %16387 = vmatprep.mubr.msk.f32.mxu0 %vm18696_vm1, %v18697_v11 }
 0x300   : > { %16388 = vmatmul.mubr.msk.f32.gmra.mrb[238].mxu0 %vm520_vm0, %v5142_v39 }
 0x301   : > { %16390 = vmatprep.mubr.msk.f32.mxu0 %vm18696_vm1, %v18697_v11 }
 0x304   : > { %16391 = vmatmul.mubr.msk.f32.gmra.mrb[240].mxu0 %vm520_vm0, %v5143_v27 }
 0x305   : > { %16393 = vmatprep.mubr.msk.f32.mxu0 %vm18696_vm1, %v18697_v11 }
 0x308   : > { %16394 = vmatmul.mubr.msk.f32.gmra.mrb[242].mxu0 %vm520_vm0, %v5144_v14 }
 0x309   : > { %16396 = vmatprep.mubr.msk.f32.mxu0 %vm18696_vm1, %v18697_v11 }
 0x30c   : > { %16397 = vmatmul.mubr.msk.f32.gmra.mrb[244].mxu0 %vm520_vm0, %v5145_v28 }
 0x30d   : > { %16399 = vmatprep.mubr.msk.f32.mxu0 %vm18696_vm1, %v18697_v11 }
 0x310   : > { %16400 = vmatmul.mubr.msk.f32.gmra.mrb[246].mxu0 %vm520_vm0, %v5146_v32 }
 0x311   : > { %16402 = vmatprep.mubr.msk.f32.mxu0 %vm18696_vm1, %v18697_v11 }
 0x314   : > { %16403 = vmatmul.mubr.msk.f32.gmra.mrb[248].mxu0 %vm520_vm0, %v5147_v24 }
 0x315   : > { %16405 = vmatprep.mubr.msk.f32.mxu0 %vm18696_vm1, %v18697_v11 }
 0x318   : > { %16406 = vmatmul.mubr.msk.f32.gmra.mrb[250].mxu0 %vm520_vm0, %v5148_v45 }
 0x319   : > { %16408 = vmatprep.mubr.msk.f32.mxu0 %vm18696_vm1, %v18697_v11 }
 0x31c   : > { %16409 = vmatmul.mubr.msk.f32.gmra.mrb[252].mxu0 %vm520_vm0, %v5149_v20 }
 0x31d   : > { %16429 = vmatprep.mubr.msk.f32.mxu0 %vm18696_vm1, %v18697_v11 }
 0x33f   : > { %v3994_v6 = vpop.f32.mrb[164].mxu0 }
 0x340   : > { %v16074_v4 = vpop.f32.mrb[165].mxu0 }
 0x341   : > { %v4131_v21 = vpop.f32.mrb[164].mxu1 }
 0x342   : > { %v16113_v5 = vpop.f32.mrb[165].mxu1  ;;  %v4132_v26 = vadd.f32 %v4131_v21, %v3994_v6 }
 0x343   : > { %v3999_v7 = vpop.f32.mrb[166].mxu0 }
 0x344   : > { %v16077_v60 = vpop.f32.mrb[167].mxu0 }
 0x345   : > { %v4136_v59 = vpop.f32.mrb[166].mxu1 }
 0x346   : > { %v16116_v41 = vpop.f32.mrb[167].mxu1  ;;  %v4137_v37 = vadd.f32 %v4136_v59, %v3999_v7 }
 0x347   : > { %v4004_v53 = vpop.f32.mrb[168].mxu0 }
 0x348   : > { %v16080_v9 = vpop.f32.mrb[169].mxu0 }
 0x349   : > { %v4141_v34 = vpop.f32.mrb[168].mxu1 }
 0x34a   : > { %v16119_v46 = vpop.f32.mrb[169].mxu1  ;;  %v4142_v10 = vadd.f32 %v4141_v34, %v4004_v53 }
 0x34b   : > { %v4009_v1 = vpop.f32.mrb[170].mxu0 }
 0x34c   : > { %v16083_v49 = vpop.f32.mrb[171].mxu0 }
 0x34d   : > { %v4146_v16 = vpop.f32.mrb[170].mxu1 }
 0x34e   : > { %v16122_v51 = vpop.f32.mrb[171].mxu1  ;;  %v4147_v48 = vadd.f32 %v4146_v16, %v4009_v1 }
 0x34f   : > { %v4014_v23 = vpop.f32.mrb[172].mxu0 }
 0x350   : > { %v16086_v12 = vpop.f32.mrb[173].mxu0 }
 0x351   : > { %v4151_v30 = vpop.f32.mrb[172].mxu1 }
 0x352   : > { %v16125_v52 = vpop.f32.mrb[173].mxu1  ;;  %v4152_v61 = vadd.f32 %v4151_v30, %v4014_v23 }
 0x353   : > { %v4019_v8 = vpop.f32.mrb[174].mxu0 }
 0x354   : > { %v16089_v57 = vpop.f32.mrb[175].mxu0 }
 0x355   : > { %v4156_v17 = vpop.f32.mrb[174].mxu1 }
 0x356   : > { %v4157_v54 = vadd.f32 %v4156_v17, %v4019_v8  ;;  %v16128_v55 = vpop.f32.mrb[175].mxu1 }
 0x357   : > { %v4024_v50 = vpop.f32.mrb[176].mxu0 }
 0x358   : > { %v16092_v44 = vpop.f32.mrb[177].mxu0 }
 0x359   : > { %v4161_v58 = vpop.f32.mrb[176].mxu1 }
 0x35a   : > { %v16131_v18 = vpop.f32.mrb[177].mxu1  ;;  %v4162_v15 = vadd.f32 %v4161_v58, %v4024_v50 }
 0x35b   : > { %v4029_v0 = vpop.f32.mrb[178].mxu0 }
 0x35c   : > { %v16095_v62 = vpop.f32.mrb[179].mxu0 }
 0x35d   : > { %v4166_v19 = vpop.f32.mrb[178].mxu1 }
 0x35e   : > { %v16134_v25 = vpop.f32.mrb[179].mxu1  ;;  %v4167_v40 = vadd.f32 %v4166_v19, %v4029_v0 }
 0x35f   : > { %v4034_v33 = vpop.f32.mrb[180].mxu0 }
 0x360   : > { %v16098_v13 = vpop.f32.mrb[181].mxu0 }
 0x361   : > { %v4171_v35 = vpop.f32.mrb[180].mxu1 }
 0x362   : > { %v4172_v31 = vadd.f32 %v4171_v35, %v4034_v33  ;;  %v16137_v43 = vpop.f32.mrb[181].mxu1 }
 0x363   : > { %v4283_v47 = vpop.f32.mrb[182].mxu0 }
 0x364   : > { %v4327_v42 = vadd.f32 %v4283_v47, %v4132_v26  ;;  %v16152_v22 = vpop.f32.mrb[183].mxu0 }
 0x365   : > { %v4444_v38 = vpop.f32.mrb[182].mxu1 }
 0x366   : > { %v4488_v29 = vadd.f32 %v4444_v38, %v4327_v42  ;;  %v16191_v2 = vpop.f32.mrb[183].mxu1 }
 0x367   : > { %v4288_v56 = vpop.f32.mrb[184].mxu0 }
 0x368   : > { %v4328_v63 = vadd.f32 %v4288_v56, %v4137_v37  ;;  %v16155_v36 = vpop.f32.mrb[185].mxu0 }
 0x369   : > { %v4449_v39 = vpop.f32.mrb[184].mxu1 }
 0x36a   : > { %v4489_v27 = vadd.f32 %v4449_v39, %v4328_v63  ;;  %v16194_v14 = vpop.f32.mrb[185].mxu1  ;;  %v610_v39 = vld [vmem:[%s19028_s26 + $0xf0] sm:$0xff] }
 0x36b   : > { %v4293_v28 = vpop.f32.mrb[186].mxu0  ;;  %646 = vst.msk [vmem:[#allocation2 + $0x108] sm:$0xff] %vm520_vm0, %v610_v39 }
 0x36c   : > { %v4329_v32 = vadd.f32 %v4293_v28, %v4142_v10  ;;  %v16158_v24 = vpop.f32.mrb[187].mxu0 }
 0x36d   : > { %v4454_v45 = vpop.f32.mrb[186].mxu1 }
 0x36e   : > { %v4490_v20 = vadd.f32 %v4454_v45, %v4329_v32  ;;  %v16197_v6 = vpop.f32.mrb[187].mxu1 }
 0x36f   : > { %v4298_v4 = vpop.f32.mrb[188].mxu0 }
 0x370   : > { %v4330_v21 = vadd.f32 %v4298_v4, %v4147_v48  ;;  %v16161_v5 = vpop.f32.mrb[189].mxu0 }
 0x371   : > { %v4459_v26 = vpop.f32.mrb[188].mxu1 }
 0x372   : > { %v4491_v7 = vadd.f32 %v4459_v26, %v4330_v21  ;;  %v16200_v60 = vpop.f32.mrb[189].mxu1 }
 0x373   : > { %v4303_v59 = vpop.f32.mrb[190].mxu0 }
 0x374   : > { %v4331_v41 = vadd.f32 %v4303_v59, %v4152_v61  ;;  %v16164_v53 = vpop.f32.mrb[191].mxu0 }
 0x375   : > { %v4464_v37 = vpop.f32.mrb[190].mxu1 }
 0x376   : > { %v4492_v9 = vadd.f32 %v4464_v37, %v4331_v41  ;;  %v16203_v34 = vpop.f32.mrb[191].mxu1  ;;  %v612_v41 = vld [vmem:[%s19028_s26 + $0x100] sm:$0xff] }
 0x377   : > { %v4308_v46 = vpop.f32.mrb[192].mxu0  ;;  %648 = vst.msk [vmem:[#allocation2 + $0x118] sm:$0xff] %vm520_vm0, %v612_v41 }
 0x378   : > { %v4332_v1 = vadd.f32 %v4308_v46, %v4157_v54  ;;  %v16167_v49 = vpop.f32.mrb[193].mxu0  ;;  %v613_v46 = vld [vmem:[%s19028_s26 + $0x108] sm:$0xff] }
 0x379   : > { %v4469_v10 = vpop.f32.mrb[192].mxu1  ;;  %649 = vst.msk [vmem:[#allocation2 + $0x120] sm:$0xff] %vm520_vm0, %v613_v46 }
 0x37a   : > { %v4493_v16 = vadd.f32 %v4469_v10, %v4332_v1  ;;  %v16206_v51 = vpop.f32.mrb[193].mxu1 }
 0x37b   : > { %v4313_v23 = vpop.f32.mrb[194].mxu0 }
 0x37c   : > { %v4333_v12 = vadd.f32 %v4313_v23, %v4162_v15  ;;  %v16170_v30 = vpop.f32.mrb[195].mxu0 }
 0x37d   : > { %v4474_v48 = vpop.f32.mrb[194].mxu1 }
 0x37e   : > { %v4494_v52 = vadd.f32 %v4474_v48, %v4333_v12  ;;  %v16209_v8 = vpop.f32.mrb[195].mxu1 }
 0x37f   : > { %v4318_v57 = vpop.f32.mrb[196].mxu0 }
 0x380   : > { %v4334_v17 = vadd.f32 %v4318_v57, %v4167_v40  ;;  %v16173_v55 = vpop.f32.mrb[197].mxu0 }
 0x381   : > { %v4479_v61 = vpop.f32.mrb[196].mxu1 }
 0x382   : > { %v4495_v50 = vadd.f32 %v4479_v61, %v4334_v17  ;;  %v16212_v44 = vpop.f32.mrb[197].mxu1 }
 0x383   : > { %v4323_v58 = vpop.f32.mrb[198].mxu0 }
 0x384   : > { %v4335_v18 = vadd.f32 %v4323_v58, %v4172_v31  ;;  %v16176_v0 = vpop.f32.mrb[199].mxu0 }
 0x385   : > { %v4484_v54 = vpop.f32.mrb[198].mxu1 }
 0x386   : > { %v4496_v62 = vadd.f32 %v4484_v54, %v4335_v18  ;;  %v16215_v19 = vpop.f32.mrb[199].mxu1 }
 0x387   : > { %v4605_v25 = vpop.f32.mrb[200].mxu0 }
 0x388   : > { %v4649_v33 = vadd.f32 %v4605_v25, %v4488_v29  ;;  %v16230_v15 = vpop.f32.mrb[201].mxu0 }
 0x389   : > { %v4766_v13 = vpop.f32.mrb[200].mxu1 }
 0x38a   : > { %v4810_v35 = vadd.f32 %v4766_v13, %v4649_v33  ;;  %v16269_v43 = vpop.f32.mrb[201].mxu1 }
 0x38b   : > { %v4610_v47 = vpop.f32.mrb[202].mxu0 }
 0x38c   : > { %v4650_v42 = vadd.f32 %v4610_v47, %v4489_v27  ;;  %v16233_v40 = vpop.f32.mrb[203].mxu0  ;;  %v611_v27 = vld [vmem:[%s19028_s26 + $0xf8] sm:$0xff] }
 0x38d   : > { %v4771_v22 = vpop.f32.mrb[202].mxu1  ;;  %647 = vst.msk [vmem:[#allocation2 + $0x110] sm:$0xff] %vm520_vm0, %v611_v27 }
 0x38e   : > { %v4811_v38 = vadd.f32 %v4771_v22, %v4650_v42  ;;  %v16272_v2 = vpop.f32.mrb[203].mxu1 }
 0x38f   : > { %v4615_v56 = vpop.f32.mrb[204].mxu0 }
 0x390   : > { %v4651_v31 = vadd.f32 %v4615_v56, %v4490_v20  ;;  %v16236_v63 = vpop.f32.mrb[205].mxu0 }
 0x391   : > { %v4776_v36 = vpop.f32.mrb[204].mxu1 }
 0x392   : > { %v4812_v14 = vadd.f32 %v4776_v36, %v4651_v31  ;;  %v16275_v28 = vpop.f32.mrb[205].mxu1 }
 0x393   : > { %v4620_v29 = vpop.f32.mrb[206].mxu0 }
 0x394   : > { %v4652_v32 = vadd.f32 %v4620_v29, %v4491_v7  ;;  %v16239_v24 = vpop.f32.mrb[207].mxu0 }
 0x395   : > { %v4781_v45 = vpop.f32.mrb[206].mxu1 }
 0x396   : > { %v4813_v6 = vadd.f32 %v4781_v45, %v4652_v32  ;;  %v16278_v4 = vpop.f32.mrb[207].mxu1 }
 0x397   : > { %v4625_v21 = vpop.f32.mrb[208].mxu0 }
 0x398   : > { %v4653_v20 = vadd.f32 %v4625_v21, %v4492_v9  ;;  %v16242_v5 = vpop.f32.mrb[209].mxu0 }
 0x399   : > { %v4786_v26 = vpop.f32.mrb[208].mxu1  ;;  %v614_v5 = vld [vmem:[%s19028_s26 + $0x110] sm:$0xff] }
 0x39a   : > { %v4814_v60 = vadd.f32 %v4786_v26, %v4653_v20  ;;  %v16281_v59 = vpop.f32.mrb[209].mxu1  ;;  %650 = vst.msk [vmem:[#allocation2 + $0x128] sm:$0xff] %vm520_vm0, %v614_v5 }
 0x39b   : > { %v4630_v53 = vpop.f32.mrb[210].mxu0 }
 0x39c   : > { %v4654_v37 = vadd.f32 %v4630_v53, %v4493_v16  ;;  %v16245_v7 = vpop.f32.mrb[211].mxu0 }
 0x39d   : > { %v4791_v34 = vpop.f32.mrb[210].mxu1  ;;  %v615_v7 = vld [vmem:[%s19028_s26 + $0x118] sm:$0xff]  ;;  %s18700_s26 = smov [#allocation5]  }
 0x39e   : > { %v4815_v1 = vadd.f32 %v4791_v34, %v4654_v37  ;;  %v16284_v49 = vpop.f32.mrb[211].mxu1  ;;  %651 = vst.msk [vmem:[#allocation2 + $0x130] sm:$0xff] %vm520_vm0, %v615_v7  ;;  %s18635_s20 = sshll.u32 %s18700_s26, 4  ;;  %s18636_s20 = int_to_ptr.vmem [resolvable:$false] %s18635_s20 }
 0x39f   : > { %v4635_v10 = vpop.f32.mrb[212].mxu0  ;;  %s18637_s21 = scalar_lea.vmem %s18636_s20, 32  ;;  %p18638_p0 = scmp.lt.s32.totalorder %s22661_s18, %s18636_s20 }
 0x3a0   : > { %v4655_v51 = vadd.f32 %v4635_v10, %v4494_v52  ;;  %v16248_v23 = vpop.f32.mrb[213].mxu0  ;;  %p18639_p1 = scmp.lt.s32.totalorder %s18637_s21, %s18631_s30 }
 0x3a1   : > { %v4796_v9 = vpop.f32.mrb[212].mxu1 }
 0x3a2   : > { %v4816_v12 = vadd.f32 %v4796_v9, %v4655_v51  ;;  %v16287_v30 = vpop.f32.mrb[213].mxu1  ;;  %p18640_p2 = por %p18639_p1, %p18638_p0 }
 0x3a3   : > { %v4640_v48 = vpop.f32.mrb[214].mxu0 }
 0x3a4   : > { %v4656_v8 = vadd.f32 %v4640_v48, %v4495_v50  ;;  %v16251_v57 = vpop.f32.mrb[215].mxu0  ;;  %p18641_p3 = pnand %p18640_p2, %p18634_p13 }
 0x3a5   : > { %v4801_v17 = vpop.f32.mrb[214].mxu1 }
 0x3a6   : > { %v4817_v55 = vadd.f32 %v4801_v17, %v4656_v8  ;;  %v16290_v61 = vpop.f32.mrb[215].mxu1 }
 0x3a7   : > { %v4645_v16 = vpop.f32.mrb[216].mxu0 }
 0x3a8   : > { %v4657_v44 = vadd.f32 %v4645_v16, %v4496_v62  ;;  %v16254_v58 = vpop.f32.mrb[217].mxu0 }
 0x3a9   : > { %v4806_v18 = vpop.f32.mrb[216].mxu1  ;;  %v20672_v58 = vld [vmem:[%s22703_s2] ss:$0 sm:$0xff] }
 0x3aa   : > { %v4818_v0 = vadd.f32 %v4806_v18, %v4657_v44  ;;  %v16293_v54 = vpop.f32.mrb[217].mxu1 }
 0x3ab   : > { %v4927_v19 = vpop.f32.mrb[218].mxu0 }
 0x3ac   : > { %v4971_v25 = vadd.f32 %v4927_v19, %v4810_v35  ;;  %v16308_v33 = vpop.f32.mrb[219].mxu0 }
 0x3ad   : > { %v5088_v52 = vpop.f32.mrb[218].mxu1 }
 0x3ae   : > { %v5132_v15 = vadd.f32 %v5088_v52, %v4971_v25  ;;  %v16347_v13 = vpop.f32.mrb[219].mxu1 }
 0x3af   : > { %v4932_v43 = vpop.f32.mrb[220].mxu0 }
 0x3b0   : > { %v4972_v47 = vadd.f32 %v4932_v43, %v4811_v38  ;;  %v16311_v42 = vpop.f32.mrb[221].mxu0 }
 0x3b1   : > { %v5093_v50 = vpop.f32.mrb[220].mxu1 }
 0x3b2   : > { %v5133_v40 = vadd.f32 %v5093_v50, %v4972_v47  ;;  %v16350_v22 = vpop.f32.mrb[221].mxu1 }
 0x3b3   : > { %v4937_v2 = vpop.f32.mrb[222].mxu0 }
 0x3b4   : > { %v4973_v56 = vadd.f32 %v4937_v2, %v4812_v14  ;;  %v16314_v31 = vpop.f32.mrb[223].mxu0 }
 0x3b5   : > { %v5098_v62 = vpop.f32.mrb[222].mxu1 }
 0x3b6   : > { %v5134_v63 = vadd.f32 %v5098_v62, %v4973_v56  ;;  %v16353_v36 = vpop.f32.mrb[223].mxu1 }
 0x3b7   : > { %v4942_v39 = vpop.f32.mrb[224].mxu0 }
 0x3b8   : > { %v4974_v28 = vadd.f32 %v4942_v39, %v4813_v6  ;;  %v16317_v35 = vpop.f32.mrb[225].mxu0 }
 0x3b9   : > { %v5103_v29 = vpop.f32.mrb[224].mxu1 }
 0x3ba   : > { %v5135_v32 = vadd.f32 %v5103_v29, %v4974_v28  ;;  %v16356_v24 = vpop.f32.mrb[225].mxu1 }
 0x3bb   : > { %v4947_v45 = vpop.f32.mrb[226].mxu0 }
 0x3bc   : > { %v4975_v38 = vadd.f32 %v4947_v45, %v4814_v60  ;;  %v16320_v27 = vpop.f32.mrb[227].mxu0 }
 0x3bd   : > { %v5108_v4 = vpop.f32.mrb[226].mxu1 }
 0x3be   : > { %v20655_v21 = vadd.f32 %v5108_v4, %v4975_v38  ;;  %v16359_v20 = vpop.f32.mrb[227].mxu1 }
 0x3bf   : > { %v4952_v14 = vpop.f32.mrb[228].mxu0 }
 0x3c0   : > { %v4976_v26 = vadd.f32 %v4952_v14, %v4815_v1  ;;  %v16323_v59 = vpop.f32.mrb[229].mxu0 }
 0x3c1   : > { %v5113_v41 = vpop.f32.mrb[228].mxu1 }
 0x3c2   : > { %v20659_v6 = vadd.f32 %v5113_v41, %v4976_v26  ;;  %v16362_v53 = vpop.f32.mrb[229].mxu1 }
 0x3c3   : > { %v4957_v37 = vpop.f32.mrb[230].mxu0 }
 0x3c4   : > { %v4977_v34 = vadd.f32 %v4957_v37, %v4816_v12  ;;  %v16326_v46 = vpop.f32.mrb[231].mxu0 }
 0x3c5   : > { %v5118_v60 = vpop.f32.mrb[230].mxu1 }
 0x3c6   : > { %v20663_v49 = vadd.f32 %v5118_v60, %v4977_v34  ;;  %v16365_v10 = vpop.f32.mrb[231].mxu1 }
 0x3c7   : > { %v4962_v51 = vpop.f32.mrb[232].mxu0 }
 0x3c8   : > { %v4978_v23 = vadd.f32 %v4962_v51, %v4817_v55  ;;  %v16329_v1 = vpop.f32.mrb[233].mxu0 }
 0x3c9   : > { %v5123_v9 = vpop.f32.mrb[232].mxu1 }
 0x3ca   : > { %v20665_v30 = vadd.f32 %v5123_v9, %v4978_v23  ;;  %v16368_v48 = vpop.f32.mrb[233].mxu1 }
 0x3cb   : > { %v4967_v8 = vpop.f32.mrb[234].mxu0 }
 0x3cc   : > { %v4979_v57 = vadd.f32 %v4967_v8, %v4818_v0  ;;  %v16332_v17 = vpop.f32.mrb[235].mxu0 }
 0x3cd   : > { %v5128_v61 = vpop.f32.mrb[234].mxu1 }
 0x3ce   : > { %v20667_v16 = vadd.f32 %v5128_v61, %v4979_v57  ;;  %v16371_v12 = vpop.f32.mrb[235].mxu1 }
 0x3cf   : > { %v5249_v44 = vpop.f32.mrb[236].mxu0 }
 0x3d0   : > { %v5293_v18 = vadd.f32 %v5249_v44, %v5132_v15  ;;  %v16386_v55 = vpop.f32.mrb[237].mxu0  ;;  %v5486_v44 = vld [vmem:[%s22702_s1 + $0x8] sm:$0xff] }
 0x3d2   : > { %v5307_v54 = vadd.f32 %v20672_v58, %v5293_v18 }
 0x3d3   : > { %v5254_v19 = vpop.f32.mrb[238].mxu0 }
 0x3d4   : > { %5316 = vst.msk [vmem:[#allocation3 + $0x90] sm:$0xff] %vm520_vm0, %v5307_v54  ;;  %v5294_v25 = vadd.f32 %v5254_v19, %v5133_v40  ;;  %v16389_v0 = vpop.f32.mrb[239].mxu0  ;;  %v5396_v13 = vmul.f32 %v5307_v54, %v5307_v54 }
 0x3d6   : > { %v5308_v33 = vadd.f32 %v20672_v58, %v5294_v25  ;;  %v5488_v25 = vld [vmem:[%s22702_s1 + $0x18] sm:$0xff] }
 0x3d7   : > { %v5259_v52 = vpop.f32.mrb[240].mxu0 }
 0x3d8   : > { %5317 = vst.msk [vmem:[#allocation3 + $0x98] sm:$0xff] %vm520_vm0, %v5308_v33  ;;  %v17826_v43 = vpack.c.bf16 %v5308_v33, %v5307_v54  ;;  %v5397_v47 = vmul.f32 %v5308_v33, %v5308_v33  ;;  %v5295_v42 = vadd.f32 %v5259_v52, %v5134_v63  ;;  %v16392_v50 = vpop.f32.mrb[241].mxu0  ;;  %v13715_v54 = vld [vmem:[%s22702_s1 + $0x38] sm:$0xff]  ;;  %v13716_v52 = vld [vmem:[%s22702_s1 + $0x40] sm:$0xff] }
 0x3da   : > { %v5309_v15 = vadd.f32 %v20672_v58, %v5295_v42  ;;  %17827 = vmatpush3.bf16.msra.mxu0 %v17826_v43  ;;  %v17838_v22 = vpack.c.bf16 %v5397_v47, %v5396_v13  ;;  %v18629_v47 = vld [vmem:[%s22704_s3] sm:$0x1]  ;;  %v13717_v42 = vld [vmem:[%s22702_s1 + $0x48] sm:$0xff] }
 0x3db   : > { %v5264_v2 = vpop.f32.mrb[242].mxu0  ;;  %17828 = vmatprep.subr.bf16.mxu0 %v18695_v3 }
 0x3dc   : > { %5318 = vst.msk [vmem:[#allocation3 + $0xa0] sm:$0xff] %vm520_vm0, %v5309_v15  ;;  %v5296_v40 = vadd.f32 %v5264_v2, %v5135_v32  ;;  %v16395_v56 = vpop.f32.mrb[243].mxu0  ;;  %17839 = vmatpush3.bf16.msra.mxu1 %v17838_v22  ;;  %v5398_v63 = vmul.f32 %v5309_v15, %v5309_v15  ;;  %v5489_v22 = vld [vmem:[%s22702_s1 + $0x20] sm:$0xff]  ;;  %v5490_v2 = vld [vmem:[%s22702_s1 + $0x28] sm:$0xff] }
 0x3dd   : > { %17840 = vmatprep.subr.bf16.mxu1 %v18695_v3  ;;  %v13718_v56 = vld [vmem:[%s22702_s1 + $0x50] sm:$0xff] }
 0x3de   : > { %v5310_v31 = vadd.f32 %v20672_v58, %v5296_v40  ;;  %v17853_v40 = vpack.c.bf16 %v13717_v42, %v13716_v52  ;;  %v5942_v52 = vld [vmem:[#allocation2 + $0xf7] sm:$0xff]  ;;  %v5781_v42 = vld [vmem:[#allocation2 + $0xe7] sm:$0xff] }
 0x3df   : > { %v7410_v62 = vld [vmem:[#allocation3 + $0x90] ss:$2 sm:$0xff]  ;;  %v7446_v36 = vld [vmem:[#allocation3 + $0x91] ss:$2 sm:$0xff]  ;;  %v5269_v39 = vpop.f32.mrb[244].mxu0 }
 0x3e0   : > { %v7472_v28 = vmax.f32 %v7410_v62, %v7446_v36  ;;  %5319 = vst.msk [vmem:[#allocation3 + $0xa8] sm:$0xff] %vm520_vm0, %v5310_v31  ;;  %v17829_v35 = vpack.c.bf16 %v5310_v31, %v5309_v15  ;;  %v5399_v29 = vmul.f32 %v5310_v31, %v5310_v31  ;;  %v5297_v24 = vadd.f32 %v5269_v39, %v20655_v21  ;;  %v16398_v45 = vpop.f32.mrb[245].mxu0  ;;  %v13719_v31 = vld [vmem:[%s22702_s1 + $0x58] sm:$0xff]  ;;  %v13753_v36 = vld [vmem:[%s22702_s1 + $0x90] sm:$0xff] }
 0x3e1   : > { %v17865_v62 = vpack.c.bf16 %v5490_v2, %v5489_v22  ;;  %v17856_v39 = vpack.c.bf16 %v13719_v31, %v13718_v56  ;;  %v13755_v45 = vld [vmem:[%s22702_s1 + $0xa0] sm:$0xff]  ;;  %v13773_v22 = vld [vmem:[%s22702_s1 + $0xe8] sm:$0xff] }
 0x3e2   : > { %7490 = vst.msk [vmem:[#allocation4 + $0x48] sm:$0xff] %vm520_vm0, %v7472_v28  ;;  %v5311_v32 = vadd.f32 %v20672_v58, %v5297_v24  ;;  %17830 = vmatpush3.bf16.msra.mxu0 %v17829_v35  ;;  %v17841_v38 = vpack.c.bf16 %v5399_v29, %v5398_v63  ;;  %v13754_v63 = vld [vmem:[%s22702_s1 + $0x98] sm:$0xff]  ;;  %v13738_v28 = vld [vmem:[%s22702_s1 + $0x60] sm:$0xff]  ;;  %v13739_v35 = vld [vmem:[%s22702_s1 + $0x68] sm:$0xff] }
 0x3e3   : > { %v5274_v27 = vpop.f32.mrb[246].mxu0  ;;  %17831 = vmatprep.subr.bf16.mxu0 %v18695_v3  ;;  %v5476_v29 = vld [vmem:[#allocation2 + $0xdd] sm:$0xff]  ;;  %v17877_v24 = vpack.c.bf16 %v13754_v63, %v13753_v36  ;;  %v5944_v31 = vld [vmem:[#allocation2 + $0x107] sm:$0xff] }
 0x3e4   : > { %5320 = vst.msk [vmem:[#allocation3 + $0xb0] sm:$0xff] %vm520_vm0, %v5311_v32  ;;  %v5298_v4 = vadd.f32 %v5274_v27, %v20659_v6  ;;  %v16401_v20 = vpop.f32.mrb[247].mxu0  ;;  %17842 = vmatpush3.bf16.msra.mxu1 %v17841_v38  ;;  %v5400_v26 = vmul.f32 %v5311_v32, %v5311_v32  ;;  %v5491_v38 = vld [vmem:[#allocation2 + $0xde] sm:$0xff]  ;;  %v17868_v27 = vpack.c.bf16 %v13739_v35, %v13738_v28  ;;  %v5949_v28 = vld [vmem:[#allocation2 + $0x12f] sm:$0xff] }
 0x3e5   : > { %17843 = vmatprep.subr.bf16.mxu1 %v18695_v3  ;;  %v13741_v20 = vld [vmem:[%s22702_s1 + $0x78] sm:$0xff]  ;;  %v13813_v35 = vld [vmem:[%s22702_s1 + $0x150] sm:$0xff] }
 0x3e6   : > { %v5312_v21 = vadd.f32 %v20672_v58, %v5298_v4  ;;  %v13740_v4 = vld [vmem:[%s22702_s1 + $0x70] sm:$0xff]  ;;  %v5943_v2 = vld [vmem:[#allocation2 + $0xff] sm:$0xff] }
 0x3e7   : > { %v7412_v14 = vld [vmem:[#allocation3 + $0xa0] ss:$2 sm:$0xff]  ;;  %v7448_v5 = vld [vmem:[#allocation3 + $0xa1] ss:$2 sm:$0xff]  ;;  %v5279_v59 = vpop.f32.mrb[248].mxu0 }
 0x3e8   : > { %v7473_v41 = vmax.f32 %v7412_v14, %v7448_v5  ;;  %5321 = vst.msk [vmem:[#allocation3 + $0xb8] sm:$0xff] %vm520_vm0, %v5312_v21  ;;  %v17832_v53 = vpack.c.bf16 %v5312_v21, %v5311_v32  ;;  %v5401_v37 = vmul.f32 %v5312_v21, %v5312_v21  ;;  %v5299_v7 = vadd.f32 %v5279_v59, %v20663_v49  ;;  %v16404_v34 = vpop.f32.mrb[249].mxu0  ;;  %v13756_v32 = vld [vmem:[%s22702_s1 + $0xa8] sm:$0xff]  ;;  %v13757_v5 = vld [vmem:[%s22702_s1 + $0xb0] sm:$0xff]  ;;  %v5947_v63 = vld [vmem:[#allocation2 + $0x11f] sm:$0xff] }
 0x3e9   : > { %v5477_v21 = vld [vmem:[#allocation2 + $0xe5] sm:$0xff]  ;;  %v17880_v14 = vpack.c.bf16 %v13756_v32, %v13755_v45  ;;  %v5946_v36 = vld [vmem:[#allocation2 + $0x117] sm:$0xff] }
 0x3ea   : > { %7491 = vst.msk [vmem:[#allocation4 + $0x50] sm:$0xff] %vm520_vm0, %v7473_v41  ;;  %v5313_v6 = vadd.f32 %v20672_v58, %v5299_v7  ;;  %17833 = vmatpush3.bf16.msra.mxu0 %v17832_v53  ;;  %v17844_v46 = vpack.c.bf16 %v5401_v37, %v5400_v26  ;;  %v13758_v26 = vld [vmem:[%s22702_s1 + $0xb8] sm:$0xff]  ;;  %v5492_v59 = vld [vmem:[#allocation2 + $0xe6] sm:$0xff]  ;;  %v17871_v41 = vpack.c.bf16 %v13741_v20, %v13740_v4  ;;  %v6102_v20 = vld [vmem:[#allocation2 + $0xf0] sm:$0xff] }
 0x3eb   : > { %v5284_v60 = vpop.f32.mrb[250].mxu0  ;;  %17834 = vmatprep.subr.bf16.mxu0 %v18695_v3  ;;  %v13742_v53 = vld [vmem:[%s22702_s1 + $0x80] sm:$0xff]  ;;  %v13743_v37 = vld [vmem:[%s22702_s1 + $0x88] sm:$0xff]  ;;  %v17883_v34 = vpack.c.bf16 %v13758_v26, %v13757_v5  ;;  %v6263_v32 = vld [vmem:[#allocation2 + $0xf1] sm:$0xff] }
 0x3ec   : > { %5322 = vst.msk [vmem:[#allocation3 + $0xc0] sm:$0xff] %vm520_vm0, %v5313_v6  ;;  %v5300_v10 = vadd.f32 %v5284_v60, %v20665_v30  ;;  %v16407_v51 = vpop.f32.mrb[251].mxu0  ;;  %17845 = vmatpush3.bf16.msra.mxu1 %v17844_v46  ;;  %v5402_v9 = vmul.f32 %v5313_v6, %v5313_v6  ;;  %v5485_v30 = vld [vmem:[%s22702_s1] sm:$0xff]  ;;  %v5478_v7 = vld [vmem:[#allocation2 + $0xed] sm:$0xff]  ;;  %v17874_v46 = vpack.c.bf16 %v13743_v37, %v13742_v53  ;;  %v5479_v60 = vld [vmem:[#allocation2 + $0xf5] sm:$0xff] }
 0x3ed   : > { %17846 = vmatprep.subr.bf16.mxu1 %v18695_v3  ;;  %v17859_v19 = vpack.c.bf16 %v5486_v44, %v5485_v30  ;;  %v5480_v51 = vld [vmem:[#allocation2 + $0xfd] sm:$0xff]  ;;  %v13799_v45 = vld [vmem:[%s22702_s1 + $0x128] sm:$0xff] }
 0x3ee   : > { %v5314_v49 = vadd.f32 %v20672_v58, %v5300_v10  ;;  %v5494_v10 = vld [vmem:[#allocation2 + $0xf6] sm:$0xff]  ;;  %v5499_v30 = vld [vmem:[#allocation2 + $0x11e] sm:$0xff]  ;;  %v13816_v4 = vld [vmem:[%s22702_s1 + $0x168] sm:$0xff] }
 0x3ef   : > { %v7414_v23 = vld [vmem:[#allocation3 + $0xb0] ss:$2 sm:$0xff]  ;;  %v7450_v1 = vld [vmem:[#allocation3 + $0xb1] ss:$2 sm:$0xff]  ;;  %v5289_v48 = vpop.f32.mrb[252].mxu0  ;;  %v13768_v44 = vld [vmem:[%s22702_s1 + $0xc0] sm:$0xff] }
 0x3f0   : > { %v7474_v8 = vmax.f32 %v7414_v23, %v7450_v1  ;;  %5323 = vst.msk [vmem:[#allocation3 + $0xc8] sm:$0xff] %vm520_vm0, %v5314_v49  ;;  %v17835_v57 = vpack.c.bf16 %v5314_v49, %v5313_v6  ;;  %v5403_v17 = vmul.f32 %v5314_v49, %v5314_v49  ;;  %v5301_v61 = vadd.f32 %v5289_v48, %v20667_v16  ;;  %v16410_v12 = vpop.f32.mrb[253].mxu0  ;;  %v13714_v16 = vld [vmem:[%s22702_s1 + $0x30] sm:$0xff]  ;;  %v5495_v49 = vld [vmem:[#allocation2 + $0xfe] sm:$0xff]  ;;  %v5496_v1 = vld [vmem:[#allocation2 + $0x106] sm:$0xff] }
 0x3f1   : > { %v17850_v33 = vpack.c.bf16 %v13715_v54, %v13714_v16  ;;  %v5493_v6 = vld [vmem:[#allocation2 + $0xee] sm:$0xff]  ;;  %v5481_v23 = vld [vmem:[#allocation2 + $0x105] sm:$0xff]  ;;  %v13784_v12 = vld [vmem:[%s22702_s1 + $0xf8] sm:$0xff] }
 0x3f2   : > { %7492 = vst.msk [vmem:[#allocation4 + $0x58] sm:$0xff] %vm520_vm0, %v7474_v8  ;;  %v5315_v18 = vadd.f32 %v20672_v58, %v5301_v61  ;;  %17836 = vmatpush3.bf16.msra.mxu0 %v17835_v57  ;;  %v17847_v55 = vpack.c.bf16 %v5403_v17, %v5402_v9  ;;  %v5487_v58 = vld [vmem:[%s22702_s1 + $0x10] sm:$0xff]  ;;  %v5484_v17 = vld [vmem:[#allocation2 + $0x11d] sm:$0xff] }
 0x3f3   : > { %16427 = vmatprep.subr.mxu0 %v18697_v11  ;;  %v17862_v15 = vpack.c.bf16 %v5488_v25, %v5487_v58  ;;  %v5482_v9 = vld [vmem:[#allocation2 + $0x10d] sm:$0xff]  ;;  %v5483_v8 = vld [vmem:[#allocation2 + $0x115] sm:$0xff]  ;;  %v13785_v54 = vld [vmem:[%s22702_s1 + $0x100] sm:$0xff] }
 0x3f4   : > { %5324 = vst.msk [vmem:[#allocation3 + $0xd0] sm:$0xff] %vm520_vm0, %v5315_v18  ;;  %17848 = vmatpush3.bf16.msra.mxu1 %v17847_v55  ;;  %v5404_v0 = vmul.f32 %v5315_v18, %v5315_v18  ;;  %v5497_v48 = vld [vmem:[#allocation2 + $0x10e] sm:$0xff]  ;;  %v5498_v57 = vld [vmem:[#allocation2 + $0x116] sm:$0xff]  ;;  %v5780_v58 = vld [vmem:[#allocation2 + $0xdf] sm:$0xff] }
 0x3f5   : > { %16448 = vmatprep.subr.mxu1 %v18697_v11  ;;  %v13783_v61 = vld [vmem:[%s22702_s1 + $0xf0] sm:$0xff]  ;;  %v13801_v5 = vld [vmem:[%s22702_s1 + $0x138] sm:$0xff] }
 0x3f6   : > { %16428 = vmatpush3.msra.mxu0 %v5315_v18  ;;  %v13769_v18 = vld [vmem:[%s22702_s1 + $0xc8] sm:$0xff]  ;;  %v17895_v16 = vpack.c.bf16 %v13784_v12, %v13783_v61  ;;  %v6264_v26 = vld [vmem:[#allocation2 + $0xf9] sm:$0xff] }
 0x3f7   : > { %v7416_v13 = vld [vmem:[#allocation3 + $0xc0] ss:$2 sm:$0xff]  ;;  %v7452_v43 = vld [vmem:[#allocation3 + $0xc1] ss:$2 sm:$0xff]  ;;  %17858 = vmatprep.subr.bf16.mxu0 %v18695_v3  ;;  %16430 = vmatmul.mubr.msk.f32.vlgmr.msra.gmra.mrb[162].mxu0 %vm3578_vm2, %v18629_v47  ;;  %v5941_v55 = vld [vmem:[#allocation2 + $0xef] sm:$0xff]  ;;  %v17886_v25 = vpack.c.bf16 %v13769_v18, %v13768_v44 }
 0x3f8   : > { %v7475_v50 = vmax.f32 %v7416_v13, %v7452_v43  ;;  %16449 = vmatpush3.msra.mxu1 %v5404_v0  ;;  %17860 = vmatpush3.bf16.msra.mxu0 %v17859_v19  ;;  %v13786_v19 = vld [vmem:[%s22702_s1 + $0x108] sm:$0xff]  ;;  %v13770_v0 = vld [vmem:[%s22702_s1 + $0xd0] sm:$0xff]  ;;  %v13818_v53 = vld [vmem:[%s22702_s1 + $0x178] sm:$0xff] }
 0x3f9   : > { %17849 = vmatprep.subr.bf16.mxu1 %v18695_v3  ;;  %16451 = vmatmul.mubr.msk.f32.vlgmr.msra.gmra.mrb[162].mxu1 %vm3578_vm2, %v18629_v47  ;;  %v17898_v13 = vpack.c.bf16 %v13786_v19, %v13785_v54  ;;  %v13787_v43 = vld [vmem:[%s22702_s1 + $0x110] sm:$0xff]  ;;  %v13788_v47 = vld [vmem:[%s22702_s1 + $0x118] sm:$0xff]  ;;  %v6109_v12 = vld [vmem:[#allocation2 + $0x128] sm:$0xff] }
 0x3fa   : > { %7493 = vst.msk [vmem:[#allocation4 + $0x60] sm:$0xff] %vm520_vm0, %v7475_v50  ;;  %17851 = vmatpush3.bf16.msra.mxu1 %v17850_v33  ;;  %17861 = vmatprep.subr.bf16.mxu0 %v18695_v3  ;;  %v13771_v33 = vld [vmem:[%s22702_s1 + $0xd8] sm:$0xff]  ;;  %v6270_v61 = vld [vmem:[#allocation2 + $0x129] sm:$0xff]  ;;  %v13828_v18 = vld [vmem:[%s22702_s1 + $0x180] sm:$0xff] }
 0x3fb   : > { %17852 = vmatprep.subr.bf16.mxu1 %v18695_v3  ;;  %16465 = vmatprep.mubr.msk.f32.mxu1 %vm18696_vm1, %v18697_v11  ;;  %v17889_v50 = vpack.c.bf16 %v13771_v33, %v13770_v0  ;;  %v6103_v37 = vld [vmem:[#allocation2 + $0xf8] sm:$0xff]  ;;  %v6110_v44 = vld [vmem:[#allocation2 + $0x130] sm:$0xff]  ;;  %v13832_v33 = vld [vmem:[%s22702_s1 + $0x1a0] sm:$0xff] }
 0x3fc   : > { %17863 = vmatpush3.bf16.msra.mxu0 %v17862_v15  ;;  %16504 = vmatprep.mubr.msk.f32.mxu0 %vm18696_vm1, %v18697_v11  ;;  %v13772_v15 = vld [vmem:[%s22702_s1 + $0xe0] sm:$0xff]  ;;  %v13830_v19 = vld [vmem:[%s22702_s1 + $0x190] sm:$0xff] }
 0x3fd   : > { %17864 = vmatprep.subr.bf16.mxu0 %v18695_v3  ;;  %v17892_v56 = vpack.c.bf16 %v13773_v22, %v13772_v15  ;;  %v6591_v15 = vld [vmem:[#allocation2 + $0x132] sm:$0xff]  ;;  %v6592_v22 = vld [vmem:[#allocation2 + $0x13a] sm:$0xff] }
 0x3fe   : > { %17854 = vmatpush3.bf16.msra.mxu1 %v17853_v40  ;;  %v17901_v40 = vpack.c.bf16 %v13788_v47, %v13787_v43  ;;  %v6588_v47 = vld [vmem:[#allocation2 + $0x11a] sm:$0xff] }
 0x3ff   : > { %17855 = vmatprep.subr.bf16.mxu1 %v18695_v3 }
 0x400   : > { %17866 = vmatpush3.bf16.msra.mxu0 %v17865_v62  ;;  %v5945_v62 = vld [vmem:[#allocation2 + $0x10f] sm:$0xff] }
 0x401   : > { %17876 = vmatprep.subr.bf16.mxu0 %v18695_v3 }
 0x402   : > { %17857 = vmatpush3.bf16.msra.mxu1 %v17856_v39  ;;  %v5948_v39 = vld [vmem:[#allocation2 + $0x127] sm:$0xff] }
 0x403   : > { %16505 = vmatmul.mubr.msk.f32.vlgmr.msra.gmra.mrb[254].mxu0 %vm520_vm0, %v5476_v29  ;;  %17867 = vmatprep.subr.bf16.mxu1 %v18695_v3  ;;  %v13814_v29 = vld [vmem:[%s22702_s1 + $0x158] sm:$0xff] }
 0x404   : > { %16507 = vmatprep.mubr.msk.f32.mxu0 %vm18696_vm1, %v18697_v11  ;;  %17878 = vmatpush3.bf16.msra.mxu0 %v17877_v24  ;;  %v13798_v24 = vld [vmem:[%s22702_s1 + $0x120] sm:$0xff] }
 0x405   : > { %16466 = vmatmul.mubr.msk.f32.vlgmr.msra.gmra.mrb[236].mxu1 %vm520_vm0, %v5491_v38  ;;  %17879 = vmatprep.subr.bf16.mxu0 %v18695_v3  ;;  %v17913_v38 = vpack.c.bf16 %v13814_v29, %v13813_v35  ;;  %v6752_v35 = vld [vmem:[#allocation2 + $0x133] sm:$0xff]  ;;  %v6753_v29 = vld [vmem:[#allocation2 + $0x13b] sm:$0xff] }
 0x406   : > { %16468 = vmatprep.mubr.msk.f32.mxu1 %vm18696_vm1, %v18697_v11  ;;  %17869 = vmatpush3.bf16.msra.mxu1 %v17868_v27  ;;  %v13815_v27 = vld [vmem:[%s22702_s1 + $0x160] sm:$0xff] }
 0x407   : > { %16508 = vmatmul.mubr.msk.f32.gmra.mrb[0].mxu0 %vm520_vm0, %v5477_v21  ;;  %17870 = vmatprep.subr.bf16.mxu1 %v18695_v3  ;;  %v17904_v21 = vpack.c.bf16 %v13799_v45, %v13798_v24  ;;  %v6754_v24 = vld [vmem:[#allocation2 + $0x143] sm:$0xff] }
 0x408   : > { %16510 = vmatprep.mubr.msk.f32.mxu0 %vm18696_vm1, %v18697_v11  ;;  %17881 = vmatpush3.bf16.msra.mxu0 %v17880_v14  ;;  %v13800_v14 = vld [vmem:[%s22702_s1 + $0x130] sm:$0xff] }
 0x409   : > { %16469 = vmatmul.mubr.msk.f32.gmra.mrb[238].mxu1 %vm520_vm0, %v5492_v59  ;;  %17882 = vmatprep.subr.bf16.mxu0 %v18695_v3  ;;  %v17916_v59 = vpack.c.bf16 %v13816_v4, %v13815_v27 }
 0x40a   : > { %16471 = vmatprep.mubr.msk.f32.mxu1 %vm18696_vm1, %v18697_v11  ;;  %17872 = vmatpush3.bf16.msra.mxu1 %v17871_v41  ;;  %v13817_v41 = vld [vmem:[%s22702_s1 + $0x170] sm:$0xff] }
 0x40b   : > { %16511 = vmatmul.mubr.msk.f32.gmra.mrb[2].mxu0 %vm520_vm0, %v5478_v7  ;;  %17873 = vmatprep.subr.bf16.mxu1 %v18695_v3  ;;  %v17907_v7 = vpack.c.bf16 %v13801_v5, %v13800_v14 }
 0x40c   : > { %16513 = vmatprep.mubr.msk.f32.mxu0 %vm18696_vm1, %v18697_v11  ;;  %17884 = vmatpush3.bf16.msra.mxu0 %v17883_v34  ;;  %v13802_v34 = vld [vmem:[%s22702_s1 + $0x140] sm:$0xff] }
 0x40d   : > { %16472 = vmatmul.mubr.msk.f32.gmra.mrb[240].mxu1 %vm520_vm0, %v5493_v6  ;;  %17894 = vmatprep.subr.bf16.mxu0 %v18695_v3  ;;  %v13803_v6 = vld [vmem:[%s22702_s1 + $0x148] sm:$0xff] }
 0x40e   : > { %16474 = vmatprep.mubr.msk.f32.mxu1 %vm18696_vm1, %v18697_v11  ;;  %17875 = vmatpush3.bf16.msra.mxu1 %v17874_v46  ;;  %v21001_v46 = vld [vmem:[#allocation2 + $0x101] sm:$0xff] }
 0x40f   : > { %16514 = vmatmul.mubr.msk.f32.gmra.mrb[4].mxu0 %vm520_vm0, %v5479_v60  ;;  %17885 = vmatprep.subr.bf16.mxu1 %v18695_v3  ;;  %v17919_v60 = vpack.c.bf16 %v13818_v53, %v13817_v41 }
 0x410   : > { %16516 = vmatprep.mubr.msk.f32.mxu0 %vm18696_vm1, %v18697_v11 }
 0x411   : > { %16475 = vmatmul.mubr.msk.f32.gmra.mrb[242].mxu1 %vm520_vm0, %v5494_v10  ;;  %v6104_v10 = vld [vmem:[#allocation2 + $0x100] sm:$0xff] }
 0x412   : > { %16477 = vmatprep.mubr.msk.f32.mxu1 %vm18696_vm1, %v18697_v11 }
 0x413   : > { %16517 = vmatmul.mubr.msk.f32.gmra.mrb[6].mxu0 %vm520_vm0, %v5480_v51  ;;  %v17910_v51 = vpack.c.bf16 %v13803_v6, %v13802_v34 }
 0x414   : > { %16519 = vmatprep.mubr.msk.f32.mxu0 %vm18696_vm1, %v18697_v11 }
 0x415   : > { %16478 = vmatmul.mubr.msk.f32.gmra.mrb[244].mxu1 %vm520_vm0, %v5495_v49  ;;  %v6266_v49 = vld [vmem:[#allocation2 + $0x109] sm:$0xff] }
 0x416   : > { %16480 = vmatprep.mubr.msk.f32.mxu1 %vm18696_vm1, %v18697_v11 }
 0x417   : > { %16520 = vmatmul.mubr.msk.f32.gmra.mrb[8].mxu0 %vm520_vm0, %v5481_v23  ;;  %v6105_v23 = vld [vmem:[#allocation2 + $0x108] sm:$0xff] }
 0x418   : > { %16522 = vmatprep.mubr.msk.f32.mxu0 %vm18696_vm1, %v18697_v11 }
 0x419   : > { %16481 = vmatmul.mubr.msk.f32.gmra.mrb[246].mxu1 %vm520_vm0, %v5496_v1  ;;  %v6267_v1 = vld [vmem:[#allocation2 + $0x111] sm:$0xff] }
 0x41a   : > { %16483 = vmatprep.mubr.msk.f32.mxu1 %vm18696_vm1, %v18697_v11 }
 0x41b   : > { %16523 = vmatmul.mubr.msk.f32.gmra.mrb[10].mxu0 %vm520_vm0, %v5482_v9  ;;  %v6106_v9 = vld [vmem:[#allocation2 + $0x110] sm:$0xff] }
 0x41c   : > { %16525 = vmatprep.mubr.msk.f32.mxu0 %vm18696_vm1, %v18697_v11 }
 0x41d   : > { %16484 = vmatmul.mubr.msk.f32.gmra.mrb[248].mxu1 %vm520_vm0, %v5497_v48  ;;  %v6268_v48 = vld [vmem:[#allocation2 + $0x119] sm:$0xff] }
 0x41e   : > { %16486 = vmatprep.mubr.msk.f32.mxu1 %vm18696_vm1, %v18697_v11 }
 0x41f   : > { %16526 = vmatmul.mubr.msk.f32.gmra.mrb[12].mxu0 %vm520_vm0, %v5483_v8  ;;  %v6107_v8 = vld [vmem:[#allocation2 + $0x118] sm:$0xff] }
 0x420   : > { %16528 = vmatprep.mubr.msk.f32.mxu0 %vm18696_vm1, %v18697_v11 }
 0x421   : > { %16487 = vmatmul.mubr.msk.f32.gmra.mrb[250].mxu1 %vm520_vm0, %v5498_v57  ;;  %v6269_v57 = vld [vmem:[#allocation2 + $0x121] sm:$0xff] }
 0x422   : > { %16489 = vmatprep.mubr.msk.f32.mxu1 %vm18696_vm1, %v18697_v11 }
 0x423   : > { %16529 = vmatmul.mubr.msk.f32.gmra.mrb[14].mxu0 %vm520_vm0, %v5484_v17  ;;  %v6108_v17 = vld [vmem:[#allocation2 + $0x120] sm:$0xff] }
 0x424   : > { %16582 = vmatprep.mubr.msk.f32.mxu0 %vm18696_vm1, %v18697_v11 }
 0x425   : > { %16490 = vmatmul.mubr.msk.f32.gmra.mrb[252].mxu1 %vm520_vm0, %v5499_v30  ;;  %v6271_v30 = vld [vmem:[#allocation2 + $0x131] sm:$0xff] }
 0x426   : > { %16543 = vmatprep.mubr.msk.f32.mxu1 %vm18696_vm1, %v18697_v11 }
 0x427   : > { %16583 = vmatmul.mubr.msk.f32.vlgmr.msra.gmra.mrb[16].mxu0 %vm520_vm0, %v5941_v55 }
 0x428   : > { %16585 = vmatprep.mubr.msk.f32.mxu0 %vm18696_vm1, %v18697_v11  ;;  %17896 = vmatpush3.bf16.msra.mxu0 %v17895_v16  ;;  %v6585_v16 = vld [vmem:[#allocation2 + $0x102] sm:$0xff] }
 0x429   : > { %16544 = vmatmul.mubr.msk.f32.vlgmr.msra.gmra.mrb[254].mxu1 %vm520_vm0, %v5780_v58  ;;  %17897 = vmatprep.subr.bf16.mxu0 %v18695_v3  ;;  %v13831_v58 = vld [vmem:[%s22702_s1 + $0x198] sm:$0xff] }
 0x42a   : > { %16546 = vmatprep.mubr.msk.f32.mxu1 %vm18696_vm1, %v18697_v11  ;;  %17887 = vmatpush3.bf16.msra.mxu1 %v17886_v25  ;;  %v6586_v25 = vld [vmem:[#allocation2 + $0x10a] sm:$0xff]  ;;  %v17925_v0 = vpack.c.bf16 %v13831_v58, %v13830_v19 }
 0x42b   : > { %16586 = vmatmul.mubr.msk.f32.gmra.mrb[18].mxu0 %vm520_vm0, %v5942_v52  ;;  %17888 = vmatprep.subr.bf16.mxu1 %v18695_v3 }
 0x42c   : > { %16588 = vmatprep.mubr.msk.f32.mxu0 %vm18696_vm1, %v18697_v11  ;;  %17899 = vmatpush3.bf16.msra.mxu0 %v17898_v13  ;;  %v6587_v13 = vld [vmem:[#allocation2 + $0x112] sm:$0xff] }
 0x42d   : > { %16547 = vmatmul.mubr.msk.f32.gmra.mrb[0].mxu1 %vm520_vm0, %v5781_v42  ;;  %17900 = vmatprep.subr.bf16.mxu0 %v18695_v3  ;;  %v6589_v42 = vld [vmem:[#allocation2 + $0x122] sm:$0xff] }
 0x42e   : > { %16549 = vmatprep.mubr.msk.f32.mxu1 %vm18696_vm1, %v18697_v11  ;;  %17890 = vmatpush3.bf16.msra.mxu1 %v17889_v50  ;;  %v6590_v50 = vld [vmem:[#allocation2 + $0x12a] sm:$0xff] }
 0x42f   : > { %16589 = vmatmul.mubr.msk.f32.gmra.mrb[20].mxu0 %vm520_vm0, %v5943_v2  ;;  %17891 = vmatprep.subr.bf16.mxu1 %v18695_v3 }
 0x430   : > { %16591 = vmatprep.mubr.msk.f32.mxu0 %vm18696_vm1, %v18697_v11  ;;  %17902 = vmatpush3.bf16.msra.mxu0 %v17901_v40  ;;  %v6593_v40 = vld [vmem:[#allocation2 + $0x142] sm:$0xff] }
 0x431   : > { %16550 = vmatmul.mubr.msk.f32.gmra.mrb[2].mxu1 %vm520_vm0, %v5941_v55  ;;  %17912 = vmatprep.subr.bf16.mxu0 %v18695_v3  ;;  %v13829_v55 = vld [vmem:[%s22702_s1 + $0x188] sm:$0xff] }
 0x432   : > { %16552 = vmatprep.mubr.msk.f32.mxu1 %vm18696_vm1, %v18697_v11  ;;  %17893 = vmatpush3.bf16.msra.mxu1 %v17892_v56  ;;  %v17922_v54 = vpack.c.bf16 %v13829_v55, %v13828_v18  ;;  %v6432_v56 = vld [vmem:[#allocation2 + $0x141] sm:$0xff] }
 0x433   : > { %16592 = vmatmul.mubr.msk.f32.gmra.mrb[22].mxu0 %vm520_vm0, %v5944_v31  ;;  %17903 = vmatprep.subr.bf16.mxu1 %v18695_v3 }
 0x434   : > { %16594 = vmatprep.mubr.msk.f32.mxu0 %vm18696_vm1, %v18697_v11 }
 0x435   : > { %16553 = vmatmul.mubr.msk.f32.gmra.mrb[4].mxu1 %vm520_vm0, %v5942_v52  ;;  %v13833_v52 = vld [vmem:[%s22702_s1 + $0x1a8] sm:$0xff] }
 0x436   : > { %16555 = vmatprep.mubr.msk.f32.mxu1 %vm18696_vm1, %v18697_v11  ;;  %v17928_v43 = vpack.c.bf16 %v13833_v52, %v13832_v33 }
 0x437   : > { %16595 = vmatmul.mubr.msk.f32.gmra.mrb[24].mxu0 %vm520_vm0, %v5945_v62 }
 0x438   : > { %16597 = vmatprep.mubr.msk.f32.mxu0 %vm18696_vm1, %v18697_v11 }
 0x439   : > { %16556 = vmatmul.mubr.msk.f32.gmra.mrb[6].mxu1 %vm520_vm0, %v5943_v2  ;;  %v6431_v2 = vld [vmem:[#allocation2 + $0x139] sm:$0xff] }
 0x43a   : > { %16558 = vmatprep.mubr.msk.f32.mxu1 %vm18696_vm1, %v18697_v11 }
 0x43b   : > { %16598 = vmatmul.mubr.msk.f32.gmra.mrb[26].mxu0 %vm520_vm0, %v5946_v36 }
 0x43c   : > { %16600 = vmatprep.mubr.msk.f32.mxu0 %vm18696_vm1, %v18697_v11 }
 0x43d   : > { %16559 = vmatmul.mubr.msk.f32.gmra.mrb[8].mxu1 %vm520_vm0, %v5944_v31  ;;  %v6746_v31 = vld [vmem:[#allocation2 + $0x103] sm:$0xff] }
 0x43e   : > { %16561 = vmatprep.mubr.msk.f32.mxu1 %vm18696_vm1, %v18697_v11 }
 0x43f   : > { %16601 = vmatmul.mubr.msk.f32.gmra.mrb[28].mxu0 %vm520_vm0, %v5947_v63 }
 0x440   : > { %16603 = vmatprep.mubr.msk.f32.mxu0 %vm18696_vm1, %v18697_v11 }
 0x441   : > { %16562 = vmatmul.mubr.msk.f32.gmra.mrb[10].mxu1 %vm520_vm0, %v5945_v62  ;;  %v6747_v62 = vld [vmem:[#allocation2 + $0x10b] sm:$0xff] }
 0x442   : > { %16564 = vmatprep.mubr.msk.f32.mxu1 %vm18696_vm1, %v18697_v11 }
 0x443   : > { %16604 = vmatmul.mubr.msk.f32.gmra.mrb[30].mxu0 %vm520_vm0, %v5948_v39  ;;  %v6750_v39 = vld [vmem:[#allocation2 + $0x123] sm:$0xff] }
 0x444   : > { %16606 = vmatprep.mubr.msk.f32.mxu0 %vm18696_vm1, %v18697_v11 }
 0x445   : > { %16565 = vmatmul.mubr.msk.f32.gmra.mrb[12].mxu1 %vm520_vm0, %v5946_v36  ;;  %v6748_v36 = vld [vmem:[#allocation2 + $0x113] sm:$0xff] }
 0x446   : > { %16567 = vmatprep.mubr.msk.f32.mxu1 %vm18696_vm1, %v18697_v11 }
 0x447   : > { %16607 = vmatmul.mubr.msk.f32.gmra.mrb[32].mxu0 %vm520_vm0, %v5949_v28  ;;  %v6751_v28 = vld [vmem:[#allocation2 + $0x12b] sm:$0xff] }
 0x448   : > { %16660 = vmatprep.mubr.msk.f32.mxu0 %vm18696_vm1, %v18697_v11 }
 0x449   : > { %16568 = vmatmul.mubr.msk.f32.gmra.mrb[14].mxu1 %vm520_vm0, %v5947_v63  ;;  %v6749_v63 = vld [vmem:[#allocation2 + $0x11b] sm:$0xff] }
 0x44a   : > { %16621 = vmatprep.mubr.msk.f32.mxu1 %vm18696_vm1, %v18697_v11 }
 0x44b   : > { %16661 = vmatmul.mubr.msk.f32.vlgmr.msra.gmra.mrb[34].mxu0 %vm520_vm0, %v6263_v32 }
 0x44c   : > { %16663 = vmatprep.mubr.msk.f32.mxu0 %vm18696_vm1, %v18697_v11  ;;  %17914 = vmatpush3.bf16.msra.mxu0 %v17913_v38 }
 0x44d   : > { %16622 = vmatmul.mubr.msk.f32.vlgmr.msra.gmra.mrb[16].mxu1 %vm520_vm0, %v6102_v20  ;;  %17915 = vmatprep.subr.bf16.mxu0 %v18695_v3 }
 0x44e   : > { %16624 = vmatprep.mubr.msk.f32.mxu1 %vm18696_vm1, %v18697_v11  ;;  %17905 = vmatpush3.bf16.msra.mxu1 %v17904_v21 }
 0x44f   : > { %16664 = vmatmul.mubr.msk.f32.gmra.mrb[36].mxu0 %vm520_vm0, %v6264_v26  ;;  %17906 = vmatprep.subr.bf16.mxu1 %v18695_v3 }
 0x450   : > { %16666 = vmatprep.mubr.msk.f32.mxu0 %vm18696_vm1, %v18697_v11  ;;  %17917 = vmatpush3.bf16.msra.mxu0 %v17916_v59 }
 0x451   : > { %16625 = vmatmul.mubr.msk.f32.gmra.mrb[18].mxu1 %vm520_vm0, %v6103_v37  ;;  %17918 = vmatprep.subr.bf16.mxu0 %v18695_v3 }
 0x452   : > { %16627 = vmatprep.mubr.msk.f32.mxu1 %vm18696_vm1, %v18697_v11  ;;  %17908 = vmatpush3.bf16.msra.mxu1 %v17907_v7 }
 0x453   : > { %16667 = vmatmul.mubr.msk.f32.gmra.mrb[38].mxu0 %vm520_vm0, %v21001_v46  ;;  %17909 = vmatprep.subr.bf16.mxu1 %v18695_v3 }
 0x454   : > { %16669 = vmatprep.mubr.msk.f32.mxu0 %vm18696_vm1, %v18697_v11  ;;  %17920 = vmatpush3.bf16.msra.mxu0 %v17919_v60 }
 0x455   : > { %16628 = vmatmul.mubr.msk.f32.gmra.mrb[20].mxu1 %vm520_vm0, %v6104_v10  ;;  %17930 = vmatprep.subr.bf16.mxu0 %v18695_v3 }
 0x456   : > { %16630 = vmatprep.mubr.msk.f32.mxu1 %vm18696_vm1, %v18697_v11  ;;  %17911 = vmatpush3.bf16.msra.mxu1 %v17910_v51 }
 0x457   : > { %16670 = vmatmul.mubr.msk.f32.gmra.mrb[40].mxu0 %vm520_vm0, %v6266_v49  ;;  %17921 = vmatprep.subr.bf16.mxu1 %v18695_v3 }
 0x458   : > { %16672 = vmatprep.mubr.msk.f32.mxu0 %vm18696_vm1, %v18697_v11 }
 0x459   : > { %16631 = vmatmul.mubr.msk.f32.gmra.mrb[22].mxu1 %vm520_vm0, %v6105_v23 }
 0x45a   : > { %16633 = vmatprep.mubr.msk.f32.mxu1 %vm18696_vm1, %v18697_v11 }
 0x45b   : > { %16673 = vmatmul.mubr.msk.f32.gmra.mrb[42].mxu0 %vm520_vm0, %v6267_v1 }
 0x45c   : > { %16675 = vmatprep.mubr.msk.f32.mxu0 %vm18696_vm1, %v18697_v11 }
 0x45d   : > { %16634 = vmatmul.mubr.msk.f32.gmra.mrb[24].mxu1 %vm520_vm0, %v6106_v9 }
 0x45e   : > { %16636 = vmatprep.mubr.msk.f32.mxu1 %vm18696_vm1, %v18697_v11 }
 0x45f   : > { %16676 = vmatmul.mubr.msk.f32.gmra.mrb[44].mxu0 %vm520_vm0, %v6268_v48 }
 0x460   : > { %16678 = vmatprep.mubr.msk.f32.mxu0 %vm18696_vm1, %v18697_v11 }
 0x461   : > { %16637 = vmatmul.mubr.msk.f32.gmra.mrb[26].mxu1 %vm520_vm0, %v6107_v8 }
 0x462   : > { %16639 = vmatprep.mubr.msk.f32.mxu1 %vm18696_vm1, %v18697_v11 }
 0x463   : > { %16679 = vmatmul.mubr.msk.f32.gmra.mrb[46].mxu0 %vm520_vm0, %v6269_v57 }
 0x464   : > { %16681 = vmatprep.mubr.msk.f32.mxu0 %vm18696_vm1, %v18697_v11 }
 0x465   : > { %16640 = vmatmul.mubr.msk.f32.gmra.mrb[28].mxu1 %vm520_vm0, %v6108_v17 }
 0x466   : > { %16642 = vmatprep.mubr.msk.f32.mxu1 %vm18696_vm1, %v18697_v11 }
 0x467   : > { %16682 = vmatmul.mubr.msk.f32.gmra.mrb[48].mxu0 %vm520_vm0, %v6270_v61 }
 0x468   : > { %16684 = vmatprep.mubr.msk.f32.mxu0 %vm18696_vm1, %v18697_v11 }
 0x469   : > { %16643 = vmatmul.mubr.msk.f32.gmra.mrb[30].mxu1 %vm520_vm0, %v6109_v12 }
 0x46a   : > { %16645 = vmatprep.mubr.msk.f32.mxu1 %vm18696_vm1, %v18697_v11 }
 0x46b   : > { %16685 = vmatmul.mubr.msk.f32.gmra.mrb[50].mxu0 %vm520_vm0, %v6271_v30 }
 0x46c   : > { %16738 = vmatprep.mubr.msk.f32.mxu0 %vm18696_vm1, %v18697_v11 }
 0x46d   : > { %16646 = vmatmul.mubr.msk.f32.gmra.mrb[32].mxu1 %vm520_vm0, %v6110_v44 }
 0x46e   : > { %16699 = vmatprep.mubr.msk.f32.mxu1 %vm18696_vm1, %v18697_v11 }
 0x46f   : > { %16739 = vmatmul.mubr.msk.f32.vlgmr.msra.gmra.mrb[52].mxu0 %vm520_vm0, %v6585_v16 }
 0x470   : > { %16741 = vmatprep.mubr.msk.f32.mxu0 %vm18696_vm1, %v18697_v11 }
 0x471   : > { %16700 = vmatmul.mubr.msk.f32.vlgmr.msra.gmra.mrb[34].mxu1 %vm520_vm0, %v21001_v46 }
 0x472   : > { %16702 = vmatprep.mubr.msk.f32.mxu1 %vm18696_vm1, %v18697_v11  ;;  %17923 = vmatpush3.bf16.msra.mxu1 %v17922_v54 }
 0x473   : > { %16742 = vmatmul.mubr.msk.f32.gmra.mrb[54].mxu0 %vm520_vm0, %v6586_v25  ;;  %17924 = vmatprep.subr.bf16.mxu1 %v18695_v3 }
 0x474   : > { %16744 = vmatprep.mubr.msk.f32.mxu0 %vm18696_vm1, %v18697_v11 }
 0x475   : > { %16703 = vmatmul.mubr.msk.f32.gmra.mrb[36].mxu1 %vm520_vm0, %v6266_v49 }
 0x476   : > { %16705 = vmatprep.mubr.msk.f32.mxu1 %vm18696_vm1, %v18697_v11  ;;  %17926 = vmatpush3.bf16.msra.mxu1 %v17925_v0 }
 0x477   : > { %16745 = vmatmul.mubr.msk.f32.gmra.mrb[56].mxu0 %vm520_vm0, %v6587_v13  ;;  %17927 = vmatprep.subr.bf16.mxu1 %v18695_v3 }
 0x478   : > { %16747 = vmatprep.mubr.msk.f32.mxu0 %vm18696_vm1, %v18697_v11 }
 0x479   : > { %16706 = vmatmul.mubr.msk.f32.gmra.mrb[38].mxu1 %vm520_vm0, %v6267_v1 }
 0x47a   : > { %16708 = vmatprep.mubr.msk.f32.mxu1 %vm18696_vm1, %v18697_v11  ;;  %17929 = vmatpush3.bf16.msra.mxu1 %v17928_v43 }
 0x47b   : > { %16748 = vmatmul.mubr.msk.f32.gmra.mrb[58].mxu0 %vm520_vm0, %v6588_v47  ;;  %17942 = vmatprep.subr.bf16.mxu1 %v18695_v3 }
 0x47c   : > { %16750 = vmatprep.mubr.msk.f32.mxu0 %vm18696_vm1, %v18697_v11 }
 0x47d   : > { %16709 = vmatmul.mubr.msk.f32.gmra.mrb[40].mxu1 %vm520_vm0, %v6268_v48 }
 0x47e   : > { %16711 = vmatprep.mubr.msk.f32.mxu1 %vm18696_vm1, %v18697_v11 }
 0x47f   : > { %16751 = vmatmul.mubr.msk.f32.gmra.mrb[60].mxu0 %vm520_vm0, %v6589_v42 }
 0x480   : > { %16753 = vmatprep.mubr.msk.f32.mxu0 %vm18696_vm1, %v18697_v11 }
 0x481   : > { %16712 = vmatmul.mubr.msk.f32.gmra.mrb[42].mxu1 %vm520_vm0, %v6269_v57 }
 0x482   : > { %16714 = vmatprep.mubr.msk.f32.mxu1 %vm18696_vm1, %v18697_v11 }
 0x483   : > { %16754 = vmatmul.mubr.msk.f32.gmra.mrb[62].mxu0 %vm520_vm0, %v6590_v50 }
 0x484   : > { %16756 = vmatprep.mubr.msk.f32.mxu0 %vm18696_vm1, %v18697_v11 }
 0x485   : > { %16715 = vmatmul.mubr.msk.f32.gmra.mrb[44].mxu1 %vm520_vm0, %v6270_v61 }
 0x486   : > { %16717 = vmatprep.mubr.msk.f32.mxu1 %vm18696_vm1, %v18697_v11 }
 0x487   : > { %16757 = vmatmul.mubr.msk.f32.gmra.mrb[64].mxu0 %vm520_vm0, %v6591_v15 }
 0x488   : > { %16759 = vmatprep.mubr.msk.f32.mxu0 %vm18696_vm1, %v18697_v11 }
 0x489   : > { %16718 = vmatmul.mubr.msk.f32.gmra.mrb[46].mxu1 %vm520_vm0, %v6271_v30 }
 0x48a   : > { %16720 = vmatprep.mubr.msk.f32.mxu1 %vm18696_vm1, %v18697_v11 }
 0x48b   : > { %16760 = vmatmul.mubr.msk.f32.gmra.mrb[66].mxu0 %vm520_vm0, %v6592_v22 }
 0x48c   : > { %16762 = vmatprep.mubr.msk.f32.mxu0 %vm18696_vm1, %v18697_v11 }
 0x48d   : > { %16721 = vmatmul.mubr.msk.f32.gmra.mrb[48].mxu1 %vm520_vm0, %v6431_v2 }
 0x48e   : > { %16723 = vmatprep.mubr.msk.f32.mxu1 %vm18696_vm1, %v18697_v11 }
 0x48f   : > { %16763 = vmatmul.mubr.msk.f32.gmra.mrb[68].mxu0 %vm520_vm0, %v6593_v40 }
 0x490   : > { %16822 = vmatprep.mubr.msk.f32.mxu0 %vm18696_vm1, %v18697_v11 }
 0x491   : > { %16724 = vmatmul.mubr.msk.f32.gmra.mrb[50].mxu1 %vm520_vm0, %v6432_v56 }
 0x492   : > { %16777 = vmatprep.mubr.msk.f32.mxu1 %vm18696_vm1, %v18697_v11 }
 0x495   : > { %16778 = vmatmul.mubr.msk.f32.vlgmr.msra.gmra.mrb[52].mxu1 %vm520_vm0, %v6746_v31 }
 0x496   : > { %16780 = vmatprep.mubr.msk.f32.mxu1 %vm18696_vm1, %v18697_v11 }
 0x499   : > { %16781 = vmatmul.mubr.msk.f32.gmra.mrb[54].mxu1 %vm520_vm0, %v6747_v62 }
 0x49a   : > { %16783 = vmatprep.mubr.msk.f32.mxu1 %vm18696_vm1, %v18697_v11 }
 0x49d   : > { %16784 = vmatmul.mubr.msk.f32.gmra.mrb[56].mxu1 %vm520_vm0, %v6748_v36 }
 0x49e   : > { %16786 = vmatprep.mubr.msk.f32.mxu1 %vm18696_vm1, %v18697_v11 }
 0x4a1   : > { %16787 = vmatmul.mubr.msk.f32.gmra.mrb[58].mxu1 %vm520_vm0, %v6749_v63 }
 0x4a2   : > { %16789 = vmatprep.mubr.msk.f32.mxu1 %vm18696_vm1, %v18697_v11 }
 0x4a5   : > { %16790 = vmatmul.mubr.msk.f32.gmra.mrb[60].mxu1 %vm520_vm0, %v6750_v39 }
 0x4a6   : > { %16792 = vmatprep.mubr.msk.f32.mxu1 %vm18696_vm1, %v18697_v11 }
 0x4a9   : > { %16793 = vmatmul.mubr.msk.f32.gmra.mrb[62].mxu1 %vm520_vm0, %v6751_v28 }
 0x4aa   : > { %16795 = vmatprep.mubr.msk.f32.mxu1 %vm18696_vm1, %v18697_v11 }
 0x4ad   : > { %16796 = vmatmul.mubr.msk.f32.gmra.mrb[64].mxu1 %vm520_vm0, %v6752_v35 }
 0x4ae   : > { %16798 = vmatprep.mubr.msk.f32.mxu1 %vm18696_vm1, %v18697_v11 }
 0x4b1   : > { %16799 = vmatmul.mubr.msk.f32.gmra.mrb[66].mxu1 %vm520_vm0, %v6753_v29 }
 0x4b2   : > { %16801 = vmatprep.mubr.msk.f32.mxu1 %vm18696_vm1, %v18697_v11 }
 0x4b5   : > { %16802 = vmatmul.mubr.msk.f32.gmra.mrb[68].mxu1 %vm520_vm0, %v6754_v24 }
 0x4b6   : > { %16843 = vmatprep.mubr.msk.f32.mxu1 %vm18696_vm1, %v18697_v11 }
 0x4d6   : > { %v5736_v45 = vpop.f32.mrb[254].mxu0 }
 0x4d7   : > { %v16506_v32 = vpop.f32.mrb[255].mxu0 }
 0x4d8   : > { %v5599_v38 = vpop.f32.mrb[236].mxu1 }
 0x4d9   : > { %v5737_v27 = vadd.f32 %v5736_v45, %v5599_v38  ;;  %v16467_v4 = vpop.f32.mrb[237].mxu1 }
 0x4da   : > { %v5741_v20 = vpop.f32.mrb[0].mxu0 }
 0x4db   : > { %v16509_v21 = vpop.f32.mrb[1].mxu0 }
 0x4dc   : > { %v5604_v14 = vpop.f32.mrb[238].mxu1 }
 0x4dd   : > { %v5742_v5 = vadd.f32 %v5741_v20, %v5604_v14  ;;  %v16470_v26 = vpop.f32.mrb[239].mxu1 }
 0x4de   : > { %v5746_v59 = vpop.f32.mrb[2].mxu0 }
 0x4df   : > { %v16512_v41 = vpop.f32.mrb[3].mxu0 }
 0x4e0   : > { %v5609_v53 = vpop.f32.mrb[240].mxu1 }
 0x4e1   : > { %v5747_v37 = vadd.f32 %v5746_v59, %v5609_v53  ;;  %v16473_v7 = vpop.f32.mrb[241].mxu1 }
 0x4e2   : > { %v5751_v34 = vpop.f32.mrb[4].mxu0 }
 0x4e3   : > { %v16515_v6 = vpop.f32.mrb[5].mxu0 }
 0x4e4   : > { %v5614_v46 = vpop.f32.mrb[242].mxu1 }
 0x4e5   : > { %v5752_v60 = vadd.f32 %v5751_v34, %v5614_v46  ;;  %v16476_v10 = vpop.f32.mrb[243].mxu1 }
 0x4e6   : > { %v5756_v51 = vpop.f32.mrb[6].mxu0 }
 0x4e7   : > { %v16518_v49 = vpop.f32.mrb[7].mxu0 }
 0x4e8   : > { %v5619_v23 = vpop.f32.mrb[244].mxu1 }
 0x4e9   : > { %v5757_v1 = vadd.f32 %v5756_v51, %v5619_v23  ;;  %v16479_v9 = vpop.f32.mrb[245].mxu1 }
 0x4ea   : > { %v5761_v48 = vpop.f32.mrb[8].mxu0 }
 0x4eb   : > { %v16521_v8 = vpop.f32.mrb[9].mxu0 }
 0x4ec   : > { %v5624_v57 = vpop.f32.mrb[246].mxu1 }
 0x4ed   : > { %v5762_v17 = vadd.f32 %v5761_v48, %v5624_v57  ;;  %v16482_v61 = vpop.f32.mrb[247].mxu1 }
 0x4ee   : > { %v5766_v12 = vpop.f32.mrb[10].mxu0 }
 0x4ef   : > { %v16524_v30 = vpop.f32.mrb[11].mxu0 }
 0x4f0   : > { %v5629_v44 = vpop.f32.mrb[248].mxu1 }
 0x4f1   : > { %v5767_v18 = vadd.f32 %v5766_v12, %v5629_v44  ;;  %v16485_v55 = vpop.f32.mrb[249].mxu1 }
 0x4f2   : > { %v5771_v16 = vpop.f32.mrb[12].mxu0 }
 0x4f3   : > { %v16527_v54 = vpop.f32.mrb[13].mxu0 }
 0x4f4   : > { %v5634_v19 = vpop.f32.mrb[250].mxu1 }
 0x4f5   : > { %v5772_v58 = vadd.f32 %v5771_v16, %v5634_v19  ;;  %v16488_v25 = vpop.f32.mrb[251].mxu1 }
 0x4f6   : > { %v5776_v0 = vpop.f32.mrb[14].mxu0 }
 0x4f7   : > { %v16530_v33 = vpop.f32.mrb[15].mxu0 }
 0x4f8   : > { %v5639_v52 = vpop.f32.mrb[252].mxu1 }
 0x4f9   : > { %v5777_v13 = vadd.f32 %v5776_v0, %v5639_v52  ;;  %v16491_v43 = vpop.f32.mrb[253].mxu1 }
 0x4fa   : > { %v6049_v47 = vpop.f32.mrb[16].mxu0 }
 0x4fb   : > { %v16584_v42 = vpop.f32.mrb[17].mxu0 }
 0x4fc   : > { %v5888_v50 = vpop.f32.mrb[254].mxu1 }
 0x4fd   : > { %v5932_v15 = vadd.f32 %v5888_v50, %v5737_v27  ;;  %v16545_v22 = vpop.f32.mrb[255].mxu1 }
 0x4fe   : > { %v6054_v2 = vpop.f32.mrb[18].mxu0 }
 0x4ff   : > { %v6093_v40 = vadd.f32 %v6049_v47, %v5932_v15  ;;  %v16587_v56 = vpop.f32.mrb[19].mxu0 }
 0x500   : > { %v5893_v31 = vpop.f32.mrb[0].mxu1 }
 0x501   : > { %v5933_v62 = vadd.f32 %v5893_v31, %v5742_v5  ;;  %v16548_v36 = vpop.f32.mrb[1].mxu1 }
 0x502   : > { %v6059_v63 = vpop.f32.mrb[20].mxu0 }
 0x503   : > { %v6094_v39 = vadd.f32 %v6054_v2, %v5933_v62  ;;  %v16590_v28 = vpop.f32.mrb[21].mxu0 }
 0x504   : > { %v5898_v35 = vpop.f32.mrb[2].mxu1 }
 0x505   : > { %v5934_v29 = vadd.f32 %v5898_v35, %v5747_v37  ;;  %v16551_v24 = vpop.f32.mrb[3].mxu1 }
 0x506   : > { %v6064_v45 = vpop.f32.mrb[22].mxu0 }
 0x507   : > { %v6095_v32 = vadd.f32 %v6059_v63, %v5934_v29  ;;  %v16593_v38 = vpop.f32.mrb[23].mxu0 }
 0x508   : > { %v5903_v4 = vpop.f32.mrb[4].mxu1 }
 0x509   : > { %v5935_v20 = vadd.f32 %v5903_v4, %v5752_v60  ;;  %v16554_v21 = vpop.f32.mrb[5].mxu1 }
 0x50a   : > { %v6069_v27 = vpop.f32.mrb[24].mxu0 }
 0x50b   : > { %v6096_v14 = vadd.f32 %v6064_v45, %v5935_v20  ;;  %v16596_v26 = vpop.f32.mrb[25].mxu0 }
 0x50c   : > { %v5908_v59 = vpop.f32.mrb[6].mxu1 }
 0x50d   : > { %v5936_v41 = vadd.f32 %v5908_v59, %v5757_v1  ;;  %v16557_v53 = vpop.f32.mrb[7].mxu1 }
 0x50e   : > { %v6074_v5 = vpop.f32.mrb[26].mxu0 }
 0x50f   : > { %v6097_v7 = vadd.f32 %v6069_v27, %v5936_v41  ;;  %v16599_v34 = vpop.f32.mrb[27].mxu0 }
 0x510   : > { %v5913_v6 = vpop.f32.mrb[8].mxu1 }
 0x511   : > { %v5937_v46 = vadd.f32 %v5913_v6, %v5762_v17  ;;  %v16560_v10 = vpop.f32.mrb[9].mxu1 }
 0x512   : > { %v6079_v37 = vpop.f32.mrb[28].mxu0 }
 0x513   : > { %v6098_v51 = vadd.f32 %v6074_v5, %v5937_v46  ;;  %v16602_v49 = vpop.f32.mrb[29].mxu0 }
 0x514   : > { %v5918_v23 = vpop.f32.mrb[10].mxu1 }
 0x515   : > { %v5938_v9 = vadd.f32 %v5918_v23, %v5767_v18  ;;  %v16563_v48 = vpop.f32.mrb[11].mxu1 }
 0x516   : > { %v6084_v60 = vpop.f32.mrb[30].mxu0 }
 0x517   : > { %v6099_v8 = vadd.f32 %v6079_v37, %v5938_v9  ;;  %v16605_v57 = vpop.f32.mrb[31].mxu0 }
 0x518   : > { %v5923_v61 = vpop.f32.mrb[12].mxu1 }
 0x519   : > { %v5939_v12 = vadd.f32 %v5923_v61, %v5772_v58  ;;  %v16566_v30 = vpop.f32.mrb[13].mxu1 }
 0x51a   : > { %v6089_v1 = vpop.f32.mrb[32].mxu0 }
 0x51b   : > { %v6100_v44 = vadd.f32 %v6084_v60, %v5939_v12  ;;  %v16608_v55 = vpop.f32.mrb[33].mxu0 }
 0x51c   : > { %v5928_v16 = vpop.f32.mrb[14].mxu1 }
 0x51d   : > { %v5940_v54 = vadd.f32 %v5928_v16, %v5777_v13  ;;  %v16569_v19 = vpop.f32.mrb[15].mxu1 }
 0x51e   : > { %v6371_v17 = vpop.f32.mrb[34].mxu0 }
 0x51f   : > { %v6101_v25 = vadd.f32 %v6089_v1, %v5940_v54  ;;  %v16662_v0 = vpop.f32.mrb[35].mxu0 }
 0x520   : > { %v6210_v33 = vpop.f32.mrb[16].mxu1 }
 0x521   : > { %v6254_v52 = vadd.f32 %v6210_v33, %v6093_v40  ;;  %v16623_v43 = vpop.f32.mrb[17].mxu1 }
 0x522   : > { %v6376_v18 = vpop.f32.mrb[36].mxu0 }
 0x523   : > { %v6415_v47 = vadd.f32 %v6371_v17, %v6254_v52  ;;  %v16665_v42 = vpop.f32.mrb[37].mxu0 }
 0x524   : > { %v6215_v50 = vpop.f32.mrb[18].mxu1 }
 0x525   : > { %v6255_v15 = vadd.f32 %v6215_v50, %v6094_v39  ;;  %v16626_v22 = vpop.f32.mrb[19].mxu1 }
 0x526   : > { %v6381_v58 = vpop.f32.mrb[38].mxu0 }
 0x527   : > { %v6416_v2 = vadd.f32 %v6376_v18, %v6255_v15  ;;  %v16668_v56 = vpop.f32.mrb[39].mxu0 }
 0x528   : > { %v6220_v31 = vpop.f32.mrb[20].mxu1 }
 0x529   : > { %v6256_v62 = vadd.f32 %v6220_v31, %v6095_v32  ;;  %v16629_v36 = vpop.f32.mrb[21].mxu1 }
 0x52a   : > { %v6386_v13 = vpop.f32.mrb[40].mxu0 }
 0x52b   : > { %v6417_v63 = vadd.f32 %v6381_v58, %v6256_v62  ;;  %v16671_v28 = vpop.f32.mrb[41].mxu0 }
 0x52c   : > { %v6225_v35 = vpop.f32.mrb[22].mxu1 }
 0x52d   : > { %v6257_v29 = vadd.f32 %v6225_v35, %v6096_v14  ;;  %v16632_v24 = vpop.f32.mrb[23].mxu1 }
 0x52e   : > { %v6391_v40 = vpop.f32.mrb[42].mxu0 }
 0x52f   : > { %v6418_v45 = vadd.f32 %v6386_v13, %v6257_v29  ;;  %v16674_v38 = vpop.f32.mrb[43].mxu0 }
 0x530   : > { %v6230_v4 = vpop.f32.mrb[24].mxu1 }
 0x531   : > { %v6258_v20 = vadd.f32 %v6230_v4, %v6097_v7  ;;  %v16635_v21 = vpop.f32.mrb[25].mxu1 }
 0x532   : > { %v6396_v39 = vpop.f32.mrb[44].mxu0 }
 0x533   : > { %v6419_v27 = vadd.f32 %v6391_v40, %v6258_v20  ;;  %v16677_v26 = vpop.f32.mrb[45].mxu0 }
 0x534   : > { %v6235_v59 = vpop.f32.mrb[26].mxu1 }
 0x535   : > { %v6259_v41 = vadd.f32 %v6235_v59, %v6098_v51  ;;  %v16638_v53 = vpop.f32.mrb[27].mxu1 }
 0x536   : > { %v6401_v32 = vpop.f32.mrb[46].mxu0 }
 0x537   : > { %v6420_v5 = vadd.f32 %v6396_v39, %v6259_v41  ;;  %v16680_v34 = vpop.f32.mrb[47].mxu0 }
 0x538   : > { %v6240_v6 = vpop.f32.mrb[28].mxu1 }
 0x539   : > { %v6260_v46 = vadd.f32 %v6240_v6, %v6099_v8  ;;  %v16641_v10 = vpop.f32.mrb[29].mxu1 }
 0x53a   : > { %v6406_v14 = vpop.f32.mrb[48].mxu0 }
 0x53b   : > { %v6421_v37 = vadd.f32 %v6401_v32, %v6260_v46  ;;  %v16683_v49 = vpop.f32.mrb[49].mxu0 }
 0x53c   : > { %v6245_v23 = vpop.f32.mrb[30].mxu1 }
 0x53d   : > { %v6261_v9 = vadd.f32 %v6245_v23, %v6100_v44  ;;  %v16644_v48 = vpop.f32.mrb[31].mxu1 }
 0x53e   : > { %v6411_v7 = vpop.f32.mrb[50].mxu0 }
 0x53f   : > { %v6422_v60 = vadd.f32 %v6406_v14, %v6261_v9  ;;  %v16686_v57 = vpop.f32.mrb[51].mxu0 }
 0x540   : > { %v6250_v61 = vpop.f32.mrb[32].mxu1 }
 0x541   : > { %v6262_v12 = vadd.f32 %v6250_v61, %v6101_v25  ;;  %v16647_v30 = vpop.f32.mrb[33].mxu1 }
 0x542   : > { %v6693_v51 = vpop.f32.mrb[52].mxu0 }
 0x543   : > { %v6423_v1 = vadd.f32 %v6411_v7, %v6262_v12  ;;  %v16740_v55 = vpop.f32.mrb[53].mxu0 }
 0x544   : > { %v6532_v16 = vpop.f32.mrb[34].mxu1 }
 0x545   : > { %v6576_v54 = vadd.f32 %v6532_v16, %v6415_v47  ;;  %v16701_v19 = vpop.f32.mrb[35].mxu1 }
 0x546   : > { %v6698_v8 = vpop.f32.mrb[54].mxu0 }
 0x547   : > { %v6737_v17 = vadd.f32 %v6693_v51, %v6576_v54  ;;  %v16743_v0 = vpop.f32.mrb[55].mxu0 }
 0x548   : > { %v6537_v33 = vpop.f32.mrb[36].mxu1 }
 0x549   : > { %v6577_v52 = vadd.f32 %v6537_v33, %v6416_v2  ;;  %v16704_v43 = vpop.f32.mrb[37].mxu1 }
 0x54a   : > { %v6703_v44 = vpop.f32.mrb[56].mxu0 }
 0x54b   : > { %v6738_v18 = vadd.f32 %v6698_v8, %v6577_v52  ;;  %v16746_v42 = vpop.f32.mrb[57].mxu0 }
 0x54c   : > { %v6542_v50 = vpop.f32.mrb[38].mxu1 }
 0x54d   : > { %v6578_v15 = vadd.f32 %v6542_v50, %v6417_v63  ;;  %v16707_v22 = vpop.f32.mrb[39].mxu1 }
 0x54e   : > { %v6708_v25 = vpop.f32.mrb[58].mxu0 }
 0x54f   : > { %v6739_v58 = vadd.f32 %v6703_v44, %v6578_v15  ;;  %v16749_v56 = vpop.f32.mrb[59].mxu0 }
 0x550   : > { %v6547_v31 = vpop.f32.mrb[40].mxu1 }
 0x551   : > { %v6579_v62 = vadd.f32 %v6547_v31, %v6418_v45  ;;  %v16710_v36 = vpop.f32.mrb[41].mxu1 }
 0x552   : > { %v6713_v47 = vpop.f32.mrb[60].mxu0 }
 0x553   : > { %v6740_v13 = vadd.f32 %v6708_v25, %v6579_v62  ;;  %v16752_v28 = vpop.f32.mrb[61].mxu0 }
 0x554   : > { %v6552_v35 = vpop.f32.mrb[42].mxu1 }
 0x555   : > { %v6580_v29 = vadd.f32 %v6552_v35, %v6419_v27  ;;  %v16713_v24 = vpop.f32.mrb[43].mxu1 }
 0x556   : > { %v6718_v2 = vpop.f32.mrb[62].mxu0 }
 0x557   : > { %v6741_v40 = vadd.f32 %v6713_v47, %v6580_v29  ;;  %v16755_v38 = vpop.f32.mrb[63].mxu0 }
 0x558   : > { %v6557_v4 = vpop.f32.mrb[44].mxu1 }
 0x559   : > { %v6581_v20 = vadd.f32 %v6557_v4, %v6420_v5  ;;  %v16716_v21 = vpop.f32.mrb[45].mxu1 }
 0x55a   : > { %v6723_v63 = vpop.f32.mrb[64].mxu0 }
 0x55b   : > { %v21156_v39 = vadd.f32 %v6718_v2, %v6581_v20  ;;  %v16758_v26 = vpop.f32.mrb[65].mxu0 }
 0x55c   : > { %v6562_v59 = vpop.f32.mrb[46].mxu1 }
 0x55d   : > { %v6582_v41 = vadd.f32 %v6562_v59, %v6421_v37  ;;  %v16719_v45 = vpop.f32.mrb[47].mxu1  ;;  %v21167_v37 = vld [vmem:[%s22703_s2] ss:$0 sm:$0xff] }
 0x55e   : > { %v6728_v53 = vpop.f32.mrb[66].mxu0 }
 0x55f   : > { %v21158_v32 = vadd.f32 %v6723_v63, %v6582_v41  ;;  %v16761_v34 = vpop.f32.mrb[67].mxu0 }
 0x560   : > { %v6567_v6 = vpop.f32.mrb[48].mxu1 }
 0x561   : > { %v6583_v27 = vadd.f32 %v6567_v6, %v6422_v60  ;;  %v16722_v46 = vpop.f32.mrb[49].mxu1 }
 0x562   : > { %v6733_v10 = vpop.f32.mrb[68].mxu0 }
 0x563   : > { %v21160_v14 = vadd.f32 %v6728_v53, %v6583_v27  ;;  %v16764_v49 = vpop.f32.mrb[69].mxu0 }
 0x564   : > { %v6572_v5 = vpop.f32.mrb[50].mxu1 }
 0x565   : > { %v6584_v23 = vadd.f32 %v6572_v5, %v6423_v1  ;;  %v16725_v9 = vpop.f32.mrb[51].mxu1 }
 0x567   : > { %v21162_v48 = vadd.f32 %v6733_v10, %v6584_v23 }
 0x568   : > { %v6854_v7 = vpop.f32.mrb[52].mxu1 }
 0x569   : > { %v6898_v57 = vadd.f32 %v6854_v7, %v6737_v17  ;;  %v16779_v61 = vpop.f32.mrb[53].mxu1  ;;  %v7082_v7 = vld [vmem:[%s22705_s4 + $0x8] sm:$0xff] }
 0x56b   : > { %v6912_v60 = vadd.f32 %v21167_v37, %v6898_v57 }
 0x56c   : > { %v6859_v12 = vpop.f32.mrb[54].mxu1 }
 0x56d   : > { %6921 = vst.msk [vmem:[#allocation3 + $0xd8] sm:$0xff] %vm520_vm0, %v6912_v60  ;;  %v6899_v30 = vadd.f32 %v6859_v12, %v6738_v18  ;;  %v16782_v51 = vpop.f32.mrb[55].mxu1  ;;  %v7001_v16 = vmul.f32 %v6912_v60, %v6912_v60 }
 0x56e   : > { %v7083_v51 = vld [vmem:[%s22705_s4 + $0x10] sm:$0xff] }
 0x56f   : > { %v6913_v1 = vadd.f32 %v21167_v37, %v6899_v30 }
 0x570   : > { %v6864_v55 = vpop.f32.mrb[56].mxu1 }
 0x571   : > { %6922 = vst.msk [vmem:[#allocation3 + $0xe0] sm:$0xff] %vm520_vm0, %v6913_v1  ;;  %v17931_v54 = vpack.c.bf16 %v6913_v1, %v6912_v60  ;;  %v7002_v19 = vmul.f32 %v6913_v1, %v6913_v1  ;;  %v6900_v8 = vadd.f32 %v6864_v55, %v6739_v58  ;;  %v16785_v0 = vpop.f32.mrb[57].mxu1  ;;  %v18630_v55 = vld [vmem:[%s22704_s3] sm:$0x1] }
 0x573   : > { %v6914_v17 = vadd.f32 %v21167_v37, %v6900_v8  ;;  %17932 = vmatpush3.bf16.msra.mxu0 %v17931_v54  ;;  %v17943_v33 = vpack.c.bf16 %v7002_v19, %v7001_v16  ;;  %v7085_v54 = vld [vmem:[%s22705_s4 + $0x20] sm:$0xff]  ;;  %v7086_v19 = vld [vmem:[%s22705_s4 + $0x28] sm:$0xff] }
 0x574   : > { %v7418_v52 = vld [vmem:[#allocation3 + $0xd0] ss:$2 sm:$0xff]  ;;  %v7454_v43 = vld [vmem:[#allocation3 + $0xd1] ss:$2 sm:$0xff]  ;;  %v6869_v44 = vpop.f32.mrb[58].mxu1  ;;  %17933 = vmatprep.subr.bf16.mxu0 %v18695_v3 }
 0x575   : > { %v7476_v18 = vmax.f32 %v7418_v52, %v7454_v43  ;;  %6923 = vst.msk [vmem:[#allocation3 + $0xe8] sm:$0xff] %vm520_vm0, %v6914_v17  ;;  %v6901_v42 = vadd.f32 %v6869_v44, %v6740_v13  ;;  %v16788_v50 = vpop.f32.mrb[59].mxu1  ;;  %17944 = vmatpush3.bf16.msra.mxu1 %v17943_v33  ;;  %v7003_v25 = vmul.f32 %v6914_v17, %v6914_v17 }
 0x576   : > { %17945 = vmatprep.subr.bf16.mxu1 %v18695_v3  ;;  %v17961_v33 = vpack.c.bf16 %v7086_v19, %v7085_v54 }
 0x577   : > { %7494 = vst.msk [vmem:[#allocation4 + $0x68] sm:$0xff] %vm520_vm0, %v7476_v18  ;;  %v6915_v15 = vadd.f32 %v21167_v37, %v6901_v42  ;;  %v7240_v42 = vld [vmem:[%s22706_s5] sm:$0xf] }
 0x578   : > { %v6874_v22 = vpop.f32.mrb[60].mxu1 }
 0x579   : > { %6924 = vst.msk [vmem:[#allocation3 + $0xf0] sm:$0xff] %vm520_vm0, %v6915_v15  ;;  %v17934_v58 = vpack.c.bf16 %v6915_v15, %v6914_v17  ;;  %v7004_v56 = vmul.f32 %v6915_v15, %v6915_v15  ;;  %v6902_v31 = vadd.f32 %v6874_v22, %v6741_v40  ;;  %v16791_v62 = vpop.f32.mrb[61].mxu1 }
 0x57b   : > { %v6916_v36 = vadd.f32 %v21167_v37, %v6902_v31  ;;  %17935 = vmatpush3.bf16.msra.mxu0 %v17934_v58  ;;  %v17946_v47 = vpack.c.bf16 %v7004_v56, %v7003_v25 }
 0x57c   : > { %v7420_v13 = vld [vmem:[#allocation3 + $0xe0] ss:$2 sm:$0xff]  ;;  %v7456_v28 = vld [vmem:[#allocation3 + $0xe1] ss:$2 sm:$0xff]  ;;  %v6879_v35 = vpop.f32.mrb[62].mxu1  ;;  %17936 = vmatprep.subr.bf16.mxu0 %v18695_v3 }
 0x57d   : > { %v7477_v29 = vmax.f32 %v7420_v13, %v7456_v28  ;;  %6925 = vst.msk [vmem:[#allocation3 + $0xf8] sm:$0xff] %vm520_vm0, %v6916_v36  ;;  %v6903_v24 = vadd.f32 %v6879_v35, %v21156_v39  ;;  %v16794_v2 = vpop.f32.mrb[63].mxu1  ;;  %17947 = vmatpush3.bf16.msra.mxu1 %v17946_v47  ;;  %v7005_v4 = vmul.f32 %v6916_v36, %v6916_v36  ;;  %v13858_v13 = vld [vmem:[%s22702_s1 + $0x1e0] sm:$0xff]  ;;  %v13859_v28 = vld [vmem:[%s22702_s1 + $0x1e8] sm:$0xff] }
 0x57e   : > { %17948 = vmatprep.subr.bf16.mxu1 %v18695_v3  ;;  %v17972_v35 = vpack.c.bf16 %v13859_v28, %v13858_v13 }
 0x57f   : > { %7495 = vst.msk [vmem:[#allocation4 + $0x70] sm:$0xff] %vm520_vm0, %v7477_v29  ;;  %v6917_v40 = vadd.f32 %v21167_v37, %v6903_v24  ;;  %v13860_v29 = vld [vmem:[%s22702_s1 + $0x1f0] sm:$0xff]  ;;  %v13861_v24 = vld [vmem:[%s22702_s1 + $0x1f8] sm:$0xff] }
 0x580   : > { %v6884_v38 = vpop.f32.mrb[64].mxu1  ;;  %v17976_v2 = vpack.c.bf16 %v13861_v24, %v13860_v29 }
 0x581   : > { %6926 = vst.msk [vmem:[#allocation3 + $0x100] sm:$0xff] %vm520_vm0, %v6917_v40  ;;  %v17937_v20 = vpack.c.bf16 %v6917_v40, %v6916_v36  ;;  %v7006_v21 = vmul.f32 %v6917_v40, %v6917_v40  ;;  %v6904_v63 = vadd.f32 %v6884_v38, %v21158_v32  ;;  %v16797_v26 = vpop.f32.mrb[65].mxu1  ;;  %v13862_v40 = vld [vmem:[%s22702_s1 + $0x200] sm:$0xff]  ;;  %v13863_v38 = vld [vmem:[%s22702_s1 + $0x208] sm:$0xff] }
 0x583   : > { %v6918_v59 = vadd.f32 %v21167_v37, %v6904_v63  ;;  %17938 = vmatpush3.bf16.msra.mxu0 %v17937_v20  ;;  %v17949_v39 = vpack.c.bf16 %v7006_v21, %v7005_v4  ;;  %v7581_v4 = vld [vmem:[#allocation2 + $0x14c] sm:$0xff]  ;;  %v17980_v20 = vpack.c.bf16 %v13863_v38, %v13862_v40  ;;  %v13853_v63 = vld [vmem:[%s22702_s1 + $0x1b8] sm:$0xff] }
 0x584   : > { %v7422_v41 = vld [vmem:[#allocation3 + $0xf0] ss:$2 sm:$0xff]  ;;  %v7458_v45 = vld [vmem:[#allocation3 + $0xf1] ss:$2 sm:$0xff]  ;;  %v6889_v53 = vpop.f32.mrb[66].mxu1  ;;  %17939 = vmatprep.subr.bf16.mxu0 %v18695_v3 }
 0x585   : > { %v7478_v34 = vmax.f32 %v7422_v41, %v7458_v45  ;;  %6927 = vst.msk [vmem:[#allocation3 + $0x108] sm:$0xff] %vm520_vm0, %v6918_v59  ;;  %v6905_v6 = vadd.f32 %v6889_v53, %v21160_v14  ;;  %v16800_v27 = vpop.f32.mrb[67].mxu1  ;;  %17950 = vmatpush3.bf16.msra.mxu1 %v17949_v39  ;;  %v7007_v10 = vmul.f32 %v6918_v59, %v6918_v59  ;;  %v7081_v14 = vld [vmem:[%s22705_s4] sm:$0xff]  ;;  %v13852_v21 = vld [vmem:[%s22702_s1 + $0x1b0] sm:$0xff]  ;;  %v7502_v39 = vlaneseq }
 0x586   : > { %17951 = vmatprep.subr.bf16.mxu1 %v18695_v3  ;;  %v21280_v26 = vpack.c.bf16 %v13853_v63, %v13852_v21  ;;  %v7515_v27 = vld [vmem:[#allocation4 + $0x1b] sm:$0xff] }
 0x587   : > { %7496 = vst.msk [vmem:[#allocation4 + $0x78] sm:$0xff] %vm520_vm0, %v7478_v34  ;;  %v6919_v32 = vadd.f32 %v21167_v37, %v6905_v6  ;;  %v21283_v45 = vshrl.u32 %v7502_v39, 7  ;;  %v7499_v34 = vld [vmem:[#allocation4] sm:$0xff]  ;;  %v7500_v6 = vld [vmem:[#allocation4 + $0x9] sm:$0xff]  ;;  %v13856_v63 = vld [vmem:[%s22702_s1 + $0x1d0] sm:$0xff] }
 0x588   : > { %v6894_v46 = vpop.f32.mrb[68].mxu1 }
 0x589   : > { %6928 = vst.msk [vmem:[#allocation3 + $0x110] sm:$0xff] %vm520_vm0, %v6919_v32  ;;  %v17940_v49 = vpack.c.bf16 %v6919_v32, %v6918_v59  ;;  %v7008_v5 = vmul.f32 %v6919_v32, %v6919_v32  ;;  %v6906_v23 = vadd.f32 %v6894_v46, %v21162_v48  ;;  %v16803_v9 = vpop.f32.mrb[69].mxu1  ;;  %v17955_v48 = vpack.c.bf16 %v7082_v7, %v7081_v14  ;;  %v7514_v46 = vld [vmem:[#allocation4 + $0x12] sm:$0xff] }
 0x58a   : > { %v21286_v53 = vsub.s32 0, %v21283_v45  ;;  %v7501_v7 = vmax.f32 %v7499_v34, %v7500_v6 }
 0x58b   : > { %v6920_v57 = vadd.f32 %v21167_v37, %v6906_v23  ;;  %17941 = vmatpush3.bf16.msra.mxu0 %v17940_v49  ;;  %v17952_v61 = vpack.c.bf16 %v7008_v5, %v7007_v10  ;;  %v7084_v37 = vld [vmem:[%s22705_s4 + $0x18] sm:$0xff]  ;;  %v7522_v10 = vld [vmem:[#allocation4 + $0x2d] sm:$0xff] }
 0x58c   : > { %v7424_v60 = vld [vmem:[#allocation3 + $0x100] ss:$2 sm:$0xff]  ;;  %v7460_v12 = vld [vmem:[#allocation3 + $0x101] ss:$2 sm:$0xff]  ;;  %16820 = vmatprep.subr.mxu0 %v18697_v11  ;;  %v17958_v16 = vpack.c.bf16 %v7084_v37, %v7083_v51  ;;  %v7536_v5 = vld [vmem:[#allocation4 + $0x51] sm:$0xff] }
 0x58d   : > { %v7479_v30 = vmax.f32 %v7424_v60, %v7460_v12  ;;  %6929 = vst.msk [vmem:[#allocation3 + $0x118] sm:$0xff] %vm520_vm0, %v6920_v57  ;;  %17953 = vmatpush3.bf16.msra.mxu1 %v17952_v61  ;;  %v7009_v1 = vmul.f32 %v6920_v57, %v6920_v57  ;;  %v7529_v49 = vld [vmem:[#allocation4 + $0x3f] sm:$0xff]  ;;  %v7528_v61 = vld [vmem:[#allocation4 + $0x36] sm:$0xff]  ;;  %v7535_v60 = vld [vmem:[#allocation4 + $0x48] sm:$0xff]  ;;  %v7516_v12 = vmax.f32 %v7514_v46, %v7515_v27 }
 0x58e   : > { %16841 = vmatprep.subr.mxu1 %v18697_v11  ;;  %v7543_v23 = vld [vmem:[#allocation4 + $0x63] sm:$0xff]  ;;  %v7550_v9 = vld [vmem:[#allocation4 + $0x75] sm:$0xff]  ;;  %v7537_v51 = vmax.f32 %v7535_v60, %v7536_v5 }
 0x58f   : > { %7497 = vst.msk [vmem:[#allocation4 + $0x80] sm:$0xff] %vm520_vm0, %v7479_v30  ;;  %16821 = vmatpush3.msra.mxu0 %v6920_v57  ;;  %v7521_v57 = vld [vmem:[#allocation4 + $0x24] sm:$0xff]  ;;  %v7542_v37 = vld [vmem:[#allocation4 + $0x5a] sm:$0xff] }
 0x590   : > { %16823 = vmatmul.mubr.msk.f32.vlgmr.msra.gmra.mrb[162].mxu0 %vm3578_vm2, %v18630_v55  ;;  %17954 = vmatprep.subr.bf16.mxu0 %v18695_v3  ;;  %v7523_v30 = vmax.f32 %v7521_v57, %v7522_v10  ;;  %v7544_v54 = vmax.f32 %v7542_v37, %v7543_v23  ;;  %v13884_v27 = vld [vmem:[%s22702_s1 + $0x210] sm:$0xff]  ;;  %v13887_v57 = vld [vmem:[%s22702_s1 + $0x228] sm:$0xff] }
 0x591   : > { %16842 = vmatpush3.msra.mxu1 %v7009_v1  ;;  %17956 = vmatpush3.bf16.msra.mxu0 %v17955_v48  ;;  %v7549_v1 = vld [vmem:[#allocation4 + $0x6c] sm:$0xff] }
 0x592   : > { %16844 = vmatmul.mubr.msk.f32.vlgmr.msra.gmra.mrb[162].mxu1 %vm3578_vm2, %v18630_v55  ;;  %17963 = vmatprep.subr.bf16.mxu1 %v18695_v3  ;;  %v7551_v19 = vmax.f32 %v7549_v1, %v7550_v9  ;;  %v7564_v9 = vld [vmem:[#allocation2 + $0x14b] sm:$0xff]  ;;  %v13900_v1 = vld [vmem:[%s22702_s1 + $0x240] sm:$0xff] }
 0x593   : > { %17965 = vmatpush3.bf16.msra.mxu1 %v17955_v48  ;;  %17957 = vmatprep.subr.bf16.mxu0 %v18695_v3  ;;  %v7530_v48 = vmax.f32 %v7528_v61, %v7529_v49 }
 0x594   : > { %v7426_v8 = vld [vmem:[#allocation3 + $0x110] ss:$2 sm:$0xff]  ;;  %v7462_v0 = vld [vmem:[#allocation3 + $0x111] ss:$2 sm:$0xff]  ;;  %17966 = vmatprep.subr.bf16.mxu1 %v18695_v3  ;;  %16858 = vmatprep.mubr.msk.f32.mxu0 %vm18696_vm1, %v18697_v11 }
 0x595   : > { %v7480_v17 = vmax.f32 %v7426_v8, %v7462_v0  ;;  %17959 = vmatpush3.bf16.msra.mxu0 %v17958_v16  ;;  %16873 = vmatprep.mubr.msk.f32.mxu1 %vm18696_vm1, %v18697_v11 }
 0x596   : > { %17960 = vmatprep.subr.bf16.mxu0 %v18695_v3  ;;  %v7556_v55 = vld [vmem:[#allocation4 + $0x7e] sm:$0xff] }
 0x597   : > { %7498 = vst.msk [vmem:[#allocation4 + $0x88] sm:$0xff] %vm520_vm0, %v7480_v17  ;;  %17968 = vmatpush3.bf16.msra.mxu1 %v17958_v16 }
 0x598   : > { %17969 = vmatprep.subr.bf16.mxu1 %v18695_v3 }
 0x599   : > { %17962 = vmatpush3.bf16.msra.mxu0 %v17961_v33 }
 0x59a   : > { %16876 = vmatprep.subr.mxu0 %v18697_v11 }
 0x59b   : > { %17971 = vmatpush3.bf16.msra.mxu1 %v17961_v33 }
 0x59c   : > { %18095 = vmatprep.subr.bf16.mxu1 %v18695_v3 }
 0x59e   : > { %v7557_v14 = vld [vmem:[#allocation4 + $0x87] sm:$0xff] }
 0x59f   : > { %v7558_v8 = vmax.f32 %v7556_v55, %v7557_v14  ;;  %v13901_v55 = vld [vmem:[%s22702_s1 + $0x248] sm:$0xff] }
 0x663   : > { %v6996_v52 = vpop.f32.mrb[162].mxu0 }
 0x664   : > { %v16824_v43 = vpop.f32.mrb[163].mxu0  ;;  %16859 = vmatmul.mubr.msk.f32.vlgmr.msra.gmra.mrb[70].mxu0 %vm520_vm0, %v6996_v52 }
 0x665   : > { %v7076_v44 = vpop.f32.mrb[162].mxu1  ;;  %16878 = vmatprep.mubr.msk.f32.mxu0 %vm18696_vm1, %v18697_v11  ;;  %16877 = vmatpush3.msk.msra.mxu0 %vm7245_vm3, %v7240_v42 }
 0x666   : > { %v16845_v18 = vpop.f32.mrb[163].mxu1  ;;  %16874 = vmatmul.mubr.msk.f32.vlgmr.msra.gmra.mrb[70].mxu1 %vm520_vm0, %v7076_v44  ;;  %16881 = vmatprep.subr.mxu0 %v18697_v11 }
 0x667   : > { %17172 = vmatprep.mubr.msk.f32.mxu1 %vm18696_vm1, %v18697_v11 }
 0x737   : > { %v7156_v50 = vpop.f32.mrb[70].mxu0 }
 0x738   : > { %v7160_v15 = vmul.f32 0.00032552084, %v7156_v50  ;;  %v16860_v22 = vpop.f32.mrb[71].mxu0 }
 0x739   : > { %v7230_v25 = vpop.f32.mrb[70].mxu1 }
 0x73a   : > { %v7235_v58 = vmul.f32 %v7160_v15, %v7160_v15  ;;  %v7234_v56 = vmul.f32 0.00032552084, %v7230_v25  ;;  %v16875_v31 = vpop.f32.mrb[71].mxu1  ;;  %16879 = vmatmul.mubr.msk.f32.vlgmr.msra.gmra.mrb[72].mxu0 %vm7241_vm4, %v7160_v15 }
 0x73b   : > { %16882 = vmatpush3.msk.msra.mxu0 %vm7245_vm3, %v7240_v42  ;;  %16883 = vmatprep.mubr.msk.f32.mxu0 %vm18696_vm1, %v18697_v11 }
 0x73c   : > { %v7236_v62 = vsub.f32 %v7234_v56, %v7235_v58  ;;  %17973 = vmatprep.subr.bf16.mxu0 %v17972_v35 }
 0x73e   : > { %v7237_v36 = vmax.f32 %v7236_v62, 0.0 }
 0x740   : > { %18619 = vrsqrt.f32 %v7237_v36 }
 0x74a   : > { %v18620_v47 = vpop.eup %18619 }
 0x74b   : > { %16884 = vmatmul.mubr.msk.f32.vlgmr.msra.gmra.mrb[74].mxu0 %vm7241_vm4, %v18620_v47 }
 0x74c   : > { %17975 = vmatpush3.bf16.msra.mxu0 %v17972_v35  ;;  %16898 = vmatprep.mubr.msk.f32.mxu0 %vm520_vm0, %v7581_v4  ;;  %v13854_v4 = vld [vmem:[%s22702_s1 + $0x1c0] sm:$0xff] }
 0x74d   : > { %17977 = vmatprep.subr.bf16.mxu0 %v17976_v2 }
 0x750   : > { %17979 = vmatpush3.bf16.msra.mxu0 %v17976_v2 }
 0x751   : > { %17981 = vmatprep.subr.bf16.mxu0 %v17980_v20 }
 0x754   : > { %17983 = vmatpush3.bf16.msra.mxu0 %v17980_v20  ;;  %v13855_v20 = vld [vmem:[%s22702_s1 + $0x1c8] sm:$0xff] }
 0x755   : > { %17985 = vmatprep.subr.bf16.mxu0 %v21280_v26  ;;  %v17988_v21 = vpack.c.bf16 %v13855_v20, %v13854_v4  ;;  %v13921_v4 = vld [vmem:[%s22702_s1 + $0x298] sm:$0xff] }
 0x80d   : > { %v7315_v59 = vpop.f32.mrb[72].mxu0 }
 0x80e   : > { %v16880_v41 = vpop.f32.mrb[73].mxu0  ;;  %v7505_v32 = vrot.slane %v7315_v59, %v21286_v53 }
 0x80f   : > { %v13857_v41 = vld [vmem:[%s22702_s1 + $0x1d8] sm:$0xff] }
 0x810   : > { %v7506_v16 = vsub.f32 %v7501_v7, %v7505_v32  ;;  %v7517_v17 = vsub.f32 %v7516_v12, %v7505_v32  ;;  %v7524_v33 = vsub.f32 %v7523_v30, %v7505_v32  ;;  %v7531_v52 = vsub.f32 %v7530_v48, %v7505_v32  ;;  %v13886_v7 = vld [vmem:[%s22702_s1 + $0x220] sm:$0xff]  ;;  %v13888_v12 = vld [vmem:[%s22702_s1 + $0x230] sm:$0xff]  ;;  %v13889_v30 = vld [vmem:[%s22702_s1 + $0x238] sm:$0xff] }
 0x811   : > { %v7538_v18 = vsub.f32 %v7537_v51, %v7505_v32  ;;  %v7545_v42 = vsub.f32 %v7544_v54, %v7505_v32  ;;  %v7552_v50 = vsub.f32 %v7551_v19, %v7505_v32  ;;  %v7559_v15 = vsub.f32 %v7558_v8, %v7505_v32  ;;  %v13885_v32 = vld [vmem:[%s22702_s1 + $0x218] sm:$0xff] }
 0x812   : > { %v17992_v34 = vpack.c.bf16 %v13857_v41, %v13856_v63  ;;  %v17996_v10 = vpack.c.bf16 %v13885_v32, %v13884_v27  ;;  %v18000_v61 = vpack.c.bf16 %v13887_v57, %v13886_v7  ;;  %v18004_v51 = vpack.c.bf16 %v13889_v30, %v13888_v12  ;;  %v13933_v63 = vld [vmem:[%s22702_s1 + $0x2a8] sm:$0xff]  ;;  %v13934_v41 = vld [vmem:[%s22702_s1 + $0x2b0] sm:$0xff] }
 0x813   : > { %v18008_v54 = vpack.c.bf16 %v13901_v55, %v13900_v1 }
 0x81e   : > { %v7388_v0 = vpop.f32.mrb[74].mxu0 }
 0x81f   : > { %v7510_v43 = vrot.slane %v7388_v0, %v21286_v53  ;;  %v16885_v44 = vpop.f32.mrb[75].mxu0 }
 0x820   : > { %v13903_v44 = vld [vmem:[%s22702_s1 + $0x258] sm:$0xff] }
 0x821   : > { %v7511_v22 = vmul.f32 %v7510_v43, %v7506_v16  ;;  %v7518_v25 = vmul.f32 %v7517_v17, %v7510_v43  ;;  %v7525_v58 = vmul.f32 %v7524_v33, %v7510_v43  ;;  %v7532_v56 = vmul.f32 %v7531_v52, %v7510_v43  ;;  %v7888_v33 = vld [vmem:[#allocation2 + $0x14d] sm:$0xff] }
 0x822   : > { %v7539_v31 = vmul.f32 %v7538_v18, %v7510_v43  ;;  %v7546_v62 = vmul.f32 %v7545_v42, %v7510_v43  ;;  %v7553_v36 = vmul.f32 %v7552_v50, %v7510_v43  ;;  %v7560_v47 = vmul.f32 %v7559_v15, %v7510_v43  ;;  %v13902_v43 = vld [vmem:[%s22702_s1 + $0x250] sm:$0xff]  ;;  %v13904_v50 = vld [vmem:[%s22702_s1 + $0x260] sm:$0xff]  ;;  %v13905_v15 = vld [vmem:[%s22702_s1 + $0x268] sm:$0xff] }
 0x823   : > { %v7512_v13 = vmax.f32 %v7511_v22, 0.0  ;;  %v7519_v28 = vmax.f32 %v7518_v25, 0.0  ;;  %v7526_v35 = vmax.f32 %v7525_v58, 0.0  ;;  %v7533_v29 = vmax.f32 %v7532_v56, 0.0  ;;  %v13916_v56 = vld [vmem:[%s22702_s1 + $0x270] sm:$0xff] }
 0x824   : > { %v7540_v24 = vmax.f32 %v7539_v31, 0.0  ;;  %v7547_v2 = vmax.f32 %v7546_v62, 0.0  ;;  %v7554_v40 = vmax.f32 %v7553_v36, 0.0  ;;  %v7561_v38 = vmax.f32 %v7560_v47, 0.0  ;;  %v13917_v31 = vld [vmem:[%s22702_s1 + $0x278] sm:$0xff] }
 0x825   : > { %7513 = vst.msk [vmem:[#allocation2 + $0x156] sm:$0xff] %vm520_vm0, %v7512_v13  ;;  %7520 = vst.msk [vmem:[#allocation2 + $0x160] sm:$0xff] %vm520_vm0, %v7519_v28  ;;  %v18012_v18 = vpack.c.bf16 %v13903_v44, %v13902_v43  ;;  %v18016_v25 = vpack.c.bf16 %v13905_v15, %v13904_v50  ;;  %v18020_v36 = vpack.c.bf16 %v13917_v31, %v13916_v56  ;;  %v13968_v56 = vld [vmem:[%s22702_s1 + $0x320] sm:$0xff]  ;;  %v13969_v31 = vld [vmem:[%s22702_s1 + $0x328] sm:$0xff] }
 0x826   : > { %7527 = vst.msk [vmem:[#allocation2 + $0x16a] sm:$0xff] %vm520_vm0, %v7526_v35  ;;  %7534 = vst.msk [vmem:[#allocation2 + $0x174] sm:$0xff] %vm520_vm0, %v7533_v29 }
 0x827   : > { %7548 = vst.msk [vmem:[#allocation2 + $0x188] sm:$0xff] %vm520_vm0, %v7547_v2  ;;  %7541 = vst.msk [vmem:[#allocation2 + $0x17e] sm:$0xff] %vm520_vm0, %v7540_v24  ;;  %v13918_v24 = vld [vmem:[%s22702_s1 + $0x280] sm:$0xff]  ;;  %v13919_v2 = vld [vmem:[%s22702_s1 + $0x288] sm:$0xff] }
 0x828   : > { %7555 = vst.msk [vmem:[#allocation2 + $0x192] sm:$0xff] %vm520_vm0, %v7554_v40  ;;  %7562 = vst.msk [vmem:[#allocation2 + $0x19c] sm:$0xff] %vm520_vm0, %v7561_v38  ;;  %v18024_v40 = vpack.c.bf16 %v13919_v2, %v13918_v24  ;;  %v13920_v38 = vld [vmem:[%s22702_s1 + $0x290] sm:$0xff] }
 0x829   : > { %v18028_v20 = vpack.c.bf16 %v13921_v4, %v13920_v38  ;;  %v13984_v38 = vld [vmem:[%s22702_s1 + $0x350] sm:$0xff]  ;;  %v13985_v4 = vld [vmem:[%s22702_s1 + $0x358] sm:$0xff] }
 0x82c   : > { %v7582_v59 = vld [vmem:[#allocation2 + $0x154] sm:$0xff]  ;;  %v7583_v39 = vld [vmem:[#allocation2 + $0x15c] sm:$0xff] }
 0x82d   : > { %16899 = vmatmul.mubr.msk.f32.vlgmr.msra.gmra.mrb[76].mxu0 %vm520_vm0, %v7582_v59  ;;  %v7584_v6 = vld [vmem:[#allocation2 + $0x164] sm:$0xff]  ;;  %v7585_v46 = vld [vmem:[#allocation2 + $0x16c] sm:$0xff]  ;;  %v7566_v48 = vld [vmem:[#allocation2 + $0x15b] sm:$0xff] }
 0x82e   : > { %16901 = vmatprep.mubr.msk.f32.mxu0 %vm520_vm0, %v7583_v39  ;;  %17987 = vmatpush3.bf16.msra.mxu0 %v21280_v26  ;;  %v7586_v26 = vld [vmem:[#allocation2 + $0x174] sm:$0xff]  ;;  %v7587_v49 = vld [vmem:[#allocation2 + $0x17c] sm:$0xff]  ;;  %v7588_v5 = vld [vmem:[#allocation2 + $0x184] sm:$0xff] }
 0x82f   : > { %17989 = vmatprep.subr.bf16.mxu0 %v17988_v21  ;;  %v7589_v23 = vld [vmem:[#allocation2 + $0x18c] sm:$0xff]  ;;  %v7590_v14 = vld [vmem:[#allocation2 + $0x194] sm:$0xff]  ;;  %v7567_v37 = vld [vmem:[#allocation2 + $0x163] sm:$0xff] }
 0x830   : > { %v7565_v60 = vld [vmem:[#allocation2 + $0x153] sm:$0xff]  ;;  %v7568_v16 = vld [vmem:[#allocation2 + $0x16b] sm:$0xff]  ;;  %v7570_v8 = vld [vmem:[#allocation2 + $0x17b] sm:$0xff] }
 0x831   : > { %16902 = vmatmul.mubr.msk.f32.gmra.mrb[78].mxu0 %vm520_vm0, %v7584_v6  ;;  %v7569_v19 = vld [vmem:[#allocation2 + $0x173] sm:$0xff]  ;;  %v7571_v0 = vld [vmem:[#allocation2 + $0x183] sm:$0xff]  ;;  %v7572_v17 = vld [vmem:[#allocation2 + $0x18b] sm:$0xff] }
 0x832   : > { %16904 = vmatprep.mubr.msk.f32.mxu0 %vm520_vm0, %v7585_v46  ;;  %17991 = vmatpush3.bf16.msra.mxu0 %v17988_v21  ;;  %v7573_v52 = vld [vmem:[#allocation2 + $0x193] sm:$0xff]  ;;  %v7890_v22 = vld [vmem:[#allocation2 + $0x15d] sm:$0xff]  ;;  %v7891_v58 = vld [vmem:[#allocation2 + $0x165] sm:$0xff] }
 0x833   : > { %17993 = vmatprep.subr.bf16.mxu0 %v17992_v34  ;;  %v7889_v42 = vld [vmem:[#allocation2 + $0x155] sm:$0xff]  ;;  %v7892_v62 = vld [vmem:[#allocation2 + $0x16d] sm:$0xff]  ;;  %v7894_v13 = vld [vmem:[#allocation2 + $0x17d] sm:$0xff] }
 0x834   : > { %v7893_v47 = vld [vmem:[#allocation2 + $0x175] sm:$0xff]  ;;  %v7895_v28 = vld [vmem:[#allocation2 + $0x185] sm:$0xff]  ;;  %v7896_v35 = vld [vmem:[#allocation2 + $0x18d] sm:$0xff] }
 0x835   : > { %16905 = vmatmul.mubr.msk.f32.gmra.mrb[80].mxu0 %vm520_vm0, %v7586_v26  ;;  %v7897_v29 = vld [vmem:[#allocation2 + $0x195] sm:$0xff]  ;;  %v13932_v21 = vld [vmem:[%s22702_s1 + $0x2a0] sm:$0xff] }
 0x836   : > { %16907 = vmatprep.mubr.msk.f32.mxu0 %vm520_vm0, %v7587_v49  ;;  %17995 = vmatpush3.bf16.msra.mxu0 %v17992_v34  ;;  %v18032_v59 = vpack.c.bf16 %v13933_v63, %v13932_v21  ;;  %v8069_v39 = vld [vmem:[#allocation2 + $0x19d] sm:$0xff]  ;;  %v8234_v26 = vld [vmem:[#allocation2 + $0x166] sm:$0xff]  ;;  %v18076_v21 = vpack.c.bf16 %v13985_v4, %v13984_v38 }
 0x837   : > { %17997 = vmatprep.subr.bf16.mxu0 %v17996_v10  ;;  %v13935_v34 = vld [vmem:[%s22702_s1 + $0x2b8] sm:$0xff]  ;;  %v13936_v46 = vld [vmem:[%s22702_s1 + $0x2c0] sm:$0xff] }
 0x838   : > { %v8232_v6 = vld [vmem:[#allocation2 + $0x156] sm:$0xff]  ;;  %v18036_v27 = vpack.c.bf16 %v13935_v34, %v13934_v41  ;;  %v8233_v32 = vld [vmem:[#allocation2 + $0x15e] sm:$0xff] }
 0x839   : > { %16908 = vmatmul.mubr.msk.f32.gmra.mrb[82].mxu0 %vm520_vm0, %v7588_v5  ;;  %v8235_v5 = vld [vmem:[#allocation2 + $0x16e] sm:$0xff]  ;;  %v8237_v57 = vld [vmem:[#allocation2 + $0x17e] sm:$0xff]  ;;  %v8240_v12 = vld [vmem:[#allocation2 + $0x196] sm:$0xff] }
 0x83a   : > { %16910 = vmatprep.mubr.msk.f32.mxu0 %vm520_vm0, %v7589_v23  ;;  %v13948_v23 = vld [vmem:[%s22702_s1 + $0x2d0] sm:$0xff]  ;;  %v8241_v30 = vld [vmem:[#allocation2 + $0x19e] sm:$0xff] }
 0x83b   : > { %v8405_v55 = vld [vmem:[#allocation2 + $0x15f] sm:$0xff]  ;;  %v8412_v50 = vld [vmem:[#allocation2 + $0x197] sm:$0xff] }
 0x83c   : > { %v8409_v44 = vld [vmem:[#allocation2 + $0x17f] sm:$0xff]  ;;  %v8754_v41 = vld [vmem:[#allocation2 + $0x190] sm:$0xff] }
 0x83d   : > { %16911 = vmatmul.mubr.msk.f32.gmra.mrb[84].mxu0 %vm520_vm0, %v7590_v14  ;;  %v8236_v14 = vld [vmem:[#allocation2 + $0x176] sm:$0xff]  ;;  %v8413_v15 = vld [vmem:[#allocation2 + $0x19f] sm:$0xff] }
 0x83e   : > { %16925 = vmatprep.mubr.msk.f32.mxu0 %vm520_vm0, %v7564_v9  ;;  %v13949_v9 = vld [vmem:[%s22702_s1 + $0x2d8] sm:$0xff]  ;;  %v8748_v24 = vld [vmem:[#allocation2 + $0x160] sm:$0xff] }
 0x83f   : > { %v18044_v7 = vpack.c.bf16 %v13949_v9, %v13948_v23  ;;  %v8751_v63 = vld [vmem:[#allocation2 + $0x178] sm:$0xff] }
 0x840   : > { %v8755_v34 = vld [vmem:[#allocation2 + $0x198] sm:$0xff] }
 0x841   : > { %16926 = vmatmul.mubr.msk.f32.vlgmr.msra.gmra.mrb[76].mxu0 %vm520_vm0, %v7565_v60  ;;  %v8239_v60 = vld [vmem:[#allocation2 + $0x18e] sm:$0xff]  ;;  %v8927_v9 = vld [vmem:[#allocation2 + $0x199] sm:$0xff] }
 0x842   : > { %16928 = vmatprep.mubr.msk.f32.mxu0 %vm520_vm0, %v7566_v48  ;;  %17999 = vmatpush3.bf16.msra.mxu0 %v17996_v10  ;;  %v13937_v10 = vld [vmem:[%s22702_s1 + $0x2c8] sm:$0xff]  ;;  %v13950_v48 = vld [vmem:[%s22702_s1 + $0x2e0] sm:$0xff]  ;;  %v8926_v23 = vld [vmem:[#allocation2 + $0x191] sm:$0xff] }
 0x843   : > { %18001 = vmatprep.subr.bf16.mxu0 %v18000_v61  ;;  %v18040_v49 = vpack.c.bf16 %v13937_v10, %v13936_v46  ;;  %v8921_v46 = vld [vmem:[#allocation2 + $0x169] sm:$0xff]  ;;  %v8922_v10 = vld [vmem:[#allocation2 + $0x171] sm:$0xff] }
 0x845   : > { %16929 = vmatmul.mubr.msk.f32.gmra.mrb[78].mxu0 %vm520_vm0, %v7567_v37  ;;  %v8404_v37 = vld [vmem:[#allocation2 + $0x157] sm:$0xff] }
 0x846   : > { %16931 = vmatprep.mubr.msk.f32.mxu0 %vm520_vm0, %v7568_v16  ;;  %18003 = vmatpush3.bf16.msra.mxu0 %v18000_v61  ;;  %v8238_v61 = vld [vmem:[#allocation2 + $0x186] sm:$0xff]  ;;  %v13952_v16 = vld [vmem:[%s22702_s1 + $0x2f0] sm:$0xff] }
 0x847   : > { %18005 = vmatprep.subr.bf16.mxu0 %v18004_v51 }
 0x849   : > { %16932 = vmatmul.mubr.msk.f32.gmra.mrb[80].mxu0 %vm520_vm0, %v7569_v19  ;;  %v8406_v19 = vld [vmem:[#allocation2 + $0x167] sm:$0xff] }
 0x84a   : > { %16934 = vmatprep.mubr.msk.f32.mxu0 %vm520_vm0, %v7570_v8  ;;  %18007 = vmatpush3.bf16.msra.mxu0 %v18004_v51  ;;  %v13951_v51 = vld [vmem:[%s22702_s1 + $0x2e8] sm:$0xff] }
 0x84b   : > { %18009 = vmatprep.subr.bf16.mxu0 %v18008_v54  ;;  %v18048_v1 = vpack.c.bf16 %v13951_v51, %v13950_v48 }
 0x84d   : > { %16935 = vmatmul.mubr.msk.f32.gmra.mrb[82].mxu0 %vm520_vm0, %v7571_v0  ;;  %v8407_v0 = vld [vmem:[#allocation2 + $0x16f] sm:$0xff] }
 0x84e   : > { %16937 = vmatprep.mubr.msk.f32.mxu0 %vm520_vm0, %v7572_v17  ;;  %v13964_v17 = vld [vmem:[%s22702_s1 + $0x300] sm:$0xff] }
 0x851   : > { %16938 = vmatmul.mubr.msk.f32.gmra.mrb[84].mxu0 %vm520_vm0, %v7573_v52  ;;  %v8408_v52 = vld [vmem:[#allocation2 + $0x177] sm:$0xff] }
 0x852   : > { %16952 = vmatprep.mubr.msk.f32.mxu0 %vm520_vm0, %v7888_v33  ;;  %v13965_v33 = vld [vmem:[%s22702_s1 + $0x308] sm:$0xff] }
 0x853   : > { %v18056_v43 = vpack.c.bf16 %v13965_v33, %v13964_v17 }
 0x855   : > { %16953 = vmatmul.mubr.msk.f32.vlgmr.msra.gmra.mrb[76].mxu0 %vm520_vm0, %v7889_v42 }
 0x856   : > { %16955 = vmatprep.mubr.msk.f32.mxu0 %vm520_vm0, %v7890_v22  ;;  %18011 = vmatpush3.bf16.msra.mxu0 %v18008_v54  ;;  %v13953_v54 = vld [vmem:[%s22702_s1 + $0x2f8] sm:$0xff] }
 0x857   : > { %18013 = vmatprep.subr.bf16.mxu0 %v18012_v18  ;;  %v18052_v8 = vpack.c.bf16 %v13953_v54, %v13952_v16 }
 0x859   : > { %16956 = vmatmul.mubr.msk.f32.gmra.mrb[78].mxu0 %vm520_vm0, %v7891_v58 }
 0x85a   : > { %16958 = vmatprep.mubr.msk.f32.mxu0 %vm520_vm0, %v7892_v62  ;;  %18015 = vmatpush3.bf16.msra.mxu0 %v18012_v18  ;;  %v8410_v18 = vld [vmem:[#allocation2 + $0x187] sm:$0xff] }
 0x85b   : > { %18017 = vmatprep.subr.bf16.mxu0 %v18016_v25 }
 0x85d   : > { %16959 = vmatmul.mubr.msk.f32.gmra.mrb[80].mxu0 %vm520_vm0, %v7893_v47 }
 0x85e   : > { %16961 = vmatprep.mubr.msk.f32.mxu0 %vm520_vm0, %v7894_v13  ;;  %18019 = vmatpush3.bf16.msra.mxu0 %v18016_v25  ;;  %v13967_v25 = vld [vmem:[%s22702_s1 + $0x318] sm:$0xff] }
 0x85f   : > { %18021 = vmatprep.subr.bf16.mxu0 %v18020_v36 }
 0x861   : > { %16962 = vmatmul.mubr.msk.f32.gmra.mrb[82].mxu0 %vm520_vm0, %v7895_v28 }
 0x862   : > { %16964 = vmatprep.mubr.msk.f32.mxu0 %vm520_vm0, %v7896_v35 }
 0x865   : > { %16965 = vmatmul.mubr.msk.f32.gmra.mrb[84].mxu0 %vm520_vm0, %v7897_v29 }
 0x866   : > { %16979 = vmatprep.mubr.msk.f32.mxu0 %vm520_vm0, %v7889_v42  ;;  %v8411_v42 = vld [vmem:[#allocation2 + $0x18f] sm:$0xff] }
 0x869   : > { %16980 = vmatmul.mubr.msk.f32.vlgmr.msra.gmra.mrb[76].mxu0 %vm520_vm0, %v7890_v22  ;;  %v13966_v22 = vld [vmem:[%s22702_s1 + $0x310] sm:$0xff] }
 0x86a   : > { %16982 = vmatprep.mubr.msk.f32.mxu0 %vm520_vm0, %v7891_v58  ;;  %18023 = vmatpush3.bf16.msra.mxu0 %v18020_v36  ;;  %v18060_v58 = vpack.c.bf16 %v13967_v25, %v13966_v22  ;;  %v13980_v36 = vld [vmem:[%s22702_s1 + $0x330] sm:$0xff] }
 0x86b   : > { %18025 = vmatprep.subr.bf16.mxu0 %v18024_v40 }
 0x86d   : > { %16983 = vmatmul.mubr.msk.f32.gmra.mrb[78].mxu0 %vm520_vm0, %v7892_v62  ;;  %v18064_v62 = vpack.c.bf16 %v13969_v31, %v13968_v56 }
 0x86e   : > { %16985 = vmatprep.mubr.msk.f32.mxu0 %vm520_vm0, %v7893_v47  ;;  %18027 = vmatpush3.bf16.msra.mxu0 %v18024_v40  ;;  %v13981_v47 = vld [vmem:[%s22702_s1 + $0x338] sm:$0xff]  ;;  %v8749_v40 = vld [vmem:[#allocation2 + $0x168] sm:$0xff] }
 0x86f   : > { %18029 = vmatprep.subr.bf16.mxu0 %v18028_v20 }
 0x871   : > { %16986 = vmatmul.mubr.msk.f32.gmra.mrb[80].mxu0 %vm520_vm0, %v7894_v13  ;;  %v18068_v13 = vpack.c.bf16 %v13981_v47, %v13980_v36 }
 0x872   : > { %16988 = vmatprep.mubr.msk.f32.mxu0 %vm520_vm0, %v7895_v28  ;;  %18031 = vmatpush3.bf16.msra.mxu0 %v18028_v20  ;;  %v8585_v28 = vld [vmem:[#allocation2 + $0x1a7] sm:$0xff]  ;;  %v8750_v20 = vld [vmem:[#allocation2 + $0x170] sm:$0xff] }
 0x873   : > { %18033 = vmatprep.subr.bf16.mxu0 %v18032_v59 }
 0x875   : > { %16989 = vmatmul.mubr.msk.f32.gmra.mrb[82].mxu0 %vm520_vm0, %v7896_v35  ;;  %v13982_v35 = vld [vmem:[%s22702_s1 + $0x340] sm:$0xff] }
 0x876   : > { %16991 = vmatprep.mubr.msk.f32.mxu0 %vm520_vm0, %v7897_v29  ;;  %v13983_v29 = vld [vmem:[%s22702_s1 + $0x348] sm:$0xff] }
 0x877   : > { %v18072_v2 = vpack.c.bf16 %v13983_v29, %v13982_v35 }
 0x879   : > { %16992 = vmatmul.mubr.msk.f32.gmra.mrb[84].mxu0 %vm520_vm0, %v8069_v39  ;;  %v8753_v39 = vld [vmem:[#allocation2 + $0x188] sm:$0xff] }
 0x87a   : > { %17006 = vmatprep.mubr.msk.f32.mxu0 %vm520_vm0, %v8232_v6  ;;  %v8756_v6 = vld [vmem:[#allocation2 + $0x1a0] sm:$0xff] }
 0x87d   : > { %17007 = vmatmul.mubr.msk.f32.vlgmr.msra.gmra.mrb[76].mxu0 %vm520_vm0, %v8233_v32  ;;  %v8920_v32 = vld [vmem:[#allocation2 + $0x161] sm:$0xff] }
 0x87e   : > { %17009 = vmatprep.mubr.msk.f32.mxu0 %vm520_vm0, %v8234_v26  ;;  %18035 = vmatpush3.bf16.msra.mxu0 %v18032_v59  ;;  %v8752_v59 = vld [vmem:[#allocation2 + $0x180] sm:$0xff] }
 0x87f   : > { %18037 = vmatprep.subr.bf16.mxu0 %v18036_v27  ;;  %v8923_v26 = vld [vmem:[#allocation2 + $0x179] sm:$0xff] }
 0x881   : > { %17010 = vmatmul.mubr.msk.f32.gmra.mrb[78].mxu0 %vm520_vm0, %v8235_v5  ;;  %v8925_v5 = vld [vmem:[#allocation2 + $0x189] sm:$0xff] }
 0x882   : > { %17012 = vmatprep.mubr.msk.f32.mxu0 %vm520_vm0, %v8236_v14  ;;  %18039 = vmatpush3.bf16.msra.mxu0 %v18036_v27  ;;  %v8757_v27 = vld [vmem:[#allocation2 + $0x1a8] sm:$0xff] }
 0x883   : > { %18041 = vmatprep.subr.bf16.mxu0 %v18040_v49  ;;  %v8928_v14 = vld [vmem:[#allocation2 + $0x1a1] sm:$0xff] }
 0x885   : > { %17013 = vmatmul.mubr.msk.f32.gmra.mrb[80].mxu0 %vm520_vm0, %v8237_v57  ;;  %v21532_v57 = vld [vmem:[%s22703_s2 + $0x1] ss:$0 sm:$0xff] }
 0x886   : > { %17015 = vmatprep.mubr.msk.f32.mxu0 %vm520_vm0, %v8238_v61  ;;  %18043 = vmatpush3.bf16.msra.mxu0 %v18040_v49  ;;  %v8924_v49 = vld [vmem:[#allocation2 + $0x181] sm:$0xff] }
 0x887   : > { %18045 = vmatprep.subr.bf16.mxu0 %v18044_v7 }
 0x889   : > { %17016 = vmatmul.mubr.msk.f32.gmra.mrb[82].mxu0 %vm520_vm0, %v8239_v60 }
 0x88a   : > { %17018 = vmatprep.mubr.msk.f32.mxu0 %vm520_vm0, %v8240_v12 }
 0x88d   : > { %17019 = vmatmul.mubr.msk.f32.gmra.mrb[84].mxu0 %vm520_vm0, %v8241_v30 }
 0x88e   : > { %17033 = vmatprep.mubr.msk.f32.mxu0 %vm520_vm0, %v8404_v37 }
 0x891   : > { %17034 = vmatmul.mubr.msk.f32.vlgmr.msra.gmra.mrb[76].mxu0 %vm520_vm0, %v8405_v55 }
 0x892   : > { %17036 = vmatprep.mubr.msk.f32.mxu0 %vm520_vm0, %v8406_v19  ;;  %18047 = vmatpush3.bf16.msra.mxu0 %v18044_v7  ;;  %v8929_v7 = vld [vmem:[#allocation2 + $0x1a9] sm:$0xff] }
 0x893   : > { %18049 = vmatprep.subr.bf16.mxu0 %v18048_v1 }
 0x895   : > { %17037 = vmatmul.mubr.msk.f32.gmra.mrb[78].mxu0 %vm520_vm0, %v8407_v0 }
 0x896   : > { %17039 = vmatprep.mubr.msk.f32.mxu0 %vm520_vm0, %v8408_v52  ;;  %18051 = vmatpush3.bf16.msra.mxu0 %v18048_v1 }
 0x897   : > { %18053 = vmatprep.subr.bf16.mxu0 %v18052_v8 }
 0x899   : > { %17040 = vmatmul.mubr.msk.f32.gmra.mrb[80].mxu0 %vm520_vm0, %v8409_v44 }
 0x89a   : > { %17042 = vmatprep.mubr.msk.f32.mxu0 %vm520_vm0, %v8410_v18  ;;  %18055 = vmatpush3.bf16.msra.mxu0 %v18052_v8 }
 0x89b   : > { %18057 = vmatprep.subr.bf16.mxu0 %v18056_v43 }
 0x89d   : > { %17043 = vmatmul.mubr.msk.f32.gmra.mrb[82].mxu0 %vm520_vm0, %v8411_v42 }
 0x89e   : > { %17045 = vmatprep.mubr.msk.f32.mxu0 %vm520_vm0, %v8412_v50 }
 0x8a1   : > { %17046 = vmatmul.mubr.msk.f32.gmra.mrb[84].mxu0 %vm520_vm0, %v8413_v15 }
 0x8a2   : > { %17060 = vmatprep.mubr.msk.f32.mxu0 %vm520_vm0, %v8405_v55 }
 0x8a5   : > { %17061 = vmatmul.mubr.msk.f32.vlgmr.msra.gmra.mrb[76].mxu0 %vm520_vm0, %v8406_v19 }
 0x8a6   : > { %17063 = vmatprep.mubr.msk.f32.mxu0 %vm520_vm0, %v8407_v0  ;;  %18059 = vmatpush3.bf16.msra.mxu0 %v18056_v43 }
 0x8a7   : > { %18061 = vmatprep.subr.bf16.mxu0 %v18060_v58 }
 0x8a9   : > { %17064 = vmatmul.mubr.msk.f32.gmra.mrb[78].mxu0 %vm520_vm0, %v8408_v52 }
 0x8aa   : > { %17066 = vmatprep.mubr.msk.f32.mxu0 %vm520_vm0, %v8409_v44  ;;  %18063 = vmatpush3.bf16.msra.mxu0 %v18060_v58 }
 0x8ab   : > { %18065 = vmatprep.subr.bf16.mxu0 %v18064_v62 }
 0x8ad   : > { %17067 = vmatmul.mubr.msk.f32.gmra.mrb[80].mxu0 %vm520_vm0, %v8410_v18 }
 0x8ae   : > { %17069 = vmatprep.mubr.msk.f32.mxu0 %vm520_vm0, %v8411_v42  ;;  %18067 = vmatpush3.bf16.msra.mxu0 %v18064_v62 }
 0x8af   : > { %18069 = vmatprep.subr.bf16.mxu0 %v18068_v13 }
 0x8b1   : > { %17070 = vmatmul.mubr.msk.f32.gmra.mrb[82].mxu0 %vm520_vm0, %v8412_v50 }
 0x8b2   : > { %17072 = vmatprep.mubr.msk.f32.mxu0 %vm520_vm0, %v8413_v15 }
 0x8b5   : > { %17073 = vmatmul.mubr.msk.f32.gmra.mrb[84].mxu0 %vm520_vm0, %v8585_v28 }
 0x8b6   : > { %17087 = vmatprep.mubr.msk.f32.mxu0 %vm520_vm0, %v8748_v24 }
 0x8b9   : > { %17088 = vmatmul.mubr.msk.f32.vlgmr.msra.gmra.mrb[76].mxu0 %vm520_vm0, %v8749_v40 }
 0x8ba   : > { %17090 = vmatprep.mubr.msk.f32.mxu0 %vm520_vm0, %v8750_v20  ;;  %18071 = vmatpush3.bf16.msra.mxu0 %v18068_v13 }
 0x8bb   : > { %18073 = vmatprep.subr.bf16.mxu0 %v18072_v2 }
 0x8bd   : > { %17091 = vmatmul.mubr.msk.f32.gmra.mrb[78].mxu0 %vm520_vm0, %v8751_v63 }
 0x8be   : > { %17093 = vmatprep.mubr.msk.f32.mxu0 %vm520_vm0, %v8752_v59  ;;  %18075 = vmatpush3.bf16.msra.mxu0 %v18072_v2 }
 0x8bf   : > { %18077 = vmatprep.subr.bf16.mxu0 %v18076_v21 }
 0x8c1   : > { %17094 = vmatmul.mubr.msk.f32.gmra.mrb[80].mxu0 %vm520_vm0, %v8753_v39 }
 0x8c2   : > { %17096 = vmatprep.mubr.msk.f32.mxu0 %vm520_vm0, %v8754_v41  ;;  %18079 = vmatpush3.bf16.msra.mxu0 %v18076_v21 }
 0x8c3   : > { %18080 = vmatprep.subr.bf16.mxu0 %v18695_v3 }
 0x8c5   : > { %17097 = vmatmul.mubr.msk.f32.gmra.mrb[82].mxu0 %vm520_vm0, %v8755_v34 }
 0x8c6   : > { %17099 = vmatprep.mubr.msk.f32.mxu0 %vm520_vm0, %v8756_v6 }
 0x8c9   : > { %17100 = vmatmul.mubr.msk.f32.gmra.mrb[84].mxu0 %vm520_vm0, %v8757_v27  ;;  %v9271_v27 = vld [vmem:[%s22705_s4] sm:$0xff] }
 0x8ca   : > { %17114 = vmatprep.mubr.msk.f32.mxu0 %vm520_vm0, %v8920_v32  ;;  %v9272_v32 = vld [vmem:[%s22705_s4 + $0x8] sm:$0xff] }
 0x8cd   : > { %17115 = vmatmul.mubr.msk.f32.vlgmr.msra.gmra.mrb[76].mxu0 %vm520_vm0, %v8921_v46 }
 0x8ce   : > { %17117 = vmatprep.mubr.msk.f32.mxu0 %vm520_vm0, %v8922_v10  ;;  %v7563_v10 = vld [vmem:[%s22704_s3 + $0x1] sm:$0x1] }
 0x8d1   : > { %17118 = vmatmul.mubr.msk.f32.gmra.mrb[78].mxu0 %vm520_vm0, %v8923_v26 }
 0x8d2   : > { %17120 = vmatprep.mubr.msk.f32.mxu0 %vm520_vm0, %v8924_v49 }
 0x8d5   : > { %17121 = vmatmul.mubr.msk.f32.gmra.mrb[80].mxu0 %vm520_vm0, %v8925_v5 }
 0x8d6   : > { %17123 = vmatprep.mubr.msk.f32.mxu0 %vm520_vm0, %v8926_v23  ;;  %v21575_v23 = vpack.c.bf16 %v9272_v32, %v9271_v27 }
 0x8d9   : > { %17124 = vmatmul.mubr.msk.f32.gmra.mrb[82].mxu0 %vm520_vm0, %v8927_v9  ;;  %v9273_v9 = vld [vmem:[%s22705_s4 + $0x10] sm:$0xff] }
 0x8da   : > { %17126 = vmatprep.mubr.msk.f32.mxu0 %vm520_vm0, %v8928_v14  ;;  %v9274_v14 = vld [vmem:[%s22705_s4 + $0x18] sm:$0xff] }
 0x8dd   : > { %17127 = vmatmul.mubr.msk.f32.gmra.mrb[84].mxu0 %vm520_vm0, %v8929_v7 }
 0x8de   : > { %17149 = vmatprep.mubr.msk.f32.mxu0 %vm18696_vm1, %v18697_v11 }
 0x9a0   : > { %v17116_v61 = vpop.f32.mrb[76].mxu0 }
 0x9a1   : > { %v9098_v60 = vadd.f32 %v17116_v61, %v21532_v57  ;;  %v9033_v12 = vpop.f32.mrb[77].mxu0 }
 0x9a2   : > { %v9097_v30 = vadd.f32 %v21532_v57, %v9033_v12  ;;  %v9275_v12 = vld [vmem:[%s22705_s4 + $0x20] sm:$0xff] }
 0x9a3   : > { %9108 = vst.msk [vmem:[#allocation3 + $0x8] sm:$0xff] %vm520_vm0, %v9098_v60  ;;  %v9192_v48 = vmul.f32 %v9098_v60, %v9098_v60 }
 0x9a4   : > { %9107 = vst.msk [vmem:[#allocation3] sm:$0xff] %vm520_vm0, %v9097_v30  ;;  %v18081_v51 = vpack.c.bf16 %v9098_v60, %v9097_v30  ;;  %v9191_v37 = vmul.f32 %v9097_v30, %v9097_v30  ;;  %v17119_v1 = vpop.f32.mrb[78].mxu0  ;;  %v21588_v60 = vpack.c.bf16 %v9274_v14, %v9273_v9  ;;  %v9276_v30 = vld [vmem:[%s22705_s4 + $0x28] sm:$0xff] }
 0x9a5   : > { %v9100_v55 = vadd.f32 %v17119_v1, %v21532_v57  ;;  %v9043_v16 = vpop.f32.mrb[79].mxu0 }
 0x9a6   : > { %v18096_v54 = vpack.c.bf16 %v9192_v48, %v9191_v37  ;;  %v9099_v19 = vadd.f32 %v21532_v57, %v9043_v16  ;;  %18082 = vmatpush3.bf16.msra.mxu0 %v18081_v51  ;;  %v21601_v48 = vpack.c.bf16 %v9276_v30, %v9275_v12  ;;  %v9430_v16 = vld [vmem:[%s22706_s5] sm:$0xf]  ;;  %v14006_v12 = vld [vmem:[%s22702_s1 + $0x368] sm:$0xff] }
 0x9a7   : > { %9110 = vst.msk [vmem:[#allocation3 + $0x18] sm:$0xff] %vm520_vm0, %v9100_v55  ;;  %v9194_v8 = vmul.f32 %v9100_v55, %v9100_v55  ;;  %18083 = vmatprep.subr.bf16.mxu0 %v18695_v3 }
 0x9a8   : > { %9109 = vst.msk [vmem:[#allocation3 + $0x10] sm:$0xff] %vm520_vm0, %v9099_v19  ;;  %v18084_v0 = vpack.c.bf16 %v9100_v55, %v9099_v19  ;;  %v9193_v17 = vmul.f32 %v9099_v19, %v9099_v19  ;;  %v17122_v33 = vpop.f32.mrb[80].mxu0  ;;  %18097 = vmatpush3.bf16.msra.mxu1 %v18096_v54 }
 0x9a9   : > { %v9102_v52 = vadd.f32 %v17122_v33, %v21532_v57  ;;  %v9053_v43 = vpop.f32.mrb[81].mxu0  ;;  %18098 = vmatprep.subr.bf16.mxu1 %v18695_v3 }
 0x9aa   : > { %v18099_v44 = vpack.c.bf16 %v9194_v8, %v9193_v17  ;;  %v9101_v18 = vadd.f32 %v21532_v57, %v9053_v43  ;;  %18085 = vmatpush3.bf16.msra.mxu0 %v18084_v0 }
 0x9ab   : > { %v9580_v42 = vld [vmem:[#allocation3] ss:$2 sm:$0xff]  ;;  %v9585_v50 = vld [vmem:[#allocation3 + $0x1] ss:$2 sm:$0xff]  ;;  %9112 = vst.msk [vmem:[#allocation3 + $0x28] sm:$0xff] %vm520_vm0, %v9102_v52  ;;  %v9196_v15 = vmul.f32 %v9102_v52, %v9102_v52  ;;  %18086 = vmatprep.subr.bf16.mxu0 %v18695_v3 }
 0x9ac   : > { %v9590_v22 = vmax.f32 %v9580_v42, %v9585_v50  ;;  %9111 = vst.msk [vmem:[#allocation3 + $0x20] sm:$0xff] %vm520_vm0, %v9101_v18  ;;  %v18087_v25 = vpack.c.bf16 %v9102_v52, %v9101_v18  ;;  %v9195_v58 = vmul.f32 %v9101_v18, %v9101_v18  ;;  %v17125_v56 = vpop.f32.mrb[82].mxu0  ;;  %18100 = vmatpush3.bf16.msra.mxu1 %v18099_v44  ;;  %v14011_v42 = vld [vmem:[%s22702_s1 + $0x390] sm:$0xff]  ;;  %v14012_v50 = vld [vmem:[%s22702_s1 + $0x398] sm:$0xff] }
 0x9ad   : > { %v9104_v31 = vadd.f32 %v17125_v56, %v21532_v57  ;;  %v9063_v62 = vpop.f32.mrb[83].mxu0  ;;  %18101 = vmatprep.subr.bf16.mxu1 %v18695_v3  ;;  %v14015_v56 = vld [vmem:[%s22702_s1 + $0x3b0] sm:$0xff] }
 0x9ae   : > { %9595 = vst.msk [vmem:[#allocation4] sm:$0xff] %vm520_vm0, %v9590_v22  ;;  %v18102_v36 = vpack.c.bf16 %v9196_v15, %v9195_v58  ;;  %v9103_v47 = vadd.f32 %v21532_v57, %v9063_v62  ;;  %18088 = vmatpush3.bf16.msra.mxu0 %v18087_v25  ;;  %v14013_v15 = vld [vmem:[%s22702_s1 + $0x3a0] sm:$0xff]  ;;  %v18129_v22 = vpack.c.bf16 %v14012_v50, %v14011_v42  ;;  %v14014_v25 = vld [vmem:[%s22702_s1 + $0x3a8] sm:$0xff] }
 0x9af   : > { %v9581_v13 = vld [vmem:[#allocation3 + $0x10] ss:$2 sm:$0xff]  ;;  %v9586_v28 = vld [vmem:[#allocation3 + $0x11] ss:$2 sm:$0xff]  ;;  %9114 = vst.msk [vmem:[#allocation3 + $0x38] sm:$0xff] %vm520_vm0, %v9104_v31  ;;  %v9198_v35 = vmul.f32 %v9104_v31, %v9104_v31  ;;  %18089 = vmatprep.subr.bf16.mxu0 %v18695_v3  ;;  %v18132_v58 = vpack.c.bf16 %v14014_v25, %v14013_v15  ;;  %v14027_v50 = vld [vmem:[%s22702_s1 + $0x3e0] sm:$0xff] }
 0x9b0   : > { %v9591_v29 = vmax.f32 %v9581_v13, %v9586_v28  ;;  %9113 = vst.msk [vmem:[#allocation3 + $0x30] sm:$0xff] %vm520_vm0, %v9103_v47  ;;  %v18090_v24 = vpack.c.bf16 %v9104_v31, %v9103_v47  ;;  %v9197_v2 = vmul.f32 %v9103_v47, %v9103_v47  ;;  %v17128_v40 = vpop.f32.mrb[84].mxu0  ;;  %18103 = vmatpush3.bf16.msra.mxu1 %v18102_v36  ;;  %v14016_v31 = vld [vmem:[%s22702_s1 + $0x3b8] sm:$0xff]  ;;  %v14028_v15 = vld [vmem:[%s22702_s1 + $0x3e8] sm:$0xff] }
 0x9b1   : > { %v9106_v38 = vadd.f32 %v17128_v40, %v21532_v57  ;;  %v9073_v4 = vpop.f32.mrb[85].mxu0  ;;  %18104 = vmatprep.subr.bf16.mxu1 %v18695_v3  ;;  %v18135_v62 = vpack.c.bf16 %v14016_v31, %v14015_v56  ;;  %v18153_v25 = vpack.c.bf16 %v14028_v15, %v14027_v50  ;;  %v14033_v56 = vld [vmem:[%s22702_s1 + $0x3f8] sm:$0xff]  ;;  %v14072_v15 = vld [vmem:[%s22702_s1 + $0x4d0] sm:$0xff] }
 0x9b2   : > { %9596 = vst.msk [vmem:[#allocation4 + $0x8] sm:$0xff] %vm520_vm0, %v9591_v29  ;;  %v18105_v20 = vpack.c.bf16 %v9198_v35, %v9197_v2  ;;  %v9105_v21 = vadd.f32 %v21532_v57, %v9073_v4  ;;  %18091 = vmatpush3.bf16.msra.mxu0 %v18090_v24 }
 0x9b3   : > { %v9582_v63 = vld [vmem:[#allocation3 + $0x20] ss:$2 sm:$0xff]  ;;  %v9587_v59 = vld [vmem:[#allocation3 + $0x21] ss:$2 sm:$0xff]  ;;  %9116 = vst.msk [vmem:[#allocation3 + $0x48] sm:$0xff] %vm520_vm0, %v9106_v38  ;;  %v9200_v39 = vmul.f32 %v9106_v38, %v9106_v38  ;;  %18092 = vmatprep.subr.bf16.mxu0 %v18695_v3 }
 0x9b4   : > { %v9592_v41 = vmax.f32 %v9582_v63, %v9587_v59  ;;  %9115 = vst.msk [vmem:[#allocation3 + $0x40] sm:$0xff] %vm520_vm0, %v9105_v21  ;;  %v18093_v34 = vpack.c.bf16 %v9106_v38, %v9105_v21  ;;  %v9199_v6 = vmul.f32 %v9105_v21, %v9105_v21  ;;  %18106 = vmatpush3.bf16.msra.mxu1 %v18105_v20 }
 0x9b5   : > { %18107 = vmatprep.subr.bf16.mxu1 %v18695_v3  ;;  %v9600_v40 = vld [vmem:[#allocation4] sm:$0xf] }
 0x9b6   : > { %9597 = vst.msk [vmem:[#allocation4 + $0x10] sm:$0xff] %vm520_vm0, %v9592_v41  ;;  %v18108_v46 = vpack.c.bf16 %v9200_v39, %v9199_v6  ;;  %18094 = vmatpush3.bf16.msra.mxu0 %v18093_v34 }
 0x9b7   : > { %v9583_v26 = vld [vmem:[#allocation3 + $0x30] ss:$2 sm:$0xff]  ;;  %v9588_v49 = vld [vmem:[#allocation3 + $0x31] ss:$2 sm:$0xff]  ;;  %18209 = vmatprep.subr.bf16.mxu0 %v18695_v3 }
 0x9b8   : > { %v9593_v5 = vmax.f32 %v9583_v26, %v9588_v49  ;;  %18109 = vmatpush3.bf16.msra.mxu1 %v18108_v46 }
 0x9b9   : > { %17150 = vmatmul.mubr.msk.f32.vlgmr.msra.gmra.mrb[86].mxu0 %vm9117_vm5, %v7563_v10  ;;  %18110 = vmatprep.subr.bf16.mxu1 %v18695_v3  ;;  %v9601_v13 = vld [vmem:[#allocation4 + $0x5] sm:$0xf]  ;;  %v9616_v4 = vld [vmem:[#allocation4 + $0xa] sm:$0xf] }
 0x9ba   : > { %9598 = vst.msk [vmem:[#allocation4 + $0x18] sm:$0xff] %vm520_vm0, %v9593_v5  ;;  %17410 = vmatprep.mubr.msk.f32.mxu0 %vm18696_vm1, %v18697_v11  ;;  %v9602_v38 = vmax.f32 %v9600_v40, %v9601_v13  ;;  %v14041_v40 = vld [vmem:[%s22702_s1 + $0x420] sm:$0xff] }
 0x9bb   : > { %v9584_v7 = vld [vmem:[#allocation3 + $0x40] ss:$2 sm:$0xff]  ;;  %v9589_v57 = vld [vmem:[#allocation3 + $0x41] ss:$2 sm:$0xff]  ;;  %17173 = vmatmul.mubr.msk.f32.vlgmr.msra.gmra.mrb[72].mxu1 %vm9117_vm5, %v7563_v10 }
 0x9bc   : > { %v9594_v61 = vmax.f32 %v9584_v7, %v9589_v57  ;;  %18112 = vmatpush3.bf16.msra.mxu1 %v21575_v23  ;;  %17187 = vmatprep.mubr.msk.f32.mxu1 %vm18696_vm1, %v18697_v11 }
 0x9bd   : > { %18113 = vmatprep.subr.bf16.mxu1 %v18695_v3  ;;  %v9617_v28 = vld [vmem:[#allocation4 + $0xf] sm:$0xf]  ;;  %v9623_v20 = vld [vmem:[#allocation4 + $0x14] sm:$0xf] }
 0x9be   : > { %9599 = vst.msk [vmem:[#allocation4 + $0x20] sm:$0xff] %vm520_vm0, %v9594_v61  ;;  %v9618_v21 = vmax.f32 %v9616_v4, %v9617_v28  ;;  %v14005_v61 = vld [vmem:[%s22702_s1 + $0x360] sm:$0xff] }
 0x9bf   : > { %v18138_v30 = vpack.c.bf16 %v14006_v12, %v14005_v61 }
 0x9c0   : > { %18115 = vmatpush3.bf16.msra.mxu1 %v21588_v60 }
 0x9c1   : > { %18116 = vmatprep.subr.bf16.mxu1 %v18695_v3  ;;  %v9624_v29 = vld [vmem:[#allocation4 + $0x19] sm:$0xf] }
 0x9c2   : > { %v9625_v63 = vmax.f32 %v9623_v20, %v9624_v29  ;;  %v14037_v29 = vld [vmem:[%s22702_s1 + $0x418] sm:$0xff] }
 0x9c4   : > { %18118 = vmatpush3.bf16.msra.mxu1 %v21601_v48 }
 0x9c5   : > { %18119 = vmatprep.subr.bf16.mxu1 %v18695_v3  ;;  %v9630_v24 = vld [vmem:[#allocation4 + $0x1e] sm:$0xf]  ;;  %v9631_v2 = vld [vmem:[#allocation4 + $0x23] sm:$0xf] }
 0x9c6   : > { %v9632_v59 = vmax.f32 %v9630_v24, %v9631_v2 }
 0xa8c   : > { %v9187_v51 = vpop.f32.mrb[86].mxu0 }
 0xa8d   : > { %17188 = vmatmul.mubr.msk.f32.vlgmr.msra.gmra.mrb[74].mxu1 %vm520_vm0, %v9187_v51  ;;  %v17151_v37 = vpop.f32.mrb[87].mxu0  ;;  %v14007_v51 = vld [vmem:[%s22702_s1 + $0x370] sm:$0xff] }
 0xa8e   : > { %18121 = vmatpush3.bf16.msra.mxu1 %v21575_v23  ;;  %v9267_v1 = vpop.f32.mrb[72].mxu1  ;;  %17202 = vmatprep.mubr.msk.f32.mxu1 %vm18696_vm1, %v18697_v11  ;;  %v14008_v37 = vld [vmem:[%s22702_s1 + $0x378] sm:$0xff] }
 0xa8f   : > { %18122 = vmatprep.subr.bf16.mxu1 %v18695_v3  ;;  %v17174_v55 = vpop.f32.mrb[73].mxu1 }
 0xa90   : > { %v18141_v55 = vpack.c.bf16 %v14008_v37, %v14007_v51  ;;  %v14060_v51 = vld [vmem:[%s22702_s1 + $0x488] sm:$0xff] }
 0xa92   : > { %18124 = vmatpush3.bf16.msra.mxu1 %v21588_v60 }
 0xa93   : > { %18125 = vmatprep.subr.bf16.mxu1 %v18695_v3 }
 0xa96   : > { %18127 = vmatpush3.bf16.msra.mxu1 %v21601_v48 }
 0xa97   : > { %17205 = vmatprep.subr.mxu1 %v18697_v11 }
 0xa99   : > { %17203 = vmatmul.mubr.msk.f32.vlgmr.msra.gmra.mrb[76].mxu1 %vm520_vm0, %v9267_v1 }
 0xa9a   : > { %17207 = vmatprep.mubr.msk.f32.mxu1 %vm18696_vm1, %v18697_v11  ;;  %17206 = vmatpush3.msk.msra.mxu1 %vm7245_vm3, %v9430_v16 }
 0xa9b   : > { %17210 = vmatprep.subr.mxu1 %v18697_v11 }
 0xb60   : > { %v9346_v54 = vpop.f32.mrb[74].mxu1 }
 0xb61   : > { %v9350_v19 = vmul.f32 0.0013020834, %v9346_v54  ;;  %v17189_v8 = vpop.f32.mrb[75].mxu1  ;;  %v14010_v54 = vld [vmem:[%s22702_s1 + $0x388] sm:$0xff] }
 0xb63   : > { %17208 = vmatmul.mubr.msk.f32.vlgmr.msra.gmra.mrb[78].mxu1 %vm7241_vm4, %v9350_v19  ;;  %v9425_v17 = vmul.f32 %v9350_v19, %v9350_v19 }
 0xb64   : > { %17211 = vmatpush3.msk.msra.mxu1 %vm7245_vm3, %v9430_v16  ;;  %17212 = vmatprep.mubr.msk.f32.mxu1 %vm18696_vm1, %v18697_v11  ;;  %v14009_v16 = vld [vmem:[%s22702_s1 + $0x380] sm:$0xff] }
 0xb65   : > { %18128 = vmatprep.subr.bf16.mxu1 %v18695_v3  ;;  %v18144_v8 = vpack.c.bf16 %v14010_v54, %v14009_v16  ;;  %v14062_v16 = vld [vmem:[%s22702_s1 + $0x498] sm:$0xff] }
 0xb6c   : > { %v9420_v0 = vpop.f32.mrb[76].mxu1 }
 0xb6d   : > { %v9424_v33 = vmul.f32 0.0013020834, %v9420_v0  ;;  %v17204_v52 = vpop.f32.mrb[77].mxu1  ;;  %v14023_v0 = vld [vmem:[%s22702_s1 + $0x3c0] sm:$0xff] }
 0xb6f   : > { %v9426_v43 = vsub.f32 %v9424_v33, %v9425_v17  ;;  %v14024_v17 = vld [vmem:[%s22702_s1 + $0x3c8] sm:$0xff] }
 0xb70   : > { %v18147_v52 = vpack.c.bf16 %v14024_v17, %v14023_v0  ;;  %v14068_v17 = vld [vmem:[%s22702_s1 + $0x4b0] sm:$0xff] }
 0xb71   : > { %v9427_v44 = vmax.f32 %v9426_v43, 0.0  ;;  %v14025_v43 = vld [vmem:[%s22702_s1 + $0x3d0] sm:$0xff] }
 0xb73   : > { %18621 = vrsqrt.f32 %v9427_v44  ;;  %v14026_v44 = vld [vmem:[%s22702_s1 + $0x3d8] sm:$0xff] }
 0xb74   : > { %v18150_v42 = vpack.c.bf16 %v14026_v44, %v14025_v43  ;;  %v14070_v44 = vld [vmem:[%s22702_s1 + $0x4c0] sm:$0xff] }
 0xb7d   : > { %v18622_v18 = vpop.eup %18621 }
 0xb7e   : > { %17213 = vmatmul.mubr.msk.f32.vlgmr.msra.gmra.mrb[80].mxu1 %vm7241_vm4, %v18622_v18 }
 0xb7f   : > { %17227 = vmatprep.mubr.msk.f32.mxu1 %vm18696_vm1, %v18697_v11  ;;  %18130 = vmatpush3.bf16.msra.mxu1 %v18129_v22 }
 0xb80   : > { %18131 = vmatprep.subr.bf16.mxu1 %v18695_v3 }
 0xb83   : > { %18133 = vmatpush3.bf16.msra.mxu1 %v18132_v58  ;;  %v14032_v58 = vld [vmem:[%s22702_s1 + $0x3f0] sm:$0xff] }
 0xb84   : > { %18134 = vmatprep.subr.bf16.mxu1 %v18695_v3 }
 0xb87   : > { %18136 = vmatpush3.bf16.msra.mxu1 %v18135_v62  ;;  %v18156_v62 = vpack.c.bf16 %v14033_v56, %v14032_v58  ;;  %v14077_v56 = vld [vmem:[%s22702_s1 + $0x4e0] sm:$0xff] }
 0xb88   : > { %18137 = vmatprep.subr.bf16.mxu1 %v18695_v3 }
 0xc36   : > { %v9503_v36 = vpop.f32.mrb[78].mxu1 }
 0xc37   : > { %v17209_v47 = vpop.f32.mrb[79].mxu1  ;;  %v9606_v35 = vrot.slane %v9503_v36, %v21286_v53  ;;  %v14034_v36 = vld [vmem:[%s22702_s1 + $0x400] sm:$0xff] }
 0xc38   : > { %v14035_v47 = vld [vmem:[%s22702_s1 + $0x408] sm:$0xff] }
 0xc39   : > { %v9607_v39 = vsub.f32 %v9602_v38, %v9606_v35  ;;  %v9619_v34 = vsub.f32 %v9618_v21, %v9606_v35  ;;  %v9626_v6 = vsub.f32 %v9625_v63, %v9606_v35  ;;  %v9633_v27 = vsub.f32 %v9632_v59, %v9606_v35  ;;  %v14036_v35 = vld [vmem:[%s22702_s1 + $0x410] sm:$0xff]  ;;  %v14042_v38 = vld [vmem:[%s22702_s1 + $0x428] sm:$0xff]  ;;  %v14044_v63 = vld [vmem:[%s22702_s1 + $0x438] sm:$0xff] }
 0xc3a   : > { %v18159_v28 = vpack.c.bf16 %v14035_v47, %v14034_v36  ;;  %v18162_v2 = vpack.c.bf16 %v14037_v29, %v14036_v35  ;;  %v18165_v20 = vpack.c.bf16 %v14042_v38, %v14041_v40  ;;  %v14043_v21 = vld [vmem:[%s22702_s1 + $0x430] sm:$0xff]  ;;  %v14081_v29 = vld [vmem:[%s22702_s1 + $0x500] sm:$0xff] }
 0xc3b   : > { %v14079_v47 = vld [vmem:[%s22702_s1 + $0x4f0] sm:$0xff] }
 0xc3c   : > { %v10348_v40 = vld [vmem:[#allocation2 + $0x1ce] sm:$0xff] }
 0xc51   : > { %v9576_v41 = vpop.f32.mrb[80].mxu1 }
 0xc52   : > { %v9611_v32 = vrot.slane %v9576_v41, %v21286_v53  ;;  %v17214_v46 = vpop.f32.mrb[81].mxu1  ;;  %v14045_v41 = vld [vmem:[%s22702_s1 + $0x440] sm:$0xff] }
 0xc53   : > { %v14051_v46 = vld [vmem:[%s22702_s1 + $0x458] sm:$0xff] }
 0xc54   : > { %v9612_v10 = vmul.f32 %v9611_v32, %v9607_v39  ;;  %v9620_v26 = vmul.f32 %v9619_v34, %v9611_v32  ;;  %v9627_v49 = vmul.f32 %v9626_v6, %v9611_v32  ;;  %v9634_v5 = vmul.f32 %v9633_v27, %v9611_v32  ;;  %v14046_v34 = vld [vmem:[%s22702_s1 + $0x448] sm:$0xff]  ;;  %v14050_v32 = vld [vmem:[%s22702_s1 + $0x450] sm:$0xff] }
 0xc55   : > { %v18168_v39 = vpack.c.bf16 %v14044_v63, %v14043_v21  ;;  %v18171_v27 = vpack.c.bf16 %v14046_v34, %v14045_v41 }
 0xc56   : > { %v9613_v9 = vmax.f32 %v9612_v10, 0.0  ;;  %v9621_v14 = vmax.f32 %v9620_v26, 0.0  ;;  %v9628_v7 = vmax.f32 %v9627_v49, 0.0  ;;  %v9635_v57 = vmax.f32 %v9634_v5, 0.0  ;;  %v14052_v49 = vld [vmem:[%s22702_s1 + $0x460] sm:$0xff]  ;;  %v14053_v5 = vld [vmem:[%s22702_s1 + $0x468] sm:$0xff] }
 0xc57   : > { %v18174_v26 = vpack.c.bf16 %v14051_v46, %v14050_v32 }
 0xc58   : > { %9615 = vst.msk [vmem:[#allocation2 + $0x1b8] sm:$0xf] %vm9614_vm6, %v9613_v9  ;;  %9622 = vst.msk [vmem:[#allocation2 + $0x1be] sm:$0xf] %vm9614_vm6, %v9621_v14  ;;  %v18177_v14 = vpack.c.bf16 %v14053_v5, %v14052_v49 }
 0xc59   : > { %9629 = vst.msk [vmem:[#allocation2 + $0x1c4] sm:$0xf] %vm9614_vm6, %v9628_v7  ;;  %9636 = vst.msk [vmem:[#allocation2 + $0x1ca] sm:$0xf] %vm9614_vm6, %v9635_v57  ;;  %v14054_v7 = vld [vmem:[%s22702_s1 + $0x470] sm:$0xff]  ;;  %v14055_v57 = vld [vmem:[%s22702_s1 + $0x478] sm:$0xff] }
 0xc5a   : > { %v18180_v12 = vpack.c.bf16 %v14055_v57, %v14054_v7 }
 0xc5f   : > { %v9648_v1 = vld [vmem:[#allocation2 + $0x1b2] sm:$0xff]  ;;  %v9649_v19 = vld [vmem:[#allocation2 + $0x1ba] sm:$0xff] }
 0xc60   : > { %17228 = vmatmul.mubr.msk.f32.vlgmr.msra.gmra.mrb[82].mxu1 %vm520_vm0, %v9648_v1  ;;  %v9650_v33 = vld [vmem:[#allocation2 + $0x1c2] sm:$0xff]  ;;  %v9638_v18 = vld [vmem:[#allocation2 + $0x1b1] sm:$0xff]  ;;  %v21710_v22 = vld [vmem:[#allocation2 + $0x1b9] sm:$0xff] }
 0xc61   : > { %18139 = vmatpush3.bf16.msra.mxu1 %v18138_v30  ;;  %17230 = vmatprep.mubr.msk.f32.mxu1 %vm18696_vm1, %v18697_v11  ;;  %v21723_v31 = vld [vmem:[#allocation2 + $0x1c1] sm:$0xff]  ;;  %v9836_v13 = vld [vmem:[#allocation2 + $0x1b3] sm:$0xff] }
 0xc62   : > { %18140 = vmatprep.subr.bf16.mxu1 %v18695_v3  ;;  %v9837_v24 = vld [vmem:[#allocation2 + $0x1bb] sm:$0xff]  ;;  %v9838_v4 = vld [vmem:[#allocation2 + $0x1c3] sm:$0xff] }
 0xc63   : > { %v9938_v59 = vld [vmem:[#allocation2 + $0x1b7] sm:$0xff]  ;;  %v21776_v6 = vld [vmem:[#allocation2 + $0x1bf] sm:$0xff]  ;;  %v21789_v10 = vld [vmem:[#allocation2 + $0x1c7] sm:$0xff] }
 0xc64   : > { %17231 = vmatmul.mubr.msk.f32.gmra.mrb[84].mxu1 %vm520_vm0, %v9649_v19  ;;  %v10040_v9 = vld [vmem:[#allocation2 + $0x1b8] sm:$0xff]  ;;  %v10041_v61 = vld [vmem:[#allocation2 + $0x1c0] sm:$0xff]  ;;  %v10042_v37 = vld [vmem:[#allocation2 + $0x1c8] sm:$0xff] }
 0xc65   : > { %18142 = vmatpush3.bf16.msra.mxu1 %v18141_v55  ;;  %17233 = vmatprep.mubr.msk.f32.mxu1 %vm18696_vm1, %v18697_v11  ;;  %v14059_v30 = vld [vmem:[%s22702_s1 + $0x480] sm:$0xff]  ;;  %v14061_v55 = vld [vmem:[%s22702_s1 + $0x490] sm:$0xff] }
 0xc66   : > { %18143 = vmatprep.subr.bf16.mxu1 %v18695_v3  ;;  %v18183_v1 = vpack.c.bf16 %v14060_v51, %v14059_v30  ;;  %v18186_v54 = vpack.c.bf16 %v14062_v16, %v14061_v55  ;;  %v14063_v19 = vld [vmem:[%s22702_s1 + $0x4a0] sm:$0xff] }
 0xc68   : > { %17234 = vmatmul.mubr.msk.f32.gmra.mrb[86].mxu1 %vm520_vm0, %v9650_v33  ;;  %v14069_v33 = vld [vmem:[%s22702_s1 + $0x4b8] sm:$0xff] }
 0xc69   : > { %18145 = vmatpush3.bf16.msra.mxu1 %v18144_v8  ;;  %17248 = vmatprep.mubr.msk.f32.mxu1 %vm18696_vm1, %v18697_v11  ;;  %v14064_v8 = vld [vmem:[%s22702_s1 + $0x4a8] sm:$0xff]  ;;  %v18192_v43 = vpack.c.bf16 %v14069_v33, %v14068_v17 }
 0xc6a   : > { %18146 = vmatprep.subr.bf16.mxu1 %v18695_v3  ;;  %v18189_v0 = vpack.c.bf16 %v14064_v8, %v14063_v19 }
 0xc6c   : > { %17249 = vmatmul.mubr.msk.f32.vlgmr.msra.gmra.mrb[88].mxu1 %vm520_vm0, %v9638_v18  ;;  %v14071_v18 = vld [vmem:[%s22702_s1 + $0x4c8] sm:$0xff] }
 0xc6d   : > { %18148 = vmatpush3.bf16.msra.mxu1 %v18147_v52  ;;  %17251 = vmatprep.mubr.msk.f32.mxu1 %vm18696_vm1, %v18697_v11  ;;  %v10144_v52 = vld [vmem:[#allocation2 + $0x1c9] sm:$0xff]  ;;  %v18195_v50 = vpack.c.bf16 %v14071_v18, %v14070_v44 }
 0xc6e   : > { %18149 = vmatprep.subr.bf16.mxu1 %v18695_v3 }
 0xc70   : > { %17252 = vmatmul.mubr.msk.f32.gmra.mrb[90].mxu1 %vm520_vm0, %v21710_v22 }
 0xc71   : > { %18151 = vmatpush3.bf16.msra.mxu1 %v18150_v42  ;;  %17254 = vmatprep.mubr.msk.f32.mxu1 %vm18696_vm1, %v18697_v11  ;;  %v10244_v42 = vld [vmem:[#allocation2 + $0x1bd] sm:$0xff] }
 0xc72   : > { %18152 = vmatprep.subr.bf16.mxu1 %v18695_v3 }
 0xc74   : > { %17255 = vmatmul.mubr.msk.f32.gmra.mrb[92].mxu1 %vm520_vm0, %v21723_v31 }
 0xc75   : > { %18154 = vmatpush3.bf16.msra.mxu1 %v18153_v25  ;;  %17269 = vmatprep.mubr.msk.f32.mxu1 %vm18696_vm1, %v18697_v11  ;;  %v10245_v25 = vld [vmem:[#allocation2 + $0x1c5] sm:$0xff] }
 0xc76   : > { %18155 = vmatprep.subr.bf16.mxu1 %v18695_v3 }
 0xc78   : > { %17270 = vmatmul.mubr.msk.f32.vlgmr.msra.gmra.mrb[94].mxu1 %vm520_vm0, %v9836_v13  ;;  %v14080_v13 = vld [vmem:[%s22702_s1 + $0x4f8] sm:$0xff] }
 0xc79   : > { %18157 = vmatpush3.bf16.msra.mxu1 %v18156_v62  ;;  %17272 = vmatprep.mubr.msk.f32.mxu1 %vm18696_vm1, %v18697_v11  ;;  %v10246_v62 = vld [vmem:[#allocation2 + $0x1cd] sm:$0xff]  ;;  %v18204_v35 = vpack.c.bf16 %v14080_v13, %v14079_v47 }
 0xc7a   : > { %18158 = vmatprep.subr.bf16.mxu1 %v18695_v3 }
 0xc7c   : > { %17273 = vmatmul.mubr.msk.f32.gmra.mrb[96].mxu1 %vm520_vm0, %v9837_v24  ;;  %v14082_v24 = vld [vmem:[%s22702_s1 + $0x508] sm:$0xff] }
 0xc7d   : > { %18160 = vmatpush3.bf16.msra.mxu1 %v18159_v28  ;;  %17275 = vmatprep.mubr.msk.f32.mxu1 %vm18696_vm1, %v18697_v11  ;;  %v10346_v28 = vld [vmem:[#allocation2 + $0x1be] sm:$0xff]  ;;  %v18207_v38 = vpack.c.bf16 %v14082_v24, %v14081_v29 }
 0xc7e   : > { %18161 = vmatprep.subr.bf16.mxu1 %v18695_v3 }
 0xc80   : > { %17276 = vmatmul.mubr.msk.f32.gmra.mrb[98].mxu1 %vm520_vm0, %v9838_v4  ;;  %v10450_v4 = vld [vmem:[#allocation2 + $0x1cf] sm:$0xff] }
 0xc81   : > { %18163 = vmatpush3.bf16.msra.mxu1 %v18162_v2  ;;  %17290 = vmatprep.mubr.msk.f32.mxu1 %vm18696_vm1, %v18697_v11  ;;  %v10347_v2 = vld [vmem:[#allocation2 + $0x1c6] sm:$0xff] }
 0xc82   : > { %18164 = vmatprep.subr.bf16.mxu1 %v18695_v3 }
 0xc84   : > { %17291 = vmatmul.mubr.msk.f32.vlgmr.msra.gmra.mrb[100].mxu1 %vm520_vm0, %v9938_v59 }
 0xc85   : > { %18166 = vmatpush3.bf16.msra.mxu1 %v18165_v20  ;;  %17293 = vmatprep.mubr.msk.f32.mxu1 %vm18696_vm1, %v18697_v11 }
 0xc86   : > { %18167 = vmatprep.subr.bf16.mxu1 %v18695_v3 }
 0xc88   : > { %17294 = vmatmul.mubr.msk.f32.gmra.mrb[102].mxu1 %vm520_vm0, %v21776_v6 }
 0xc89   : > { %18169 = vmatpush3.bf16.msra.mxu1 %v18168_v39  ;;  %17296 = vmatprep.mubr.msk.f32.mxu1 %vm18696_vm1, %v18697_v11 }
 0xc8a   : > { %18170 = vmatprep.subr.bf16.mxu1 %v18695_v3 }
 0xc8c   : > { %17297 = vmatmul.mubr.msk.f32.gmra.mrb[104].mxu1 %vm520_vm0, %v21789_v10 }
 0xc8d   : > { %18172 = vmatpush3.bf16.msra.mxu1 %v18171_v27  ;;  %17311 = vmatprep.mubr.msk.f32.mxu1 %vm18696_vm1, %v18697_v11 }
 0xc8e   : > { %18173 = vmatprep.subr.bf16.mxu1 %v18695_v3 }
 0xc90   : > { %17312 = vmatmul.mubr.msk.f32.vlgmr.msra.gmra.mrb[106].mxu1 %vm520_vm0, %v10040_v9 }
 0xc91   : > { %18175 = vmatpush3.bf16.msra.mxu1 %v18174_v26  ;;  %17314 = vmatprep.mubr.msk.f32.mxu1 %vm18696_vm1, %v18697_v11 }
 0xc92   : > { %18176 = vmatprep.subr.bf16.mxu1 %v18695_v3 }
 0xc94   : > { %17315 = vmatmul.mubr.msk.f32.gmra.mrb[108].mxu1 %vm520_vm0, %v10041_v61 }
 0xc95   : > { %18178 = vmatpush3.bf16.msra.mxu1 %v18177_v14  ;;  %17317 = vmatprep.mubr.msk.f32.mxu1 %vm18696_vm1, %v18697_v11 }
 0xc96   : > { %18179 = vmatprep.subr.bf16.mxu1 %v18695_v3 }
 0xc98   : > { %17318 = vmatmul.mubr.msk.f32.gmra.mrb[110].mxu1 %vm520_vm0, %v10042_v37 }
 0xc99   : > { %18181 = vmatpush3.bf16.msra.mxu1 %v18180_v12  ;;  %17332 = vmatprep.mubr.msk.f32.mxu1 %vm18696_vm1, %v18697_v11 }
 0xc9a   : > { %18182 = vmatprep.subr.bf16.mxu1 %v18695_v3 }
 0xc9c   : > { %17333 = vmatmul.mubr.msk.f32.vlgmr.msra.gmra.mrb[112].mxu1 %vm520_vm0, %v21710_v22  ;;  %v14073_v22 = vld [vmem:[%s22702_s1 + $0x4d8] sm:$0xff] }
 0xc9d   : > { %18184 = vmatpush3.bf16.msra.mxu1 %v18183_v1  ;;  %17335 = vmatprep.mubr.msk.f32.mxu1 %vm18696_vm1, %v18697_v11  ;;  %v18198_v58 = vpack.c.bf16 %v14073_v22, %v14072_v15 }
 0xc9e   : > { %18185 = vmatprep.subr.bf16.mxu1 %v18695_v3 }
 0xca0   : > { %17336 = vmatmul.mubr.msk.f32.gmra.mrb[114].mxu1 %vm520_vm0, %v21723_v31  ;;  %v14078_v31 = vld [vmem:[%s22702_s1 + $0x4e8] sm:$0xff] }
 0xca1   : > { %18187 = vmatpush3.bf16.msra.mxu1 %v18186_v54  ;;  %17338 = vmatprep.mubr.msk.f32.mxu1 %vm18696_vm1, %v18697_v11  ;;  %v18201_v36 = vpack.c.bf16 %v14078_v31, %v14077_v56 }
 0xca2   : > { %18188 = vmatprep.subr.bf16.mxu1 %v18695_v3 }
 0xca4   : > { %17339 = vmatmul.mubr.msk.f32.gmra.mrb[116].mxu1 %vm520_vm0, %v10144_v52 }
 0xca5   : > { %18190 = vmatpush3.bf16.msra.mxu1 %v18189_v0  ;;  %17353 = vmatprep.mubr.msk.f32.mxu1 %vm18696_vm1, %v18697_v11 }
 0xca6   : > { %18191 = vmatprep.subr.bf16.mxu1 %v18695_v3 }
 0xca8   : > { %17354 = vmatmul.mubr.msk.f32.vlgmr.msra.gmra.mrb[118].mxu1 %vm520_vm0, %v10244_v42 }
 0xca9   : > { %18193 = vmatpush3.bf16.msra.mxu1 %v18192_v43  ;;  %17356 = vmatprep.mubr.msk.f32.mxu1 %vm18696_vm1, %v18697_v11 }
 0xcaa   : > { %18194 = vmatprep.subr.bf16.mxu1 %v18695_v3 }
 0xcac   : > { %17357 = vmatmul.mubr.msk.f32.gmra.mrb[120].mxu1 %vm520_vm0, %v10245_v25 }
 0xcad   : > { %18196 = vmatpush3.bf16.msra.mxu1 %v18195_v50  ;;  %17359 = vmatprep.mubr.msk.f32.mxu1 %vm18696_vm1, %v18697_v11 }
 0xcae   : > { %18197 = vmatprep.subr.bf16.mxu1 %v18695_v3 }
 0xcb0   : > { %17360 = vmatmul.mubr.msk.f32.gmra.mrb[122].mxu1 %vm520_vm0, %v10246_v62 }
 0xcb1   : > { %18199 = vmatpush3.bf16.msra.mxu1 %v18198_v58  ;;  %17374 = vmatprep.mubr.msk.f32.mxu1 %vm18696_vm1, %v18697_v11 }
 0xcb2   : > { %18200 = vmatprep.subr.bf16.mxu1 %v18695_v3 }
 0xcb4   : > { %17375 = vmatmul.mubr.msk.f32.vlgmr.msra.gmra.mrb[124].mxu1 %vm520_vm0, %v10346_v28 }
 0xcb5   : > { %18202 = vmatpush3.bf16.msra.mxu1 %v18201_v36  ;;  %17377 = vmatprep.mubr.msk.f32.mxu1 %vm18696_vm1, %v18697_v11 }
 0xcb6   : > { %18203 = vmatprep.subr.bf16.mxu1 %v18695_v3 }
 0xcb8   : > { %17378 = vmatmul.mubr.msk.f32.gmra.mrb[126].mxu1 %vm520_vm0, %v10347_v2 }
 0xcb9   : > { %18205 = vmatpush3.bf16.msra.mxu1 %v18204_v35  ;;  %17380 = vmatprep.mubr.msk.f32.mxu1 %vm18696_vm1, %v18697_v11 }
 0xcba   : > { %18206 = vmatprep.subr.bf16.mxu1 %v18695_v3 }
 0xcbc   : > { %17381 = vmatmul.mubr.msk.f32.gmra.mrb[128].mxu1 %vm520_vm0, %v10348_v40 }
 0xcbd   : > { %18208 = vmatpush3.bf16.msra.mxu1 %v18207_v38  ;;  %17395 = vmatprep.mubr.msk.f32.mxu1 %vm18696_vm1, %v18697_v11 }
 0xcbe   : > { %18212 = vmatprep.subr.bf16.mxu1 %v18695_v3 }
 0xcc0   : > { %17396 = vmatmul.mubr.msk.f32.vlgmr.msra.gmra.mrb[130].mxu1 %vm520_vm0, %v21776_v6 }
 0xcc1   : > { %17398 = vmatprep.mubr.msk.f32.mxu1 %vm18696_vm1, %v18697_v11 }
 0xcc4   : > { %17399 = vmatmul.mubr.msk.f32.gmra.mrb[132].mxu1 %vm520_vm0, %v21789_v10 }
 0xcc5   : > { %17401 = vmatprep.mubr.msk.f32.mxu1 %vm18696_vm1, %v18697_v11 }
 0xcc8   : > { %17402 = vmatmul.mubr.msk.f32.gmra.mrb[134].mxu1 %vm520_vm0, %v10450_v4 }
 0xcc9   : > { %17419 = vmatprep.mubr.msk.f32.mxu1 %vm18696_vm1, %v18697_v11 }
 0xd33   : > { %v9733_v20 = vpop.f32.mrb[82].mxu1 }
 0xd34   : > { %v17229_v21 = vpop.f32.mrb[83].mxu1 }
 0xd37   : > { %v9738_v63 = vpop.f32.mrb[84].mxu1 }
 0xd38   : > { %v17232_v59 = vpop.f32.mrb[85].mxu1 }
 0xd3b   : > { %v9743_v39 = vpop.f32.mrb[86].mxu1 }
 0xd3c   : > { %v17235_v41 = vpop.f32.mrb[87].mxu1 }
 0xd3f   : > { %v9822_v34 = vpop.f32.mrb[88].mxu1 }
 0xd40   : > { %v9823_v6 = vadd.f32 %v9822_v34, %v9733_v20  ;;  %v17250_v27 = vpop.f32.mrb[89].mxu1 }
 0xd43   : > { %v9827_v32 = vpop.f32.mrb[90].mxu1 }
 0xd44   : > { %v9828_v46 = vadd.f32 %v9827_v32, %v9738_v63  ;;  %v17253_v10 = vpop.f32.mrb[91].mxu1 }
 0xd47   : > { %v9832_v26 = vpop.f32.mrb[92].mxu1 }
 0xd48   : > { %v9833_v49 = vadd.f32 %v9832_v26, %v9743_v39  ;;  %v17256_v5 = vpop.f32.mrb[93].mxu1 }
 0xd4b   : > { %v9921_v9 = vpop.f32.mrb[94].mxu1 }
 0xd4c   : > { %v9935_v14 = vadd.f32 %v9921_v9, %v9823_v6  ;;  %v17271_v7 = vpop.f32.mrb[95].mxu1 }
 0xd4f   : > { %v9926_v57 = vpop.f32.mrb[96].mxu1 }
 0xd50   : > { %v9936_v61 = vadd.f32 %v9926_v57, %v9828_v46  ;;  %v17274_v12 = vpop.f32.mrb[97].mxu1 }
 0xd53   : > { %v9931_v30 = vpop.f32.mrb[98].mxu1 }
 0xd54   : > { %v9937_v51 = vadd.f32 %v9931_v30, %v9833_v49  ;;  %v17277_v37 = vpop.f32.mrb[99].mxu1  ;;  %v14086_v49 = vld [vmem:[%s22703_s2 + $0x2] ss:$0 sm:$0xff] }
 0xd57   : > { %v10023_v1 = vpop.f32.mrb[100].mxu1 }
 0xd58   : > { %v10037_v55 = vadd.f32 %v10023_v1, %v9935_v14  ;;  %v17292_v16 = vpop.f32.mrb[101].mxu1 }
 0xd5b   : > { %v10028_v54 = vpop.f32.mrb[102].mxu1 }
 0xd5c   : > { %v10038_v19 = vadd.f32 %v10028_v54, %v9936_v61  ;;  %v17295_v8 = vpop.f32.mrb[103].mxu1 }
 0xd5d   : > { %v9637_v8 = vld [vmem:[%s22704_s3 + $0x2] sm:$0x1] }
 0xd5f   : > { %v10033_v0 = vpop.f32.mrb[104].mxu1 }
 0xd60   : > { %v10039_v17 = vadd.f32 %v10033_v0, %v9937_v51  ;;  %v17298_v33 = vpop.f32.mrb[105].mxu1 }
 0xd63   : > { %v10125_v52 = vpop.f32.mrb[106].mxu1 }
 0xd64   : > { %v10139_v43 = vadd.f32 %v10125_v52, %v10037_v55  ;;  %v17313_v44 = vpop.f32.mrb[107].mxu1 }
 0xd67   : > { %v10130_v18 = vpop.f32.mrb[108].mxu1 }
 0xd68   : > { %v10140_v42 = vadd.f32 %v10130_v18, %v10038_v19  ;;  %v17316_v50 = vpop.f32.mrb[109].mxu1 }
 0xd6b   : > { %v10135_v15 = vpop.f32.mrb[110].mxu1 }
 0xd6c   : > { %v10141_v22 = vadd.f32 %v10135_v15, %v10039_v17  ;;  %v17319_v25 = vpop.f32.mrb[111].mxu1 }
 0xd6f   : > { %v10227_v58 = vpop.f32.mrb[112].mxu1 }
 0xd70   : > { %v10241_v56 = vadd.f32 %v10227_v58, %v10139_v43  ;;  %v17334_v31 = vpop.f32.mrb[113].mxu1 }
 0xd73   : > { %v10232_v62 = vpop.f32.mrb[114].mxu1 }
 0xd74   : > { %v10242_v36 = vadd.f32 %v10232_v62, %v10140_v42  ;;  %v17337_v47 = vpop.f32.mrb[115].mxu1 }
 0xd77   : > { %v10237_v13 = vpop.f32.mrb[116].mxu1 }
 0xd78   : > { %v10243_v28 = vadd.f32 %v10237_v13, %v10141_v22  ;;  %v17340_v35 = vpop.f32.mrb[117].mxu1 }
 0xd79   : > { %v18508_v35 = vld [vmem:[%s22707_s6 + $0x4] ss:$12 sps:$4 sm:$0xff]  }
 0xd7b   : > { %v10329_v29 = vpop.f32.mrb[118].mxu1 }
 0xd7c   : > { %v10343_v24 = vadd.f32 %v10329_v29, %v10241_v56  ;;  %v17355_v2 = vpop.f32.mrb[119].mxu1  ;;  %v18509_v29 = vld [vmem:[%s22707_s6 + $0x8] ss:$12 sps:$4 sm:$0xff]  }
 0xd7d   : > { %v18512_v2 = vld [vmem:[%s22707_s6 + $0x1c] ss:$12 sps:$4 sm:$0xff]  }
 0xd7f   : > { %v10334_v40 = vpop.f32.mrb[120].mxu1 }
 0xd80   : > { %v10344_v38 = vadd.f32 %v10334_v40, %v10242_v36  ;;  %v17358_v4 = vpop.f32.mrb[121].mxu1  ;;  %v18513_v40 = vld [vmem:[%s22707_s6 + $0x20] ss:$12 sps:$4 sm:$0xff]  }
 0xd81   : > { %v18517_v4 = vld [vmem:[%s22707_s6 + $0x38] ss:$12 sps:$4 sm:$0xff]  }
 0xd83   : > { %v10339_v20 = vpop.f32.mrb[122].mxu1 }
 0xd84   : > { %v10345_v21 = vadd.f32 %v10339_v20, %v10243_v28  ;;  %v17361_v63 = vpop.f32.mrb[123].mxu1  ;;  %v18506_v28 = vld [vmem:[%s22707_s6] ss:$12 sps:$4 sm:$0xff]   ;;  %v18514_v20 = vld [vmem:[%s22707_s6 + $0x30] ss:$12 sps:$4 sm:$0xff]  }
 0xd85   : > { %v18520_v63 = vld [vmem:[%s22707_s6 + $0x4c] ss:$12 sps:$4 sm:$0xff]  }
 0xd87   : > { %v10431_v59 = vpop.f32.mrb[124].mxu1 }
 0xd88   : > { %v10445_v39 = vadd.f32 %v10431_v59, %v10343_v24  ;;  %v17376_v41 = vpop.f32.mrb[125].mxu1  ;;  %v18510_v24 = vld [vmem:[%s22707_s6 + $0x18] ss:$12 sps:$4 sm:$0xff]  }
 0xd8b   : > { %v10436_v34 = vpop.f32.mrb[126].mxu1 }
 0xd8c   : > { %v10446_v6 = vadd.f32 %v10436_v34, %v10344_v38  ;;  %v17379_v27 = vpop.f32.mrb[127].mxu1  ;;  %v18516_v38 = vld [vmem:[%s22707_s6 + $0x34] ss:$12 sps:$4 sm:$0xff]  }
 0xd8f   : > { %v10441_v32 = vpop.f32.mrb[128].mxu1 }
 0xd90   : > { %v10447_v46 = vadd.f32 %v10441_v32, %v10345_v21  ;;  %v17382_v10 = vpop.f32.mrb[129].mxu1  ;;  %v18698_v21 = vmov 0  }
 0xd93   : > { %v10533_v26 = vpop.f32.mrb[130].mxu1 }
 0xd94   : > { %v10547_v5 = vadd.f32 %v10533_v26, %v10445_v39  ;;  %v17397_v9 = vpop.f32.mrb[131].mxu1 }
 0xd96   : > { %v10555_v14 = vadd.f32 %v14086_v49, %v10547_v5 }
 0xd97   : > { %v10538_v7 = vpop.f32.mrb[132].mxu1 }
 0xd98   : > { %10558 = vst.msk [vmem:[#allocation3] sm:$0xff] %vm520_vm0, %v10555_v14  ;;  %v10548_v57 = vadd.f32 %v10538_v7, %v10446_v6  ;;  %v17400_v61 = vpop.f32.mrb[133].mxu1  ;;  %v10635_v51 = vmul.f32 %v10555_v14, %v10555_v14 }
 0xd9a   : > { %v10556_v12 = vadd.f32 %v14086_v49, %v10548_v57 }
 0xd9b   : > { %v10543_v30 = vpop.f32.mrb[134].mxu1 }
 0xd9c   : > { %10559 = vst.msk [vmem:[#allocation3 + $0x8] sm:$0xff] %vm520_vm0, %v10556_v12  ;;  %v18210_v37 = vpack.c.bf16 %v10556_v12, %v10555_v14  ;;  %v10636_v1 = vmul.f32 %v10556_v12, %v10556_v12  ;;  %v10549_v55 = vadd.f32 %v10543_v30, %v10447_v46  ;;  %v17403_v16 = vpop.f32.mrb[135].mxu1  ;;  %v18518_v12 = vld [vmem:[%s22707_s6 + $0x48] ss:$12 sps:$4 sm:$0xff]   ;;  %v18521_v30 = vld [vmem:[%s22707_s6 + $0x50] ss:$12 sps:$4 sm:$0xff]  }
 0xd9d   : > { %v18528_v16 = vld [vmem:[%s22707_s6 + $0x7c] ss:$12 sps:$4 sm:$0xff]  }
 0xd9e   : > { %v10557_v54 = vadd.f32 %v14086_v49, %v10549_v55  ;;  %18211 = vmatpush3.bf16.msra.mxu0 %v18210_v37  ;;  %v18213_v19 = vpack.c.bf16 %v10636_v1, %v10635_v51  ;;  %v18524_v37 = vld [vmem:[%s22707_s6 + $0x64] ss:$12 sps:$4 sm:$0xff]   ;;  %v18522_v1 = vld [vmem:[%s22707_s6 + $0x60] ss:$12 sps:$4 sm:$0xff]   ;;  %v18525_v55 = vld [vmem:[%s22707_s6 + $0x68] ss:$12 sps:$4 sm:$0xff]  }
 0xd9f   : > { %17408 = vmatprep.subr.mxu0 %v18697_v11 }
 0xda0   : > { %10560 = vst.msk [vmem:[#allocation3 + $0x10] sm:$0xff] %vm520_vm0, %v10557_v54  ;;  %18214 = vmatpush3.bf16.msra.mxu1 %v18213_v19  ;;  %v10637_v0 = vmul.f32 %v10557_v54, %v10557_v54  ;;  %v18529_v19 = vld [vmem:[%s22707_s6 + $0x80] ss:$12 sps:$4 sm:$0xff]  }
 0xda1   : > { %17417 = vmatprep.subr.mxu1 %v18697_v11 }
 0xda2   : > { %17409 = vmatpush3.msra.mxu0 %v10557_v54  ;;  %v18526_v54 = vld [vmem:[%s22707_s6 + $0x78] ss:$12 sps:$4 sm:$0xff]  }
 0xda3   : > { %17411 = vmatmul.mubr.msk.f32.vlgmr.msra.gmra.mrb[88].mxu0 %vm10561_vm7, %v9637_v8  ;;  %18215 = vmatprep.subr.bf16.mxu0 %v18695_v3  ;;  %v11017_v17 = vld [vmem:[#allocation3] ss:$2 sm:$0xff]  ;;  %v11019_v33 = vld [vmem:[#allocation3 + $0x1] ss:$2 sm:$0xff] }
 0xda4   : > { %17418 = vmatpush3.msra.mxu1 %v10637_v0  ;;  %18217 = vmatpush3.bf16.msra.mxu0 %v21575_v23  ;;  %v11021_v52 = vmax.f32 %v11017_v17, %v11019_v33  ;;  %v18530_v0 = vld [vmem:[%s22707_s6 + $0x90] ss:$12 sps:$4 sm:$0xff]   ;;  %v18533_v17 = vld [vmem:[%s22707_s6 + $0x98] ss:$12 sps:$4 sm:$0xff]  }
 0xda5   : > { %17420 = vmatmul.mubr.msk.f32.vlgmr.msra.gmra.mrb[136].mxu1 %vm10561_vm7, %v9637_v8  ;;  %18224 = vmatprep.subr.bf16.mxu1 %v18695_v3  ;;  %v18532_v8 = vld [vmem:[%s22707_s6 + $0x94] ss:$12 sps:$4 sm:$0xff]  }
 0xda6   : > { %18226 = vmatpush3.bf16.msra.mxu1 %v21575_v23  ;;  %18218 = vmatprep.subr.bf16.mxu0 %v18695_v3  ;;  %11023 = vst.msk [vmem:[#allocation4] sm:$0xff] %vm520_vm0, %v11021_v52  ;;  %v18536_v52 = vld [vmem:[%s22707_s6 + $0xac] ss:$12 sps:$4 sm:$0xff]  }
 0xda7   : > { %18227 = vmatprep.subr.bf16.mxu1 %v18695_v3  ;;  %17434 = vmatprep.mubr.msk.f32.mxu0 %vm18696_vm1, %v18697_v11  ;;  %v11018_v43 = vld [vmem:[#allocation3 + $0x10] ss:$2 sm:$0xf]  ;;  %v11020_v44 = vld [vmem:[#allocation3 + $0x11] ss:$2 sm:$0xf] }
 0xda8   : > { %18220 = vmatpush3.bf16.msra.mxu0 %v21588_v60  ;;  %17449 = vmatprep.mubr.msk.f32.mxu1 %vm18696_vm1, %v18697_v11  ;;  %v11022_v18 = vmax.f32 %v11018_v43, %v11020_v44  ;;  %v18534_v43 = vld [vmem:[%s22707_s6 + $0xa8] ss:$12 sps:$4 sm:$0xff]   ;;  %v18537_v44 = vld [vmem:[%s22707_s6 + $0xb0] ss:$12 sps:$4 sm:$0xff]  }
 0xda9   : > { %18221 = vmatprep.subr.bf16.mxu0 %v18695_v3 }
 0xdaa   : > { %18229 = vmatpush3.bf16.msra.mxu1 %v21588_v60  ;;  %11024 = vst.msk [vmem:[#allocation4 + $0x8] sm:$0xf] %vm9614_vm6, %v11022_v18  ;;  %v18540_v18 = vld [vmem:[%s22707_s6 + $0xc4] ss:$12 sps:$4 sm:$0xff]  }
 0xdab   : > { %18230 = vmatprep.subr.bf16.mxu1 %v18695_v3 }
 0xdac   : > { %18223 = vmatpush3.bf16.msra.mxu0 %v21601_v48 }
 0xdad   : > { %17452 = vmatprep.subr.mxu0 %v18697_v11  ;;  %v11025_v41 = vld [vmem:[#allocation4] sm:$0x3]  ;;  %v11026_v34 = vld [vmem:[#allocation4 + $0x3] sm:$0x3]  ;;  %v11039_v32 = vld [vmem:[#allocation4 + $0x6] sm:$0x3] }
 0xdae   : > { %18232 = vmatpush3.bf16.msra.mxu1 %v21601_v48  ;;  %v10867_v48 = vld [vmem:[%s22706_s5] sm:$0xf]  ;;  %v11027_v46 = vmax.f32 %v11025_v41, %v11026_v34  ;;  %v11765_v41 = vld [vmem:[%s22709_s8 + $0xa8] sm:$0xff] }
 0xdaf   : > { %17457 = vmatprep.subr.mxu1 %v18697_v11  ;;  %v11748_v34 = vld [vmem:[%s22709_s8 + $0x20] sm:$0xff] }
 0xdb1   : > { %v11040_v6 = vld [vmem:[#allocation4 + $0x9] sm:$0x3] }
 0xdb2   : > { %v11041_v10 = vmax.f32 %v11039_v32, %v11040_v6  ;;  %v11766_v32 = vld [vmem:[%s22709_s8 + $0xb0] sm:$0xff] }
 0xe76   : > { %v10631_v23 = vpop.f32.mrb[88].mxu0 }
 0xe77   : > { %17435 = vmatmul.mubr.msk.f32.vlgmr.msra.gmra.mrb[90].mxu0 %vm520_vm0, %v10631_v23  ;;  %v17412_v42 = vpop.f32.mrb[89].mxu0  ;;  %v18538_v23 = vld [vmem:[%s22707_s6 + $0xc0] ss:$12 sps:$4 sm:$0xff]  }
 0xe78   : > { %v10704_v50 = vpop.f32.mrb[136].mxu1  ;;  %17454 = vmatprep.mubr.msk.f32.mxu0 %vm18696_vm1, %v18697_v11  ;;  %17453 = vmatpush3.msk.msra.mxu0 %vm7245_vm3, %v10867_v48  ;;  %v18541_v42 = vld [vmem:[%s22707_s6 + $0xc8] ss:$12 sps:$4 sm:$0xff]  }
 0xe79   : > { %17450 = vmatmul.mubr.msk.f32.vlgmr.msra.gmra.mrb[138].mxu1 %vm520_vm0, %v10704_v50  ;;  %v17421_v60 = vpop.f32.mrb[137].mxu1  ;;  %11110 = vmatprep.subr.bf16.mxu0 %v18508_v35  ;;  %v11744_v35 = vld [vmem:[%s22709_s8] sm:$0xff] }
 0xe7a   : > { %17459 = vmatprep.mubr.msk.f32.mxu1 %vm18696_vm1, %v18697_v11  ;;  %17458 = vmatpush3.msk.msra.mxu1 %vm7245_vm3, %v10867_v48  ;;  %v18544_v60 = vld [vmem:[%s22707_s6 + $0xdc] ss:$12 sps:$4 sm:$0xff]   ;;  %v18542_v48 = vld [vmem:[%s22707_s6 + $0xd8] ss:$12 sps:$4 sm:$0xff]  }
 0xe7b   : > { %17462 = vmatprep.subr.bf16.mxu1 %v18697_v11 }
 0xf4a   : > { %v10783_v15 = vpop.f32.mrb[90].mxu0 }
 0xf4b   : > { %v10787_v22 = vmul.f32 0.0052083335, %v10783_v15  ;;  %v17436_v25 = vpop.f32.mrb[91].mxu0  ;;  %v18545_v15 = vld [vmem:[%s22707_s6 + $0xe0] ss:$12 sps:$4 sm:$0xff]  }
 0xf4c   : > { %v10857_v58 = vpop.f32.mrb[138].mxu1  ;;  %v18548_v25 = vld [vmem:[%s22707_s6 + $0xf4] ss:$12 sps:$4 sm:$0xff]  }
 0xf4d   : > { %v10862_v56 = vmul.f32 %v10787_v22, %v10787_v22  ;;  %v10861_v31 = vmul.f32 0.0052083335, %v10857_v58  ;;  %17455 = vmatmul.mubr.msk.f32.vlgmr.msra.gmra.mrb[92].mxu0 %vm7241_vm4, %v10787_v22  ;;  %v17451_v62 = vpop.f32.mrb[139].mxu1  ;;  %v18546_v58 = vld [vmem:[%s22707_s6 + $0xf0] ss:$12 sps:$4 sm:$0xff]  }
 0xf4e   : > { %11111 = vmatpush1.bf16.msra.mxu0 %v18506_v28  ;;  %11142 = vmatprep.mubr.bf16.mxu0 %v18698_v21  ;;  %v18550_v62 = vld [vmem:[%s22707_s6 + $0x108] ss:$12 sps:$4 sm:$0xff]  }
 0xf4f   : > { %v10863_v36 = vsub.f32 %v10861_v31, %v10862_v56  ;;  %11112 = vmatprep.subr.bf16.mxu0 %v18512_v2  ;;  %v18549_v56 = vld [vmem:[%s22707_s6 + $0xf8] ss:$12 sps:$4 sm:$0xff]   ;;  %v11761_v28 = vld [vmem:[%s22709_s8 + $0x88] sm:$0xff]  ;;  %v11762_v2 = vld [vmem:[%s22709_s8 + $0x90] sm:$0xff] }
 0xf50   : > { %v18552_v31 = vld [vmem:[%s22707_s6 + $0x10c] ss:$12 sps:$4 sm:$0xff]  }
 0xf51   : > { %v10864_v47 = vmax.f32 %v10863_v36, 0.0  ;;  %v18553_v36 = vld [vmem:[%s22707_s6 + $0x110] ss:$12 sps:$4 sm:$0xff]  }
 0xf52   : > { %11113 = vmatpush1.bf16.msra.mxu0 %v18510_v24  ;;  %v11745_v24 = vld [vmem:[%s22709_s8 + $0x8] sm:$0xff] }
 0xf53   : > { %18623 = vrsqrt.f32 %v10864_v47  ;;  %11114 = vmatprep.subr.bf16.mxu0 %v18516_v38  ;;  %v22132_v38 = vpack.c.bf16 %v11745_v24, %v11744_v35 }
 0xf56   : > { %11115 = vmatpush1.bf16.msra.mxu0 %v18514_v20  ;;  %v11746_v20 = vld [vmem:[%s22709_s8 + $0x10] sm:$0xff] }
 0xf57   : > { %11285 = vmatprep.subr.bf16.mxu0 %v18520_v63  ;;  %v11747_v63 = vld [vmem:[%s22709_s8 + $0x18] sm:$0xff] }
 0xf5d   : > { %v18624_v13 = vpop.eup %18623 }
 0xf5e   : > { %17460 = vmatmul.mubr.msk.f32.vlgmr.msra.gmra.mrb[140].mxu1 %vm7241_vm4, %v18624_v13  ;;  %v11760_v13 = vld [vmem:[%s22709_s8 + $0x80] sm:$0xff] }
 0xf5f   : > { %17468 = vmatprep.mubr.msk.bf16.mxu1 %vm18696_vm1, %v18697_v11  ;;  %17463 = vmatpush3.bf16.msra.mxu1 %v18509_v29  ;;  %v22121_v29 = vpack.c.bf16 %v11761_v28, %v11760_v13 }
 0xf60   : > { %17464 = vmatprep.subr.bf16.mxu1 %v18697_v11 }
 0xf63   : > { %17465 = vmatpush3.bf16.msra.mxu1 %v18513_v40  ;;  %v11763_v40 = vld [vmem:[%s22709_s8 + $0x98] sm:$0xff] }
 0xf64   : > { %17466 = vmatprep.subr.bf16.mxu1 %v18697_v11 }
 0xf67   : > { %17467 = vmatpush3.bf16.msra.mxu1 %v18517_v4  ;;  %v22134_v4 = vpack.c.bf16 %v11763_v40, %v11762_v2 }
 0xf68   : > { %17472 = vmatprep.subr.bf16.mxu1 %v18697_v11 }
0x1020   : > { %v10940_v59 = vpop.f32.mrb[92].mxu0 }
0x1021   : > { %v17456_v39 = vpop.f32.mrb[93].mxu0  ;;  %v11031_v27 = vrot.slane %v10940_v59, %v21286_v53  ;;  %v22144_v59 = vpack.c.bf16 %v11747_v63, %v11746_v20 }
0x1022   : > { %v11764_v39 = vld [vmem:[%s22709_s8 + $0xa0] sm:$0xff] }
0x1023   : > { %v11032_v49 = vsub.f32 %v11027_v46, %v11031_v27  ;;  %v11042_v5 = vsub.f32 %v11041_v10, %v11031_v27  ;;  %v22157_v6 = vpack.c.bf16 %v11765_v41, %v11764_v39  ;;  %v11749_v27 = vld [vmem:[%s22709_s8 + $0x28] sm:$0xff]  ;;  %v11767_v46 = vld [vmem:[%s22709_s8 + $0xb8] sm:$0xff] }
0x1024   : > { %v22168_v10 = vpack.c.bf16 %v11749_v27, %v11748_v34 }
0x1031   : > { %v11013_v26 = vpop.f32.mrb[140].mxu1 }
0x1032   : > { %v11036_v9 = vrot.slane %v11013_v26, %v21286_v53  ;;  %v17461_v14 = vpop.f32.mrb[141].mxu1  ;;  %v22170_v26 = vpack.c.bf16 %v11767_v46, %v11766_v32 }
0x1033   : > { %v11769_v14 = vld [vmem:[%s22709_s8 + $0xc8] sm:$0xff] }
0x1034   : > { %v11037_v7 = vmul.f32 %v11036_v9, %v11032_v49  ;;  %v11043_v57 = vmul.f32 %v11042_v5, %v11036_v9  ;;  %v11750_v49 = vld [vmem:[%s22709_s8 + $0x30] sm:$0xff]  ;;  %v11751_v5 = vld [vmem:[%s22709_s8 + $0x38] sm:$0xff]  ;;  %v11768_v9 = vld [vmem:[%s22709_s8 + $0xc0] sm:$0xff] }
0x1036   : > { %v11038_v61 = vmax.f32 %v11037_v7, 0.0  ;;  %v11044_v50 = vmax.f32 %v11043_v57, 0.0  ;;  %v22186_v7 = vpack.c.bf16 %v11751_v5, %v11750_v49  ;;  %v22189_v57 = vpack.c.bf16 %v11769_v14, %v11768_v9 }
0x1038   : > { %v11046_v51 = vpack.c.bf16 %v11038_v61, %v11038_v61  ;;  %v11394_v22 = vpack.c.bf16 %v11044_v50, %v11044_v50  ;;  %v11752_v61 = vld [vmem:[%s22709_s8 + $0x40] sm:$0xff]  ;;  %v11778_v50 = vld [vmem:[%s22709_s8 + $0x110] sm:$0xff] }
0x103a   : > { %14104 = vmatmul.mubr.msk.bf16.vlgmr.msra.gmra.mrb[96].mxu0 %vm520_vm0, %v11046_v51  ;;  %17469 = vmatmul.mubr.msk.bf16.vlgmr.msra.gmra.mrb[144].mxu1 %vm520_vm0, %v11046_v51  ;;  %v11232_v33 = vshrl.u32 %v11046_v51, 16  ;;  %v11581_v47 = vshrl.u32 %v11394_v22, 16  ;;  %v11770_v51 = vld [vmem:[%s22709_s8 + $0xd0] sm:$0xff] }
0x103b   : > { %11286 = vmatpush1.bf16.msra.mxu0 %v18518_v12  ;;  %17473 = vmatpush3.bf16.msra.mxu1 %v18521_v30  ;;  %v11753_v12 = vld [vmem:[%s22709_s8 + $0x48] sm:$0xff] }
0x103c   : > { %11287 = vmatprep.subr.bf16.mxu0 %v18524_v37  ;;  %17474 = vmatprep.subr.bf16.mxu1 %v18697_v11  ;;  %v22198_v30 = vpack.c.bf16 %v11753_v12, %v11752_v61  ;;  %v11771_v37 = vld [vmem:[%s22709_s8 + $0xd8] sm:$0xff] }
0x103d   : > { %11317 = vmatprep.mubr.bf16.mxu0 %v18698_v21  ;;  %17478 = vmatprep.mubr.msk.bf16.mxu1 %vm18696_vm1, %v18697_v11 }
0x103f   : > { %11288 = vmatpush1.bf16.msra.mxu0 %v18522_v1  ;;  %17475 = vmatpush3.bf16.msra.mxu1 %v18525_v55  ;;  %v11754_v1 = vld [vmem:[%s22709_s8 + $0x50] sm:$0xff]  ;;  %v22211_v55 = vpack.c.bf16 %v11771_v37, %v11770_v51 }
0x1040   : > { %11289 = vmatprep.subr.bf16.mxu0 %v18528_v16  ;;  %17476 = vmatprep.subr.bf16.mxu1 %v18697_v11  ;;  %v11755_v16 = vld [vmem:[%s22709_s8 + $0x58] sm:$0xff] }
0x1043   : > { %11290 = vmatpush1.bf16.msra.mxu0 %v18526_v54  ;;  %17477 = vmatpush3.bf16.msra.mxu1 %v18529_v19  ;;  %v11772_v54 = vld [vmem:[%s22709_s8 + $0xe0] sm:$0xff]  ;;  %v11773_v19 = vld [vmem:[%s22709_s8 + $0xe8] sm:$0xff] }
0x1044   : > { %11459 = vmatprep.subr.bf16.mxu0 %v18532_v8  ;;  %17482 = vmatprep.subr.bf16.mxu1 %v18697_v11  ;;  %v22222_v8 = vpack.c.bf16 %v11755_v16, %v11754_v1  ;;  %v11045_v1 = vld [vmem:[%s22708_s7] sm:$0x7] }
0x1046   : > { %14127 = vmatmul.mubr.msk.bf16.vlgmr.msra.gmra.mrb[100].mxu0 %vm520_vm0, %v11232_v33  ;;  %17479 = vmatmul.mubr.msk.bf16.vlgmr.msra.gmra.mrb[148].mxu1 %vm520_vm0, %v11232_v33  ;;  %v11777_v33 = vld [vmem:[%s22709_s8 + $0x108] sm:$0xff] }
0x1047   : > { %11460 = vmatpush1.bf16.msra.mxu0 %v18530_v0  ;;  %17483 = vmatpush3.bf16.msra.mxu1 %v18533_v17  ;;  %v22224_v0 = vpack.c.bf16 %v11773_v19, %v11772_v54  ;;  %v11776_v17 = vld [vmem:[%s22709_s8 + $0x100] sm:$0xff] }
0x1048   : > { %11461 = vmatprep.subr.bf16.mxu0 %v18536_v52  ;;  %17484 = vmatprep.subr.bf16.mxu1 %v18697_v11  ;;  %v11756_v52 = vld [vmem:[%s22709_s8 + $0x60] sm:$0xff] }
0x1049   : > { %11491 = vmatprep.mubr.bf16.mxu0 %v18698_v21  ;;  %17488 = vmatprep.mubr.msk.bf16.mxu1 %vm18696_vm1, %v18697_v11 }
0x104b   : > { %11462 = vmatpush1.bf16.msra.mxu0 %v18534_v43  ;;  %17485 = vmatpush3.bf16.msra.mxu1 %v18537_v44  ;;  %v22236_v43 = vpack.c.bf16 %v11777_v33, %v11776_v17  ;;  %v11757_v44 = vld [vmem:[%s22709_s8 + $0x68] sm:$0xff] }
0x104c   : > { %11463 = vmatprep.subr.bf16.mxu0 %v18540_v18  ;;  %17486 = vmatprep.subr.bf16.mxu1 %v18697_v11  ;;  %v11774_v18 = vld [vmem:[%s22709_s8 + $0xf0] sm:$0xff] }
0x104f   : > { %11464 = vmatpush1.bf16.msra.mxu0 %v18538_v23  ;;  %17487 = vmatpush3.bf16.msra.mxu1 %v18541_v42  ;;  %v11775_v23 = vld [vmem:[%s22709_s8 + $0xf8] sm:$0xff]  ;;  %v22248_v42 = vpack.c.bf16 %v11757_v44, %v11756_v52 }
0x1050   : > { %11634 = vmatprep.subr.bf16.mxu0 %v18544_v60  ;;  %17492 = vmatprep.subr.bf16.mxu1 %v18697_v11  ;;  %v11779_v60 = vld [vmem:[%s22709_s8 + $0x118] sm:$0xff] }
0x1052   : > { %14150 = vmatmul.mubr.msk.bf16.vlgmr.msra.gmra.mrb[104].mxu0 %vm520_vm0, %v11394_v22  ;;  %17489 = vmatmul.mubr.msk.bf16.vlgmr.msra.gmra.mrb[152].mxu1 %vm520_vm0, %v11394_v22  ;;  %v11758_v22 = vld [vmem:[%s22709_s8 + $0x70] sm:$0xff] }
0x1053   : > { %11635 = vmatpush1.bf16.msra.mxu0 %v18542_v48  ;;  %17493 = vmatpush3.bf16.msra.mxu1 %v18545_v15  ;;  %v22258_v48 = vpack.c.bf16 %v11775_v23, %v11774_v18  ;;  %v22260_v15 = vpack.c.bf16 %v11779_v60, %v11778_v50 }
0x1054   : > { %11636 = vmatprep.subr.bf16.mxu0 %v18548_v25  ;;  %17494 = vmatprep.subr.bf16.mxu1 %v18697_v11  ;;  %v11759_v25 = vld [vmem:[%s22709_s8 + $0x78] sm:$0xff] }
0x1055   : > { %11666 = vmatprep.mubr.bf16.mxu0 %v18698_v21  ;;  %17498 = vmatprep.mubr.msk.bf16.mxu1 %vm18696_vm1, %v18697_v11 }
0x1057   : > { %11637 = vmatpush1.bf16.msra.mxu0 %v18546_v58  ;;  %17495 = vmatpush3.bf16.msra.mxu1 %v18549_v56  ;;  %v22270_v58 = vpack.c.bf16 %v11759_v25, %v11758_v22  ;;  %v18699_v56 = vmov 1966171168  }
0x1058   : > { %11638 = vmatprep.subr.bf16.mxu0 %v18552_v31  ;;  %17496 = vmatprep.subr.bf16.mxu1 %v18697_v11  ;;  %v11196_v31 = vunpack.c.l.s4 %v18699_v56 }
0x105b   : > { %11639 = vmatpush1.bf16.msra.mxu0 %v18550_v62  ;;  %17497 = vmatpush3.bf16.msra.mxu1 %v18553_v36  ;;  %v11197_v62 = vunpack.c.0.s8 %v11196_v31 }
0x105c   : > { %18265 = vmatprep.subr.bf16.mxu1 %v18695_v3  ;;  %18234 = vmatprep.subr.bf16.mxu0 %v22121_v29 }
0x105d   : > { %v22278_v36 = vsub.s32 %v11197_v62, %v21283_v45 }
0x105e   : > { %14173 = vmatmul.mubr.msk.bf16.vlgmr.msra.gmra.mrb[108].mxu0 %vm520_vm0, %v11581_v47  ;;  %17499 = vmatmul.mubr.msk.bf16.vlgmr.msra.gmra.mrb[156].mxu1 %vm520_vm0, %v11581_v47 }
0x105f   : > { %17510 = vmatprep.mubr.msk.f32.mxu1 %vm18696_vm1, %v18697_v11  ;;  %18236 = vmatpush3.bf16.msra.mxu0 %v22132_v38 }
0x1060   : > { %18238 = vmatprep.subr.bf16.mxu0 %v22134_v4  ;;  %18267 = vmatpush3.bf16.msra.mxu1 %v22236_v43 }
0x1061   : > { %18268 = vmatprep.subr.bf16.mxu1 %v18695_v3 }
0x1063   : > { %18240 = vmatpush3.bf16.msra.mxu0 %v22144_v59 }
0x1064   : > { %18242 = vmatprep.subr.bf16.mxu0 %v22157_v6  ;;  %18270 = vmatpush3.bf16.msra.mxu1 %v22260_v15 }
0x1065   : > { %18272 = vmatprep.subr.bf16.mxu1 %v22121_v29 }
0x1067   : > { %18244 = vmatpush3.bf16.msra.mxu0 %v22168_v10 }
0x1068   : > { %18246 = vmatprep.subr.bf16.mxu0 %v22170_v26 }
0x106b   : > { %18248 = vmatpush3.bf16.msra.mxu0 %v22186_v7 }
0x106c   : > { %18250 = vmatprep.subr.bf16.mxu0 %v22189_v57 }
0x106f   : > { %18252 = vmatpush3.bf16.msra.mxu0 %v22198_v30 }
0x1070   : > { %18254 = vmatprep.subr.bf16.mxu0 %v22211_v55 }
0x1073   : > { %18256 = vmatpush3.bf16.msra.mxu0 %v22222_v8 }
0x1074   : > { %18258 = vmatprep.subr.bf16.mxu0 %v22224_v0 }
0x1077   : > { %18260 = vmatpush3.bf16.msra.mxu0 %v22248_v42 }
0x1078   : > { %18262 = vmatprep.subr.bf16.mxu0 %v22258_v48 }
0x107b   : > { %18264 = vmatpush3.bf16.msra.mxu0 %v22270_v58 }
0x107c   : > { %18303 = vmatprep.subr.bf16.mxu0 %v18695_v3 }
0x110d   : > { %v11144_v47 = vpop.f32.mrb[96].mxu0  ;;  %v11185_v13 = vpop.f32.mrb[144].mxu1 }
0x110e   : > { %v11146_v28 = vpop.f32.mrb[97].mxu0  ;;  %v17470_v35 = vpop.f32.mrb[145].mxu1  ;;  %v11208_v29 = vrot.slane %v11185_v13, %v22278_v36 }
0x110f   : > { %v11194_v24 = vcombine.low %v11144_v47, %v11146_v28  ;;  %v11148_v2 = vpop.f32.mrb[98].mxu0  ;;  %v11188_v40 = vpop.f32.mrb[146].mxu1 }
0x1110   : > { %v11149_v20 = vpop.f32.mrb[99].mxu0  ;;  %v17471_v63 = vpop.f32.mrb[147].mxu1 }
0x1111   : > { %v11201_v39 = vrot.slane %v11194_v24, %v22278_v36 }
0x1113   : > { %v11209_v41 = vcombine.low %v11201_v39, %v11208_v29 }
0x1115   : > { %v11216_v12 = vrot.slane %v11209_v41, %v22278_v36 }
0x1117   : > { %v11218_v54 = vadd.f32 %v11216_v12, %v11045_v1 }
0x1119   : > { %v11319_v34 = vpop.f32.mrb[100].mxu0  ;;  %v11360_v27 = vpop.f32.mrb[148].mxu1 }
0x111a   : > { %v11321_v32 = vpop.f32.mrb[101].mxu0  ;;  %v17480_v46 = vpop.f32.mrb[149].mxu1  ;;  %v11383_v51 = vrot.slane %v11360_v27, %v22278_v36 }
0x111b   : > { %v11369_v49 = vcombine.low %v11319_v34, %v11321_v32  ;;  %v11323_v5 = vpop.f32.mrb[102].mxu0  ;;  %v11363_v9 = vpop.f32.mrb[150].mxu1  ;;  %v22296_v46 = vsub.s32 2, %v21283_v45 }
0x111c   : > { %v11324_v14 = vpop.f32.mrb[103].mxu0  ;;  %v17481_v61 = vpop.f32.mrb[151].mxu1 }
0x111d   : > { %v11376_v37 = vrot.slane %v11369_v49, %v22278_v36  ;;  %v22299_v49 = vsub.s32 1, %v21283_v45 }
0x111f   : > { %v11384_v16 = vcombine.low %v11376_v37, %v11383_v51 }
0x1121   : > { %v11391_v19 = vrot.slane %v11384_v16, %v22278_v36 }
0x1123   : > { %v11393_v17 = vadd.f32 %v11391_v19, %v11218_v54 }
0x1125   : > { %v11493_v33 = vpop.f32.mrb[104].mxu0  ;;  %v11534_v52 = vpop.f32.mrb[152].mxu1 }
0x1126   : > { %v11495_v44 = vpop.f32.mrb[105].mxu0  ;;  %v17490_v18 = vpop.f32.mrb[153].mxu1  ;;  %v11557_v56 = vrot.slane %v11534_v52, %v22278_v36  ;;  %v18558_v52 = vld [vmem:[%s22711_s10 + $0x10] ss:$8 sps:$4 sm:$0xff]  }
0x1127   : > { %v11543_v23 = vcombine.low %v11493_v33, %v11495_v44  ;;  %v11497_v50 = vpop.f32.mrb[106].mxu0  ;;  %v11537_v60 = vpop.f32.mrb[154].mxu1  ;;  %v18557_v33 = vld [vmem:[%s22711_s10 + $0x4] ss:$8 sps:$4 sm:$0xff]   ;;  %v18560_v44 = vld [vmem:[%s22711_s10 + $0x14] ss:$8 sps:$4 sm:$0xff]  }
0x1128   : > { %v11498_v22 = vpop.f32.mrb[107].mxu0  ;;  %v17491_v25 = vpop.f32.mrb[155].mxu1  ;;  %v18563_v18 = vld [vmem:[%s22711_s10 + $0x24] ss:$8 sps:$4 sm:$0xff]   ;;  %v18566_v50 = vld [vmem:[%s22711_s10 + $0x34] ss:$8 sps:$4 sm:$0xff]  }
0x1129   : > { %v11550_v31 = vrot.slane %v11543_v23, %v22278_v36  ;;  %v18561_v23 = vld [vmem:[%s22711_s10 + $0x20] ss:$8 sps:$4 sm:$0xff]   ;;  %v18564_v60 = vld [vmem:[%s22711_s10 + $0x30] ss:$8 sps:$4 sm:$0xff]   ;;  %v18569_v22 = vld [vmem:[%s22711_s10 + $0x44] ss:$8 sps:$4 sm:$0xff]  }
0x112a   : > { %v18567_v25 = vld [vmem:[%s22711_s10 + $0x40] ss:$8 sps:$4 sm:$0xff]  }
0x112b   : > { %v11558_v62 = vcombine.low %v11550_v31, %v11557_v56  ;;  %v18572_v56 = vld [vmem:[%s22711_s10 + $0x54] ss:$8 sps:$4 sm:$0xff]   ;;  %v18570_v31 = vld [vmem:[%s22711_s10 + $0x50] ss:$8 sps:$4 sm:$0xff]  }
0x112d   : > { %v11565_v47 = vrot.slane %v11558_v62, %v22278_v36  ;;  %v18575_v62 = vld [vmem:[%s22711_s10 + $0x64] ss:$8 sps:$4 sm:$0xff]  }
0x112f   : > { %v11567_v13 = vadd.f32 %v11565_v47, %v11393_v17  ;;  %v18555_v17 = vld [vmem:[%s22711_s10] ss:$8 sps:$4 sm:$0xff]  }
0x1130   : > { %v18573_v47 = vld [vmem:[%s22711_s10 + $0x60] ss:$8 sps:$4 sm:$0xff]  }
0x1131   : > { %v11668_v28 = vpop.f32.mrb[108].mxu0  ;;  %v11709_v35 = vpop.f32.mrb[156].mxu1 }
0x1132   : > { %v11670_v24 = vpop.f32.mrb[109].mxu0  ;;  %v17500_v2 = vpop.f32.mrb[157].mxu1  ;;  %v11732_v41 = vrot.slane %v11709_v35, %v22278_v36  ;;  %v18581_v35 = vld [vmem:[%s22711_s10 + $0x84] ss:$8 sps:$4 sm:$0xff]  }
0x1133   : > { %v11718_v40 = vcombine.low %v11668_v28, %v11670_v24  ;;  %v11672_v20 = vpop.f32.mrb[110].mxu0  ;;  %v11712_v63 = vpop.f32.mrb[158].mxu1  ;;  %v18576_v28 = vld [vmem:[%s22711_s10 + $0x70] ss:$8 sps:$4 sm:$0xff]   ;;  %v18579_v24 = vld [vmem:[%s22711_s10 + $0x80] ss:$8 sps:$4 sm:$0xff]  }
0x1134   : > { %v11673_v29 = vpop.f32.mrb[111].mxu0  ;;  %v17501_v39 = vpop.f32.mrb[159].mxu1  ;;  %v18584_v2 = vld [vmem:[%s22711_s10 + $0x94] ss:$8 sps:$4 sm:$0xff]   ;;  %v18587_v20 = vld [vmem:[%s22711_s10 + $0xa4] ss:$8 sps:$4 sm:$0xff]  }
0x1135   : > { %v11725_v34 = vrot.slane %v11718_v40, %v22278_v36  ;;  %v18582_v40 = vld [vmem:[%s22711_s10 + $0x90] ss:$8 sps:$4 sm:$0xff]   ;;  %v18585_v63 = vld [vmem:[%s22711_s10 + $0xa0] ss:$8 sps:$4 sm:$0xff]   ;;  %v18590_v29 = vld [vmem:[%s22711_s10 + $0xb4] ss:$8 sps:$4 sm:$0xff]  }
0x1136   : > { %v18588_v39 = vld [vmem:[%s22711_s10 + $0xb0] ss:$8 sps:$4 sm:$0xff]  }
0x1137   : > { %v11733_v27 = vcombine.low %v11725_v34, %v11732_v41  ;;  %v18591_v41 = vld [vmem:[%s22711_s10 + $0xc0] ss:$8 sps:$4 sm:$0xff]   ;;  %v18593_v34 = vld [vmem:[%s22711_s10 + $0xc4] ss:$8 sps:$4 sm:$0xff]  }
0x1139   : > { %v11740_v32 = vrot.slane %v11733_v27, %v22278_v36  ;;  %v18596_v27 = vld [vmem:[%s22711_s10 + $0xd4] ss:$8 sps:$4 sm:$0xff]  }
0x113b   : > { %v22301_v5 = vadd.f32 %v11740_v32, %v11567_v13  ;;  %v18578_v13 = vld [vmem:[%s22711_s10 + $0x74] ss:$8 sps:$4 sm:$0xff]   ;;  %v18594_v32 = vld [vmem:[%s22711_s10 + $0xd0] ss:$8 sps:$4 sm:$0xff]  }
0x113d   : > { %v11792_v9 = vrot.slane %v22301_v5, %v22296_v46  ;;  %v11788_v14 = vrot.slane %v22301_v5, %v22299_v49  ;;  %v11784_v61 = vrot.slane %v22301_v5, %v21286_v53  ;;  %v11743_v12 = vmul.f32 %v22301_v5, %v22301_v5 }
0x113f   : > { %11862 = vmatprep.mubr.f32.mxu0 %v11788_v14  ;;  %17511 = vmatmul.mubr.msk.f32.vlgmr.msra.gmra.mrb[142].mxu1 %vm11795_vm8, %v11792_v9  ;;  %v11947_v45 = vrot.slane %v11743_v12, %v22299_v49  ;;  %v11951_v51 = vrot.slane %v11743_v12, %v22296_v46  ;;  %v18599_v9 = vld [vmem:[%s22711_s10 + $0xe4] ss:$8 sps:$4 sm:$0xff]   ;;  %v18597_v14 = vld [vmem:[%s22711_s10 + $0xe0] ss:$8 sps:$4 sm:$0xff]  }
0x1140   : > { %18274 = vmatpush3.bf16.msra.mxu1 %v22132_v38  ;;  %11863 = vmatmul.mubr.f32.vlgmr.msra.gmra.mrb[94].mxu0 %v11784_v61  ;;  %v11943_v38 = vrot.slane %v11743_v12, %v21286_v53  ;;  %v18602_v61 = vld [vmem:[%s22711_s10 + $0xf4] ss:$8 sps:$4 sm:$0xff]   ;;  %v18600_v12 = vld [vmem:[%s22711_s10 + $0xf0] ss:$8 sps:$4 sm:$0xff]  }
0x1141   : > { %18305 = vmatpush3.bf16.msra.mxu0 %v22236_v43  ;;  %12020 = vmatprep.mubr.f32.mxu1 %v11947_v45  ;;  %v18605_v45 = vld [vmem:[%s22711_s10 + $0x104] ss:$8 sps:$4 sm:$0xff]  }
0x1142   : > { %18276 = vmatprep.subr.bf16.mxu1 %v22134_v4  ;;  %18306 = vmatprep.subr.bf16.mxu0 %v18695_v3  ;;  %v12102_v4 = vld [vmem:[%s22710_s9] sm:$0xff] }
0x1143   : > { %17521 = vmatprep.mubr.msk.f32.mxu0 %vm18696_vm1, %v18697_v11 }
0x1144   : > { %18278 = vmatpush3.bf16.msra.mxu1 %v22144_v59  ;;  %v12106_v59 = vcombine.high %v12102_v4, %v12102_v4 }
0x1145   : > { %18308 = vmatpush3.bf16.msra.mxu0 %v22260_v15  ;;  %18280 = vmatprep.subr.bf16.mxu1 %v22157_v6  ;;  %v12103_v6 = vld [vmem:[%s22710_s9 + $0x8] sm:$0xf] }
0x1146   : > { %14177 = vmatprep.subr.msk.mxu0 %vm7245_vm3, %v12106_v59 }
0x1148   : > { %18282 = vmatpush3.bf16.msra.mxu1 %v22168_v10  ;;  %17522 = vmatmul.mubr.msk.f32.vlgmr.msra.gmra.mrb[112].mxu0 %vm11795_vm8, %v11951_v51  ;;  %v12792_v51 = vld [vmem:[%s22713_s12] sm:$0xff] }
0x1149   : > { %18284 = vmatprep.subr.bf16.mxu1 %v22170_v26  ;;  %12180 = vmatprep.mubr.f32.mxu0 %v18697_v11 }
0x114a   : > { %14178 = vmatpush1.msk.msra.mxu0 %vm7245_vm3, %v12102_v4 }
0x114b   : > { %14182 = vmatprep.subr.msk.mxu0 %vm7245_vm3, %v12106_v59 }
0x114c   : > { %18286 = vmatpush3.bf16.msra.mxu1 %v22186_v7 }
0x114d   : > { %18288 = vmatprep.subr.bf16.mxu1 %v22189_v57 }
0x1150   : > { %18290 = vmatpush3.bf16.msra.mxu1 %v22198_v30 }
0x1151   : > { %18292 = vmatprep.subr.bf16.mxu1 %v22211_v55 }
0x1154   : > { %18294 = vmatpush3.bf16.msra.mxu1 %v22222_v8 }
0x1155   : > { %18296 = vmatprep.subr.bf16.mxu1 %v22224_v0 }
0x1158   : > { %18298 = vmatpush3.bf16.msra.mxu1 %v22248_v42 }
0x1159   : > { %18300 = vmatprep.subr.bf16.mxu1 %v22258_v48 }
0x115c   : > { %18302 = vmatpush3.bf16.msra.mxu1 %v22270_v58 }
0x115d   : > { %17524 = vmatprep.subr.mxu1 %v18697_v11 }
0x115f   : > { %12021 = vmatmul.mubr.f32.vlgmr.msra.gmra.mrb[160].mxu1 %v11943_v38  ;;  %v12793_v38 = vld [vmem:[%s22713_s12 + $0x8] sm:$0xff] }
0x1160   : > { %17526 = vmatprep.mubr.msk.f32.mxu1 %vm18696_vm1, %v18697_v11  ;;  %17525 = vmatpush3.msk.msra.mxu1 %vm7245_vm3, %v12103_v6  ;;  %v22469_v59 = vpack.c.bf16 %v12793_v38, %v12792_v51 }
0x1161   : > { %17529 = vmatprep.subr.mxu1 %v18697_v11 }
0x1212   : > { %v11934_v10 = vpop.f32.mrb[142].mxu1 }
0x1213   : > { %v15222_v26 = vpop.f32.mrb[94].mxu0  ;;  %v17512_v7 = vpop.f32.mrb[143].mxu1 }
0x1214   : > { %v15223_v57 = vpop.f32.mrb[95].mxu0  ;;  %v12797_v7 = vld [vmem:[%s22713_s12 + $0x28] sm:$0xff] }
0x1215   : > { %v15224_v30 = vadd.f32 %v15223_v57, %v15222_v26  ;;  %v12796_v26 = vld [vmem:[%s22713_s12 + $0x20] sm:$0xff] }
0x1216   : > { %v22485_v57 = vpack.c.bf16 %v12797_v7, %v12796_v26 }
0x1217   : > { %v11935_v55 = vadd.f32 %v15224_v30, %v11934_v10  ;;  %v12798_v30 = vld [vmem:[%s22713_s12 + $0x30] sm:$0xff] }
0x1219   : > { %v11938_v8 = vmul.f32 0.013888889, %v11935_v55  ;;  %v12799_v55 = vld [vmem:[%s22713_s12 + $0x38] sm:$0xff] }
0x121b   : > { %v12092_v0 = vpop.f32.mrb[112].mxu0  ;;  %14179 = vmatmul.mubr.msk.f32.vlgmr.msra.gmra.mrb[114].mxu0 %vm7241_vm4, %v11938_v8  ;;  %17527 = vmatmul.mubr.msk.f32.vlgmr.msra.gmra.mrb[164].mxu1 %vm7241_vm4, %v11938_v8  ;;  %v12097_v1 = vmul.f32 %v11938_v8, %v11938_v8  ;;  %v22495_v8 = vpack.c.bf16 %v12799_v55, %v12798_v30 }
0x121c   : > { %v17523_v43 = vpop.f32.mrb[113].mxu0  ;;  %14183 = vmatpush1.msk.msra.mxu0 %vm7245_vm3, %v12102_v4  ;;  %12324 = vmatprep.mubr.f32.mxu0 %v18697_v11  ;;  %v12794_v4 = vld [vmem:[%s22713_s12 + $0x10] sm:$0xff] }
0x121d   : > { %17530 = vmatpush3.msk.msra.mxu1 %vm7245_vm3, %v12103_v6  ;;  %17531 = vmatprep.mubr.msk.f32.mxu1 %vm18696_vm1, %v18697_v11  ;;  %v12795_v6 = vld [vmem:[%s22713_s12 + $0x18] sm:$0xff]  ;;  %v12801_v43 = vld [vmem:[%s22713_s12 + $0x48] sm:$0xff] }
0x121e   : > { %18309 = vmatprep.subr.bf16.mxu1 %v18695_v3  ;;  %12708 = vmatprep.subr.bf16.mxu0 %v18557_v33  ;;  %v22475_v10 = vpack.c.bf16 %v12795_v6, %v12794_v4 }
0x1232   : > { %v15262_v42 = vpop.f32.mrb[160].mxu1 }
0x1233   : > { %v15263_v48 = vpop.f32.mrb[161].mxu1 }
0x1234   : > { %v15264_v15 = vadd.f32 %v15263_v48, %v15262_v42  ;;  %v12802_v48 = vld [vmem:[%s22713_s12 + $0x50] sm:$0xff] }
0x1236   : > { %v12093_v58 = vadd.f32 %v15264_v15, %v12092_v0  ;;  %v12800_v0 = vld [vmem:[%s22713_s12 + $0x40] sm:$0xff]  ;;  %v12803_v15 = vld [vmem:[%s22713_s12 + $0x58] sm:$0xff] }
0x1237   : > { %v22505_v42 = vpack.c.bf16 %v12801_v43, %v12800_v0 }
0x1238   : > { %v12096_v37 = vmul.f32 0.013888889, %v12093_v58  ;;  %v22515_v58 = vpack.c.bf16 %v12803_v15, %v12802_v48 }
0x123a   : > { %v12098_v16 = vsub.f32 %v12096_v37, %v12097_v1  ;;  %v12804_v37 = vld [vmem:[%s22713_s12 + $0x60] sm:$0xff]  ;;  %v12805_v1 = vld [vmem:[%s22713_s12 + $0x68] sm:$0xff] }
0x123c   : > { %v12099_v54 = vmax.f32 %v12098_v16, 0.0  ;;  %v22525_v16 = vpack.c.bf16 %v12805_v1, %v12804_v37  ;;  %v18611_v37 = vld [vmem:[%s22715_s14 + $0x8] sm:$0xff]   ;;  %v18612_v1 = vld [vmem:[%s22715_s14 + $0x10] sm:$0xff]  }
0x123e   : > { %18625 = vrsqrt.f32 %v12099_v54  ;;  %v12806_v54 = vld [vmem:[%s22713_s12 + $0x70] sm:$0xff] }
0x1248   : > { %v18626_v19 = vpop.eup %18625 }
0x1249   : > { %14184 = vmatmul.mubr.msk.f32.vlgmr.msra.gmra.mrb[116].mxu0 %vm7241_vm4, %v18626_v19  ;;  %17532 = vmatmul.mubr.msk.f32.vlgmr.msra.gmra.mrb[166].mxu1 %vm7241_vm4, %v18626_v19  ;;  %v12807_v19 = vld [vmem:[%s22713_s12 + $0x78] sm:$0xff] }
0x124a   : > { %12709 = vmatpush1.bf16.msra.mxu0 %v18555_v17  ;;  %18311 = vmatpush1.bf16.msra.mxu1 %v22469_v59  ;;  %v22535_v17 = vpack.c.bf16 %v12807_v19, %v12806_v54  ;;  %v18614_v54 = vld [vmem:[%s22715_s14 + $0x20] sm:$0xff]   ;;  %v18615_v19 = vld [vmem:[%s22715_s14 + $0x28] sm:$0xff]  }
0x124b   : > { %12710 = vmatprep.subr.bf16.mxu0 %v18560_v44  ;;  %18312 = vmatprep.subr.bf16.mxu1 %v18695_v3 }
0x124e   : > { %12711 = vmatpush1.bf16.msra.mxu0 %v18558_v52  ;;  %18314 = vmatpush1.bf16.msra.mxu1 %v22475_v10 }
0x124f   : > { %12712 = vmatprep.subr.bf16.mxu0 %v18563_v18  ;;  %18315 = vmatprep.subr.bf16.mxu1 %v18695_v3 }
0x1252   : > { %12713 = vmatpush1.bf16.msra.mxu0 %v18561_v23  ;;  %18317 = vmatpush1.bf16.msra.mxu1 %v22485_v57 }
0x1253   : > { %12714 = vmatprep.subr.bf16.mxu0 %v18566_v50  ;;  %18318 = vmatprep.subr.bf16.mxu1 %v18695_v3 }
0x1256   : > { %12715 = vmatpush1.bf16.msra.mxu0 %v18564_v60  ;;  %18320 = vmatpush1.bf16.msra.mxu1 %v22495_v8 }
0x1257   : > { %12716 = vmatprep.subr.bf16.mxu0 %v18569_v22  ;;  %18321 = vmatprep.subr.bf16.mxu1 %v18695_v3 }
0x125a   : > { %12717 = vmatpush1.bf16.msra.mxu0 %v18567_v25  ;;  %18323 = vmatpush1.bf16.msra.mxu1 %v22505_v42 }
0x125b   : > { %12718 = vmatprep.subr.bf16.mxu0 %v18572_v56  ;;  %18324 = vmatprep.subr.bf16.mxu1 %v18695_v3 }
0x125e   : > { %12719 = vmatpush1.bf16.msra.mxu0 %v18570_v31  ;;  %18326 = vmatpush1.bf16.msra.mxu1 %v22515_v58 }
0x125f   : > { %12720 = vmatprep.subr.bf16.mxu0 %v18575_v62  ;;  %18327 = vmatprep.subr.bf16.mxu1 %v18695_v3 }
0x1262   : > { %12721 = vmatpush1.bf16.msra.mxu0 %v18573_v47  ;;  %18329 = vmatpush1.bf16.msra.mxu1 %v22525_v16 }
0x1263   : > { %12722 = vmatprep.subr.bf16.mxu0 %v18578_v13  ;;  %18330 = vmatprep.subr.bf16.mxu1 %v18695_v3 }
0x1266   : > { %12723 = vmatpush1.bf16.msra.mxu0 %v18576_v28  ;;  %18332 = vmatpush1.bf16.msra.mxu1 %v22535_v17 }
0x1267   : > { %12724 = vmatprep.subr.bf16.mxu0 %v18581_v35  ;;  %18333 = vmatprep.subr.bf16.mxu1 %v18695_v3 }
0x126a   : > { %12725 = vmatpush1.bf16.msra.mxu0 %v18579_v24 }
0x126b   : > { %12726 = vmatprep.subr.bf16.mxu0 %v18584_v2 }
0x126e   : > { %12727 = vmatpush1.bf16.msra.mxu0 %v18582_v40 }
0x126f   : > { %12728 = vmatprep.subr.bf16.mxu0 %v18587_v20 }
0x1272   : > { %12729 = vmatpush1.bf16.msra.mxu0 %v18585_v63 }
0x1273   : > { %12730 = vmatprep.subr.bf16.mxu0 %v18590_v29 }
0x1276   : > { %12731 = vmatpush1.bf16.msra.mxu0 %v18588_v39 }
0x1277   : > { %12732 = vmatprep.subr.bf16.mxu0 %v18593_v34 }
0x127a   : > { %12733 = vmatpush1.bf16.msra.mxu0 %v18591_v41 }
0x127b   : > { %12734 = vmatprep.subr.bf16.mxu0 %v18596_v27  ;;  %v18603_v27 = vld [vmem:[%s22711_s10 + $0x100] ss:$8 sps:$4 sm:$0xff]  }
0x127e   : > { %12735 = vmatpush1.bf16.msra.mxu0 %v18594_v32  ;;  %v18608_v32 = vld [vmem:[%s22711_s10 + $0x114] ss:$8 sps:$4 sm:$0xff]  }
0x127f   : > { %12736 = vmatprep.subr.bf16.mxu0 %v18599_v9 }
0x1282   : > { %12737 = vmatpush1.bf16.msra.mxu0 %v18597_v14  ;;  %v12808_v14 = vld [vmem:[%s22713_s12 + $0x80] sm:$0xff] }
0x1283   : > { %12738 = vmatprep.subr.bf16.mxu0 %v18602_v61  ;;  %v12809_v61 = vld [vmem:[%s22713_s12 + $0x88] sm:$0xff] }
0x1286   : > { %12739 = vmatpush1.bf16.msra.mxu0 %v18600_v12  ;;  %v18334_v12 = vpack.c.bf16 %v12809_v61, %v12808_v14 }
0x1287   : > { %12749 = vmatprep.subr.bf16.mxu0 %v18605_v45 }
0x1288   : > { %18335 = vmatpush1.bf16.msra.mxu1 %v18334_v12 }
0x1289   : > { %18336 = vmatprep.subr.bf16.mxu1 %v18695_v3 }
0x12ee   : > { %v12182_v33 = vpop.f32.mrb[114].mxu0  ;;  %v12253_v52 = vpop.f32.mrb[164].mxu1 }
0x12ef   : > { %v12184_v44 = vpop.f32.mrb[115].mxu0  ;;  %v17528_v18 = vpop.f32.mrb[165].mxu1  ;;  %v12418_v50 = vrot.slane %v12253_v52, %v22278_v36  ;;  %v18618_v52 = vld [vmem:[%s22715_s14 + $0x40] sm:$0xff]  }
0x12f0   : > { %v12404_v23 = vcombine.low %v12182_v33, %v12184_v44  ;;  %v18617_v33 = vld [vmem:[%s22715_s14 + $0x38] sm:$0xff]  }
0x12f2   : > { %v12411_v60 = vrot.slane %v12404_v23, %v22278_v36 }
0x12f4   : > { %v12419_v22 = vcombine.low %v12411_v60, %v12418_v50 }
0x12f6   : > { %v12426_v13 = vrot.slane %v12419_v22, %v22278_v36 }
0x12f8   : > { %v12428_v2 = vsub.f32 %v22301_v5, %v12426_v13 }
0x131c   : > { %v12326_v25 = vpop.f32.mrb[116].mxu0  ;;  %v12397_v56 = vpop.f32.mrb[166].mxu1 }
0x131d   : > { %v12328_v31 = vpop.f32.mrb[117].mxu0  ;;  %v17533_v62 = vpop.f32.mrb[167].mxu1  ;;  %v12446_v28 = vrot.slane %v12397_v56, %v22278_v36 }
0x131e   : > { %v12432_v47 = vcombine.low %v12326_v25, %v12328_v31 }
0x1320   : > { %v12439_v35 = vrot.slane %v12432_v47, %v22278_v36 }
0x1322   : > { %v12447_v24 = vcombine.low %v12439_v35, %v12446_v28 }
0x1324   : > { %v12454_v40 = vrot.slane %v12447_v24, %v22278_v36  ;;  %v18606_v36 = vld [vmem:[%s22711_s10 + $0x110] ss:$8 sps:$4 sm:$0xff]  }
0x1326   : > { %v12456_v20 = vmul.f32 %v12454_v40, %v12428_v2 }
0x1328   : > { %v12457_v63 = vmax.f32 %v12456_v20, 0.0 }
0x132a   : > { %v12462_v29 = vrot.slane %v12457_v63, %v21286_v53  ;;  %v12466_v39 = vrot.slane %v12457_v63, %v22299_v49  ;;  %v12470_v5 = vrot.slane %v12457_v63, %v22296_v46  ;;  %v12513_v46 = vld [vmem:[%s22712_s11] sm:$0x3] }
0x132b   : > { %v12702_v45 = vrot.slane %v12513_v46, %v22299_v49  ;;  %v12698_v51 = vrot.slane %v12513_v46, %v21286_v53  ;;  %v12964_v49 = vld [vmem:[%s22714_s13] sm:$0xff] }
0x132c   : > { %v12474_v41 = vpack.c.bf16 %v12462_v29, %v12462_v29  ;;  %v12475_v34 = vpack.c.bf16 %v12466_v39, %v12466_v39  ;;  %v12476_v9 = vpack.c.bf16 %v12470_v5, %v12470_v5 }
0x132e   : > { %12740 = vmatprep.mubr.bf16.mxu0 %v12475_v34 }
0x132f   : > { %12741 = vmatmul.mubr.bf16.vlgmr.msra.gmra.mrb[120].mxu0 %v12474_v41 }
0x1330   : > { %12750 = vmatpush1.bf16.msra.mxu0 %v18603_v27  ;;  %12781 = vmatprep.mubr.bf16.mxu0 %v18698_v21 }
0x1331   : > { %12751 = vmatprep.subr.bf16.mxu0 %v18608_v32 }
0x1334   : > { %12752 = vmatpush1.bf16.msra.mxu0 %v18606_v36 }
0x133b   : > { %14223 = vmatmul.mubr.msk.bf16.vlgmr.msra.gmra.mrb[120].mxu0 %vm11795_vm8, %v12476_v9 }
0x133c   : > { %13112 = vmatprep.mubr.f32.mxu0 %v18697_v11 }
0x140e   : > { %v12783_v38 = vpop.f32.mrb[120].mxu0 }
0x140f   : > { %v12785_v4 = vpop.f32.mrb[121].mxu0  ;;  %v22576_v7 = vadd.f32 %v12783_v38, %v12698_v51 }
0x1410   : > { %v22574_v6 = vadd.f32 %v12785_v4, %v12702_v45  ;;  %v12787_v26 = vpop.f32.mrb[122].mxu0 }
0x1411   : > { %v12788_v30 = vpop.f32.mrb[123].mxu0  ;;  %v12790_v53 = vmul.f32 %v22576_v7, %v22576_v7 }
0x1412   : > { %v12791_v55 = vmul.f32 %v22574_v6, %v22574_v6  ;;  %14224 = vmatprep.mubr.msk.f32.mxu1 %vm12810_vm9, %v22574_v6 }
0x1413   : > { %12879 = vmatmul.mubr.f32.vlgmr.msra.gmra.mrb[168].mxu1 %v22576_v7 }
0x1414   : > { %18338 = vmatpush1.bf16.msra.mxu1 %v22469_v59  ;;  %14225 = vmatprep.mubr.msk.f32.mxu1 %vm12810_vm9, %v12791_v55  ;;  %v12966_v59 = vcombine.high %v12964_v49, %v12964_v49 }
0x1415   : > { %18339 = vmatprep.subr.bf16.mxu1 %v18695_v3 }
0x1416   : > { %14229 = vmatprep.subr.msk.mxu0 %vm7245_vm3, %v12966_v59 }
0x1417   : > { %14230 = vmatpush1.msk.msra.mxu0 %vm7245_vm3, %v12964_v49 }
0x1418   : > { %18341 = vmatpush1.bf16.msra.mxu1 %v22475_v10 }
0x1419   : > { %18342 = vmatprep.subr.bf16.mxu1 %v18695_v3 }
0x141c   : > { %18344 = vmatpush1.bf16.msra.mxu1 %v22485_v57 }
0x141d   : > { %18345 = vmatprep.subr.bf16.mxu1 %v18695_v3 }
0x1420   : > { %18347 = vmatpush1.bf16.msra.mxu1 %v22495_v8 }
0x1421   : > { %18348 = vmatprep.subr.bf16.mxu1 %v18695_v3 }
0x1424   : > { %18350 = vmatpush1.bf16.msra.mxu1 %v22505_v42 }
0x1425   : > { %18351 = vmatprep.subr.bf16.mxu1 %v18695_v3 }
0x1428   : > { %18353 = vmatpush1.bf16.msra.mxu1 %v22515_v58  ;;  %v18610_v58 = vld [vmem:[%s22715_s14] sm:$0xff]  }
0x1429   : > { %18354 = vmatprep.subr.bf16.mxu1 %v18695_v3 }
0x142c   : > { %18356 = vmatpush1.bf16.msra.mxu1 %v22525_v16  ;;  %v18613_v16 = vld [vmem:[%s22715_s14 + $0x18] sm:$0xff]  }
0x142d   : > { %18357 = vmatprep.subr.bf16.mxu1 %v18695_v3 }
0x1430   : > { %18359 = vmatpush1.bf16.msra.mxu1 %v22535_v17  ;;  %v18616_v17 = vld [vmem:[%s22715_s14 + $0x30] sm:$0xff]  }
0x1431   : > { %18360 = vmatprep.subr.bf16.mxu1 %v18695_v3 }
0x1434   : > { %18362 = vmatpush1.bf16.msra.mxu1 %v18334_v12 }
0x1435   : > { %14226 = vmatprep.subr.msk.mxu1 %vm7245_vm3, %v12966_v59 }
0x1437   : > { %12953 = vmatmul.mubr.f32.vlgmr.msra.gmra.mrb[170].mxu1 %v12790_v53 }
0x1438   : > { %13038 = vmatprep.mubr.f32.mxu1 %v18697_v11  ;;  %14227 = vmatpush1.msk.msra.mxu1 %vm7245_vm3, %v12964_v49 }
0x1439   : > { %13203 = vmatprep.subr.bf16.mxu1 %v18698_v21 }
0x14e6   : > { %v12880_v3 = vpop.f32.mrb[168].mxu1 }
0x14e7   : > { %v12884_v10 = vmul.f32 0.027777778, %v12880_v3  ;;  %v12882_v57 = vpop.f32.mrb[169].mxu1 }
0x14e9   : > { %14228 = vmatmul.mubr.msk.f32.vlgmr.msra.gmra.mrb[172].mxu1 %vm7241_vm4, %v12884_v10  ;;  %v12959_v8 = vmul.f32 %v12884_v10, %v12884_v10 }
0x14ea   : > { %13204 = vmatpush1.bf16.msra.mxu1 %v18610_v58 }
0x14eb   : > { %13205 = vmatprep.subr.bf16.mxu1 %v18698_v21 }
0x14ee   : > { %13206 = vmatpush1.bf16.msra.mxu1 %v18611_v37 }
0x14ef   : > { %13207 = vmatprep.subr.bf16.mxu1 %v18698_v21 }
0x14f2   : > { %13208 = vmatpush1.bf16.msra.mxu1 %v18612_v1 }
0x14f3   : > { %13209 = vmatprep.subr.bf16.mxu1 %v18698_v21 }
0x14f6   : > { %13210 = vmatpush1.bf16.msra.mxu1 %v18613_v16 }
0x14f7   : > { %13211 = vmatprep.subr.bf16.mxu1 %v18698_v21 }
0x14fa   : > { %13212 = vmatpush1.bf16.msra.mxu1 %v18614_v54 }
0x14fb   : > { %13213 = vmatprep.subr.bf16.mxu1 %v18698_v21 }
0x14fe   : > { %13214 = vmatpush1.bf16.msra.mxu1 %v18615_v19 }
0x14ff   : > { %13215 = vmatprep.subr.bf16.mxu1 %v18698_v21 }
0x1502   : > { %13216 = vmatpush1.bf16.msra.mxu1 %v18616_v17 }
0x1503   : > { %13217 = vmatprep.subr.bf16.mxu1 %v18698_v21 }
0x1506   : > { %13218 = vmatpush1.bf16.msra.mxu1 %v18617_v33 }
0x1507   : > { %13219 = vmatprep.subr.bf16.mxu1 %v18698_v21  ;;  %v13145_v21 = vld [vmem:[%s22716_s15] sm:$0x1] }
0x150a   : > { %v12954_v11 = vpop.f32.mrb[170].mxu1  ;;  %13220 = vmatpush1.bf16.msra.mxu1 %v18618_v52 }
0x150b   : > { %v12958_v0 = vmul.f32 0.027777778, %v12954_v11  ;;  %v12956_v43 = vpop.f32.mrb[171].mxu1 }
0x150d   : > { %v12960_v42 = vsub.f32 %v12958_v0, %v12959_v8 }
0x150f   : > { %v12961_v48 = vmax.f32 %v12960_v42, 0.0 }
0x1511   : > { %18627 = vrsqrt.f32 %v12961_v48 }
0x151b   : > { %v18628_v15 = vpop.eup %18627 }
0x151c   : > { %14231 = vmatmul.mubr.msk.f32.vlgmr.msra.gmra.mrb[118].mxu0 %vm7241_vm4, %v18628_v15 }
0x15bc   : > { %v13040_v44 = vpop.f32.mrb[172].mxu1 }
0x15bd   : > { %v13042_v18 = vpop.f32.mrb[173].mxu1  ;;  %v13119_v23 = vsub.f32 %v22576_v7, %v13040_v44 }
0x15be   : > { %v13120_v50 = vsub.f32 %v22574_v6, %v13042_v18 }
0x15ef   : > { %v13114_v60 = vpop.f32.mrb[118].mxu0 }
0x15f0   : > { %v13121_v22 = vmul.f32 %v13119_v23, %v13114_v60  ;;  %v13116_v25 = vpop.f32.mrb[119].mxu0 }
0x15f1   : > { %v13122_v56 = vmul.f32 %v13120_v50, %v13116_v25 }
0x15f2   : > { %v13123_v31 = vmax.f32 %v13121_v22, 0.0 }
0x15f3   : > { %v13124_v62 = vmax.f32 %v13122_v56, 0.0 }
0x15f4   : > { %v13125_v13 = vpack.c.bf16 %v13123_v31, %v13123_v31 }
0x15f5   : > { %v13126_v47 = vpack.c.bf16 %v13124_v62, %v13124_v62 }
0x15f7   : > { %14241 = vmatprep.mubr.msk.bf16.mxu1 %vm12810_vm9, %v13126_v47 }
0x15f8   : > { %13236 = vmatmul.mubr.bf16.vlgmr.msra.gmra.mrb[176].mxu1 %v13125_v13 }
0x16cb   : > { %v13237_v28 = vpop.f32.mrb[176].mxu1 }
0x16cc   : > { %v13238_v35 = vadd.f32 %v13237_v28, %v13145_v21  ;;  %v13239_v24 = vpop.f32.mrb[177].mxu1 }
0x16cd   : > { %v13240_v2 = vpop.f32.mrb[178].mxu1 }
0x16ce   : > { %v13241_v40 = vpop.f32.mrb[179].mxu1  ;;  %13244 = vst.msk [vmem:[%s513_s17] sm:$0x1] %vm13243_vm10, %v13238_v35 }
0x16cf   : > { %18644 = shalt.err (!%p18641_p3)
}
0x16d0   : > { %s18645_s19 = scalar_lea.hbm %s22659_s23, 16  ;;  %s18649_s28 = scalar_lea.hbm %s22717_s16, 32 }
0x16d1   : > { %p18646_p4 = scmp.ne.s32.totalorder %s22659_s23, %s18645_s19  ;;  %p18650_p9 = scmp.lt.u32.totalorder %s22659_s23, %s22717_s16 }
0x16d2   : > { %p18651_p10 = scmp.lt.u32.totalorder %s18649_s28, %s18645_s19  ;;  %p18653_p12 = scmp.lt.u32.totalorder %s18645_s19, %s22659_s23 }
0x16d3   : > { %p18647_p7 = pnand %p18646_p4, %p18824_p5 }
0x16d4   : > { %p18652_p11 = por %p18651_p10, %p18650_p9 }
0x16d5   : > { %p18648_p8 = pneg %p18647_p7 }
0x16d6   : > { %p18654_p13 = por %p18653_p12, %p18652_p11 }
0x16d8   : > { %p18655_p0 = pnand %p18654_p13, %p18648_p8 }
0x16da   : > { %18658 = shalt.err (!%p18655_p0)
}
0x16db   : > { %18462 = dma.vmem_to_hbm [thread:$0]  (%p18824_p5), %s22661_s18, 16, %s22659_s23, %s13246_s25  }
0x16dc PF: > { %s22732_s30 = sld [smem:[#allocation8_spill]]  ;;  %p18468_p1 = scmp.ge.s32.totalorder %s18693_s24, 2 }
0x16de   : > { %p18465_p2 = pnand %p18468_p1, %p18828_p6 }
0x16e2   : > { %s13270_s21 = sand.u32 1, %s22732_s30  }
0x16e3   : > { %s13271_s27 = scalar_lea.sflag [#allocation6], %s13270_s21 }
0x16e4   : > { %18676 = dma.done.wait (!%p18465_p2), %s13271_s27, 16  }
0x16e5   : > { %18678 = vsyncadd (!%p18465_p2), %s13271_s27, 4294967280  ;;  %s22734_s24 = sld [smem:[#allocation10_spill]]  ;;  %s22735_s19 = sld [smem:[#allocation9_spill]] }
0x16e6   : > { %s22736_s23 = sld [smem:[#allocation11_spill]]  ;;  %s22737_s21 = smov %s18685_s22 }
0x16eb   : > { %p26_p3 = scmp.ge.s32.totalorder %s22734_s24, 4   ;;  %s22738_s22 = smov %s22735_s19 }
0x16ed   :  { %28 = sbr.rel (!%p26_p3) target bundleno = 5 (0x5), region = 183 }
0x16f4   :  { %13275 = vsyncpa [#allocation6], 1 }
0x16f5   :  { %13277 = vsyncpa [#allocation6 + $0x1], 1 }

</bundles_post_ra>
